<compile_context>
chip_gen: v7x
topology: tpu7x:2x2x1
jax: 0.10.0
libtpu: 0.0.40
codegen_flags: <defaults>
</compile_context>

<pallas_src>
import numpy as np
import jax
import jax.numpy as jnp
from jax.experimental import pallas as pl
from jax.experimental.pallas import tpu as pltpu


# ----------------------------- kernel helpers --------------------------------

def _layernorm_channels(y, gamma, beta, eps=1e-6):
    """LayerNorm2d: normalize each spatial position over the channel (last) axis."""
    u = jnp.mean(y, axis=-1, keepdims=True)
    yc = y - u
    var = jnp.mean(yc * yc, axis=-1, keepdims=True)
    return yc * jax.lax.rsqrt(var + eps) * gamma + beta


# --------------------------------- kernel ------------------------------------

def aff_kernel(a_ref, b_ref, c_ref, d_ref,
               w1l_ref, b1l_ref, w2l_ref, b2l_ref,
               w1g_ref, b1g_ref, w2g_ref, b2g_ref,
               wmp_ref, bmp_ref,
               wn1_ref, ln1_g_ref, ln1_b_ref,
               w3_ref, ln2_g_ref, ln2_b_ref,
               smat_ref,
               o_ref):
    f32 = jnp.float32
    a = a_ref[0].astype(f32)            # (HW, C)
    b = b_ref[0].astype(f32)
    c = c_ref[0].astype(f32)
    d = d_ref[0].astype(f32)
    HW, C = a.shape

    x = a + b + c + d

    # ---- MS_CAM: local attention branch (1x1 conv -> ReLU -> 1x1 conv) ----
    hl = jnp.dot(x, w1l_ref[...], preferred_element_type=f32) + b1l_ref[...]
    hl = jnp.maximum(hl, 0.0)
    xl = jnp.dot(hl, w2l_ref[...], preferred_element_type=f32) + b2l_ref[...]

    # ---- MS_CAM: global attention branch (GAP -> 1x1 -> ReLU -> 1x1) ----
    # global average pool via MXU (ones-row matmul) instead of a sublane reduce.
    ones_row = jnp.ones((1, HW), f32)
    p = jnp.dot(ones_row, x, preferred_element_type=f32) * (1.0 / HW)      # (1, C)
    hg = jnp.dot(p, w1g_ref[...], preferred_element_type=f32) + b1g_ref[...]
    hg = jnp.maximum(hg, 0.0)
    xg = jnp.dot(hg, w2g_ref[...], preferred_element_type=f32) + b2g_ref[...]

    cam = xl + xg                                                          # broadcast (1,C)

    # ---- multi_proj (1x1 conv C -> 4C) + per-chunk sigmoid gating ----
    mp = jnp.dot(cam, wmp_ref[...], preferred_element_type=f32) + bmp_ref[...]
    xo = (a * jax.nn.sigmoid(mp[:, 0 * C:1 * C])
          + b * jax.nn.sigmoid(mp[:, 1 * C:2 * C])
          + c * jax.nn.sigmoid(mp[:, 2 * C:3 * C])
          + d * jax.nn.sigmoid(mp[:, 3 * C:4 * C]))

    # ---- neck[0]: 1x1 conv (no bias) ; neck[1]: LayerNorm2d ----
    y = jnp.dot(xo, wn1_ref[...], preferred_element_type=f32)
    y = _layernorm_channels(y, ln1_g_ref[...], ln1_b_ref[...])

    # ---- neck[2]: 3x3 conv, padding=1, no bias (9 shift-matrix taps on the MXU) ----
    acc = jnp.zeros((HW, C), f32)
    for t in range(9):
        shifted = jnp.dot(smat_ref[t], y, preferred_element_type=f32)      # zero-padded spatial shift
        acc = acc + jnp.dot(shifted, w3_ref[t], preferred_element_type=f32)

    # ---- neck[3]: LayerNorm2d ----
    out = _layernorm_channels(acc, ln2_g_ref[...], ln2_b_ref[...])

    o_ref[0] = out.astype(o_ref.dtype)


# -------------------------------- wrapper -------------------------------------

def make_shift_matrices(H, W):
    """(9, HW, HW) 0/1 matrices: tap t = kh*3+kw gathers input at (h+kh-1, w+kw-1), zero-padded."""
    HW = H * W
    idx = np.arange(HW)
    h, w = idx // W, idx % W
    mats = np.zeros((9, HW, HW), np.float32)
    for kh in range(3):
        for kw in range(3):
            dh, dw = kh - 1, kw - 1
            hs, ws = h + dh, w + dw
            valid = (hs >= 0) & (hs < H) & (ws >= 0) & (ws < W)
            rows = idx[valid]
            cols = (hs * W + ws)[valid]
            mats[kh * 3 + kw, rows, cols] = 1.0
    return jnp.asarray(mats)


def _resident_spec(arr):
    """Full-array block with a constant index map: DMA'd once, stays VMEM resident."""
    if arr.ndim == 2:
        return pl.BlockSpec(arr.shape, lambda i: (0, 0))
    elif arr.ndim == 3:
        return pl.BlockSpec(arr.shape, lambda i: (0, 0, 0))
    raise ValueError("unexpected param rank")


def aff_forward(a, b, c, d, params):
    """a..d: (B, C, H, W) float32. Returns (B, C, H, W)."""
    B, C, H, W = a.shape
    HW = H * W

    def to_seq(x):   # NCHW -> (B, HW, C), channels last (lane dense)
        return jnp.transpose(x, (0, 2, 3, 1)).reshape(B, HW, C).astype(jnp.float32)

    seq_inputs = [to_seq(t) for t in (a, b, c, d)]

    param_list = [
        params["w1l"], params["b1l"], params["w2l"], params["b2l"],
        params["w1g"], params["b1g"], params["w2g"], params["b2g"],
        params["wmp"], params["bmp"],
        params["wn1"], params["ln1_g"], params["ln1_b"],
        params["w3"], params["ln2_g"], params["ln2_b"],
        params["smat"],
    ]

    act_spec = pl.BlockSpec((1, HW, C), lambda i: (i, 0, 0))

    inter = params["w1l"].shape[1]
    matmul_flops = 2 * B * HW * (
        C * inter + inter * C        # local attention 1x1 convs
        + 4 * C * C                  # multi_proj
        + C * C                      # neck 1x1 conv
        + 9 * C * C                  # 3x3 conv taps
        + 9 * HW * C                 # shift matmuls
    )
    transcendentals = B * HW * 4 * C
    param_bytes = sum(int(p.size) * 4 for p in param_list)
    bytes_accessed = 5 * B * HW * C * 4 + param_bytes

    out_seq = pl.pallas_call(
        aff_kernel,
        out_shape=jax.ShapeDtypeStruct((B, HW, C), jnp.float32),
        grid=(B,),
        in_specs=[act_spec] * 4 + [_resident_spec(p) for p in param_list],
        out_specs=act_spec,
        compiler_params=pltpu.CompilerParams(
            dimension_semantics=("parallel",),
            vmem_limit_bytes=48 * 1024 * 1024,
        ),
        cost_estimate=pl.CostEstimate(
            flops=int(matmul_flops),
            transcendentals=int(transcendentals),
            bytes_accessed=int(bytes_accessed),
        ),
    )(*seq_inputs, *param_list)

    return jnp.transpose(out_seq.reshape(B, H, W, C), (0, 3, 1, 2))


# --------------------------- params & reference --------------------------------

def init_params(key, channels=256, r=4, H=8, W=8):
    """Weights stored as (in_features, out_features) (transpose of PyTorch conv weights)."""
    inter = channels // r if channels > 64 else 64
    C, IC = channels, inter

    def conv1x1(k, cin, cout, bias=True):
        kw, kb = jax.random.split(k)
        bound = 1.0 / np.sqrt(cin)
        w = jax.random.uniform(kw, (cin, cout), jnp.float32, -bound, bound)
        if bias:
            bvec = jax.random.uniform(kb, (1, cout), jnp.float32, -bound, bound)
            return w, bvec
        return w, None

    keys = jax.random.split(key, 8)
    w1l, b1l = conv1x1(keys[0], C, IC)
    w2l, b2l = conv1x1(keys[1], IC, C)
    w1g, b1g = conv1x1(keys[2], C, IC)
    w2g, b2g = conv1x1(keys[3], IC, C)
    wmp, bmp = conv1x1(keys[4], C, 4 * C)
    wn1, _ = conv1x1(keys[5], C, C, bias=False)
    bound3 = 1.0 / np.sqrt(C * 9)
    w3 = jax.random.uniform(keys[6], (9, C, C), jnp.float32, -bound3, bound3)

    return dict(
        w1l=w1l, b1l=b1l, w2l=w2l, b2l=b2l,
        w1g=w1g, b1g=b1g, w2g=w2g, b2g=b2g,
        wmp=wmp, bmp=bmp,
        wn1=wn1,
        ln1_g=jnp.ones((1, C), jnp.float32), ln1_b=jnp.zeros((1, C), jnp.float32),
        w3=w3,
        ln2_g=jnp.ones((1, C), jnp.float32), ln2_b=jnp.zeros((1, C), jnp.float32),
        smat=make_shift_matrices(H, W),
    )


def _mm(x, w):
    return jax.lax.dot_general(
        x, w, dimension_numbers=(((x.ndim - 1,), (0,)), ((), ())),
        precision=jax.lax.Precision.HIGHEST)


def _ln2d_ref(y, gamma, beta, eps=1e-6):
    u = jnp.mean(y, axis=-1, keepdims=True)
    yc = y - u
    var = jnp.mean(yc * yc, axis=-1, keepdims=True)
    return yc * jax.lax.rsqrt(var + eps) * gamma + beta


def reference_forward(a, b, c, d, p):
    """Pure-JAX reference matching the PyTorch AFF module (channels-last internally)."""
    to_nhwc = lambda t: jnp.transpose(t, (0, 2, 3, 1)).astype(jnp.float32)
    a_, b_, c_, d_ = map(to_nhwc, (a, b, c, d))
    x = a_ + b_ + c_ + d_

    xl = _mm(jax.nn.relu(_mm(x, p["w1l"]) + p["b1l"]), p["w2l"]) + p["b2l"]
    g = jnp.mean(x, axis=(1, 2), keepdims=True)
    xg = _mm(jax.nn.relu(_mm(g, p["w1g"]) + p["b1g"]), p["w2g"]) + p["b2g"]
    cam = xl + xg

    mp = _mm(cam, p["wmp"]) + p["bmp"]
    w1c, w2c, w3c, w4c = jnp.split(mp, 4, axis=-1)
    xo = (a_ * jax.nn.sigmoid(w1c) + b_ * jax.nn.sigmoid(w2c)
          + c_ * jax.nn.sigmoid(w3c) + d_ * jax.nn.sigmoid(w4c))

    y = _mm(xo, p["wn1"])
    y = _ln2d_ref(y, p["ln1_g"], p["ln1_b"])

    B, H, W, C = y.shape
    yp = jnp.pad(y, ((0, 0), (1, 1), (1, 1), (0, 0)))
    out = jnp.zeros_like(y)
    for kh in range(3):
        for kw in range(3):
            tap = yp[:, kh:kh + H, kw:kw + W, :]
            out = out + _mm(tap, p["w3"][kh * 3 + kw])
    out = _ln2d_ref(out, p["ln2_g"], p["ln2_b"])
    return jnp.transpose(out, (0, 3, 1, 2))


# ----------------------------------- main --------------------------------------

if __name__ == "__main__":
    B, C, H, W = 2, 256, 8, 8        # neck hard-codes 256 channels, so C must be 256

    key = jax.random.PRNGKey(0)
    ka, kb, kc, kd, kp = jax.random.split(key, 5)
    a = jax.random.normal(ka, (B, C, H, W), jnp.float32)
    b = jax.random.normal(kb, (B, C, H, W), jnp.float32)
    c = jax.random.normal(kc, (B, C, H, W), jnp.float32)
    d = jax.random.normal(kd, (B, C, H, W), jnp.float32)

    params = init_params(kp, channels=C, r=4, H=H, W=W)

    out = aff_forward(a, b, c, d, params)
    out = jax.block_until_ready(out)

    ref = reference_forward(a, b, c, d, params)
    assert out.shape == (B, C, H, W)
    max_err = float(jnp.max(jnp.abs(out - ref)))
    assert jnp.allclose(out, ref, atol=5e-3, rtol=5e-3), f"max_err={max_err}"

    print("KERNEL_OK")
</pallas_src>

<mosaic_0001>
module attributes {stable_mosaic.version = 11 : i64} {
  func.func @aff_kernel(%arg0: i32, %arg1: memref<1x64x256xf32, #tpu.memory_space<vmem>>, %arg2: memref<1x64x256xf32, #tpu.memory_space<vmem>>, %arg3: memref<1x64x256xf32, #tpu.memory_space<vmem>>, %arg4: memref<1x64x256xf32, #tpu.memory_space<vmem>>, %arg5: memref<256x64xf32, #tpu.memory_space<vmem>>, %arg6: memref<1x64xf32, #tpu.memory_space<vmem>>, %arg7: memref<64x256xf32, #tpu.memory_space<vmem>>, %arg8: memref<1x256xf32, #tpu.memory_space<vmem>>, %arg9: memref<256x64xf32, #tpu.memory_space<vmem>>, %arg10: memref<1x64xf32, #tpu.memory_space<vmem>>, %arg11: memref<64x256xf32, #tpu.memory_space<vmem>>, %arg12: memref<1x256xf32, #tpu.memory_space<vmem>>, %arg13: memref<256x1024xf32, #tpu.memory_space<vmem>>, %arg14: memref<1x1024xf32, #tpu.memory_space<vmem>>, %arg15: memref<256x256xf32, #tpu.memory_space<vmem>>, %arg16: memref<1x256xf32, #tpu.memory_space<vmem>>, %arg17: memref<1x256xf32, #tpu.memory_space<vmem>>, %arg18: memref<9x256x256xf32, #tpu.memory_space<vmem>>, %arg19: memref<1x256xf32, #tpu.memory_space<vmem>>, %arg20: memref<1x256xf32, #tpu.memory_space<vmem>>, %arg21: memref<9x64x64xf32, #tpu.memory_space<vmem>>, %arg22: memref<1x64x256xf32, #tpu.memory_space<vmem>>) attributes {dimension_semantics = [#tpu.dimension_semantics<parallel>], iteration_bounds = array<i64: 2>, scalar_prefetch = 0 : i64, scratch_operands = 0 : i64, tpu.core_type = #tpu.core_type<tc>, window_params = [{transform_indices = @transform_0, window_bounds = array<i64: 1, 64, 256>}, {transform_indices = @transform_1, window_bounds = array<i64: 1, 64, 256>}, {transform_indices = @transform_2, window_bounds = array<i64: 1, 64, 256>}, {transform_indices = @transform_3, window_bounds = array<i64: 1, 64, 256>}, {pipeline_mode = #tpu.pipeline_mode<synchronous>, transform_indices = @transform_4, window_bounds = array<i64: 256, 64>}, {pipeline_mode = #tpu.pipeline_mode<synchronous>, transform_indices = @transform_5, window_bounds = array<i64: 1, 64>}, {pipeline_mode = #tpu.pipeline_mode<synchronous>, transform_indices = @transform_6, window_bounds = array<i64: 64, 256>}, {pipeline_mode = #tpu.pipeline_mode<synchronous>, transform_indices = @transform_7, window_bounds = array<i64: 1, 256>}, {pipeline_mode = #tpu.pipeline_mode<synchronous>, transform_indices = @transform_8, window_bounds = array<i64: 256, 64>}, {pipeline_mode = #tpu.pipeline_mode<synchronous>, transform_indices = @transform_9, window_bounds = array<i64: 1, 64>}, {pipeline_mode = #tpu.pipeline_mode<synchronous>, transform_indices = @transform_10, window_bounds = array<i64: 64, 256>}, {pipeline_mode = #tpu.pipeline_mode<synchronous>, transform_indices = @transform_11, window_bounds = array<i64: 1, 256>}, {pipeline_mode = #tpu.pipeline_mode<synchronous>, transform_indices = @transform_12, window_bounds = array<i64: 256, 1024>}, {pipeline_mode = #tpu.pipeline_mode<synchronous>, transform_indices = @transform_13, window_bounds = array<i64: 1, 1024>}, {pipeline_mode = #tpu.pipeline_mode<synchronous>, transform_indices = @transform_14, window_bounds = array<i64: 256, 256>}, {pipeline_mode = #tpu.pipeline_mode<synchronous>, transform_indices = @transform_15, window_bounds = array<i64: 1, 256>}, {pipeline_mode = #tpu.pipeline_mode<synchronous>, transform_indices = @transform_16, window_bounds = array<i64: 1, 256>}, {pipeline_mode = #tpu.pipeline_mode<synchronous>, transform_indices = @transform_17, window_bounds = array<i64: 9, 256, 256>}, {pipeline_mode = #tpu.pipeline_mode<synchronous>, transform_indices = @transform_18, window_bounds = array<i64: 1, 256>}, {pipeline_mode = #tpu.pipeline_mode<synchronous>, transform_indices = @transform_19, window_bounds = array<i64: 1, 256>}, {pipeline_mode = #tpu.pipeline_mode<synchronous>, transform_indices = @transform_20, window_bounds = array<i64: 9, 64, 64>}, {transform_indices = @transform_21, window_bounds = array<i64: 1, 64, 256>}]} {
    %c0 = arith.constant 0 : index
    %c0_0 = arith.constant 0 : index
    %c0_1 = arith.constant 0 : index
    %0 = vector.load %arg1[%c0, %c0_0, %c0_1] : memref<1x64x256xf32, #tpu.memory_space<vmem>>, vector<1x64x256xf32>
    %1 = vector.shape_cast %0 : vector<1x64x256xf32> to vector<64x256xf32>
    %c0_2 = arith.constant 0 : index
    %c0_3 = arith.constant 0 : index
    %c0_4 = arith.constant 0 : index
    %2 = vector.load %arg2[%c0_2, %c0_3, %c0_4] : memref<1x64x256xf32, #tpu.memory_space<vmem>>, vector<1x64x256xf32>
    %3 = vector.shape_cast %2 : vector<1x64x256xf32> to vector<64x256xf32>
    %c0_5 = arith.constant 0 : index
    %c0_6 = arith.constant 0 : index
    %c0_7 = arith.constant 0 : index
    %4 = vector.load %arg3[%c0_5, %c0_6, %c0_7] : memref<1x64x256xf32, #tpu.memory_space<vmem>>, vector<1x64x256xf32>
    %5 = vector.shape_cast %4 : vector<1x64x256xf32> to vector<64x256xf32>
    %c0_8 = arith.constant 0 : index
    %c0_9 = arith.constant 0 : index
    %c0_10 = arith.constant 0 : index
    %6 = vector.load %arg4[%c0_8, %c0_9, %c0_10] : memref<1x64x256xf32, #tpu.memory_space<vmem>>, vector<1x64x256xf32>
    %7 = vector.shape_cast %6 : vector<1x64x256xf32> to vector<64x256xf32>
    %8 = arith.addf %1, %3 : vector<64x256xf32>
    %9 = arith.addf %8, %5 : vector<64x256xf32>
    %10 = arith.addf %9, %7 : vector<64x256xf32>
    %c0_11 = arith.constant 0 : index
    %c0_12 = arith.constant 0 : index
    %11 = vector.load %arg5[%c0_11, %c0_12] : memref<256x64xf32, #tpu.memory_space<vmem>>, vector<256x64xf32>
    %cst = arith.constant dense<0.000000e+00> : vector<64x64xf32>
    %12 = tpu.matmul %10, %11, %cst {dimension_numbers = #tpu.dot_dimension_numbers<[1], [0], [0], [1], [0, 0, 1, 1], [], []>} : vector<64x256xf32>, vector<256x64xf32>, vector<64x64xf32> -> vector<64x64xf32>
    %c0_13 = arith.constant 0 : index
    %c0_14 = arith.constant 0 : index
    %13 = vector.load %arg6[%c0_13, %c0_14] : memref<1x64xf32, #tpu.memory_space<vmem>>, vector<1x64xf32>
    %14 = vector.broadcast %13 : vector<1x64xf32> to vector<64x64xf32>
    %15 = arith.addf %12, %14 : vector<64x64xf32>
    %cst_15 = arith.constant 0.000000e+00 : f32
    %16 = vector.broadcast %cst_15 : f32 to vector<64x64xf32>
    %17 = arith.maximumf %15, %16 : vector<64x64xf32>
    %c0_16 = arith.constant 0 : index
    %c0_17 = arith.constant 0 : index
    %18 = vector.load %arg7[%c0_16, %c0_17] : memref<64x256xf32, #tpu.memory_space<vmem>>, vector<64x256xf32>
    %cst_18 = arith.constant dense<0.000000e+00> : vector<64x256xf32>
    %19 = tpu.matmul %17, %18, %cst_18 {dimension_numbers = #tpu.dot_dimension_numbers<[1], [0], [0], [1], [0, 0, 1, 1], [], []>} : vector<64x64xf32>, vector<64x256xf32>, vector<64x256xf32> -> vector<64x256xf32>
    %c0_19 = arith.constant 0 : index
    %c0_20 = arith.constant 0 : index
    %20 = vector.load %arg8[%c0_19, %c0_20] : memref<1x256xf32, #tpu.memory_space<vmem>>, vector<1x256xf32>
    %21 = vector.broadcast %20 : vector<1x256xf32> to vector<64x256xf32>
    %22 = arith.addf %19, %21 : vector<64x256xf32>
    %cst_21 = arith.constant 1.000000e+00 : f32
    %23 = vector.broadcast %cst_21 : f32 to vector<1x64xf32>
    %cst_22 = arith.constant dense<0.000000e+00> : vector<1x256xf32>
    %24 = tpu.matmul %23, %10, %cst_22 {dimension_numbers = #tpu.dot_dimension_numbers<[1], [0], [0], [1], [0, 0, 1, 1], [], []>} : vector<1x64xf32>, vector<64x256xf32>, vector<1x256xf32> -> vector<1x256xf32>
    %cst_23 = arith.constant 1.562500e-02 : f32
    %25 = vector.broadcast %cst_23 : f32 to vector<1x256xf32>
    %26 = arith.mulf %24, %25 : vector<1x256xf32>
    %c0_24 = arith.constant 0 : index
    %c0_25 = arith.constant 0 : index
    %27 = vector.load %arg9[%c0_24, %c0_25] : memref<256x64xf32, #tpu.memory_space<vmem>>, vector<256x64xf32>
    %cst_26 = arith.constant dense<0.000000e+00> : vector<1x64xf32>
    %28 = tpu.matmul %26, %27, %cst_26 {dimension_numbers = #tpu.dot_dimension_numbers<[1], [0], [0], [1], [0, 0, 1, 1], [], []>} : vector<1x256xf32>, vector<256x64xf32>, vector<1x64xf32> -> vector<1x64xf32>
    %c0_27 = arith.constant 0 : index
    %c0_28 = arith.constant 0 : index
    %29 = vector.load %arg10[%c0_27, %c0_28] : memref<1x64xf32, #tpu.memory_space<vmem>>, vector<1x64xf32>
    %30 = arith.addf %28, %29 : vector<1x64xf32>
    %cst_29 = arith.constant 0.000000e+00 : f32
    %31 = vector.broadcast %cst_29 : f32 to vector<1x64xf32>
    %32 = arith.maximumf %30, %31 : vector<1x64xf32>
    %c0_30 = arith.constant 0 : index
    %c0_31 = arith.constant 0 : index
    %33 = vector.load %arg11[%c0_30, %c0_31] : memref<64x256xf32, #tpu.memory_space<vmem>>, vector<64x256xf32>
    %cst_32 = arith.constant dense<0.000000e+00> : vector<1x256xf32>
    %34 = tpu.matmul %32, %33, %cst_32 {dimension_numbers = #tpu.dot_dimension_numbers<[1], [0], [0], [1], [0, 0, 1, 1], [], []>} : vector<1x64xf32>, vector<64x256xf32>, vector<1x256xf32> -> vector<1x256xf32>
    %c0_33 = arith.constant 0 : index
    %c0_34 = arith.constant 0 : index
    %35 = vector.load %arg12[%c0_33, %c0_34] : memref<1x256xf32, #tpu.memory_space<vmem>>, vector<1x256xf32>
    %36 = arith.addf %34, %35 : vector<1x256xf32>
    %37 = vector.broadcast %36 : vector<1x256xf32> to vector<64x256xf32>
    %38 = arith.addf %22, %37 : vector<64x256xf32>
    %c0_35 = arith.constant 0 : index
    %c0_36 = arith.constant 0 : index
    %39 = vector.load %arg13[%c0_35, %c0_36] : memref<256x1024xf32, #tpu.memory_space<vmem>>, vector<256x1024xf32>
    %cst_37 = arith.constant dense<0.000000e+00> : vector<64x1024xf32>
    %40 = tpu.matmul %38, %39, %cst_37 {dimension_numbers = #tpu.dot_dimension_numbers<[1], [0], [0], [1], [0, 0, 1, 1], [], []>} : vector<64x256xf32>, vector<256x1024xf32>, vector<64x1024xf32> -> vector<64x1024xf32>
    %c0_38 = arith.constant 0 : index
    %c0_39 = arith.constant 0 : index
    %41 = vector.load %arg14[%c0_38, %c0_39] : memref<1x1024xf32, #tpu.memory_space<vmem>>, vector<1x1024xf32>
    %42 = vector.broadcast %41 : vector<1x1024xf32> to vector<64x1024xf32>
    %43 = arith.addf %40, %42 : vector<64x1024xf32>
    %44 = vector.extract_strided_slice %43 {offsets = [0, 0], sizes = [64, 256], strides = [1, 1]} : vector<64x1024xf32> to vector<64x256xf32>
    %45 = arith.negf %44 : vector<64x256xf32>
    %46 = math.exp %45 : vector<64x256xf32>
    %cst_40 = arith.constant 1.000000e+00 : f32
    %47 = vector.broadcast %cst_40 : f32 to vector<64x256xf32>
    %48 = arith.addf %47, %46 : vector<64x256xf32>
    %49 = arith.divf %47, %48 : vector<64x256xf32>
    %50 = arith.mulf %1, %49 : vector<64x256xf32>
    %51 = vector.extract_strided_slice %43 {offsets = [0, 256], sizes = [64, 256], strides = [1, 1]} : vector<64x1024xf32> to vector<64x256xf32>
    %52 = arith.negf %51 : vector<64x256xf32>
    %53 = math.exp %52 : vector<64x256xf32>
    %cst_41 = arith.constant 1.000000e+00 : f32
    %54 = vector.broadcast %cst_41 : f32 to vector<64x256xf32>
    %55 = arith.addf %54, %53 : vector<64x256xf32>
    %56 = arith.divf %54, %55 : vector<64x256xf32>
    %57 = arith.mulf %3, %56 : vector<64x256xf32>
    %58 = arith.addf %50, %57 : vector<64x256xf32>
    %59 = vector.extract_strided_slice %43 {offsets = [0, 512], sizes = [64, 256], strides = [1, 1]} : vector<64x1024xf32> to vector<64x256xf32>
    %60 = arith.negf %59 : vector<64x256xf32>
    %61 = math.exp %60 : vector<64x256xf32>
    %cst_42 = arith.constant 1.000000e+00 : f32
    %62 = vector.broadcast %cst_42 : f32 to vector<64x256xf32>
    %63 = arith.addf %62, %61 : vector<64x256xf32>
    %64 = arith.divf %62, %63 : vector<64x256xf32>
    %65 = arith.mulf %5, %64 : vector<64x256xf32>
    %66 = arith.addf %58, %65 : vector<64x256xf32>
    %67 = vector.extract_strided_slice %43 {offsets = [0, 768], sizes = [64, 256], strides = [1, 1]} : vector<64x1024xf32> to vector<64x256xf32>
    %68 = arith.negf %67 : vector<64x256xf32>
    %69 = math.exp %68 : vector<64x256xf32>
    %cst_43 = arith.constant 1.000000e+00 : f32
    %70 = vector.broadcast %cst_43 : f32 to vector<64x256xf32>
    %71 = arith.addf %70, %69 : vector<64x256xf32>
    %72 = arith.divf %70, %71 : vector<64x256xf32>
    %73 = arith.mulf %7, %72 : vector<64x256xf32>
    %74 = arith.addf %66, %73 : vector<64x256xf32>
    %c0_44 = arith.constant 0 : index
    %c0_45 = arith.constant 0 : index
    %75 = vector.load %arg15[%c0_44, %c0_45] : memref<256x256xf32, #tpu.memory_space<vmem>>, vector<256x256xf32>
    %cst_46 = arith.constant dense<0.000000e+00> : vector<64x256xf32>
    %76 = tpu.matmul %74, %75, %cst_46 {dimension_numbers = #tpu.dot_dimension_numbers<[1], [0], [0], [1], [0, 0, 1, 1], [], []>} : vector<64x256xf32>, vector<256x256xf32>, vector<64x256xf32> -> vector<64x256xf32>
    %c0_47 = arith.constant 0 : index
    %c0_48 = arith.constant 0 : index
    %77 = vector.load %arg16[%c0_47, %c0_48] : memref<1x256xf32, #tpu.memory_space<vmem>>, vector<1x256xf32>
    %c0_49 = arith.constant 0 : index
    %c0_50 = arith.constant 0 : index
    %78 = vector.load %arg17[%c0_49, %c0_50] : memref<1x256xf32, #tpu.memory_space<vmem>>, vector<1x256xf32>
    %cst_51 = arith.constant dense<0.000000e+00> : vector<64xf32>
    %79 = vector.multi_reduction <add>, %76, %cst_51 [1] : vector<64x256xf32> to vector<64xf32>
    %80 = vector.shape_cast %79 : vector<64xf32> to vector<64x1xf32>
    %cst_52 = arith.constant 2.560000e+02 : f32
    %81 = vector.broadcast %cst_52 : f32 to vector<64x1xf32>
    %82 = arith.divf %80, %81 : vector<64x1xf32>
    %83 = vector.broadcast %82 : vector<64x1xf32> to vector<64x256xf32>
    %84 = arith.subf %76, %83 : vector<64x256xf32>
    %85 = arith.mulf %84, %84 : vector<64x256xf32>
    %cst_53 = arith.constant dense<0.000000e+00> : vector<64xf32>
    %86 = vector.multi_reduction <add>, %85, %cst_53 [1] : vector<64x256xf32> to vector<64xf32>
    %87 = vector.shape_cast %86 : vector<64xf32> to vector<64x1xf32>
    %cst_54 = arith.constant 2.560000e+02 : f32
    %88 = vector.broadcast %cst_54 : f32 to vector<64x1xf32>
    %89 = arith.divf %87, %88 : vector<64x1xf32>
    %cst_55 = arith.constant 9.99999997E-7 : f32
    %90 = vector.broadcast %cst_55 : f32 to vector<64x1xf32>
    %91 = arith.addf %89, %90 : vector<64x1xf32>
    %92 = math.rsqrt %91 : vector<64x1xf32>
    %93 = vector.broadcast %92 : vector<64x1xf32> to vector<64x256xf32>
    %94 = arith.mulf %84, %93 : vector<64x256xf32>
    %95 = vector.broadcast %77 : vector<1x256xf32> to vector<64x256xf32>
    %96 = arith.mulf %94, %95 : vector<64x256xf32>
    %97 = vector.broadcast %78 : vector<1x256xf32> to vector<64x256xf32>
    %98 = arith.addf %96, %97 : vector<64x256xf32>
    %cst_56 = arith.constant 0.000000e+00 : f32
    %99 = vector.broadcast %cst_56 : f32 to vector<64x256xf32>
    %c0_57 = arith.constant 0 : index
    %c0_58 = arith.constant 0 : index
    %c0_59 = arith.constant 0 : index
    %100 = vector.load %arg21[%c0_57, %c0_58, %c0_59] : memref<9x64x64xf32, #tpu.memory_space<vmem>>, vector<1x64x64xf32>
    %101 = vector.shape_cast %100 : vector<1x64x64xf32> to vector<64x64xf32>
    %cst_60 = arith.constant dense<0.000000e+00> : vector<64x256xf32>
    %102 = tpu.matmul %101, %98, %cst_60 {dimension_numbers = #tpu.dot_dimension_numbers<[1], [0], [0], [1], [0, 0, 1, 1], [], []>} : vector<64x64xf32>, vector<64x256xf32>, vector<64x256xf32> -> vector<64x256xf32>
    %c0_61 = arith.constant 0 : index
    %c0_62 = arith.constant 0 : index
    %c0_63 = arith.constant 0 : index
    %103 = vector.load %arg18[%c0_61, %c0_62, %c0_63] : memref<9x256x256xf32, #tpu.memory_space<vmem>>, vector<1x256x256xf32>
    %104 = vector.shape_cast %103 : vector<1x256x256xf32> to vector<256x256xf32>
    %cst_64 = arith.constant dense<0.000000e+00> : vector<64x256xf32>
    %105 = tpu.matmul %102, %104, %cst_64 {dimension_numbers = #tpu.dot_dimension_numbers<[1], [0], [0], [1], [0, 0, 1, 1], [], []>} : vector<64x256xf32>, vector<256x256xf32>, vector<64x256xf32> -> vector<64x256xf32>
    %106 = arith.addf %99, %105 : vector<64x256xf32>
    %c1 = arith.constant 1 : index
    %c0_65 = arith.constant 0 : index
    %c0_66 = arith.constant 0 : index
    %107 = vector.load %arg21[%c1, %c0_65, %c0_66] : memref<9x64x64xf32, #tpu.memory_space<vmem>>, vector<1x64x64xf32>
    %108 = vector.shape_cast %107 : vector<1x64x64xf32> to vector<64x64xf32>
    %cst_67 = arith.constant dense<0.000000e+00> : vector<64x256xf32>
    %109 = tpu.matmul %108, %98, %cst_67 {dimension_numbers = #tpu.dot_dimension_numbers<[1], [0], [0], [1], [0, 0, 1, 1], [], []>} : vector<64x64xf32>, vector<64x256xf32>, vector<64x256xf32> -> vector<64x256xf32>
    %c1_68 = arith.constant 1 : index
    %c0_69 = arith.constant 0 : index
    %c0_70 = arith.constant 0 : index
    %110 = vector.load %arg18[%c1_68, %c0_69, %c0_70] : memref<9x256x256xf32, #tpu.memory_space<vmem>>, vector<1x256x256xf32>
    %111 = vector.shape_cast %110 : vector<1x256x256xf32> to vector<256x256xf32>
    %cst_71 = arith.constant dense<0.000000e+00> : vector<64x256xf32>
    %112 = tpu.matmul %109, %111, %cst_71 {dimension_numbers = #tpu.dot_dimension_numbers<[1], [0], [0], [1], [0, 0, 1, 1], [], []>} : vector<64x256xf32>, vector<256x256xf32>, vector<64x256xf32> -> vector<64x256xf32>
    %113 = arith.addf %106, %112 : vector<64x256xf32>
    %c2 = arith.constant 2 : index
    %c0_72 = arith.constant 0 : index
    %c0_73 = arith.constant 0 : index
    %114 = vector.load %arg21[%c2, %c0_72, %c0_73] : memref<9x64x64xf32, #tpu.memory_space<vmem>>, vector<1x64x64xf32>
    %115 = vector.shape_cast %114 : vector<1x64x64xf32> to vector<64x64xf32>
    %cst_74 = arith.constant dense<0.000000e+00> : vector<64x256xf32>
    %116 = tpu.matmul %115, %98, %cst_74 {dimension_numbers = #tpu.dot_dimension_numbers<[1], [0], [0], [1], [0, 0, 1, 1], [], []>} : vector<64x64xf32>, vector<64x256xf32>, vector<64x256xf32> -> vector<64x256xf32>
    %c2_75 = arith.constant 2 : index
    %c0_76 = arith.constant 0 : index
    %c0_77 = arith.constant 0 : index
    %117 = vector.load %arg18[%c2_75, %c0_76, %c0_77] : memref<9x256x256xf32, #tpu.memory_space<vmem>>, vector<1x256x256xf32>
    %118 = vector.shape_cast %117 : vector<1x256x256xf32> to vector<256x256xf32>
    %cst_78 = arith.constant dense<0.000000e+00> : vector<64x256xf32>
    %119 = tpu.matmul %116, %118, %cst_78 {dimension_numbers = #tpu.dot_dimension_numbers<[1], [0], [0], [1], [0, 0, 1, 1], [], []>} : vector<64x256xf32>, vector<256x256xf32>, vector<64x256xf32> -> vector<64x256xf32>
    %120 = arith.addf %113, %119 : vector<64x256xf32>
    %c3 = arith.constant 3 : index
    %c0_79 = arith.constant 0 : index
    %c0_80 = arith.constant 0 : index
    %121 = vector.load %arg21[%c3, %c0_79, %c0_80] : memref<9x64x64xf32, #tpu.memory_space<vmem>>, vector<1x64x64xf32>
    %122 = vector.shape_cast %121 : vector<1x64x64xf32> to vector<64x64xf32>
    %cst_81 = arith.constant dense<0.000000e+00> : vector<64x256xf32>
    %123 = tpu.matmul %122, %98, %cst_81 {dimension_numbers = #tpu.dot_dimension_numbers<[1], [0], [0], [1], [0, 0, 1, 1], [], []>} : vector<64x64xf32>, vector<64x256xf32>, vector<64x256xf32> -> vector<64x256xf32>
    %c3_82 = arith.constant 3 : index
    %c0_83 = arith.constant 0 : index
    %c0_84 = arith.constant 0 : index
    %124 = vector.load %arg18[%c3_82, %c0_83, %c0_84] : memref<9x256x256xf32, #tpu.memory_space<vmem>>, vector<1x256x256xf32>
    %125 = vector.shape_cast %124 : vector<1x256x256xf32> to vector<256x256xf32>
    %cst_85 = arith.constant dense<0.000000e+00> : vector<64x256xf32>
    %126 = tpu.matmul %123, %125, %cst_85 {dimension_numbers = #tpu.dot_dimension_numbers<[1], [0], [0], [1], [0, 0, 1, 1], [], []>} : vector<64x256xf32>, vector<256x256xf32>, vector<64x256xf32> -> vector<64x256xf32>
    %127 = arith.addf %120, %126 : vector<64x256xf32>
    %c4 = arith.constant 4 : index
    %c0_86 = arith.constant 0 : index
    %c0_87 = arith.constant 0 : index
    %128 = vector.load %arg21[%c4, %c0_86, %c0_87] : memref<9x64x64xf32, #tpu.memory_space<vmem>>, vector<1x64x64xf32>
    %129 = vector.shape_cast %128 : vector<1x64x64xf32> to vector<64x64xf32>
    %cst_88 = arith.constant dense<0.000000e+00> : vector<64x256xf32>
    %130 = tpu.matmul %129, %98, %cst_88 {dimension_numbers = #tpu.dot_dimension_numbers<[1], [0], [0], [1], [0, 0, 1, 1], [], []>} : vector<64x64xf32>, vector<64x256xf32>, vector<64x256xf32> -> vector<64x256xf32>
    %c4_89 = arith.constant 4 : index
    %c0_90 = arith.constant 0 : index
    %c0_91 = arith.constant 0 : index
    %131 = vector.load %arg18[%c4_89, %c0_90, %c0_91] : memref<9x256x256xf32, #tpu.memory_space<vmem>>, vector<1x256x256xf32>
    %132 = vector.shape_cast %131 : vector<1x256x256xf32> to vector<256x256xf32>
    %cst_92 = arith.constant dense<0.000000e+00> : vector<64x256xf32>
    %133 = tpu.matmul %130, %132, %cst_92 {dimension_numbers = #tpu.dot_dimension_numbers<[1], [0], [0], [1], [0, 0, 1, 1], [], []>} : vector<64x256xf32>, vector<256x256xf32>, vector<64x256xf32> -> vector<64x256xf32>
    %134 = arith.addf %127, %133 : vector<64x256xf32>
    %c5 = arith.constant 5 : index
    %c0_93 = arith.constant 0 : index
    %c0_94 = arith.constant 0 : index
    %135 = vector.load %arg21[%c5, %c0_93, %c0_94] : memref<9x64x64xf32, #tpu.memory_space<vmem>>, vector<1x64x64xf32>
    %136 = vector.shape_cast %135 : vector<1x64x64xf32> to vector<64x64xf32>
    %cst_95 = arith.constant dense<0.000000e+00> : vector<64x256xf32>
    %137 = tpu.matmul %136, %98, %cst_95 {dimension_numbers = #tpu.dot_dimension_numbers<[1], [0], [0], [1], [0, 0, 1, 1], [], []>} : vector<64x64xf32>, vector<64x256xf32>, vector<64x256xf32> -> vector<64x256xf32>
    %c5_96 = arith.constant 5 : index
    %c0_97 = arith.constant 0 : index
    %c0_98 = arith.constant 0 : index
    %138 = vector.load %arg18[%c5_96, %c0_97, %c0_98] : memref<9x256x256xf32, #tpu.memory_space<vmem>>, vector<1x256x256xf32>
    %139 = vector.shape_cast %138 : vector<1x256x256xf32> to vector<256x256xf32>
    %cst_99 = arith.constant dense<0.000000e+00> : vector<64x256xf32>
    %140 = tpu.matmul %137, %139, %cst_99 {dimension_numbers = #tpu.dot_dimension_numbers<[1], [0], [0], [1], [0, 0, 1, 1], [], []>} : vector<64x256xf32>, vector<256x256xf32>, vector<64x256xf32> -> vector<64x256xf32>
    %141 = arith.addf %134, %140 : vector<64x256xf32>
    %c6 = arith.constant 6 : index
    %c0_100 = arith.constant 0 : index
    %c0_101 = arith.constant 0 : index
    %142 = vector.load %arg21[%c6, %c0_100, %c0_101] : memref<9x64x64xf32, #tpu.memory_space<vmem>>, vector<1x64x64xf32>
    %143 = vector.shape_cast %142 : vector<1x64x64xf32> to vector<64x64xf32>
    %cst_102 = arith.constant dense<0.000000e+00> : vector<64x256xf32>
    %144 = tpu.matmul %143, %98, %cst_102 {dimension_numbers = #tpu.dot_dimension_numbers<[1], [0], [0], [1], [0, 0, 1, 1], [], []>} : vector<64x64xf32>, vector<64x256xf32>, vector<64x256xf32> -> vector<64x256xf32>
    %c6_103 = arith.constant 6 : index
    %c0_104 = arith.constant 0 : index
    %c0_105 = arith.constant 0 : index
    %145 = vector.load %arg18[%c6_103, %c0_104, %c0_105] : memref<9x256x256xf32, #tpu.memory_space<vmem>>, vector<1x256x256xf32>
    %146 = vector.shape_cast %145 : vector<1x256x256xf32> to vector<256x256xf32>
    %cst_106 = arith.constant dense<0.000000e+00> : vector<64x256xf32>
    %147 = tpu.matmul %144, %146, %cst_106 {dimension_numbers = #tpu.dot_dimension_numbers<[1], [0], [0], [1], [0, 0, 1, 1], [], []>} : vector<64x256xf32>, vector<256x256xf32>, vector<64x256xf32> -> vector<64x256xf32>
    %148 = arith.addf %141, %147 : vector<64x256xf32>
    %c7 = arith.constant 7 : index
    %c0_107 = arith.constant 0 : index
    %c0_108 = arith.constant 0 : index
    %149 = vector.load %arg21[%c7, %c0_107, %c0_108] : memref<9x64x64xf32, #tpu.memory_space<vmem>>, vector<1x64x64xf32>
    %150 = vector.shape_cast %149 : vector<1x64x64xf32> to vector<64x64xf32>
    %cst_109 = arith.constant dense<0.000000e+00> : vector<64x256xf32>
    %151 = tpu.matmul %150, %98, %cst_109 {dimension_numbers = #tpu.dot_dimension_numbers<[1], [0], [0], [1], [0, 0, 1, 1], [], []>} : vector<64x64xf32>, vector<64x256xf32>, vector<64x256xf32> -> vector<64x256xf32>
    %c7_110 = arith.constant 7 : index
    %c0_111 = arith.constant 0 : index
    %c0_112 = arith.constant 0 : index
    %152 = vector.load %arg18[%c7_110, %c0_111, %c0_112] : memref<9x256x256xf32, #tpu.memory_space<vmem>>, vector<1x256x256xf32>
    %153 = vector.shape_cast %152 : vector<1x256x256xf32> to vector<256x256xf32>
    %cst_113 = arith.constant dense<0.000000e+00> : vector<64x256xf32>
    %154 = tpu.matmul %151, %153, %cst_113 {dimension_numbers = #tpu.dot_dimension_numbers<[1], [0], [0], [1], [0, 0, 1, 1], [], []>} : vector<64x256xf32>, vector<256x256xf32>, vector<64x256xf32> -> vector<64x256xf32>
    %155 = arith.addf %148, %154 : vector<64x256xf32>
    %c8 = arith.constant 8 : index
    %c0_114 = arith.constant 0 : index
    %c0_115 = arith.constant 0 : index
    %156 = vector.load %arg21[%c8, %c0_114, %c0_115] : memref<9x64x64xf32, #tpu.memory_space<vmem>>, vector<1x64x64xf32>
    %157 = vector.shape_cast %156 : vector<1x64x64xf32> to vector<64x64xf32>
    %cst_116 = arith.constant dense<0.000000e+00> : vector<64x256xf32>
    %158 = tpu.matmul %157, %98, %cst_116 {dimension_numbers = #tpu.dot_dimension_numbers<[1], [0], [0], [1], [0, 0, 1, 1], [], []>} : vector<64x64xf32>, vector<64x256xf32>, vector<64x256xf32> -> vector<64x256xf32>
    %c8_117 = arith.constant 8 : index
    %c0_118 = arith.constant 0 : index
    %c0_119 = arith.constant 0 : index
    %159 = vector.load %arg18[%c8_117, %c0_118, %c0_119] : memref<9x256x256xf32, #tpu.memory_space<vmem>>, vector<1x256x256xf32>
    %160 = vector.shape_cast %159 : vector<1x256x256xf32> to vector<256x256xf32>
    %cst_120 = arith.constant dense<0.000000e+00> : vector<64x256xf32>
    %161 = tpu.matmul %158, %160, %cst_120 {dimension_numbers = #tpu.dot_dimension_numbers<[1], [0], [0], [1], [0, 0, 1, 1], [], []>} : vector<64x256xf32>, vector<256x256xf32>, vector<64x256xf32> -> vector<64x256xf32>
    %162 = arith.addf %155, %161 : vector<64x256xf32>
    %c0_121 = arith.constant 0 : index
    %c0_122 = arith.constant 0 : index
    %163 = vector.load %arg19[%c0_121, %c0_122] : memref<1x256xf32, #tpu.memory_space<vmem>>, vector<1x256xf32>
    %c0_123 = arith.constant 0 : index
    %c0_124 = arith.constant 0 : index
    %164 = vector.load %arg20[%c0_123, %c0_124] : memref<1x256xf32, #tpu.memory_space<vmem>>, vector<1x256xf32>
    %cst_125 = arith.constant dense<0.000000e+00> : vector<64xf32>
    %165 = vector.multi_reduction <add>, %162, %cst_125 [1] : vector<64x256xf32> to vector<64xf32>
    %166 = vector.shape_cast %165 : vector<64xf32> to vector<64x1xf32>
    %cst_126 = arith.constant 2.560000e+02 : f32
    %167 = vector.broadcast %cst_126 : f32 to vector<64x1xf32>
    %168 = arith.divf %166, %167 : vector<64x1xf32>
    %169 = vector.broadcast %168 : vector<64x1xf32> to vector<64x256xf32>
    %170 = arith.subf %162, %169 : vector<64x256xf32>
    %171 = arith.mulf %170, %170 : vector<64x256xf32>
    %cst_127 = arith.constant dense<0.000000e+00> : vector<64xf32>
    %172 = vector.multi_reduction <add>, %171, %cst_127 [1] : vector<64x256xf32> to vector<64xf32>
    %173 = vector.shape_cast %172 : vector<64xf32> to vector<64x1xf32>
    %cst_128 = arith.constant 2.560000e+02 : f32
    %174 = vector.broadcast %cst_128 : f32 to vector<64x1xf32>
    %175 = arith.divf %173, %174 : vector<64x1xf32>
    %cst_129 = arith.constant 9.99999997E-7 : f32
    %176 = vector.broadcast %cst_129 : f32 to vector<64x1xf32>
    %177 = arith.addf %175, %176 : vector<64x1xf32>
    %178 = math.rsqrt %177 : vector<64x1xf32>
    %179 = vector.broadcast %178 : vector<64x1xf32> to vector<64x256xf32>
    %180 = arith.mulf %170, %179 : vector<64x256xf32>
    %181 = vector.broadcast %163 : vector<1x256xf32> to vector<64x256xf32>
    %182 = arith.mulf %180, %181 : vector<64x256xf32>
    %183 = vector.broadcast %164 : vector<1x256xf32> to vector<64x256xf32>
    %184 = arith.addf %182, %183 : vector<64x256xf32>
    %c0_130 = arith.constant 0 : index
    %c0_131 = arith.constant 0 : index
    %c0_132 = arith.constant 0 : index
    %185 = vector.load %arg22[%c0_130, %c0_131, %c0_132] : memref<1x64x256xf32, #tpu.memory_space<vmem>>, vector<1x64x256xf32>
    %186 = vector.shape_cast %185 : vector<1x64x256xf32> to vector<64x256xf32>
    %187 = vector.shape_cast %184 : vector<64x256xf32> to vector<1x64x256xf32>
    tpu.vector_store %arg22[%c0_130, %c0_131, %c0_132], %187 {strides = array<i32>} : memref<1x64x256xf32, #tpu.memory_space<vmem>>, vector<1x64x256xf32>,
    return
  }
  func.func @transform_0(%arg0: i32) -> (i32, i32, i32) {
    %c0_i32 = arith.constant 0 : i32
    %c0_i32_0 = arith.constant 0 : i32
    %c0_i32_1 = arith.constant 0 : i32
    return %arg0, %c0_i32, %c0_i32_0 : i32, i32, i32
  }
  func.func @transform_1(%arg0: i32) -> (i32, i32, i32) {
    %c0_i32 = arith.constant 0 : i32
    %c0_i32_0 = arith.constant 0 : i32
    %c0_i32_1 = arith.constant 0 : i32
    return %arg0, %c0_i32, %c0_i32_0 : i32, i32, i32
  }
  func.func @transform_2(%arg0: i32) -> (i32, i32, i32) {
    %c0_i32 = arith.constant 0 : i32
    %c0_i32_0 = arith.constant 0 : i32
    %c0_i32_1 = arith.constant 0 : i32
    return %arg0, %c0_i32, %c0_i32_0 : i32, i32, i32
  }
  func.func @transform_3(%arg0: i32) -> (i32, i32, i32) {
    %c0_i32 = arith.constant 0 : i32
    %c0_i32_0 = arith.constant 0 : i32
    %c0_i32_1 = arith.constant 0 : i32
    return %arg0, %c0_i32, %c0_i32_0 : i32, i32, i32
  }
  func.func @transform_4(%arg0: i32) -> (i32, i32) {
    %c0_i32 = arith.constant 0 : i32
    %c0_i32_0 = arith.constant 0 : i32
    %c0_i32_1 = arith.constant 0 : i32
    return %c0_i32, %c0_i32_0 : i32, i32
  }
  func.func @transform_5(%arg0: i32) -> (i32, i32) {
    %c0_i32 = arith.constant 0 : i32
    %c0_i32_0 = arith.constant 0 : i32
    %c0_i32_1 = arith.constant 0 : i32
    return %c0_i32, %c0_i32_0 : i32, i32
  }
  func.func @transform_6(%arg0: i32) -> (i32, i32) {
    %c0_i32 = arith.constant 0 : i32
    %c0_i32_0 = arith.constant 0 : i32
    %c0_i32_1 = arith.constant 0 : i32
    return %c0_i32, %c0_i32_0 : i32, i32
  }
  func.func @transform_7(%arg0: i32) -> (i32, i32) {
    %c0_i32 = arith.constant 0 : i32
    %c0_i32_0 = arith.constant 0 : i32
    %c0_i32_1 = arith.constant 0 : i32
    return %c0_i32, %c0_i32_0 : i32, i32
  }
  func.func @transform_8(%arg0: i32) -> (i32, i32) {
    %c0_i32 = arith.constant 0 : i32
    %c0_i32_0 = arith.constant 0 : i32
    %c0_i32_1 = arith.constant 0 : i32
    return %c0_i32, %c0_i32_0 : i32, i32
  }
  func.func @transform_9(%arg0: i32) -> (i32, i32) {
    %c0_i32 = arith.constant 0 : i32
    %c0_i32_0 = arith.constant 0 : i32
    %c0_i32_1 = arith.constant 0 : i32
    return %c0_i32, %c0_i32_0 : i32, i32
  }
  func.func @transform_10(%arg0: i32) -> (i32, i32) {
    %c0_i32 = arith.constant 0 : i32
    %c0_i32_0 = arith.constant 0 : i32
    %c0_i32_1 = arith.constant 0 : i32
    return %c0_i32, %c0_i32_0 : i32, i32
  }
  func.func @transform_11(%arg0: i32) -> (i32, i32) {
    %c0_i32 = arith.constant 0 : i32
    %c0_i32_0 = arith.constant 0 : i32
    %c0_i32_1 = arith.constant 0 : i32
    return %c0_i32, %c0_i32_0 : i32, i32
  }
  func.func @transform_12(%arg0: i32) -> (i32, i32) {
    %c0_i32 = arith.constant 0 : i32
    %c0_i32_0 = arith.constant 0 : i32
    %c0_i32_1 = arith.constant 0 : i32
    return %c0_i32, %c0_i32_0 : i32, i32
  }
  func.func @transform_13(%arg0: i32) -> (i32, i32) {
    %c0_i32 = arith.constant 0 : i32
    %c0_i32_0 = arith.constant 0 : i32
    %c0_i32_1 = arith.constant 0 : i32
    return %c0_i32, %c0_i32_0 : i32, i32
  }
  func.func @transform_14(%arg0: i32) -> (i32, i32) {
    %c0_i32 = arith.constant 0 : i32
    %c0_i32_0 = arith.constant 0 : i32
    %c0_i32_1 = arith.constant 0 : i32
    return %c0_i32, %c0_i32_0 : i32, i32
  }
  func.func @transform_15(%arg0: i32) -> (i32, i32) {
    %c0_i32 = arith.constant 0 : i32
    %c0_i32_0 = arith.constant 0 : i32
    %c0_i32_1 = arith.constant 0 : i32
    return %c0_i32, %c0_i32_0 : i32, i32
  }
  func.func @transform_16(%arg0: i32) -> (i32, i32) {
    %c0_i32 = arith.constant 0 : i32
    %c0_i32_0 = arith.constant 0 : i32
    %c0_i32_1 = arith.constant 0 : i32
    return %c0_i32, %c0_i32_0 : i32, i32
  }
  func.func @transform_17(%arg0: i32) -> (i32, i32, i32) {
    %c0_i32 = arith.constant 0 : i32
    %c0_i32_0 = arith.constant 0 : i32
    %c0_i32_1 = arith.constant 0 : i32
    %c0_i32_2 = arith.constant 0 : i32
    return %c0_i32, %c0_i32_0, %c0_i32_1 : i32, i32, i32
  }
  func.func @transform_18(%arg0: i32) -> (i32, i32) {
    %c0_i32 = arith.constant 0 : i32
    %c0_i32_0 = arith.constant 0 : i32
    %c0_i32_1 = arith.constant 0 : i32
    return %c0_i32, %c0_i32_0 : i32, i32
  }
  func.func @transform_19(%arg0: i32) -> (i32, i32) {
    %c0_i32 = arith.constant 0 : i32
    %c0_i32_0 = arith.constant 0 : i32
    %c0_i32_1 = arith.constant 0 : i32
    return %c0_i32, %c0_i32_0 : i32, i32
  }
  func.func @transform_20(%arg0: i32) -> (i32, i32, i32) {
    %c0_i32 = arith.constant 0 : i32
    %c0_i32_0 = arith.constant 0 : i32
    %c0_i32_1 = arith.constant 0 : i32
    %c0_i32_2 = arith.constant 0 : i32
    return %c0_i32, %c0_i32_0, %c0_i32_1 : i32, i32, i32
  }
  func.func @transform_21(%arg0: i32) -> (i32, i32, i32) {
    %c0_i32 = arith.constant 0 : i32
    %c0_i32_0 = arith.constant 0 : i32
    %c0_i32_1 = arith.constant 0 : i32
    return %arg0, %c0_i32, %c0_i32_0 : i32, i32, i32
  }
}

</mosaic_0001>

<bundles_post_ra>
// kernel: tpu_custom_call.1
= control target key start
LH: loop header
LB: loop body
LE: loop exit
PB: predicated region body
PF: predicated region fallthrough
CT: control target
= control target key end

     0   :  { %s12186_s0 = inlined_call_operand.hbm [shape: f32[2,64,256], index: 0, kind: input, shape index: {}]   ;;  %s12187_s1 = inlined_call_operand.hbm [shape: f32[2,64,256], index: 1, kind: input, shape index: {}]   ;;  %s12188_s2 = inlined_call_operand.hbm [shape: f32[2,64,256], index: 2, kind: input, shape index: {}]   ;;  %s12189_s3 = inlined_call_operand.hbm [shape: f32[2,64,256], index: 3, kind: input, shape index: {}]   ;;  %s12190_s4 = inlined_call_operand.vmem [shape: f32[256,64], index: 4, kind: input, shape index: {}]   ;;  %s12191_s5 = inlined_call_operand.hbm [shape: f32[1,64], index: 5, kind: input, shape index: {}]   ;;  %s12192_s6 = inlined_call_operand.hbm [shape: f32[64,256], index: 6, kind: input, shape index: {}]   ;;  %s12193_s7 = inlined_call_operand.hbm [shape: f32[1,256], index: 7, kind: input, shape index: {}]   ;;  %s12194_s8 = inlined_call_operand.vmem [shape: f32[256,64], index: 8, kind: input, shape index: {}]   ;;  %s12195_s9 = inlined_call_operand.hbm [shape: f32[1,64], index: 9, kind: input, shape index: {}]   ;;  %s12196_s10 = inlined_call_operand.hbm [shape: f32[64,256], index: 10, kind: input, shape index: {}]   ;;  %s12197_s11 = inlined_call_operand.hbm [shape: f32[1,256], index: 11, kind: input, shape index: {}]   ;;  %s12198_s12 = inlined_call_operand.hbm [shape: f32[256,1024], index: 12, kind: input, shape index: {}]   ;;  %s12199_s13 = inlined_call_operand.hbm [shape: f32[1,1024], index: 13, kind: input, shape index: {}]   ;;  %s12200_s14 = inlined_call_operand.hbm [shape: f32[256,256], index: 14, kind: input, shape index: {}]   ;;  %s12201_s15 = inlined_call_operand.hbm [shape: f32[1,256], index: 15, kind: input, shape index: {}]   ;;  %s12202_s16 = inlined_call_operand.hbm [shape: f32[1,256], index: 16, kind: input, shape index: {}]   ;;  %s12203_s17 = inlined_call_operand.hbm [shape: f32[9,256,256], index: 17, kind: input, shape index: {}]   ;;  %s12204_s18 = inlined_call_operand.hbm [shape: f32[1,256], index: 18, kind: input, shape index: {}]   ;;  %s12205_s19 = inlined_call_operand.hbm [shape: f32[1,256], index: 19, kind: input, shape index: {}]   ;;  %s12206_s20 = inlined_call_operand.hbm [shape: f32[9,64,64], index: 20, kind: input, shape index: {}]   ;;  %s12207_s21 = inlined_call_operand.hbm [shape: f32[2,64,256], index: 21, kind: output, shape index: {}]  }
   0x1   :  { %12247 = sst [smem:[#allocation51_spill]] %s12186_s0 }
   0x2   :  { %12248 = sst [smem:[#allocation52_spill]] %s12187_s1 }
   0x3   :  { %12249 = sst [smem:[#allocation53_spill]] %s12188_s2 }
   0x4   :  { %12250 = sst [smem:[#allocation54_spill]] %s12189_s3 }
   0x5   :  { %12251 = sst [smem:[#allocation55_spill]] %s12190_s4 }
   0x6   :  { %12252 = sst [smem:[#allocation56_spill]] %s12191_s5 }
   0x7   :  { %12253 = sst [smem:[#allocation57_spill]] %s12192_s6 }
   0x8   :  { %12254 = sst [smem:[#allocation58_spill]] %s12193_s7 }
   0x9   :  { %12255 = sst [smem:[#allocation59_spill]] %s12194_s8 }
   0xa   :  { %12256 = sst [smem:[#allocation60_spill]] %s12195_s9 }
   0xb   :  { %12257 = sst [smem:[#allocation61_spill]] %s12197_s11 }
   0xc   :  { %12258 = sst [smem:[#allocation62_spill]] %s12199_s13 }
   0xd   :  { %12259 = sst [smem:[#allocation63_spill]] %s12201_s15 }
   0xe   :  { %12260 = sst [smem:[#allocation64_spill]] %s12202_s16 }
   0xf   :  { %12261 = sst [smem:[#allocation65_spill]] %s12203_s17 }
  0x10   :  { %12262 = sst [smem:[#allocation66_spill]] %s12204_s18 }
  0x11   :  { %12263 = sst [smem:[#allocation67_spill]] %s12205_s19 }
  0x12   :  { %12264 = sst [smem:[#allocation68_spill]] %s12206_s20 }
  0x13   :  { %12265 = sst [smem:[#allocation69_spill]] %s12207_s21 }
  0x14   :  { %26 = vsyncpa [#allocation3], 0 }
  0x15   :  { %28 = vsyncpa [#allocation3 + $0x1], 0 }
  0x16   :  { %29 = vsyncpa [#allocation6], 0 }
  0x17   :  { %31 = vsyncpa [#allocation6 + $0x1], 0 }
  0x18   :  { %32 = vsyncpa [#allocation9], 0 }
  0x19   :  { %34 = vsyncpa [#allocation9 + $0x1], 0 }
  0x1a   :  { %35 = vsyncpa [#allocation12], 0 }
  0x1b   :  { %36 = vsyncpa [#allocation15], 0 }
  0x1c   :  { %37 = vsyncpa [#allocation18], 0 }
  0x1d   :  { %38 = vsyncpa [#allocation21], 0 }
  0x1e   :  { %39 = vsyncpa [#allocation24], 0 }
  0x1f   :  { %40 = vsyncpa [#allocation27], 0 }
  0x20   :  { %41 = vsyncpa [#allocation30], 0 }
  0x21   :  { %42 = vsyncpa [#allocation4], 0 }
  0x22   :  { %44 = vsyncpa [#allocation4 + $0x1], 0  ;;  %s9798_s2 = smov 0   ;;  %s9800_s25 = smov 0  }
  0x23   :  { %s9802_s26 = smov 0   ;;  %s9804_s27 = smov 0  }
  0x24 LB: > { %12266 = sst [smem:[#allocation45_spill]] %s9644_s2  ;;  %s9658_s3 = smov [#allocation10]   ;;  %s9656_s27 = sphi %s9804_s27, %s12333_s27   ;;  %s9652_s26 = sphi %s9802_s26, %s12337_s26   ;;  %s9648_s25 = sphi %s9800_s25, %s12336_s25   ;;  %s9644_s2 = sphi %s9798_s2, %s12335_s2  }
  0x25   : > { %s558_s28 = sshll.u32 %s9658_s3, 4  ;;  %s9819_s29 = sadd.s32 4294967295, %s9656_s27   ;;  %s9824_s28 = int_to_ptr.vmem [resolvable:$true] %s558_s28 }
  0x26   : > { %p6857_p0 = scmp.ge.s32.totalorder %s9656_s27, 1  ;;  %p12225_p1 = scmp.eq.s32.totalorder %s9819_s29, 0 }
  0x27   : > { %p542_p2 = scmp.lt.s32.totalorder %s9656_s27, 3  ;;  %s9659_s4 = smov [#allocation11]  }
  0x28   : > { %s568_s30 = sshll.u32 %s9659_s4, 4  ;;  %s9660_s22 = smov [#allocation14]   ;;  %s9833_s30 = int_to_ptr.vmem [resolvable:$true] %s568_s30 }
  0x29   : > { %p9826_p3 = pnand %p6857_p0, %p542_p2  ;;  %s596_s23 = sshll.u32 %s9660_s22, 4  ;;  %s9841_s23 = int_to_ptr.vmem [resolvable:$true] %s596_s23 }
  0x2a   : > { %s12270_s3 = sld [smem:[#allocation56_spill]] }
  0x2b   : > { %s12267_s0 = scalar_select %p9826_p3, 1, 0 }
  0x2c   : > { %p8505_p5 = pneg %p9826_p3 }
  0x2d   : > { %12268 = sst [smem:[#allocation46_spill]] %s12267_s0 }
  0x2e   : > { %p9837_p6 = pnand %p8505_p5, %p12225_p1 }
  0x30   : > { %s12269_s5 = scalar_select %p9837_p6, 1, 0 }
  0x31   : > { %s9010_s21 = scalar_lea.hbm %s12270_s3, 16  ;;  %p9851_p8 = pneg %p9837_p6 }
  0x32   : > { %p9011_p7 = scmp.ne.s32.totalorder %s12270_s3, %s9010_s21  ;;  %p9017_p11 = scmp.lt.u32.totalorder %s9010_s21, %s12270_s3 }
  0x33   : > { %s12271_s4 = scalar_select %p9851_p8, 1, 0 }
  0x34   : > { %p9013_p9 = pnand %p9851_p8, %p9011_p7 }
  0x36   : > { %p9014_p10 = pneg %p9013_p9 }
  0x38   : > { %p9019_p12 = pnand %p9017_p11, %p9014_p10 }
  0x3a   : > { %9022 = shalt.err (!%p9019_p12)
}
  0x3b   : > { %s9023_s8 = scalar_lea.vmem %s9824_s28, 16  ;;  %s9030_s0 = scalar_lea.vmem %s9824_s28, 32 }
  0x3c   : > { %p9024_p13 = scmp.ne.s32.totalorder %s9824_s28, %s9023_s8  ;;  %p9031_p5 = scmp.lt.s32.totalorder %s9824_s28, %s9824_s28 }
  0x3d   : > { %p9032_p7 = scmp.lt.s32.totalorder %s9030_s0, %s9023_s8 }
  0x3e   : > { %p9026_p0 = pnand %p9024_p13, %p9851_p8 }
  0x3f   : > { %p9033_p9 = por %p9032_p7, %p9031_p5 }
  0x40   : > { %p9027_p2 = pneg %p9026_p0 }
  0x42   : > { %p9034_p4 = pnand %p9033_p9, %p9027_p2 }
  0x44   : > { %9037 = shalt.err (!%p9034_p4)
}
  0x45   : > { %8508 = dma.hbm_to_vmem [thread:$0]  (!%p9837_p6), %s12270_s3, 16, %s9824_s28, [#allocation9]  }
  0x46   : > { %s12272_s6 = sld [smem:[#allocation57_spill]] }
  0x4c   : > { %s9038_s22 = scalar_lea.hbm %s12272_s6, 2048 }
  0x4d   : > { %p9039_p10 = scmp.ne.s32.totalorder %s12272_s6, %s9038_s22  ;;  %p9045_p4 = scmp.lt.u32.totalorder %s9038_s22, %s12272_s6 }
  0x4f   : > { %p9041_p11 = pnand %p9039_p10, %p9851_p8 }
  0x51   : > { %p9042_p12 = pneg %p9041_p11 }
  0x53   : > { %p9047_p13 = pnand %p9045_p4, %p9042_p12 }
  0x55   : > { %9050 = shalt.err (!%p9047_p13)
}
  0x56   : > { %s9051_s28 = scalar_lea.vmem %s9833_s30, 2048  ;;  %p9059_p7 = scmp.lt.s32.totalorder %s9833_s30, %s9833_s30 }
  0x57   : > { %p9052_p0 = scmp.ne.s32.totalorder %s9833_s30, %s9051_s28  ;;  %p9060_p9 = scmp.lt.s32.totalorder %s9051_s28, %s9051_s28 }
  0x59   : > { %p9054_p2 = pnand %p9052_p0, %p9851_p8  ;;  %p9061_p10 = por %p9060_p9, %p9059_p7 }
  0x5b   : > { %p9055_p5 = pneg %p9054_p2 }
  0x5d   : > { %p9062_p11 = pnand %p9061_p10, %p9055_p5 }
  0x5f   : > { %9065 = shalt.err (!%p9062_p11)
}
  0x60   : > { %s12221_s16 = smov 256   ;;  %s12223_s18 = smov 16  }
  0x61   : > { %8511 = dma.hbm_to_vmem [thread:$0]  (!%p9837_p6), %s12272_s6, 2048, %s9833_s30, [#allocation12], %s12221_s16, %s12221_s16, %s12223_s18  }
  0x62   : > { %s12273_s9 = sld [smem:[#allocation60_spill]] }
  0x68   : > { %s9066_s22 = scalar_lea.hbm %s12273_s9, 16 }
  0x69   : > { %p9067_p12 = scmp.ne.s32.totalorder %s12273_s9, %s9066_s22  ;;  %p9073_p0 = scmp.lt.u32.totalorder %s9066_s22, %s12273_s9 }
  0x6b   : > { %p9069_p4 = pnand %p9067_p12, %p9851_p8 }
  0x6d   : > { %p9070_p13 = pneg %p9069_p4 }
  0x6f   : > { %p9075_p2 = pnand %p9073_p0, %p9070_p13 }
  0x71   : > { %9078 = shalt.err (!%p9075_p2)
}
  0x72   : > { %s9079_s30 = scalar_lea.vmem %s9841_s23, 16  ;;  %s9086_s20 = scalar_lea.vmem %s9841_s23, 32 }
  0x73   : > { %p9080_p5 = scmp.ne.s32.totalorder %s9841_s23, %s9079_s30  ;;  %p9087_p10 = scmp.lt.s32.totalorder %s9841_s23, %s9841_s23 }
  0x74   : > { %p9088_p11 = scmp.lt.s32.totalorder %s9086_s20, %s9079_s30 }
  0x75   : > { %p9082_p7 = pnand %p9080_p5, %p9851_p8 }
  0x76   : > { %p9089_p12 = por %p9088_p11, %p9087_p10 }
  0x77   : > { %p9083_p9 = pneg %p9082_p7 }
  0x79   : > { %p9090_p4 = pnand %p9089_p12, %p9083_p9 }
  0x7b   : > { %9093 = shalt.err (!%p9090_p4)
}
  0x7c   : > { %8517 = dma.hbm_to_vmem [thread:$0]  (!%p9837_p6), %s12273_s9, 16, %s9841_s23, [#allocation15]  }
  0x7d   : > { %s9663_s1 = smov [#allocation17]   ;;  %s9664_s22 = smov [#allocation20]  }
  0x7e   : > { %s620_s24 = sshll.u32 %s9663_s1, 4  ;;  %s644_s8 = sshll.u32 %s9664_s22, 4  ;;  %s621_s24 = int_to_ptr.vmem [resolvable:$true] %s620_s24  ;;  %s645_s8 = int_to_ptr.vmem [resolvable:$true] %s644_s8 }
  0x7f   : > { %s12274_s11 = sld [smem:[#allocation61_spill]] }
  0x85   : > { %s9094_s30 = scalar_lea.hbm %s12274_s11, 32 }
  0x86   : > { %p9095_p13 = scmp.ne.s32.totalorder %s12274_s11, %s9094_s30  ;;  %p9101_p5 = scmp.lt.u32.totalorder %s9094_s30, %s12274_s11 }
  0x88   : > { %p9097_p0 = pnand %p9095_p13, %p9851_p8 }
  0x8a   : > { %p9098_p2 = pneg %p9097_p0 }
  0x8c   : > { %p9103_p7 = pnand %p9101_p5, %p9098_p2 }
  0x8e   : > { %9106 = shalt.err (!%p9103_p7)
}
  0x8f   : > { %s9107_s23 = scalar_lea.vmem %s621_s24, 32  ;;  %p9115_p12 = scmp.lt.s32.totalorder %s621_s24, %s621_s24 }
  0x90   : > { %p9108_p9 = scmp.ne.s32.totalorder %s621_s24, %s9107_s23  ;;  %p9116_p4 = scmp.lt.s32.totalorder %s9107_s23, %s9107_s23 }
  0x92   : > { %p9110_p10 = pnand %p9108_p9, %p9851_p8  ;;  %p9117_p1 = por %p9116_p4, %p9115_p12 }
  0x94   : > { %p9111_p11 = pneg %p9110_p10 }
  0x96   : > { %p9118_p3 = pnand %p9117_p1, %p9111_p11 }
  0x98   : > { %9121 = shalt.err (!%p9118_p3)
}
  0x99   : > { %8523 = dma.hbm_to_vmem [thread:$0]  (!%p9837_p6), %s12274_s11, 32, %s621_s24, [#allocation18]  }
  0x9a   : > { %s12275_s13 = sld [smem:[#allocation62_spill]] }
  0xa0   : > { %s9122_s22 = scalar_lea.hbm %s12275_s13, 128 }
  0xa1   : > { %p9123_p13 = scmp.ne.s32.totalorder %s12275_s13, %s9122_s22  ;;  %p9129_p3 = scmp.lt.u32.totalorder %s9122_s22, %s12275_s13 }
  0xa3   : > { %p9125_p0 = pnand %p9123_p13, %p9851_p8 }
  0xa5   : > { %p9126_p1 = pneg %p9125_p0 }
  0xa7   : > { %p9131_p2 = pnand %p9129_p3, %p9126_p1 }
  0xa9   : > { %9134 = shalt.err (!%p9131_p2)
}
  0xaa   : > { %s9135_s3 = scalar_lea.vmem %s645_s8, 128  ;;  %p9143_p10 = scmp.lt.s32.totalorder %s645_s8, %s645_s8 }
  0xab   : > { %p9136_p5 = scmp.ne.s32.totalorder %s645_s8, %s9135_s3  ;;  %p9144_p11 = scmp.lt.s32.totalorder %s9135_s3, %s9135_s3 }
  0xad   : > { %p9138_p7 = pnand %p9136_p5, %p9851_p8  ;;  %p9145_p12 = por %p9144_p11, %p9143_p10 }
  0xaf   : > { %p9139_p9 = pneg %p9138_p7 }
  0xb1   : > { %p9146_p4 = pnand %p9145_p12, %p9139_p9 }
  0xb3   : > { %9149 = shalt.err (!%p9146_p4)
}
  0xb4   : > { %8529 = dma.hbm_to_vmem [thread:$0]  (!%p9837_p6), %s12275_s13, 128, %s645_s8, [#allocation21]  }
  0xb5   : > { %s9665_s16 = smov [#allocation23]   ;;  %s9666_s18 = smov [#allocation26]  }
  0xb6   : > { %s668_s21 = sshll.u32 %s9665_s16, 4  ;;  %s689_s1 = sshll.u32 %s9666_s18, 4  ;;  %s669_s21 = int_to_ptr.vmem [resolvable:$true] %s668_s21  ;;  %s690_s1 = int_to_ptr.vmem [resolvable:$true] %s689_s1 }
  0xb7   : > { %s12276_s15 = sld [smem:[#allocation63_spill]] }
  0xbd   : > { %s9150_s28 = scalar_lea.hbm %s12276_s15, 32 }
  0xbe   : > { %p9151_p13 = scmp.ne.s32.totalorder %s12276_s15, %s9150_s28  ;;  %p9157_p3 = scmp.lt.u32.totalorder %s9150_s28, %s12276_s15 }
  0xc0   : > { %p9153_p0 = pnand %p9151_p13, %p9851_p8 }
  0xc2   : > { %p9154_p1 = pneg %p9153_p0 }
  0xc4   : > { %p9159_p2 = pnand %p9157_p3, %p9154_p1 }
  0xc6   : > { %9162 = shalt.err (!%p9159_p2)
}
  0xc7   : > { %s9163_s8 = scalar_lea.vmem %s669_s21, 32  ;;  %p9171_p10 = scmp.lt.s32.totalorder %s669_s21, %s669_s21 }
  0xc8   : > { %p9164_p5 = scmp.ne.s32.totalorder %s669_s21, %s9163_s8  ;;  %p9172_p11 = scmp.lt.s32.totalorder %s9163_s8, %s9163_s8 }
  0xca   : > { %p9166_p7 = pnand %p9164_p5, %p9851_p8  ;;  %p9173_p12 = por %p9172_p11, %p9171_p10 }
  0xcc   : > { %p9167_p9 = pneg %p9166_p7 }
  0xce   : > { %p9174_p4 = pnand %p9173_p12, %p9167_p9 }
  0xd0   : > { %9177 = shalt.err (!%p9174_p4)
}
  0xd1   : > { %8535 = dma.hbm_to_vmem [thread:$0]  (!%p9837_p6), %s12276_s15, 32, %s669_s21, [#allocation24]  }
  0xd2   : > { %s12277_s17 = sld [smem:[#allocation65_spill]] }
  0xd8   : > { %s9178_s0 = scalar_lea.hbm %s12277_s17, 73728 }
  0xd9   : > { %p9179_p13 = scmp.ne.s32.totalorder %s12277_s17, %s9178_s0  ;;  %p9185_p3 = scmp.lt.u32.totalorder %s9178_s0, %s12277_s17 }
  0xdb   : > { %p9181_p0 = pnand %p9179_p13, %p9851_p8 }
  0xdd   : > { %p9182_p1 = pneg %p9181_p0 }
  0xdf   : > { %p9187_p2 = pnand %p9185_p3, %p9182_p1 }
  0xe1   : > { %9190 = shalt.err (!%p9187_p2)
}
  0xe2   : > { %s9191_s24 = scalar_lea.vmem %s690_s1, 73728  ;;  %p9199_p10 = scmp.lt.s32.totalorder %s690_s1, %s690_s1 }
  0xe3   : > { %p9192_p5 = scmp.ne.s32.totalorder %s690_s1, %s9191_s24  ;;  %p9200_p11 = scmp.lt.s32.totalorder %s9191_s24, %s9191_s24 }
  0xe5   : > { %p9194_p7 = pnand %p9192_p5, %p9851_p8  ;;  %p9201_p12 = por %p9200_p11, %p9199_p10 }
  0xe7   : > { %p9195_p9 = pneg %p9194_p7 }
  0xe9   : > { %p9202_p4 = pnand %p9201_p12, %p9195_p9 }
  0xeb   : > { %9205 = shalt.err (!%p9202_p4)
}
  0xec   : > { %s12278_s21 = smov 16   ;;  %s12279_s8 = smov 256  }
  0xed   : > { %8541 = dma.hbm_to_vmem [thread:$0]  (!%p9837_p6), %s12277_s17, 73728, %s690_s1, [#allocation27], %s12279_s8, %s12279_s8, %s12278_s21  }
  0xee   : > { %s9667_s18 = smov [#allocation29]   ;;  %s12280_s19 = sld [smem:[#allocation67_spill]] }
  0xef   : > { %s714_s22 = sshll.u32 %s9667_s18, 4  ;;  %s715_s22 = int_to_ptr.vmem [resolvable:$true] %s714_s22 }
  0xf4   : > { %s9206_s30 = scalar_lea.hbm %s12280_s19, 32 }
  0xf5   : > { %p9207_p13 = scmp.ne.s32.totalorder %s12280_s19, %s9206_s30  ;;  %p9213_p3 = scmp.lt.u32.totalorder %s9206_s30, %s12280_s19 }
  0xf7   : > { %p9209_p0 = pnand %p9207_p13, %p9851_p8 }
  0xf9   : > { %p9210_p1 = pneg %p9209_p0 }
  0xfb   : > { %p9215_p2 = pnand %p9213_p3, %p9210_p1 }
  0xfd   : > { %9218 = shalt.err (!%p9215_p2)
}
  0xfe   : > { %s9219_s1 = scalar_lea.vmem %s715_s22, 32  ;;  %p9227_p10 = scmp.lt.s32.totalorder %s715_s22, %s715_s22 }
  0xff   : > { %p9220_p5 = scmp.ne.s32.totalorder %s715_s22, %s9219_s1  ;;  %p9228_p11 = scmp.lt.s32.totalorder %s9219_s1, %s9219_s1 }
 0x101   : > { %p9222_p7 = pnand %p9220_p5, %p9851_p8  ;;  %p9229_p12 = por %p9228_p11, %p9227_p10 }
 0x103   : > { %p9223_p9 = pneg %p9222_p7 }
 0x105   : > { %p9230_p4 = pnand %p9229_p12, %p9223_p9 }
 0x107   : > { %9233 = shalt.err (!%p9230_p4)
}
 0x108   : > { %8547 = dma.hbm_to_vmem [thread:$0]  (!%p9837_p6), %s12280_s19, 32, %s715_s22, [#allocation30]  }
 0x109   : > { %s6856_s6 = sadd.s32 4294967294, %s9656_s27   ;;  %s10018_s18 = sadd.s32 1, %s9656_s27  }
 0x10a   : > { %12281 = sst [smem:[#allocation47_spill]] %s10018_s18  ;;  %s54_s0 = ssub.s32 %s9656_s27, %s10018_s18 }
 0x10b   : > { %s57_s28 = sadd.s32 1, %s9652_s26  ;;  %p55_p13 = scmp.eq.s32.totalorder %s54_s0, 0 }
 0x10c   : > { %p64_p0 = scmp.ne.s32.totalorder %s9652_s26, %s9648_s25  ;;  %p65_p1 = scmp.eq.s32.totalorder %s9656_s27, 0 }
 0x10d   : > { %p70_p3 = scmp.ne.s32.totalorder %s9648_s25, %s9644_s2  ;;  %p12283_p5 = scmp.eq.s32.totalorder %s9819_s29, 0 }
 0x10e   : > { %s10029_s30 = scalar_select %p55_p13, %s9652_s26, %s57_s28  }
 0x10f   : > { %p66_p2 = por %p65_p1, %p64_p0  ;;  %p10033_p7 = por %p12283_p5, %p70_p3 }
 0x110   : > { %12282 = sst [smem:[#allocation48_spill]] %s10029_s30  ;;  %p529_p9 = scmp.eq.s32.totalorder %s9819_s29, 1 }
 0x111   : > { %s12284_s22 = scalar_select %p10033_p7, 1, 0 }
 0x112   : > { %p535_p10 = scmp.eq.s32.totalorder %s6856_s6, 1  ;;  %p8583_p11 = scmp.lt.s32.totalorder %s9656_s27, 2 }
 0x113   : > { %s12227_s20 = sand.u32 1, %s9652_s26   ;;  %p10040_p12 = por %p529_p9, %p64_p0 }
 0x114   : > { %p10044_p4 = por %p535_p10, %p70_p3  ;;  %s10050_s1 = sshll.u32 %s12227_s20, 7 }
 0x115   : > { %s12285_s3 = scalar_select %p10040_p12, 1, 0 }
 0x116   : > { %s12287_s24 = scalar_select %p10044_p4, 1, 0 }
 0x117   : > { %12286 = sst [smem:[#allocation49_spill]] %s12285_s3  ;;  %s10053_s23 = sshll.u32 %s9656_s27, 11 }
 0x118   : > { %12288 = sst [smem:[#allocation50_spill]] %s12287_s24  ;;  %p10055_p13 = pnand %p8583_p11, %p66_p2 }
 0x119   : > { %s12231_s6 = sand.u32 1, %s9656_s27   ;;  %s12290_s9 = sld [smem:[#allocation52_spill]] }
 0x11a   : > { %s12289_s16 = scalar_select %p10055_p13, 1, 0 }
 0x11b   : > { %s763_s20 = scalar_lea.vmem [#allocation5], %s10050_s1  ;;  %s10071_s15 = scalar_lea.sflag [#allocation6], %s12231_s6 }
 0x11c   : > { %s770_s13 = sshll.u32 %s763_s20, 4  ;;  %p10077_p1 = pneg %p10055_p13  ;;  %s10067_s13 = int_to_ptr.vmem [resolvable:$true] %s770_s13 }
 0x11e   : > { %s12291_s19 = scalar_select %p10077_p1, 1, 0 }
 0x11f   : > { %s10064_s11 = scalar_lea.hbm %s12290_s9, %s10053_s23  ;;  %s9239_s20 = scalar_lea.hbm %s12290_s9, 4096 }
 0x120   : > { %s9234_s17 = scalar_lea.hbm %s10064_s11, 2048  ;;  %p9240_p5 = scmp.lt.u32.totalorder %s10064_s11, %s12290_s9 }
 0x121   : > { %p9235_p0 = scmp.ne.s32.totalorder %s10064_s11, %s9234_s17  ;;  %p9241_p9 = scmp.lt.u32.totalorder %s9239_s20, %s9234_s17 }
 0x122   : > { %p9243_p11 = scmp.lt.u32.totalorder %s9234_s17, %s10064_s11 }
 0x123   : > { %p9237_p3 = pnand %p10077_p1, %p9235_p0  ;;  %p9242_p10 = por %p9241_p9, %p9240_p5 }
 0x125   : > { %p9238_p2 = pneg %p9237_p3  ;;  %p9244_p4 = por %p9243_p11, %p9242_p10 }
 0x127   : > { %p9245_p12 = pnand %p9244_p4, %p9238_p2 }
 0x129   : > { %9248 = shalt.err (!%p9245_p12)
}
 0x12a   : > { %s9249_s6 = scalar_lea.vmem %s10067_s13, 2048  ;;  %s9668_s0 = smov [#allocation5]  }
 0x12b   : > { %p9250_p0 = scmp.ne.s32.totalorder %s10067_s13, %s9249_s6  ;;  %s9254_s28 = sshll.u32 %s9668_s0, 4  ;;  %s9255_s28 = int_to_ptr.vmem [resolvable:$false] %s9254_s28 }
 0x12c   : > { %s9256_s18 = scalar_lea.vmem %s9255_s28, 4096  ;;  %p9257_p6 = scmp.lt.s32.totalorder %s10067_s13, %s9255_s28 }
 0x12d   : > { %p9252_p3 = pnand %p9250_p0, %p10077_p1  ;;  %p9258_p8 = scmp.lt.s32.totalorder %s9256_s18, %s9249_s6 }
 0x12f   : > { %p9253_p7 = pneg %p9252_p3  ;;  %p9259_p5 = por %p9258_p8, %p9257_p6 }
 0x131   : > { %p9260_p9 = pnand %p9259_p5, %p9253_p7 }
 0x133   : > { %9263 = shalt.err (!%p9260_p9)
}
 0x134   : > { %8557 = dma.hbm_to_vmem [thread:$0]  (!%p10055_p13), %s10064_s11, 2048, %s10067_s13, %s10071_s15, %s12279_s8, %s12279_s8, %s12278_s21  }
 0x135   : > { %s9669_s17 = smov [#allocation13]   ;;  %s9670_s20 = smov [#allocation16]  }
 0x136   : > { %s582_s30 = sshll.u32 %s9669_s17, 4  ;;  %s606_s0 = sshll.u32 %s9670_s20, 4  ;;  %s583_s30 = int_to_ptr.vmem [resolvable:$true] %s582_s30  ;;  %s607_s0 = int_to_ptr.vmem [resolvable:$true] %s606_s0 }
 0x137   : > { %s12292_s7 = sld [smem:[#allocation58_spill]]  ;;  %p12293_p8 = scmp.ne.s32.totalorder %s12271_s4, 0 }
 0x13d   : > { %s9264_s18 = scalar_lea.hbm %s12292_s7, 32 }
 0x13e   : > { %p9265_p6 = scmp.ne.s32.totalorder %s12292_s7, %s9264_s18  ;;  %p9271_p4 = scmp.lt.u32.totalorder %s9264_s18, %s12292_s7 }
 0x140   : > { %p9267_p7 = pnand %p9265_p6, %p12293_p8 }
 0x142   : > { %p9268_p12 = pneg %p9267_p7 }
 0x144   : > { %p9273_p2 = pnand %p9271_p4, %p9268_p12 }
 0x146   : > { %9276 = shalt.err (!%p9273_p2)
}
 0x147   : > { %s9277_s11 = scalar_lea.vmem %s583_s30, 32  ;;  %p9285_p3 = scmp.lt.s32.totalorder %s583_s30, %s583_s30 }
 0x148   : > { %p9278_p10 = scmp.ne.s32.totalorder %s583_s30, %s9277_s11  ;;  %p9286_p5 = scmp.lt.s32.totalorder %s9277_s11, %s9277_s11 }
 0x14a   : > { %p9280_p11 = pnand %p9278_p10, %p12293_p8  ;;  %p9287_p9 = por %p9286_p5, %p9285_p3 }
 0x14c   : > { %p9281_p0 = pneg %p9280_p11 }
 0x14e   : > { %p9288_p13 = pnand %p9287_p9, %p9281_p0 }
 0x150   : > { %9291 = shalt.err (!%p9288_p13)
}
 0x151   : > { %p12294_p6 = scmp.ne.s32.totalorder %s12269_s5, 0  ;;  %s9292_s24 = scalar_lea.hbm %s12196_s10, 2048 }
 0x152   : > { %p9293_p7 = scmp.ne.s32.totalorder %s12196_s10, %s9292_s24  ;;  %p9299_p13 = scmp.lt.u32.totalorder %s9292_s24, %s12196_s10 }
 0x153   : > { %8514 = dma.hbm_to_vmem [thread:$0]  (!%p12294_p6), %s12292_s7, 32, %s583_s30, [#allocation12]  }
 0x154   : > { %p9295_p12 = pnand %p9293_p7, %p12293_p8 }
 0x156   : > { %p9296_p4 = pneg %p9295_p12 }
 0x158   : > { %p9301_p2 = pnand %p9299_p13, %p9296_p4 }
 0x15a   : > { %9304 = shalt.err (!%p9301_p2)
}
 0x15b   : > { %s9305_s18 = scalar_lea.vmem %s607_s0, 2048  ;;  %p9313_p3 = scmp.lt.s32.totalorder %s607_s0, %s607_s0 }
 0x15c   : > { %p9306_p10 = scmp.ne.s32.totalorder %s607_s0, %s9305_s18  ;;  %p9314_p5 = scmp.lt.s32.totalorder %s9305_s18, %s9305_s18 }
 0x15e   : > { %p9308_p11 = pnand %p9306_p10, %p12293_p8  ;;  %p9315_p9 = por %p9314_p5, %p9313_p3 }
 0x160   : > { %p9309_p0 = pneg %p9308_p11 }
 0x162   : > { %p9316_p1 = pnand %p9315_p9, %p9309_p0 }
 0x164   : > { %9319 = shalt.err (!%p9316_p1)
}
 0x165   : > { %8520 = dma.hbm_to_vmem [thread:$0]  (!%p12294_p6), %s12196_s10, 2048, %s607_s0, [#allocation15], %s12279_s8, %s12279_s8, %s12278_s21  }
 0x166   : > { %s9671_s9 = smov [#allocation19]   ;;  %s9320_s24 = scalar_lea.hbm %s12198_s12, 32768 }
 0x167   : > { %s630_s13 = sshll.u32 %s9671_s9, 4  ;;  %p9321_p1 = scmp.ne.s32.totalorder %s12198_s12, %s9320_s24  ;;  %s631_s13 = int_to_ptr.vmem [resolvable:$true] %s630_s13 }
 0x168   : > { %p9327_p4 = scmp.lt.u32.totalorder %s9320_s24, %s12198_s12 }
 0x169   : > { %p9323_p7 = pnand %p9321_p1, %p12293_p8 }
 0x16b   : > { %p9324_p12 = pneg %p9323_p7 }
 0x16d   : > { %p9329_p13 = pnand %p9327_p4, %p9324_p12 }
 0x16f   : > { %9332 = shalt.err (!%p9329_p13)
}
 0x170   : > { %s9333_s0 = scalar_lea.vmem %s631_s13, 32768  ;;  %p9341_p0 = scmp.lt.s32.totalorder %s631_s13, %s631_s13 }
 0x171   : > { %p9334_p2 = scmp.ne.s32.totalorder %s631_s13, %s9333_s0  ;;  %p9342_p3 = scmp.lt.s32.totalorder %s9333_s0, %s9333_s0 }
 0x173   : > { %p9336_p10 = pnand %p9334_p2, %p12293_p8  ;;  %p9343_p5 = por %p9342_p3, %p9341_p0 }
 0x175   : > { %p9337_p11 = pneg %p9336_p10 }
 0x177   : > { %p9344_p9 = pnand %p9343_p5, %p9337_p11 }
 0x179   : > { %9347 = shalt.err (!%p9344_p9)
}
 0x17a   : > { %s9672_s18 = smov 1024   ;;  %s9673_s30 = smov 64  }
 0x17b   : > { %8526 = dma.hbm_to_vmem [thread:$0]  (!%p12294_p6), %s12198_s12, 32768, %s631_s13, [#allocation18], %s9672_s18, %s9672_s18, %s9673_s30  }
 0x17c   : > { %s9674_s2 = smov [#allocation22]   ;;  %s9675_s24 = smov [#allocation25]  }
 0x17d   : > { %s654_s3 = sshll.u32 %s9674_s2, 4  ;;  %s679_s17 = sshll.u32 %s9675_s24, 4  ;;  %s655_s3 = int_to_ptr.vmem [resolvable:$true] %s654_s3  ;;  %s10161_s17 = int_to_ptr.vmem [resolvable:$true] %s679_s17 }
 0x17e   : > { %s9348_s6 = scalar_lea.hbm %s12200_s14, 8192 }
 0x17f   : > { %p9349_p1 = scmp.ne.s32.totalorder %s12200_s14, %s9348_s6  ;;  %p9355_p4 = scmp.lt.u32.totalorder %s9348_s6, %s12200_s14 }
 0x181   : > { %p9351_p7 = pnand %p9349_p1, %p12293_p8 }
 0x183   : > { %p9352_p12 = pneg %p9351_p7 }
 0x185   : > { %p9357_p13 = pnand %p9355_p4, %p9352_p12 }
 0x187   : > { %9360 = shalt.err (!%p9357_p13)
}
 0x188   : > { %s9361_s18 = scalar_lea.vmem %s655_s3, 8192  ;;  %p9369_p0 = scmp.lt.s32.totalorder %s655_s3, %s655_s3 }
 0x189   : > { %p9362_p2 = scmp.ne.s32.totalorder %s655_s3, %s9361_s18  ;;  %p9370_p3 = scmp.lt.s32.totalorder %s9361_s18, %s9361_s18 }
 0x18b   : > { %p9364_p10 = pnand %p9362_p2, %p12293_p8  ;;  %p9371_p5 = por %p9370_p3, %p9369_p0 }
 0x18d   : > { %p9365_p11 = pneg %p9364_p10 }
 0x18f   : > { %p9372_p9 = pnand %p9371_p5, %p9365_p11 }
 0x191   : > { %9375 = shalt.err (!%p9372_p9)
}
 0x192   : > { %8532 = dma.hbm_to_vmem [thread:$0]  (!%p12294_p6), %s12200_s14, 8192, %s655_s3, [#allocation21], %s12279_s8, %s12279_s8, %s12278_s21  }
 0x193   : > { %s12295_s24 = sld [smem:[#allocation64_spill]] }
 0x199   : > { %s9376_s20 = scalar_lea.hbm %s12295_s24, 32 }
 0x19a   : > { %p9377_p1 = scmp.ne.s32.totalorder %s12295_s24, %s9376_s20  ;;  %p9383_p4 = scmp.lt.u32.totalorder %s9376_s20, %s12295_s24 }
 0x19c   : > { %p9379_p7 = pnand %p9377_p1, %p12293_p8 }
 0x19e   : > { %p9380_p12 = pneg %p9379_p7 }
 0x1a0   : > { %p9385_p13 = pnand %p9383_p4, %p9380_p12 }
 0x1a2   : > { %9388 = shalt.err (!%p9385_p13)
}
 0x1a3   : > { %s9389_s3 = scalar_lea.vmem %s10161_s17, 32  ;;  %p9397_p0 = scmp.lt.s32.totalorder %s10161_s17, %s10161_s17 }
 0x1a4   : > { %p9390_p2 = scmp.ne.s32.totalorder %s10161_s17, %s9389_s3  ;;  %p9398_p3 = scmp.lt.s32.totalorder %s9389_s3, %s9389_s3 }
 0x1a6   : > { %p9392_p10 = pnand %p9390_p2, %p12293_p8  ;;  %p9399_p5 = por %p9398_p3, %p9397_p0 }
 0x1a8   : > { %p9393_p11 = pneg %p9392_p10 }
 0x1aa   : > { %p9400_p9 = pnand %p9399_p5, %p9393_p11 }
 0x1ac   : > { %9403 = shalt.err (!%p9400_p9)
}
 0x1ad   : > { %8538 = dma.hbm_to_vmem [thread:$0]  (!%p12294_p6), %s12295_s24, 32, %s10161_s17, [#allocation24]  }
 0x1ae   : > { %s9676_s7 = smov [#allocation28]   ;;  %s9677_s9 = smov [#allocation31]  }
 0x1af   : > { %s703_s30 = sshll.u32 %s9676_s7, 4  ;;  %s724_s2 = sshll.u32 %s9677_s9, 4  ;;  %s704_s30 = int_to_ptr.vmem [resolvable:$true] %s703_s30  ;;  %s10207_s2 = int_to_ptr.vmem [resolvable:$true] %s724_s2 }
 0x1b0   : > { %s12296_s6 = sld [smem:[#allocation66_spill]] }
 0x1b6   : > { %s9404_s0 = scalar_lea.hbm %s12296_s6, 32 }
 0x1b7   : > { %p9405_p1 = scmp.ne.s32.totalorder %s12296_s6, %s9404_s0  ;;  %p9411_p4 = scmp.lt.u32.totalorder %s9404_s0, %s12296_s6 }
 0x1b9   : > { %p9407_p7 = pnand %p9405_p1, %p12293_p8 }
 0x1bb   : > { %p9408_p12 = pneg %p9407_p7 }
 0x1bd   : > { %p9413_p13 = pnand %p9411_p4, %p9408_p12 }
 0x1bf   : > { %9416 = shalt.err (!%p9413_p13)
}
 0x1c0   : > { %s9417_s18 = scalar_lea.vmem %s704_s30, 32  ;;  %p9425_p0 = scmp.lt.s32.totalorder %s704_s30, %s704_s30 }
 0x1c1   : > { %p9418_p2 = scmp.ne.s32.totalorder %s704_s30, %s9417_s18  ;;  %p9426_p3 = scmp.lt.s32.totalorder %s9417_s18, %s9417_s18 }
 0x1c3   : > { %p9420_p10 = pnand %p9418_p2, %p12293_p8  ;;  %p9427_p5 = por %p9426_p3, %p9425_p0 }
 0x1c5   : > { %p9421_p11 = pneg %p9420_p10 }
 0x1c7   : > { %p9428_p9 = pnand %p9427_p5, %p9421_p11 }
 0x1c9   : > { %9431 = shalt.err (!%p9428_p9)
}
 0x1ca   : > { %8544 = dma.hbm_to_vmem [thread:$0]  (!%p12294_p6), %s12296_s6, 32, %s704_s30, [#allocation27]  }
 0x1cb   : > { %s12297_s0 = sld [smem:[#allocation68_spill]] }
 0x1d1   : > { %s9432_s11 = scalar_lea.hbm %s12297_s0, 9216 }
 0x1d2   : > { %p9433_p1 = scmp.ne.s32.totalorder %s12297_s0, %s9432_s11  ;;  %p9439_p4 = scmp.lt.u32.totalorder %s9432_s11, %s12297_s0 }
 0x1d4   : > { %p9435_p7 = pnand %p9433_p1, %p12293_p8 }
 0x1d6   : > { %p9436_p12 = pneg %p9435_p7 }
 0x1d8   : > { %p9441_p13 = pnand %p9439_p4, %p9436_p12 }
 0x1da   : > { %9444 = shalt.err (!%p9441_p13)
}
 0x1db   : > { %s9445_s30 = scalar_lea.vmem %s10207_s2, 9216  ;;  %p9453_p0 = scmp.lt.s32.totalorder %s10207_s2, %s10207_s2 }
 0x1dc   : > { %p9446_p2 = scmp.ne.s32.totalorder %s10207_s2, %s9445_s30  ;;  %p9454_p3 = scmp.lt.s32.totalorder %s9445_s30, %s9445_s30 }
 0x1de   : > { %p9448_p10 = pnand %p9446_p2, %p12293_p8  ;;  %p9455_p5 = por %p9454_p3, %p9453_p0 }
 0x1e0   : > { %p9449_p11 = pneg %p9448_p10 }
 0x1e2   : > { %p9456_p9 = pnand %p9455_p5, %p9449_p11 }
 0x1e4   : > { %9459 = shalt.err (!%p9456_p9)
}
 0x1e5   : > { %s9678_s7 = smov 128   ;;  %s9679_s9 = smov 8  }
 0x1e6   : > { %8550 = dma.hbm_to_vmem [thread:$0]  (!%p12294_p6), %s12297_s0, 9216, %s10207_s2, [#allocation30], %s9678_s7, %s9678_s7, %s9679_s9  }
 0x1e7   : > { %s12298_s3 = sld [smem:[#allocation51_spill]]  ;;  %s742_s17 = scalar_lea.vmem [#allocation2], %s10050_s1 }
 0x1e8   : > { %s749_s18 = sshll.u32 %s742_s17, 4  ;;  %s12299_s30 = sand.u32 1, %s9652_s26   ;;  %s10257_s18 = int_to_ptr.vmem [resolvable:$true] %s749_s18 }
 0x1e9   : > { %s10261_s6 = scalar_lea.sflag [#allocation3], %s12299_s30  ;;  %p12300_p1 = scmp.ne.s32.totalorder %s12291_s19, 0 }
 0x1ed   : > { %s10254_s13 = scalar_lea.hbm %s12298_s3, %s10053_s23  ;;  %s9465_s9 = scalar_lea.hbm %s12298_s3, 4096 }
 0x1ee   : > { %s9460_s5 = scalar_lea.hbm %s10254_s13, 2048  ;;  %p9466_p12 = scmp.lt.u32.totalorder %s10254_s13, %s12298_s3 }
 0x1ef   : > { %p9461_p8 = scmp.ne.s32.totalorder %s10254_s13, %s9460_s5  ;;  %p9467_p4 = scmp.lt.u32.totalorder %s9465_s9, %s9460_s5 }
 0x1f0   : > { %p9469_p2 = scmp.lt.u32.totalorder %s9460_s5, %s10254_s13 }
 0x1f1   : > { %p9463_p6 = pnand %p9461_p8, %p12300_p1  ;;  %p9468_p13 = por %p9467_p4, %p9466_p12 }
 0x1f3   : > { %p9464_p7 = pneg %p9463_p6  ;;  %p9470_p10 = por %p9469_p2, %p9468_p13 }
 0x1f5   : > { %p9471_p11 = pnand %p9470_p10, %p9464_p7 }
 0x1f7   : > { %9474 = shalt.err (!%p9471_p11)
}
 0x1f8   : > { %s9475_s4 = scalar_lea.vmem %s10257_s18, 2048  ;;  %s9680_s11 = smov [#allocation2]  }
 0x1f9   : > { %p9476_p0 = scmp.ne.s32.totalorder %s10257_s18, %s9475_s4  ;;  %s9480_s17 = sshll.u32 %s9680_s11, 4  ;;  %s9481_s17 = int_to_ptr.vmem [resolvable:$false] %s9480_s17 }
 0x1fa   : > { %s9482_s30 = scalar_lea.vmem %s9481_s17, 4096  ;;  %p9483_p9 = scmp.lt.s32.totalorder %s10257_s18, %s9481_s17 }
 0x1fb   : > { %p9478_p3 = pnand %p9476_p0, %p12300_p1  ;;  %p9484_p8 = scmp.lt.s32.totalorder %s9482_s30, %s9475_s4 }
 0x1fd   : > { %p9479_p5 = pneg %p9478_p3  ;;  %p9485_p6 = por %p9484_p8, %p9483_p9 }
 0x1ff   : > { %p9486_p12 = pnand %p9485_p6, %p9479_p5 }
 0x201   : > { %9489 = shalt.err (!%p9486_p12)
}
 0x202   : > { %p12301_p7 = scmp.ne.s32.totalorder %s12289_s16, 0  ;;  %s12302_s7 = sld [smem:[#allocation53_spill]] }
 0x203   : > { %s784_s20 = scalar_lea.vmem [#allocation7], %s10050_s1 }
 0x204   : > { %8554 = dma.hbm_to_vmem [thread:$0]  (!%p12301_p7), %s10254_s13, 2048, %s10257_s18, %s10261_s6, %s12279_s8, %s12279_s8, %s12278_s21  }
 0x205   : > { %s791_s28 = sshll.u32 %s784_s20, 4  ;;  %s10295_s28 = int_to_ptr.vmem [resolvable:$true] %s791_s28 }
 0x208   : > { %s10292_s9 = scalar_lea.hbm %s12302_s7, %s10053_s23  ;;  %s9495_s13 = scalar_lea.hbm %s12302_s7, 4096 }
 0x209   : > { %s9490_s4 = scalar_lea.hbm %s10292_s9, 2048  ;;  %p9496_p10 = scmp.lt.u32.totalorder %s10292_s9, %s12302_s7 }
 0x20a   : > { %p9491_p4 = scmp.ne.s32.totalorder %s10292_s9, %s9490_s4  ;;  %p9497_p11 = scmp.lt.u32.totalorder %s9495_s13, %s9490_s4 }
 0x20b   : > { %p9499_p3 = scmp.lt.u32.totalorder %s9490_s4, %s10292_s9 }
 0x20c   : > { %p9493_p13 = pnand %p9491_p4, %p12300_p1  ;;  %p9498_p0 = por %p9497_p11, %p9496_p10 }
 0x20e   : > { %p9494_p2 = pneg %p9493_p13  ;;  %p9500_p5 = por %p9499_p3, %p9498_p0 }
 0x210   : > { %p9501_p9 = pnand %p9500_p5, %p9494_p2 }
 0x212   : > { %9504 = shalt.err (!%p9501_p9)
}
 0x213   : > { %s9505_s30 = scalar_lea.vmem %s10295_s28, 2048  ;;  %s9681_s5 = smov [#allocation7]  }
 0x214   : > { %p9506_p8 = scmp.ne.s32.totalorder %s10295_s28, %s9505_s30  ;;  %s9510_s2 = sshll.u32 %s9681_s5, 4  ;;  %s9511_s2 = int_to_ptr.vmem [resolvable:$false] %s9510_s2 }
 0x215   : > { %s9512_s20 = scalar_lea.vmem %s9511_s2, 4096  ;;  %p9513_p4 = scmp.lt.s32.totalorder %s10295_s28, %s9511_s2 }
 0x216   : > { %p9508_p6 = pnand %p9506_p8, %p12300_p1  ;;  %p9514_p13 = scmp.lt.s32.totalorder %s9512_s20, %s9505_s30 }
 0x218   : > { %p9509_p12 = pneg %p9508_p6  ;;  %p9515_p10 = por %p9514_p13, %p9513_p4 }
 0x21a   : > { %p9516_p11 = pnand %p9515_p10, %p9509_p12 }
 0x21c   : > { %9519 = shalt.err (!%p9516_p11)
}
 0x21d   : > { %8560 = dma.hbm_to_vmem [thread:$0]  (!%p12301_p7), %s10292_s9, 2048, %s10295_s28, %s10071_s15, %s12279_s8, %s12279_s8, %s12278_s21  }
 0x21e   : > { %s12303_s6 = sld [smem:[#allocation54_spill]]  ;;  %s805_s18 = scalar_lea.vmem [#allocation8], %s10050_s1 }
 0x21f   : > { %s812_s17 = sshll.u32 %s805_s18, 4  ;;  %s12304_s30 = sand.u32 1, %s9656_s27   ;;  %s10329_s17 = int_to_ptr.vmem [resolvable:$true] %s812_s17 }
 0x220   : > { %s10333_s5 = scalar_lea.sflag [#allocation9], %s12304_s30 }
 0x224   : > { %s10326_s13 = scalar_lea.hbm %s12303_s6, %s10053_s23  ;;  %s9525_s23 = scalar_lea.hbm %s12303_s6, 4096 }
 0x225   : > { %s9520_s2 = scalar_lea.hbm %s10326_s13, 2048  ;;  %p9526_p5 = scmp.lt.u32.totalorder %s10326_s13, %s12303_s6 }
 0x226   : > { %p9521_p2 = scmp.ne.s32.totalorder %s10326_s13, %s9520_s2  ;;  %p9527_p9 = scmp.lt.u32.totalorder %s9525_s23, %s9520_s2 }
 0x227   : > { %p9529_p6 = scmp.lt.u32.totalorder %s9520_s2, %s10326_s13 }
 0x228   : > { %p9523_p0 = pnand %p9521_p2, %p12300_p1  ;;  %p9528_p8 = por %p9527_p9, %p9526_p5 }
 0x22a   : > { %p9524_p3 = pneg %p9523_p0  ;;  %p9530_p12 = por %p9529_p6, %p9528_p8 }
 0x22c   : > { %p9531_p4 = pnand %p9530_p12, %p9524_p3 }
 0x22e   : > { %9534 = shalt.err (!%p9531_p4)
}
 0x22f   : > { %s9535_s1 = scalar_lea.vmem %s10329_s17, 2048  ;;  %s9682_s4 = smov [#allocation8]  }
 0x230   : > { %p9536_p13 = scmp.ne.s32.totalorder %s10329_s17, %s9535_s1  ;;  %s9540_s11 = sshll.u32 %s9682_s4, 4  ;;  %s9541_s11 = int_to_ptr.vmem [resolvable:$false] %s9540_s11 }
 0x231   : > { %s9542_s18 = scalar_lea.vmem %s9541_s11, 4096  ;;  %p9543_p2 = scmp.lt.s32.totalorder %s10329_s17, %s9541_s11 }
 0x232   : > { %p9538_p10 = pnand %p9536_p13, %p12300_p1  ;;  %p9544_p0 = scmp.lt.s32.totalorder %s9542_s18, %s9535_s1 }
 0x234   : > { %p9539_p11 = pneg %p9538_p10  ;;  %p9545_p5 = por %p9544_p0, %p9543_p2 }
 0x236   : > { %p9546_p9 = pnand %p9545_p5, %p9539_p11 }
 0x238   : > { %9549 = shalt.err (!%p9546_p9)
}
 0x239   : > { %8563 = dma.hbm_to_vmem [thread:$0]  (!%p12301_p7), %s10326_s13, 2048, %s10329_s17, %s10333_s5, %s12279_s8, %s12279_s8, %s12278_s21  }
 0x23a   : > { %s12305_s19 = sld [smem:[#allocation46_spill]] }
 0x240   : > { %p12306_p1 = scmp.ne.s32.totalorder %s12305_s19, 0 }
 0x241   : > { %s10363_s30 = sand.u32 (!%p12306_p1), 1, %s9648_s25   ;;  %p12307_p3 = scmp.ne.s32.totalorder (!%p12306_p1), %s12284_s22, 0 }
 0x242   : > { %824 = sbr.rel (%p12306_p1) target bundleno = 3895 (0xf37), region = 104  ;;  %s10366_s2 = sshll.u32 (!%p12306_p1), %s10363_s30, 7 }
 0x243   : > { %s827_s16 = scalar_lea.sflag (!%p12306_p1), [#allocation3], %s10363_s30  ;;  %s10370_s15 = scalar_lea.vmem (!%p12306_p1), [#allocation2], %s10366_s2 }
 0x249   : > { %9595 = dma.done.wait (%p12307_p3), %s827_s16, 2048  }
 0x24a   : > { %9597 = vsyncadd (%p12307_p3), %s827_s16, 4294965248  ;;  %s835_s21 = sand.u32 1, %s9819_s29   ;;  %s10378_s13 = scalar_lea.vmem [#allocation5], %s10366_s2 }
 0x24b   : > { %s836_s8 = scalar_lea.sflag [#allocation6], %s835_s21 }
 0x24c   : > { %9599 = dma.done.wait (%p12307_p3), %s836_s8, 4096  }
 0x24d   : > { %9601 = vsyncadd (%p12307_p3), %s836_s8, 4294963200  ;;  %s10385_s17 = scalar_lea.vmem [#allocation7], %s10366_s2  ;;  %s854_s5 = scalar_lea.sflag [#allocation9], %s835_s21 }
 0x24e   : > { %s10388_s9 = scalar_lea.vmem [#allocation8], %s10366_s2 }
 0x24f   : > { %9603 = dma.done.wait (%p12307_p3), %s854_s5, 2048  }
 0x250   : > { %9605 = vsyncadd (%p12307_p3), %s854_s5, 4294965248  ;;  %p12308_p7 = scmp.eq.s32.totalorder %s9819_s29, 0 }
 0x252   : > { %9607 = dma.done.wait (%p12308_p7), [#allocation9], 16   ;;  %p12309_p8 = pmov %p12308_p7 }
 0x253   : > { %p12310_p6 = pmov %p12308_p7 }
 0x254   : > { %9609 = vsyncadd (%p12309_p8), [#allocation9], 4294967280 }
 0x255   : > { %9611 = dma.done.wait (%p12310_p6), [#allocation12], 2080   ;;  %p12311_p12 = pmov %p12310_p6 }
 0x256   : > { %p12312_p4 = pmov %p12310_p6 }
 0x257   : > { %9613 = vsyncadd (%p12311_p12), [#allocation12], 4294965216 }
 0x258   : > { %9615 = dma.done.wait (%p12312_p4), [#allocation15], 2064   ;;  %p12313_p13 = pmov %p12312_p4 }
 0x259   : > { %p12314_p10 = pmov %p12312_p4 }
 0x25a   : > { %9617 = vsyncadd (%p12313_p13), [#allocation15], 4294965232 }
 0x25b   : > { %9619 = dma.done.wait (%p12314_p10), [#allocation18], 32800   ;;  %p12315_p11 = pmov %p12312_p4 }
 0x25c   : > { %p12316_p2 = pmov %p12312_p4 }
 0x25d   : > { %9621 = vsyncadd (%p12315_p11), [#allocation18], 4294934496 }
 0x25e   : > { %9623 = dma.done.wait (%p12316_p2), [#allocation21], 8320   ;;  %p12317_p0 = pmov %p12316_p2 }
 0x260   : > { %9625 = vsyncadd (%p12317_p0), [#allocation21], 4294958976  ;;  %p12318_p5 = pmov %p12317_p0 }
 0x261   : > { %p12319_p9 = pmov %p12317_p0 }
 0x262   : > { %9627 = dma.done.wait (%p12318_p5), [#allocation24], 64  }
 0x263   : > { %9629 = vsyncadd (%p12319_p9), [#allocation24], 4294967232  ;;  %p12320_p1 = pmov %p12317_p0 }
 0x264   : > { %p12321_p3 = pmov %p12317_p0 }
 0x265   : > { %9631 = dma.done.wait (%p12320_p1), [#allocation27], 73760  }
 0x266   : > { %9633 = vsyncadd (%p12321_p3), [#allocation27], 4294893536  ;;  %p12322_p7 = pmov %p12317_p0 }
 0x267   : > { %p12323_p8 = pmov %p12317_p0 }
 0x268   : > { %9635 = dma.done.wait (%p12322_p7), [#allocation30], 9248  }
 0x269   : > { %9637 = vsyncadd (%p12323_p8), [#allocation30], 4294958048  ;;  %s12324_s28 = sld [smem:[#allocation55_spill]]  ;;  %v992_v27 = vld [vmem:[%s10370_s15 + $0x8] sm:$0xff]  ;;  %v994_v28 = vld [vmem:[%s10370_s15 + $0x18] sm:$0xff]  ;;  %vm1283_vm0 = vcmask 523264  }
 0x26a   : > { %v1008_v29 = vld [vmem:[%s10378_s13 + $0x8] sm:$0xff]  ;;  %v1010_v30 = vld [vmem:[%s10378_s13 + $0x18] sm:$0xff]  ;;  %v991_v40 = vld [vmem:[%s10370_s15] sm:$0xff]  ;;  %s12325_s18 = sld [smem:[#allocation59_spill]]  ;;  %s12327_s1 = sld [smem:[#allocation69_spill]] }
 0x26b   : > { %v1024_v33 = vld [vmem:[%s10385_s17 + $0x8] sm:$0xff]  ;;  %v1026_v34 = vld [vmem:[%s10385_s17 + $0x18] sm:$0xff]  ;;  %v1056_v36 = vadd.f32 %v1008_v29, %v992_v27  ;;  %v1058_v37 = vadd.f32 %v1010_v30, %v994_v28  ;;  %v1007_v41 = vld [vmem:[%s10378_s13] sm:$0xff]  ;;  %s9685_s19 = smov [#allocation32]  }
 0x26c   : > { %v1040_v35 = vld [vmem:[%s10388_s9 + $0x8] sm:$0xff]  ;;  %v1042_v39 = vld [vmem:[%s10388_s9 + $0x18] sm:$0xff]  ;;  %v1023_v45 = vld [vmem:[%s10385_s17] sm:$0xff]  ;;  %v1055_v46 = vadd.f32 %v1007_v41, %v991_v40  ;;  %s9554_s16 = sshll.u32 %s9685_s19, 4  ;;  %s9555_s16 = int_to_ptr.vmem [resolvable:$false] %s9554_s16 }
 0x26d   : > { %v1072_v43 = vadd.f32 %v1056_v36, %v1024_v33  ;;  %v1074_v44 = vadd.f32 %v1058_v37, %v1026_v34  ;;  %v993_v47 = vld [vmem:[%s10370_s15 + $0x10] sm:$0xff]  ;;  %v1039_v55 = vld [vmem:[%s10388_s9] sm:$0xff]  ;;  %v1012_v27 = vld [vmem:[%s10378_s13 + $0x28] sm:$0xff]  ;;  %s9556_s21 = scalar_lea.vmem %s9555_s16, 4096 }
 0x26e   : > { %v1009_v49 = vld [vmem:[%s10378_s13 + $0x10] sm:$0xff]  ;;  %v1071_v56 = vadd.f32 %v1055_v46, %v1023_v45  ;;  %v995_v60 = vld [vmem:[%s10370_s15 + $0x20] sm:$0xff]  ;;  %v998_v40 = vld [vmem:[%s10370_s15 + $0x38] sm:$0xff] }
 0x26f   : > { %v1119_v0 = vld [vmem:[%s12324_s28 + $0x80] sm:$0xff]  ;;  %v1120_v1 = vld [vmem:[%s12324_s28 + $0x88] sm:$0xff]  ;;  %v1121_v5 = vld [vmem:[%s12324_s28 + $0x90] sm:$0xff]  ;;  %v10512_v53 = vadd.f32 %v1072_v43, %v1040_v35  ;;  %v10514_v54 = vadd.f32 %v1074_v44, %v1042_v39  ;;  %v1057_v57 = vadd.f32 %v1009_v49, %v993_v47 }
 0x270   : > { %v1103_v2 = vld [vmem:[%s12324_s28] sm:$0xff]  ;;  %v7155_v3 = vpack.c.bf16 %v1120_v1, %v1119_v0  ;;  %v1104_v4 = vld [vmem:[%s12324_s28 + $0x8] sm:$0xff]  ;;  %v1122_v6 = vld [vmem:[%s12324_s28 + $0x98] sm:$0xff] }
 0x271   : > { %v7157_v7 = vpack.c.bf16 %v1104_v4, %v1103_v2  ;;  %v7159_v8 = vpack.c.bf16 %v1122_v6, %v1121_v5  ;;  %v1105_v9 = vld [vmem:[%s12324_s28 + $0x10] sm:$0xff]  ;;  %v1106_v10 = vld [vmem:[%s12324_s28 + $0x18] sm:$0xff]  ;;  %v1123_v11 = vld [vmem:[%s12324_s28 + $0xa0] sm:$0xff]  ;;  %1206 = vmatprep.mubr.f32.mxu1 %v10512_v53  ;;  %v7203_v0 = vpack.c.bf16 %v10514_v54, %v10512_v53  ;;  %v10533_v6 = vadd.f32 %v1071_v56, %v1039_v55 }
 0x272   : > { %7156 = vmatprep.subr.bf16.mxu1 %v7155_v3  ;;  %v1124_v12 = vld [vmem:[%s12324_s28 + $0xa8] sm:$0xff]  ;;  %v7161_v13 = vpack.c.bf16 %v1106_v10, %v1105_v9  ;;  %v1107_v15 = vld [vmem:[%s12324_s28 + $0x20] sm:$0xff]  ;;  %v1125_v17 = vld [vmem:[%s12324_s28 + $0xb0] sm:$0xff] }
 0x273   : > { %7158 = vmatpush3.bf16.msra.mxu1 %v7157_v7  ;;  %v7163_v14 = vpack.c.bf16 %v1124_v12, %v1123_v11  ;;  %v1108_v16 = vld [vmem:[%s12324_s28 + $0x28] sm:$0xff]  ;;  %v1126_v18 = vld [vmem:[%s12324_s28 + $0xb8] sm:$0xff]  ;;  %v1109_v20 = vld [vmem:[%s12324_s28 + $0x30] sm:$0xff] }
 0x274   : > { %7160 = vmatprep.subr.bf16.mxu1 %v7159_v8  ;;  %v7165_v19 = vpack.c.bf16 %v1108_v16, %v1107_v15  ;;  %v7167_v21 = vpack.c.bf16 %v1126_v18, %v1125_v17  ;;  %v1110_v22 = vld [vmem:[%s12324_s28 + $0x38] sm:$0xff]  ;;  %v1127_v23 = vld [vmem:[%s12324_s28 + $0xc0] sm:$0xff]  ;;  %v1128_v24 = vld [vmem:[%s12324_s28 + $0xc8] sm:$0xff] }
 0x275   : > { %v1111_v25 = vld [vmem:[%s12324_s28 + $0x40] sm:$0xff]  ;;  %v1112_v26 = vld [vmem:[%s12324_s28 + $0x48] sm:$0xff]  ;;  %v7169_v31 = vpack.c.bf16 %v1110_v22, %v1109_v20  ;;  %v1129_v32 = vld [vmem:[%s12324_s28 + $0xd0] sm:$0xff]  ;;  %v7171_v38 = vpack.c.bf16 %v1128_v24, %v1127_v23 }
 0x276   : > { %v1130_v42 = vld [vmem:[%s12324_s28 + $0xd8] sm:$0xff]  ;;  %v7173_v48 = vpack.c.bf16 %v1112_v26, %v1111_v25  ;;  %v1025_v50 = vld [vmem:[%s10385_s17 + $0x10] sm:$0xff]  ;;  %v1011_v61 = vld [vmem:[%s10378_s13 + $0x20] sm:$0xff] }
 0x277   : > { %7162 = vmatpush3.bf16.msra.mxu1 %v7161_v13  ;;  %v1113_v51 = vld [vmem:[%s12324_s28 + $0x50] sm:$0xff]  ;;  %v1114_v52 = vld [vmem:[%s12324_s28 + $0x58] sm:$0xff]  ;;  %v7175_v58 = vpack.c.bf16 %v1130_v42, %v1129_v32  ;;  %v1131_v62 = vld [vmem:[%s12324_s28 + $0xe0] sm:$0xff]  ;;  %v1073_v1 = vadd.f32 %v1057_v57, %v1025_v50  ;;  %v1059_v3 = vadd.f32 %v1011_v61, %v995_v60 }
 0x278   : > { %7164 = vmatprep.subr.bf16.mxu1 %v7163_v14  ;;  %v1041_v59 = vld [vmem:[%s10388_s9 + $0x10] sm:$0xff]  ;;  %v1132_v63 = vld [vmem:[%s12324_s28 + $0xe8] sm:$0xff]  ;;  %v1027_v2 = vld [vmem:[%s10385_s17 + $0x20] sm:$0xff]  ;;  %v7177_v5 = vpack.c.bf16 %v1114_v52, %v1113_v51 }
 0x279   : > { %v1115_v4 = vld [vmem:[%s12324_s28 + $0x60] sm:$0xff]  ;;  %v10535_v7 = vadd.f32 %v1073_v1, %v1041_v59  ;;  %v997_v8 = vld [vmem:[%s10370_s15 + $0x30] sm:$0xff]  ;;  %v7179_v11 = vpack.c.bf16 %v1132_v63, %v1131_v62  ;;  %v1116_v12 = vld [vmem:[%s12324_s28 + $0x68] sm:$0xff]  ;;  %v1075_v15 = vadd.f32 %v1059_v3, %v1027_v2 }
 0x27a   : > { %v1013_v9 = vld [vmem:[%s10378_s13 + $0x30] sm:$0xff]  ;;  %v1134_v14 = vld [vmem:[%s12324_s28 + $0xf8] sm:$0xff]  ;;  %v1043_v18 = vld [vmem:[%s10388_s9 + $0x20] sm:$0xff]  ;;  %v7181_v24 = vpack.c.bf16 %v1116_v12, %v1115_v4 }
 0x27b   : > { %7166 = vmatpush3.bf16.msra.mxu1 %v7165_v19  ;;  %v1029_v10 = vld [vmem:[%s10385_s17 + $0x30] sm:$0xff]  ;;  %v1061_v16 = vadd.f32 %v1013_v9, %v997_v8  ;;  %v7205_v17 = vpack.c.bf16 %v10535_v7, %v10533_v6  ;;  %v999_v20 = vld [vmem:[%s10370_s15 + $0x40] sm:$0xff]  ;;  %v996_v26 = vld [vmem:[%s10370_s15 + $0x28] sm:$0xff] }
 0x27c   : > { %7168 = vmatprep.subr.bf16.mxu1 %v7167_v21  ;;  %v1133_v13 = vld [vmem:[%s12324_s28 + $0xf0] sm:$0xff]  ;;  %v1015_v22 = vld [vmem:[%s10378_s13 + $0x40] sm:$0xff]  ;;  %v1118_v30 = vld [vmem:[%s12324_s28 + $0x78] sm:$0xff]  ;;  %v1060_v39 = vadd.f32 %v1012_v27, %v996_v26 }
 0x27d   : > { %v1045_v19 = vld [vmem:[%s10388_s9 + $0x30] sm:$0xff]  ;;  %v1077_v21 = vadd.f32 %v1061_v16, %v1029_v10  ;;  %v1031_v23 = vld [vmem:[%s10385_s17 + $0x40] sm:$0xff]  ;;  %v1063_v28 = vadd.f32 %v1015_v22, %v999_v20  ;;  %v7183_v29 = vpack.c.bf16 %v1134_v14, %v1133_v13  ;;  %v1028_v35 = vld [vmem:[%s10385_s17 + $0x28] sm:$0xff] }
 0x27e   : > { %v1117_v25 = vld [vmem:[%s12324_s28 + $0x70] sm:$0xff]  ;;  %v1047_v42 = vld [vmem:[%s10388_s9 + $0x40] sm:$0xff]  ;;  %v1014_v45 = vld [vmem:[%s10378_s13 + $0x38] sm:$0xff]  ;;  %v1076_v60 = vadd.f32 %v1060_v39, %v1028_v35 }
 0x27f   : > { %7170 = vmatpush3.bf16.msra.mxu1 %v7169_v31  ;;  %v10564_v31 = vadd.f32 %v1075_v15, %v1043_v18  ;;  %v10566_v32 = vadd.f32 %v1077_v21, %v1045_v19  ;;  %v1001_v33 = vld [vmem:[%s10370_s15 + $0x50] sm:$0xff]  ;;  %v1079_v36 = vadd.f32 %v1063_v28, %v1031_v23  ;;  %v7185_v44 = vpack.c.bf16 %v1118_v30, %v1117_v25  ;;  %v1003_v47 = vld [vmem:[%s10370_s15 + $0x60] sm:$0xff]  ;;  %v1044_v51 = vld [vmem:[%s10388_s9 + $0x28] sm:$0xff] }
 0x280   : > { %7172 = vmatprep.subr.bf16.mxu1 %v7171_v38  ;;  %v1017_v34 = vld [vmem:[%s10378_s13 + $0x50] sm:$0xff]  ;;  %v1035_v49 = vld [vmem:[%s10385_s17 + $0x60] sm:$0xff]  ;;  %v1030_v52 = vld [vmem:[%s10385_s17 + $0x38] sm:$0xff]  ;;  %v1062_v61 = vadd.f32 %v1014_v45, %v998_v40  ;;  %v10597_v22 = vadd.f32 %v1076_v60, %v1044_v51 }
 0x281   : > { %v1033_v37 = vld [vmem:[%s10385_s17 + $0x50] sm:$0xff]  ;;  %v1065_v38 = vadd.f32 %v1017_v34, %v1001_v33  ;;  %v7209_v41 = vpack.c.bf16 %v10566_v32, %v10564_v31  ;;  %v1000_v55 = vld [vmem:[%s10370_s15 + $0x48] sm:$0xff]  ;;  %v10585_v57 = vadd.f32 %v1079_v36, %v1047_v42  ;;  %v1051_v62 = vld [vmem:[%s10388_s9 + $0x60] sm:$0xff] }
 0x282   : > { %v1049_v43 = vld [vmem:[%s10388_s9 + $0x50] sm:$0xff]  ;;  %v1016_v56 = vld [vmem:[%s10378_s13 + $0x48] sm:$0xff]  ;;  %v1258_v9 = vld [vmem:[#allocation11 + $0x18] sm:$0xff]  ;;  %v1078_v23 = vadd.f32 %v1062_v61, %v1030_v52 }
 0x283   : > { %7174 = vmatpush3.bf16.msra.mxu1 %v7173_v48  ;;  %v1081_v46 = vadd.f32 %v1065_v38, %v1033_v37  ;;  %v1019_v48 = vld [vmem:[%s10378_s13 + $0x60] sm:$0xff]  ;;  %v1005_v59 = vld [vmem:[%s10370_s15 + $0x70] sm:$0xff]  ;;  %v1046_v26 = vld [vmem:[%s10388_s9 + $0x38] sm:$0xff] }
 0x284   : > { %7176 = vmatprep.subr.bf16.mxu1 %v7175_v58  ;;  %v1067_v50 = vadd.f32 %v1019_v48, %v1003_v47  ;;  %v1021_v63 = vld [vmem:[%s10378_s13 + $0x70] sm:$0xff]  ;;  %v1255_v10 = vld [vmem:[#allocation11] sm:$0xff]  ;;  %v1262_v14 = vld [vmem:[#allocation11 + $0x38] sm:$0xff]  ;;  %v10611_v39 = vadd.f32 %v1078_v23, %v1046_v26 }
 0x285   : > { %v10587_v58 = vadd.f32 %v1081_v46, %v1049_v43  ;;  %v1037_v1 = vld [vmem:[%s10385_s17 + $0x70] sm:$0xff]  ;;  %v1259_v19 = vld [vmem:[#allocation11 + $0x20] sm:$0xff]  ;;  %v1266_v25 = vld [vmem:[#allocation11 + $0x58] sm:$0xff] }
 0x286   : > { %v1053_v2 = vld [vmem:[%s10388_s9 + $0x70] sm:$0xff]  ;;  %v1083_v4 = vadd.f32 %v1067_v50, %v1035_v49  ;;  %v1032_v27 = vld [vmem:[%s10385_s17 + $0x48] sm:$0xff]  ;;  %v1002_v28 = vld [vmem:[%s10370_s15 + $0x58] sm:$0xff]  ;;  %v7207_v26 = vpack.c.bf16 %v10611_v39, %v10597_v22 }
 0x287   : > { %7178 = vmatpush3.bf16.msra.mxu1 %v7177_v5  ;;  %v7213_v3 = vpack.c.bf16 %v10587_v58, %v10585_v57  ;;  %v1069_v5 = vadd.f32 %v1021_v63, %v1005_v59  ;;  %v1256_v8 = vld [vmem:[#allocation11 + $0x8] sm:$0xff]  ;;  %v1257_v12 = vld [vmem:[#allocation11 + $0x10] sm:$0xff]  ;;  %v1263_v36 = vld [vmem:[#allocation11 + $0x40] sm:$0xff] }
 0x288   : > { %7180 = vmatprep.subr.bf16.mxu1 %v7179_v11  ;;  %v7187_v11 = vpack.c.bf16 %v1258_v9, %v1256_v8  ;;  %v1260_v13 = vld [vmem:[#allocation11 + $0x28] sm:$0xff]  ;;  %v7189_v16 = vpack.c.bf16 %v1257_v12, %v1255_v10  ;;  %v1261_v20 = vld [vmem:[#allocation11 + $0x30] sm:$0xff]  ;;  %v1270_v9 = vld [vmem:[#allocation11 + $0x78] sm:$0xff] }
 0x289   : > { %v1085_v15 = vadd.f32 %v1069_v5, %v1037_v1  ;;  %v7191_v18 = vpack.c.bf16 %v1262_v14, %v1260_v13  ;;  %v1264_v21 = vld [vmem:[#allocation11 + $0x48] sm:$0xff]  ;;  %v7193_v33 = vpack.c.bf16 %v1261_v20, %v1259_v19  ;;  %v1018_v34 = vld [vmem:[%s10378_s13 + $0x58] sm:$0xff]  ;;  %v9683_v14 = vmov 0.0  }
 0x28a   : > { %v7195_v35 = vpack.c.bf16 %v1266_v25, %v1264_v21  ;;  %v1265_v37 = vld [vmem:[#allocation11 + $0x50] sm:$0xff]  ;;  %v1048_v40 = vld [vmem:[%s10388_s9 + $0x48] sm:$0xff]  ;;  %v1066_v43 = vadd.f32 %v1018_v34, %v1002_v28 }
 0x28b   : > { %7182 = vmatpush3.bf16.msra.mxu1 %v7181_v24  ;;  %v1064_v24 = vadd.f32 %v1016_v56, %v1000_v55  ;;  %v10605_v30 = vadd.f32 %v1085_v15, %v1053_v2  ;;  %v1034_v45 = vld [vmem:[%s10385_s17 + $0x58] sm:$0xff]  ;;  %v1004_v46 = vld [vmem:[%s10370_s15 + $0x68] sm:$0xff] }
 0x28c   : > { %7184 = vmatprep.subr.bf16.mxu1 %v7183_v29  ;;  %v10603_v29 = vadd.f32 %v1083_v4, %v1051_v62  ;;  %v1020_v47 = vld [vmem:[%s10378_s13 + $0x68] sm:$0xff]  ;;  %v1050_v49 = vld [vmem:[%s10388_s9 + $0x58] sm:$0xff]  ;;  %v1082_v50 = vadd.f32 %v1066_v43, %v1034_v45 }
 0x28d   : > { %v1080_v42 = vadd.f32 %v1064_v24, %v1032_v27  ;;  %v1068_v51 = vadd.f32 %v1020_v47, %v1004_v46  ;;  %v1036_v52 = vld [vmem:[%s10385_s17 + $0x68] sm:$0xff]  ;;  %v1006_v55 = vld [vmem:[%s10370_s15 + $0x78] sm:$0xff] }
 0x28e   : > { %v7217_v38 = vpack.c.bf16 %v10605_v30, %v10603_v29  ;;  %v1022_v56 = vld [vmem:[%s10378_s13 + $0x78] sm:$0xff]  ;;  %v1098_v59 = vadd.f32 %v1082_v50, %v1050_v49  ;;  %v1052_v62 = vld [vmem:[%s10388_s9 + $0x68] sm:$0xff] }
 0x28f   : > { %7186 = vmatpush3.bf16.msra.mxu1 %v7185_v44  ;;  %v7197_v44 = vpack.c.bf16 %v1265_v37, %v1263_v36  ;;  %v10620_v48 = vadd.f32 %v1080_v42, %v1048_v40  ;;  %v1084_v60 = vadd.f32 %v1068_v51, %v1036_v52  ;;  %v1070_v61 = vadd.f32 %v1022_v56, %v1006_v55  ;;  %v1038_v63 = vld [vmem:[%s10385_s17 + $0x78] sm:$0xff]  ;;  %v1268_v8 = vld [vmem:[#allocation11 + $0x68] sm:$0xff]  ;;  %v1513_v52 = vld [vmem:[%s12325_s18 + $0x80] sm:$0xff] }
 0x290   : > { %7188 = vmatprep.subr.bf16.mxu1 %v7187_v11  ;;  %v1054_v4 = vld [vmem:[%s10388_s9 + $0x78] sm:$0xff]  ;;  %v7199_v10 = vpack.c.bf16 %v1270_v9, %v1268_v8  ;;  %v1267_v11 = vld [vmem:[#allocation11 + $0x60] sm:$0xff]  ;;  %v9684_v51 = vmov 1.0  }
 0x291   : > { %v1100_v1 = vadd.f32 %v1084_v60, %v1052_v62  ;;  %v1086_v2 = vadd.f32 %v1070_v61, %v1038_v63  ;;  %v1269_v12 = vld [vmem:[#allocation11 + $0x70] sm:$0xff]  ;;  %v1514_v55 = vld [vmem:[%s12325_s18 + $0x88] sm:$0xff]  ;;  %v1517_v8 = vld [vmem:[%s12325_s18 + $0xa0] sm:$0xff] }
 0x292   : > { %1207 = vmatmul.mubr.f32.vlgmr.msra.gmra.mrb[0].mxu1 %v10533_v6  ;;  %v7201_v13 = vpack.c.bf16 %v1269_v12, %v1267_v11  ;;  %v7219_v56 = vpack.c.bf16 %v1514_v55, %v1513_v52  ;;  %v1498_v60 = vld [vmem:[%s12325_s18 + $0x8] sm:$0xff]  ;;  %v1515_v62 = vld [vmem:[%s12325_s18 + $0x90] sm:$0xff]  ;;  %v1516_v63 = vld [vmem:[%s12325_s18 + $0x98] sm:$0xff] }
 0x293   : > { %1211 = vmatprep.mubr.f32.mxu1 %v10514_v54  ;;  %7190 = vmatpush1.bf16.msra.mxu1 %v7189_v16  ;;  %v1102_v5 = vadd.f32 %v1086_v2, %v1054_v4  ;;  %v6907_v16 = vld [vmem:[#allocation10] ss:$0 sm:$0xff]  ;;  %v1499_v2 = vld [vmem:[%s12325_s18 + $0x10] sm:$0xff]  ;;  %v1500_v4 = vld [vmem:[%s12325_s18 + $0x18] sm:$0xff] }
 0x294   : > { %7192 = vmatprep.subr.bf16.mxu1 %v7191_v18  ;;  %7220 = vmatprep.subr.bf16.mxu0 %v7219_v56  ;;  %v1518_v9 = vld [vmem:[%s12325_s18 + $0xa8] sm:$0xff]  ;;  %v1501_v11 = vld [vmem:[%s12325_s18 + $0x20] sm:$0xff] }
 0x295   : > { %v7215_v6 = vpack.c.bf16 %v1102_v5, %v1100_v1  ;;  %v1502_v12 = vld [vmem:[%s12325_s18 + $0x28] sm:$0xff] }
 0x296   : > { %1212 = vmatmul.mubr.f32.gmra.mrb[2].mxu1 %v10535_v7 }
 0x297   : > { %1216 = vmatprep.mubr.f32.mxu1 %v10597_v22  ;;  %7194 = vmatpush1.bf16.msra.mxu1 %v7193_v33  ;;  %v7211_v33 = vpack.c.bf16 %v1098_v59, %v10620_v48 }
 0x298   : > { %7196 = vmatprep.subr.bf16.mxu1 %v7195_v35 }
 0x29a   : > { %1217 = vmatmul.mubr.f32.gmra.mrb[4].mxu1 %v10564_v31 }
 0x29b   : > { %1221 = vmatprep.mubr.f32.mxu1 %v10611_v39  ;;  %7198 = vmatpush1.bf16.msra.mxu1 %v7197_v44 }
 0x29c   : > { %7200 = vmatprep.subr.bf16.mxu1 %v7199_v10  ;;  %v7227_v10 = vpack.c.bf16 %v1518_v9, %v1517_v8 }
 0x29e   : > { %1222 = vmatmul.mubr.f32.gmra.mrb[6].mxu1 %v10566_v32 }
 0x29f   : > { %1226 = vmatprep.mubr.f32.mxu1 %v10620_v48  ;;  %7202 = vmatpush1.bf16.msra.mxu1 %v7201_v13  ;;  %v7229_v13 = vpack.c.bf16 %v1502_v12, %v1501_v11 }
 0x2a0   : > { %7204 = vmatprep.subr.bf16.mxu1 %v7203_v0 }
 0x2a2   : > { %1227 = vmatmul.mubr.f32.gmra.mrb[8].mxu1 %v10585_v57 }
 0x2a3   : > { %1231 = vmatprep.mubr.f32.mxu1 %v1098_v59  ;;  %v1497_v59 = vld [vmem:[%s12325_s18] sm:$0xff] }
 0x2a4   : > { %v7221_v61 = vpack.c.bf16 %v1498_v60, %v1497_v59 }
 0x2a6   : > { %1232 = vmatmul.mubr.f32.gmra.mrb[10].mxu1 %v10587_v58  ;;  %7222 = vmatpush3.bf16.msra.mxu0 %v7221_v61 }
 0x2a7   : > { %1236 = vmatprep.mubr.f32.mxu1 %v1100_v1  ;;  %v7223_v1 = vpack.c.bf16 %v1516_v63, %v1515_v62 }
 0x2a9   : > { %7224 = vmatprep.subr.bf16.mxu0 %v7223_v1 }
 0x2aa   : > { %1237 = vmatmul.mubr.f32.gmra.mrb[12].mxu1 %v10603_v29 }
 0x2ab   : > { %1241 = vmatprep.mubr.f32.mxu1 %v1102_v5  ;;  %v7225_v5 = vpack.c.bf16 %v1500_v4, %v1499_v2 }
 0x2ad   : > { %7226 = vmatpush3.bf16.msra.mxu0 %v7225_v5 }
 0x2ae   : > { %1242 = vmatmul.mubr.f32.gmra.mrb[14].mxu1 %v10605_v30  ;;  %7228 = vmatprep.subr.bf16.mxu0 %v7227_v10 }
 0x2af   : > { %1372 = vmatprep.mubr.f32.mxu1 %v9683_v14 }
 0x2b1   : > { %7230 = vmatpush3.bf16.msra.mxu0 %v7229_v13  ;;  %v1610_v13 = vld [vmem:[#allocation16 + $0x48] sm:$0xff] }
 0x365   : > { %v7096_v15 = vpop.f32.mrb[0].mxu1 }
 0x366   : > { %v7097_v18 = vpop.f32.mrb[1].mxu1 }
 0x367   : > { %v7098_v19 = vadd.f32 %v7097_v18, %v7096_v15  ;;  %v1519_v15 = vld [vmem:[%s12325_s18 + $0xb0] sm:$0xff] }
 0x369   : > { %v1209_v20 = vadd.f32 %v7098_v19, %v6907_v16  ;;  %v7099_v21 = vpop.f32.mrb[2].mxu1  ;;  %v1503_v19 = vld [vmem:[%s12325_s18 + $0x30] sm:$0xff] }
 0x36a   : > { %v7100_v23 = vpop.f32.mrb[3].mxu1 }
 0x36b   : > { %v1247_v24 = vmax.f32 %v1209_v20, 0.0  ;;  %v7101_v25 = vadd.f32 %v7100_v23, %v7099_v21  ;;  %v1504_v20 = vld [vmem:[%s12325_s18 + $0x38] sm:$0xff]  ;;  %v1521_v23 = vld [vmem:[%s12325_s18 + $0xc0] sm:$0xff] }
 0x36c   : > { %v7233_v21 = vpack.c.bf16 %v1504_v20, %v1503_v19  ;;  %v1611_v19 = vld [vmem:[#allocation16 + $0x50] sm:$0xff] }
 0x36d   : > { %v1214_v27 = vadd.f32 %v7101_v25, %v6907_v16  ;;  %v7102_v28 = vpop.f32.mrb[4].mxu1  ;;  %6908 = vmatmul.mubr.msk.f32.vlgmr.msra.gmra.mrb[16].mxu1 %vm1283_vm0, %v1247_v24  ;;  %v1522_v24 = vld [vmem:[%s12325_s18 + $0xc8] sm:$0xff] }
 0x36e   : > { %v7103_v53 = vpop.f32.mrb[5].mxu1  ;;  %1378 = vmatprep.mubr.f32.mxu1 %v9683_v14  ;;  %7206 = vmatpush1.bf16.msra.mxu1 %v7205_v17  ;;  %v7235_v25 = vpack.c.bf16 %v1522_v24, %v1521_v23  ;;  %v1616_v23 = vld [vmem:[#allocation16 + $0x78] sm:$0xff] }
 0x36f   : > { %v1248_v54 = vmax.f32 %v1214_v27, 0.0  ;;  %v7104_v0 = vadd.f32 %v7103_v53, %v7102_v28  ;;  %7208 = vmatprep.subr.bf16.mxu1 %v7207_v26  ;;  %v1505_v26 = vld [vmem:[%s12325_s18 + $0x40] sm:$0xff]  ;;  %v1506_v27 = vld [vmem:[%s12325_s18 + $0x48] sm:$0xff]  ;;  %v1523_v53 = vld [vmem:[%s12325_s18 + $0xd0] sm:$0xff] }
 0x370   : > { %v7237_v28 = vpack.c.bf16 %v1506_v27, %v1505_v26  ;;  %v1615_v26 = vld [vmem:[#allocation16 + $0x70] sm:$0xff] }
 0x371   : > { %v1219_v34 = vadd.f32 %v7104_v0, %v6907_v16  ;;  %v7105_v35 = vpop.f32.mrb[6].mxu1  ;;  %6909 = vmatmul.mubr.msk.f32.gmra.mrb[18].mxu1 %vm1283_vm0, %v1248_v54  ;;  %v1524_v54 = vld [vmem:[%s12325_s18 + $0xd8] sm:$0xff] }
 0x372   : > { %v7106_v22 = vpop.f32.mrb[7].mxu1  ;;  %1384 = vmatprep.mubr.f32.mxu1 %v9683_v14  ;;  %7210 = vmatpush1.bf16.msra.mxu1 %v7209_v41  ;;  %v7239_v0 = vpack.c.bf16 %v1524_v54, %v1523_v53  ;;  %v1736_v53 = vld [vmem:[#allocation19 + $0x48] sm:$0xff] }
 0x373   : > { %v1249_v36 = vmax.f32 %v1219_v34, 0.0  ;;  %v7107_v37 = vadd.f32 %v7106_v22, %v7105_v35  ;;  %7212 = vmatprep.subr.bf16.mxu1 %v7211_v33  ;;  %v1507_v33 = vld [vmem:[%s12325_s18 + $0x50] sm:$0xff]  ;;  %v1508_v34 = vld [vmem:[%s12325_s18 + $0x58] sm:$0xff]  ;;  %v1525_v22 = vld [vmem:[%s12325_s18 + $0xe0] sm:$0xff] }
 0x374   : > { %v7241_v35 = vpack.c.bf16 %v1508_v34, %v1507_v33  ;;  %v1529_v33 = vld [vmem:[#allocation14] sm:$0x1] }
 0x375   : > { %v1224_v7 = vadd.f32 %v7107_v37, %v6907_v16  ;;  %v7108_v17 = vpop.f32.mrb[8].mxu1  ;;  %6910 = vmatmul.mubr.msk.f32.gmra.mrb[20].mxu1 %vm1283_vm0, %v1249_v36  ;;  %v1526_v36 = vld [vmem:[%s12325_s18 + $0xe8] sm:$0xff] }
 0x376   : > { %v7109_v39 = vpop.f32.mrb[9].mxu1  ;;  %1390 = vmatprep.mubr.f32.mxu1 %v9683_v14  ;;  %7214 = vmatpush1.bf16.msra.mxu1 %v7213_v3  ;;  %v7243_v37 = vpack.c.bf16 %v1526_v36, %v1525_v22  ;;  %v1727_v22 = vld [vmem:[#allocation19] sm:$0xff] }
 0x377   : > { %v1250_v40 = vmax.f32 %v1224_v7, 0.0  ;;  %v7110_v42 = vadd.f32 %v7109_v39, %v7108_v17  ;;  %7216 = vmatprep.subr.bf16.mxu1 %v7215_v6  ;;  %v1509_v6 = vld [vmem:[%s12325_s18 + $0x60] sm:$0xff]  ;;  %v1510_v7 = vld [vmem:[%s12325_s18 + $0x68] sm:$0xff]  ;;  %v1527_v39 = vld [vmem:[%s12325_s18 + $0xf0] sm:$0xff] }
 0x378   : > { %v7245_v17 = vpack.c.bf16 %v1510_v7, %v1509_v6  ;;  %v1735_v36 = vld [vmem:[#allocation19 + $0x40] sm:$0xff]  ;;  %v1752_v6 = vld [vmem:[#allocation19 + $0xc8] sm:$0xff] }
 0x379   : > { %v1229_v31 = vadd.f32 %v7110_v42, %v6907_v16  ;;  %v7111_v32 = vpop.f32.mrb[10].mxu1  ;;  %6911 = vmatmul.mubr.msk.f32.gmra.mrb[22].mxu1 %vm1283_vm0, %v1250_v40  ;;  %v1528_v40 = vld [vmem:[%s12325_s18 + $0xf8] sm:$0xff] }
 0x37a   : > { %v7112_v41 = vpop.f32.mrb[11].mxu1  ;;  %1396 = vmatprep.mubr.f32.mxu1 %v9683_v14  ;;  %7218 = vmatpush1.bf16.msra.mxu1 %v7217_v38  ;;  %v7247_v42 = vpack.c.bf16 %v1528_v40, %v1527_v39 }
 0x37b   : > { %v1251_v43 = vmax.f32 %v1229_v31, 0.0  ;;  %v7113_v44 = vadd.f32 %v7112_v41, %v7111_v32  ;;  %v1511_v31 = vld [vmem:[%s12325_s18 + $0x70] sm:$0xff]  ;;  %v1512_v32 = vld [vmem:[%s12325_s18 + $0x78] sm:$0xff] }
 0x37c   : > { %v7249_v41 = vpack.c.bf16 %v1512_v32, %v1511_v31  ;;  %v1751_v31 = vld [vmem:[#allocation19 + $0xc0] sm:$0xff]  ;;  %v1760_v32 = vld [vmem:[#allocation19 + $0x108] sm:$0xff] }
 0x37d   : > { %v1234_v45 = vadd.f32 %v7113_v44, %v6907_v16  ;;  %v7114_v46 = vpop.f32.mrb[12].mxu1  ;;  %6912 = vmatmul.mubr.msk.f32.gmra.mrb[24].mxu1 %vm1283_vm0, %v1251_v43  ;;  %v1602_v43 = vld [vmem:[#allocation16 + $0x8] sm:$0xff]  ;;  %v1604_v44 = vld [vmem:[#allocation16 + $0x18] sm:$0xff] }
 0x37e   : > { %v7115_v57 = vpop.f32.mrb[13].mxu1  ;;  %1402 = vmatprep.mubr.f32.mxu1 %v9683_v14 }
 0x37f   : > { %v1252_v58 = vmax.f32 %v1234_v45, 0.0  ;;  %v7116_v3 = vadd.f32 %v7115_v57, %v7114_v46  ;;  %v1601_v45 = vld [vmem:[#allocation16] sm:$0xff]  ;;  %v7251_v46 = vpack.c.bf16 %v1604_v44, %v1602_v43  ;;  %v1603_v57 = vld [vmem:[#allocation16 + $0x10] sm:$0xff] }
 0x381   : > { %v1239_v47 = vadd.f32 %v7116_v3, %v6907_v16  ;;  %v7117_v48 = vpop.f32.mrb[14].mxu1  ;;  %6913 = vmatmul.mubr.msk.f32.gmra.mrb[26].mxu1 %vm1283_vm0, %v1252_v58  ;;  %v1606_v58 = vld [vmem:[#allocation16 + $0x28] sm:$0xff]  ;;  %v1608_v3 = vld [vmem:[#allocation16 + $0x38] sm:$0xff]  ;;  %7252 = vmatprep.subr.bf16.mxu1 %v7251_v46 }
 0x382   : > { %v7118_v49 = vpop.f32.mrb[15].mxu1  ;;  %1408 = vmatprep.mubr.f32.mxu1 %v9683_v14  ;;  %v1767_v46 = vld [vmem:[#allocation19 + $0x140] sm:$0xff] }
 0x383   : > { %v1253_v29 = vmax.f32 %v1239_v47, 0.0  ;;  %v7119_v30 = vadd.f32 %v7118_v49, %v7117_v48  ;;  %v7253_v47 = vpack.c.bf16 %v1603_v57, %v1601_v45  ;;  %v7255_v48 = vpack.c.bf16 %v1608_v3, %v1606_v58  ;;  %v1605_v49 = vld [vmem:[#allocation16 + $0x20] sm:$0xff]  ;;  %v1776_v57 = vld [vmem:[#allocation19 + $0x188] sm:$0xff] }
 0x384   : > { %v1759_v45 = vld [vmem:[#allocation19 + $0x100] sm:$0xff]  ;;  %v1784_v58 = vld [vmem:[#allocation19 + $0x1c8] sm:$0xff] }
 0x385   : > { %v1244_v38 = vadd.f32 %v7119_v30, %v6907_v16  ;;  %6914 = vmatmul.mubr.msk.f32.gmra.mrb[28].mxu1 %vm1283_vm0, %v1253_v29  ;;  %v1520_v16 = vld [vmem:[%s12325_s18 + $0xb8] sm:$0xff]  ;;  %v7277_v3 = vpack.c.bf16 %v1767_v46, %v1759_v45  ;;  %v1887_v46 = vld [vmem:[#allocation19 + $0x500] sm:$0xff] }
 0x386   : > { %1414 = vmatprep.mubr.f32.mxu1 %v9683_v14  ;;  %v7231_v18 = vpack.c.bf16 %v1520_v16, %v1519_v15  ;;  %v1607_v29 = vld [vmem:[#allocation16 + $0x30] sm:$0xff]  ;;  %v1612_v15 = vld [vmem:[#allocation16 + $0x58] sm:$0xff] }
 0x387   : > { %v1254_v50 = vmax.f32 %v1244_v38, 0.0  ;;  %v7257_v30 = vpack.c.bf16 %v1607_v29, %v1605_v49  ;;  %v7259_v16 = vpack.c.bf16 %v1612_v15, %v1610_v13  ;;  %v1783_v49 = vld [vmem:[#allocation19 + $0x1c0] sm:$0xff]  ;;  %v1792_v29 = vld [vmem:[#allocation19 + $0x208] sm:$0xff] }
 0x388   : > { %7232 = vmatprep.subr.bf16.mxu0 %v7231_v18  ;;  %v1609_v18 = vld [vmem:[#allocation16 + $0x40] sm:$0xff]  ;;  %v1808_v13 = vld [vmem:[#allocation19 + $0x288] sm:$0xff] }
 0x389   : > { %6915 = vmatmul.mubr.msk.f32.gmra.mrb[30].mxu1 %vm1283_vm0, %v1254_v50  ;;  %7234 = vmatpush3.bf16.msra.mxu0 %v7233_v21  ;;  %v7261_v20 = vpack.c.bf16 %v1611_v19, %v1609_v18  ;;  %v1614_v21 = vld [vmem:[#allocation16 + $0x68] sm:$0xff] }
 0x38a   : > { %1488 = vmatprep.mubr.f32.mxu1 %v9683_v14  ;;  %7236 = vmatprep.subr.bf16.mxu0 %v7235_v25  ;;  %v7263_v24 = vpack.c.bf16 %v1616_v23, %v1614_v21  ;;  %v1613_v25 = vld [vmem:[#allocation16 + $0x60] sm:$0xff]  ;;  %v1816_v15 = vld [vmem:[#allocation19 + $0x2c8] sm:$0xff] }
 0x38b   : > { %v7265_v27 = vpack.c.bf16 %v1615_v26, %v1613_v25  ;;  %v7287_v18 = vpack.c.bf16 %v1816_v15, %v1808_v13  ;;  %v1807_v19 = vld [vmem:[#allocation19 + $0x280] sm:$0xff]  ;;  %v1824_v21 = vld [vmem:[#allocation19 + $0x308] sm:$0xff] }
 0x38c   : > { %v1832_v23 = vld [vmem:[#allocation19 + $0x348] sm:$0xff]  ;;  %v1823_v26 = vld [vmem:[#allocation19 + $0x300] sm:$0xff] }
 0x38d   : > { %6916 = vmatmul.mubr.msk.f32.vlgmr.msra.gmra.mrb[32].mxu1 %vm1283_vm0, %v9684_v51  ;;  %7238 = vmatpush3.bf16.msra.mxu0 %v7237_v28  ;;  %v1728_v28 = vld [vmem:[#allocation19 + $0x8] sm:$0xff]  ;;  %v7291_v25 = vpack.c.bf16 %v1832_v23, %v1824_v21  ;;  %v1927_v13 = vld [vmem:[#allocation19 + $0x640] sm:$0xff] }
 0x38e   : > { %1696 = vmatprep.mubr.f32.mxu1 %v9683_v14  ;;  %7240 = vmatprep.subr.bf16.mxu0 %v7239_v0  ;;  %v7267_v54 = vpack.c.bf16 %v1736_v53, %v1728_v28  ;;  %v1840_v28 = vld [vmem:[#allocation19 + $0x388] sm:$0xff]  ;;  %v1943_v21 = vld [vmem:[#allocation19 + $0x6c0] sm:$0xff] }
 0x38f   : > { %7254 = vmatpush1.bf16.msra.mxu1 %v7253_v47  ;;  %v7279_v47 = vpack.c.bf16 %v1784_v58, %v1776_v57  ;;  %v1848_v53 = vld [vmem:[#allocation19 + $0x3c8] sm:$0xff]  ;;  %v1895_v57 = vld [vmem:[#allocation19 + $0x540] sm:$0xff] }
 0x390   : > { %7256 = vmatprep.subr.bf16.mxu1 %v7255_v48  ;;  %v1775_v48 = vld [vmem:[#allocation19 + $0x180] sm:$0xff]  ;;  %v1904_v58 = vld [vmem:[#allocation19 + $0x588] sm:$0xff] }
 0x391   : > { %7242 = vmatpush3.bf16.msra.mxu0 %v7241_v35  ;;  %v1936_v15 = vld [vmem:[#allocation19 + $0x688] sm:$0xff] }
 0x392   : > { %7244 = vmatprep.subr.bf16.mxu0 %v7243_v37  ;;  %v1744_v37 = vld [vmem:[#allocation19 + $0x88] sm:$0xff] }
 0x393   : > { %7258 = vmatpush1.bf16.msra.mxu1 %v7257_v30  ;;  %v7271_v40 = vpack.c.bf16 %v1752_v6, %v1744_v37  ;;  %v1800_v30 = vld [vmem:[#allocation19 + $0x248] sm:$0xff]  ;;  %v1855_v6 = vld [vmem:[#allocation19 + $0x400] sm:$0xff] }
 0x394   : > { %7260 = vmatprep.subr.bf16.mxu1 %v7259_v16 }
 0x395   : > { %7246 = vmatpush3.bf16.msra.mxu0 %v7245_v17  ;;  %v7269_v17 = vpack.c.bf16 %v1735_v36, %v1727_v22  ;;  %v1864_v22 = vld [vmem:[#allocation19 + $0x448] sm:$0xff] }
 0x396   : > { %7248 = vmatprep.subr.bf16.mxu0 %v7247_v42  ;;  %v1743_v42 = vld [vmem:[#allocation19 + $0x80] sm:$0xff] }
 0x397   : > { %7262 = vmatpush1.bf16.msra.mxu1 %v7261_v20  ;;  %v7273_v43 = vpack.c.bf16 %v1751_v31, %v1743_v42  ;;  %v1815_v20 = vld [vmem:[#allocation19 + $0x2c0] sm:$0xff] }
 0x398   : > { %7264 = vmatprep.subr.bf16.mxu1 %v7263_v24  ;;  %v7289_v24 = vpack.c.bf16 %v1815_v20, %v1807_v19  ;;  %v1871_v31 = vld [vmem:[#allocation19 + $0x480] sm:$0xff] }
 0x399   : > { %7250 = vmatpush3.bf16.msra.mxu0 %v7249_v41  ;;  %v1768_v41 = vld [vmem:[#allocation19 + $0x148] sm:$0xff]  ;;  %v1935_v20 = vld [vmem:[#allocation19 + $0x680] sm:$0xff] }
 0x39a   : > { %v7275_v44 = vpack.c.bf16 %v1768_v41, %v1760_v32  ;;  %v1879_v32 = vld [vmem:[#allocation19 + $0x4c0] sm:$0xff]  ;;  %v1888_v41 = vld [vmem:[#allocation19 + $0x508] sm:$0xff]  ;;  %v7321_v23 = vpack.c.bf16 %v1943_v21, %v1935_v20 }
 0x39b   : > { %7266 = vmatpush1.bf16.msra.mxu1 %v7265_v27  ;;  %v1831_v27 = vld [vmem:[#allocation19 + $0x340] sm:$0xff] }
 0x39c   : > { %7268 = vmatprep.subr.bf16.mxu1 %v7267_v54  ;;  %v7293_v54 = vpack.c.bf16 %v1831_v27, %v1823_v26  ;;  %v1951_v27 = vld [vmem:[#allocation19 + $0x700] sm:$0xff] }
 0x440   : > { %v10768_v38 = vpop.f32.mrb[16].mxu1 }
 0x441   : > { %v10770_v50 = vpop.f32.mrb[17].mxu1 }
 0x444   : > { %v10772_v51 = vpop.f32.mrb[18].mxu1 }
 0x445   : > { %v10774_v52 = vpop.f32.mrb[19].mxu1 }
 0x448   : > { %v10776_v55 = vpop.f32.mrb[20].mxu1 }
 0x449   : > { %v10778_v56 = vpop.f32.mrb[21].mxu1 }
 0x44c   : > { %v10780_v59 = vpop.f32.mrb[22].mxu1 }
 0x44d   : > { %v10782_v60 = vpop.f32.mrb[23].mxu1 }
 0x450   : > { %v10784_v61 = vpop.f32.mrb[24].mxu1 }
 0x451   : > { %v10786_v62 = vpop.f32.mrb[25].mxu1 }
 0x454   : > { %v10788_v63 = vpop.f32.mrb[26].mxu1 }
 0x455   : > { %v10790_v1 = vpop.f32.mrb[27].mxu1 }
 0x458   : > { %v10792_v2 = vpop.f32.mrb[28].mxu1 }
 0x459   : > { %v10794_v4 = vpop.f32.mrb[29].mxu1 }
 0x45c   : > { %v10796_v5 = vpop.f32.mrb[30].mxu1 }
 0x45d   : > { %v10798_v8 = vpop.f32.mrb[31].mxu1 }
 0x460   : > { %v1490_v9 = vpop.f32.mrb[32].mxu1 }
 0x461   : > { %v1492_v10 = vpop.f32.mrb[33].mxu1  ;;  %v1495_v12 = vmul.f32 0.015625, %v1490_v9  ;;  %v7281_v9 = vpack.c.bf16 %v1783_v49, %v1775_v48  ;;  %v1903_v49 = vld [vmem:[#allocation19 + $0x580] sm:$0xff] }
 0x462   : > { %v1496_v11 = vmul.f32 0.015625, %v1492_v10  ;;  %v7283_v10 = vpack.c.bf16 %v1800_v30, %v1792_v29  ;;  %v1911_v29 = vld [vmem:[#allocation19 + $0x5c0] sm:$0xff]  ;;  %v1920_v30 = vld [vmem:[#allocation19 + $0x608] sm:$0xff] }
 0x464   : > { %1594 = vmatprep.mubr.f32.mxu0 %v1496_v11  ;;  %v1791_v11 = vld [vmem:[#allocation19 + $0x200] sm:$0xff] }
 0x465   : > { %1595 = vmatmul.mubr.f32.vlgmr.msra.gmra.mrb[0].mxu0 %v1495_v12  ;;  %v1799_v12 = vld [vmem:[#allocation19 + $0x240] sm:$0xff] }
 0x466   : > { %v7285_v16 = vpack.c.bf16 %v1799_v12, %v1791_v11  ;;  %v1919_v12 = vld [vmem:[#allocation19 + $0x600] sm:$0xff] }
 0x538   : > { %v7152_v0 = vpop.f32.mrb[0].mxu0 }
 0x539   : > { %v7153_v34 = vpop.f32.mrb[1].mxu0 }
 0x53a   : > { %v7154_v35 = vadd.f32 %v7153_v34, %v7152_v0  ;;  %v7295_v0 = vpack.c.bf16 %v1848_v53, %v1840_v28  ;;  %v1847_v34 = vld [vmem:[#allocation19 + $0x3c0] sm:$0xff] }
 0x53b   : > { %v1959_v28 = vld [vmem:[#allocation19 + $0x740] sm:$0xff] }
 0x53c   : > { %v1597_v7 = vadd.f32 %v7154_v35, %v1529_v33  ;;  %v1839_v33 = vld [vmem:[#allocation19 + $0x380] sm:$0xff]  ;;  %v1856_v35 = vld [vmem:[#allocation19 + $0x408] sm:$0xff]  ;;  %v7325_v53 = vpack.c.bf16 %v1959_v28, %v1951_v27  ;;  %v1762_v28 = vld [vmem:[#allocation19 + $0x118] sm:$0xff] }
 0x53d   : > { %v7297_v36 = vpack.c.bf16 %v1847_v34, %v1839_v33  ;;  %v7299_v37 = vpack.c.bf16 %v1864_v22, %v1856_v35  ;;  %v1967_v34 = vld [vmem:[#allocation19 + $0x780] sm:$0xff] }
 0x53e   : > { %v1600_v39 = vmax.f32 %v1597_v7, 0.0  ;;  %v1863_v7 = vld [vmem:[#allocation19 + $0x440] sm:$0xff] }
 0x53f   : > { %v1975_v35 = vld [vmem:[#allocation19 + $0x7c0] sm:$0xff] }
 0x540   : > { %6917 = vmatmul.mubr.msk.f32.vlgmr.msra.gmra.mrb[34].mxu1 %vm1283_vm0, %v1600_v39  ;;  %v1880_v39 = vld [vmem:[#allocation19 + $0x4c8] sm:$0xff]  ;;  %v7329_v22 = vpack.c.bf16 %v1975_v35, %v1967_v34 }
 0x541   : > { %7270 = vmatpush1.bf16.msra.mxu1 %v7269_v17  ;;  %v1872_v17 = vld [vmem:[#allocation19 + $0x488] sm:$0xff] }
 0x542   : > { %7272 = vmatprep.subr.bf16.mxu1 %v7271_v40  ;;  %v7301_v40 = vpack.c.bf16 %v1863_v7, %v1855_v6  ;;  %v7303_v42 = vpack.c.bf16 %v1880_v39, %v1872_v17  ;;  %v1273_v7 = vlaneseq }
 0x544   : > { %v10801_v17 = vshrl.u32 %v1273_v7, 7  ;;  %v1786_v7 = vld [vmem:[#allocation19 + $0x1d8] sm:$0xff] }
 0x545   : > { %7274 = vmatpush1.bf16.msra.mxu1 %v7273_v43  ;;  %v1896_v43 = vld [vmem:[#allocation19 + $0x548] sm:$0xff] }
 0x546   : > { %7276 = vmatprep.subr.bf16.mxu1 %v7275_v44  ;;  %v7305_v44 = vpack.c.bf16 %v1879_v32, %v1871_v31  ;;  %v7307_v45 = vpack.c.bf16 %v1896_v43, %v1888_v41  ;;  %v10804_v39 = vsub.s32 0, %v10801_v17  ;;  %v1617_v31 = vld [vmem:[#allocation17] sm:$0x3] }
 0x548   : > { %v1622_v43 = vrot.slane %v1617_v31, %v10804_v39 }
 0x549   : > { %7278 = vmatpush1.bf16.msra.mxu1 %v7277_v3  ;;  %v1912_v3 = vld [vmem:[#allocation19 + $0x5c8] sm:$0xff] }
 0x54a   : > { %7280 = vmatprep.subr.bf16.mxu1 %v7279_v47  ;;  %v7309_v47 = vpack.c.bf16 %v1895_v57, %v1887_v46  ;;  %v7311_v48 = vpack.c.bf16 %v1912_v3, %v1904_v58 }
 0x54d   : > { %7282 = vmatpush1.bf16.msra.mxu1 %v7281_v9  ;;  %v1928_v9 = vld [vmem:[#allocation19 + $0x648] sm:$0xff] }
 0x54e   : > { %7284 = vmatprep.subr.bf16.mxu1 %v7283_v10  ;;  %v7313_v10 = vpack.c.bf16 %v1911_v29, %v1903_v49  ;;  %v7315_v11 = vpack.c.bf16 %v1928_v9, %v1920_v30  ;;  %v1729_v49 = vld [vmem:[#allocation19 + $0x10] sm:$0xff] }
 0x551   : > { %7286 = vmatpush1.bf16.msra.mxu1 %v7285_v16  ;;  %v1944_v16 = vld [vmem:[#allocation19 + $0x6c8] sm:$0xff] }
 0x552   : > { %7288 = vmatprep.subr.bf16.mxu1 %v7287_v18  ;;  %v7317_v18 = vpack.c.bf16 %v1927_v13, %v1919_v12  ;;  %v7319_v19 = vpack.c.bf16 %v1944_v16, %v1936_v15  ;;  %v1754_v12 = vld [vmem:[#allocation19 + $0xd8] sm:$0xff] }
 0x555   : > { %7290 = vmatpush1.bf16.msra.mxu1 %v7289_v24  ;;  %v1952_v24 = vld [vmem:[#allocation19 + $0x708] sm:$0xff] }
 0x556   : > { %7292 = vmatprep.subr.bf16.mxu1 %v7291_v25  ;;  %v1960_v25 = vld [vmem:[#allocation19 + $0x748] sm:$0xff] }
 0x557   : > { %v7323_v26 = vpack.c.bf16 %v1960_v25, %v1952_v24 }
 0x559   : > { %7294 = vmatpush1.bf16.msra.mxu1 %v7293_v54  ;;  %v1968_v54 = vld [vmem:[#allocation19 + $0x788] sm:$0xff] }
 0x55a   : > { %7296 = vmatprep.subr.bf16.mxu1 %v7295_v0  ;;  %v1976_v0 = vld [vmem:[#allocation19 + $0x7c8] sm:$0xff] }
 0x55b   : > { %v7327_v33 = vpack.c.bf16 %v1976_v0, %v1968_v54 }
 0x55d   : > { %7298 = vmatpush1.bf16.msra.mxu1 %v7297_v36  ;;  %v1730_v36 = vld [vmem:[#allocation19 + $0x18] sm:$0xff] }
 0x55e   : > { %7300 = vmatprep.subr.bf16.mxu1 %v7299_v37  ;;  %v1738_v37 = vld [vmem:[#allocation19 + $0x58] sm:$0xff] }
 0x55f   : > { %v7331_v6 = vpack.c.bf16 %v1738_v37, %v1730_v36  ;;  %v1761_v36 = vld [vmem:[#allocation19 + $0x110] sm:$0xff] }
 0x560   : > { %v1769_v37 = vld [vmem:[#allocation19 + $0x150] sm:$0xff] }
 0x561   : > { %7302 = vmatpush1.bf16.msra.mxu1 %v7301_v40  ;;  %v10807_v40 = vsub.s32 1, %v10801_v17 }
 0x562   : > { %7304 = vmatprep.subr.bf16.mxu1 %v7303_v42  ;;  %v1271_v42 = vld [vmem:[#allocation13] sm:$0x3] }
 0x563   : > { %v1276_v32 = vrot.slane %v1271_v42, %v10804_v39  ;;  %v1280_v41 = vrot.slane %v1271_v42, %v10807_v40  ;;  %v7341_v42 = vpack.c.bf16 %v1769_v37, %v1761_v36  ;;  %v1890_v36 = vld [vmem:[#allocation19 + $0x518] sm:$0xff] }
 0x564   : > { %v1898_v37 = vld [vmem:[#allocation19 + $0x558] sm:$0xff] }
 0x565   : > { %7306 = vmatpush1.bf16.msra.mxu1 %v7305_v44  ;;  %v1626_v44 = vrot.slane %v1617_v31, %v10807_v40  ;;  %v1377_v46 = vadd.f32 %v10770_v50, %v1280_v41  ;;  %v1381_v57 = vadd.f32 %v10772_v51, %v1276_v32  ;;  %v1383_v58 = vadd.f32 %v10774_v52, %v1280_v41  ;;  %v1746_v50 = vld [vmem:[#allocation19 + $0x98] sm:$0xff] }
 0x566   : > { %7308 = vmatprep.subr.bf16.mxu1 %v7307_v45  ;;  %v1375_v45 = vadd.f32 %v10768_v38, %v1276_v32  ;;  %v1387_v3 = vadd.f32 %v10776_v55, %v1276_v32  ;;  %v1393_v29 = vadd.f32 %v10780_v59, %v1276_v32  ;;  %v1395_v30 = vadd.f32 %v10782_v60, %v1280_v41 }
 0x567   : > { %v1399_v9 = vadd.f32 %v10784_v61, %v1276_v32  ;;  %v1401_v51 = vadd.f32 %v10786_v62, %v1280_v41  ;;  %v1405_v52 = vadd.f32 %v10788_v63, %v1276_v32  ;;  %v1407_v55 = vadd.f32 %v10790_v1, %v1280_v41 }
 0x568   : > { %v1411_v13 = vadd.f32 %v10792_v2, %v1276_v32  ;;  %v1413_v59 = vadd.f32 %v10794_v4, %v1280_v41  ;;  %v1417_v60 = vadd.f32 %v10796_v5, %v1276_v32  ;;  %v1419_v15 = vadd.f32 %v10798_v8, %v1280_v41  ;;  %v1745_v8 = vld [vmem:[#allocation19 + $0x90] sm:$0xff] }
 0x569   : > { %7310 = vmatpush1.bf16.msra.mxu1 %v7309_v47  ;;  %v1389_v47 = vadd.f32 %v10778_v56, %v1280_v41  ;;  %v1777_v32 = vld [vmem:[#allocation19 + $0x190] sm:$0xff] }
 0x56a   : > { %7312 = vmatprep.subr.bf16.mxu1 %v7311_v48  ;;  %v1785_v41 = vld [vmem:[#allocation19 + $0x1d0] sm:$0xff] }
 0x56d   : > { %7314 = vmatpush1.bf16.msra.mxu1 %v7313_v10 }
 0x56e   : > { %7316 = vmatprep.subr.bf16.mxu1 %v7315_v11  ;;  %v1737_v11 = vld [vmem:[#allocation19 + $0x50] sm:$0xff] }
 0x571   : > { %7318 = vmatpush1.bf16.msra.mxu1 %v7317_v18  ;;  %v7333_v18 = vpack.c.bf16 %v1737_v11, %v1729_v49 }
 0x572   : > { %7320 = vmatprep.subr.bf16.mxu1 %v7319_v19  ;;  %v7335_v19 = vpack.c.bf16 %v1754_v12, %v1746_v50  ;;  %v1825_v50 = vld [vmem:[#allocation19 + $0x310] sm:$0xff] }
 0x573   : > { %v1833_v12 = vld [vmem:[#allocation19 + $0x350] sm:$0xff] }
 0x575   : > { %7322 = vmatpush1.bf16.msra.mxu1 %v7321_v23  ;;  %v1753_v23 = vld [vmem:[#allocation19 + $0xd0] sm:$0xff] }
 0x576   : > { %7324 = vmatprep.subr.bf16.mxu1 %v7323_v26  ;;  %v7337_v35 = vpack.c.bf16 %v1753_v23, %v1745_v8  ;;  %v1874_v8 = vld [vmem:[#allocation19 + $0x498] sm:$0xff] }
 0x577   : > { %v1882_v23 = vld [vmem:[#allocation19 + $0x4d8] sm:$0xff] }
 0x579   : > { %7326 = vmatpush1.bf16.msra.mxu1 %v7325_v53  ;;  %v1770_v53 = vld [vmem:[#allocation19 + $0x158] sm:$0xff] }
 0x57a   : > { %7328 = vmatprep.subr.bf16.mxu1 %v7327_v33 }
 0x57d   : > { %7330 = vmatpush1.bf16.msra.mxu1 %v7329_v22  ;;  %v7339_v22 = vpack.c.bf16 %v1770_v53, %v1762_v28  ;;  %v7367_v53 = vpack.c.bf16 %v1882_v23, %v1874_v8 }
 0x57e   : > { %7332 = vmatprep.subr.bf16.mxu1 %v7331_v6  ;;  %v1778_v6 = vld [vmem:[#allocation19 + $0x198] sm:$0xff] }
 0x57f   : > { %v7343_v31 = vpack.c.bf16 %v1786_v7, %v1778_v6  ;;  %v7371_v7 = vpack.c.bf16 %v1898_v37, %v1890_v36 }
 0x613   : > { %v1698_v48 = vpop.f32.mrb[34].mxu1 }
 0x614   : > { %v1699_v10 = vadd.f32 %v1698_v48, %v1622_v43  ;;  %v1700_v38 = vpop.f32.mrb[35].mxu1  ;;  %v1794_v43 = vld [vmem:[#allocation19 + $0x218] sm:$0xff] }
 0x615   : > { %v1701_v56 = vadd.f32 %v1700_v38, %v1626_v44  ;;  %v1802_v44 = vld [vmem:[#allocation19 + $0x258] sm:$0xff] }
 0x616   : > { %v1706_v61 = vrot.slane %v1699_v10, %v10804_v39  ;;  %v1834_v10 = vld [vmem:[#allocation19 + $0x358] sm:$0xff] }
 0x617   : > { %v1710_v16 = vrot.slane %v1701_v56, %v10804_v39 }
 0x618   : > { %v10831_v62 = vadd.f32 %v1706_v61, %v1375_v45  ;;  %v10833_v63 = vadd.f32 %v1706_v61, %v1381_v57  ;;  %v10835_v1 = vadd.f32 %v1706_v61, %v1387_v3  ;;  %v10837_v20 = vadd.f32 %v1706_v61, %v1393_v29  ;;  %v1793_v57 = vld [vmem:[#allocation19 + $0x210] sm:$0xff]  ;;  %v1810_v3 = vld [vmem:[#allocation19 + $0x298] sm:$0xff] }
 0x619   : > { %v10839_v2 = vadd.f32 %v1710_v16, %v1377_v46  ;;  %v10841_v4 = vadd.f32 %v1710_v16, %v1383_v58  ;;  %v10843_v5 = vadd.f32 %v1710_v16, %v1389_v47  ;;  %v10845_v21 = vadd.f32 %v1710_v16, %v1395_v30  ;;  %v1801_v58 = vld [vmem:[#allocation19 + $0x250] sm:$0xff]  ;;  %v1818_v47 = vld [vmem:[#allocation19 + $0x2d8] sm:$0xff] }
 0x61a   : > { %v10847_v24 = vadd.f32 %v1710_v16, %v1401_v51  ;;  %v10849_v25 = vadd.f32 %v1706_v61, %v1399_v9  ;;  %v10851_v26 = vadd.f32 %v1710_v16, %v1407_v55  ;;  %v10853_v27 = vadd.f32 %v1706_v61, %v1405_v52  ;;  %v1809_v29 = vld [vmem:[#allocation19 + $0x290] sm:$0xff]  ;;  %v1826_v9 = vld [vmem:[#allocation19 + $0x318] sm:$0xff] }
 0x61b   : > { %2089 = vmatprep.mubr.f32.mxu1 %v10839_v2  ;;  %v10856_v54 = vadd.f32 %v1710_v16, %v1413_v59  ;;  %v10858_v0 = vadd.f32 %v1706_v61, %v1411_v13  ;;  %v10860_v33 = vadd.f32 %v1710_v16, %v1419_v15  ;;  %v10862_v34 = vadd.f32 %v1706_v61, %v1417_v60  ;;  %v1817_v30 = vld [vmem:[#allocation19 + $0x2d0] sm:$0xff]  ;;  %v1842_v51 = vld [vmem:[#allocation19 + $0x398] sm:$0xff] }
 0x61c   : > { %2090 = vmatmul.mubr.f32.vlgmr.msra.gmra.mrb[36].mxu1 %v10831_v62  ;;  %v7345_v45 = vpack.c.bf16 %v1785_v41, %v1777_v32  ;;  %v7347_v46 = vpack.c.bf16 %v1802_v44, %v1794_v43  ;;  %v7349_v48 = vpack.c.bf16 %v1801_v58, %v1793_v57  ;;  %v7351_v49 = vpack.c.bf16 %v1818_v47, %v1810_v3  ;;  %v1850_v52 = vld [vmem:[#allocation19 + $0x3d8] sm:$0xff]  ;;  %v1841_v13 = vld [vmem:[#allocation19 + $0x390] sm:$0xff] }
 0x61d   : > { %7334 = vmatpush1.bf16.msra.mxu1 %v7333_v18  ;;  %2095 = vmatprep.mubr.f32.mxu1 %v10841_v4  ;;  %v7353_v38 = vpack.c.bf16 %v1817_v30, %v1809_v29  ;;  %v7355_v11 = vpack.c.bf16 %v1834_v10, %v1826_v9  ;;  %v7357_v55 = vpack.c.bf16 %v1833_v12, %v1825_v50  ;;  %v1849_v59 = vld [vmem:[#allocation19 + $0x3d0] sm:$0xff]  ;;  %v1858_v60 = vld [vmem:[#allocation19 + $0x418] sm:$0xff] }
 0x61e   : > { %7336 = vmatprep.subr.bf16.mxu1 %v7335_v19  ;;  %v7359_v56 = vpack.c.bf16 %v1850_v52, %v1842_v51  ;;  %v1866_v61 = vld [vmem:[#allocation19 + $0x458] sm:$0xff]  ;;  %v7361_v15 = vpack.c.bf16 %v1849_v59, %v1841_v13  ;;  %v1857_v18 = vld [vmem:[#allocation19 + $0x410] sm:$0xff] }
 0x61f   : > { %v7363_v16 = vpack.c.bf16 %v1866_v61, %v1858_v60  ;;  %v1865_v19 = vld [vmem:[#allocation19 + $0x450] sm:$0xff]  ;;  %v1906_v32 = vld [vmem:[#allocation19 + $0x598] sm:$0xff] }
 0x620   : > { %2096 = vmatmul.mubr.f32.gmra.mrb[38].mxu1 %v10833_v63  ;;  %v7365_v28 = vpack.c.bf16 %v1865_v19, %v1857_v18  ;;  %v1914_v41 = vld [vmem:[#allocation19 + $0x5d8] sm:$0xff]  ;;  %v1732_v18 = vld [vmem:[#allocation19 + $0x28] sm:$0xff] }
 0x621   : > { %7338 = vmatpush1.bf16.msra.mxu1 %v7337_v35  ;;  %2101 = vmatprep.mubr.f32.mxu1 %v10843_v5  ;;  %v1873_v35 = vld [vmem:[#allocation19 + $0x490] sm:$0xff]  ;;  %v7375_v44 = vpack.c.bf16 %v1914_v41, %v1906_v32  ;;  %v1922_v57 = vld [vmem:[#allocation19 + $0x618] sm:$0xff]  ;;  %v1740_v19 = vld [vmem:[#allocation19 + $0x68] sm:$0xff] }
 0x622   : > { %7340 = vmatprep.subr.bf16.mxu1 %v7339_v22  ;;  %v1881_v22 = vld [vmem:[#allocation19 + $0x4d0] sm:$0xff]  ;;  %v1930_v58 = vld [vmem:[#allocation19 + $0x658] sm:$0xff]  ;;  %v7395_v23 = vpack.c.bf16 %v1740_v19, %v1732_v18 }
 0x623   : > { %v7369_v6 = vpack.c.bf16 %v1881_v22, %v1873_v35  ;;  %v7379_v47 = vpack.c.bf16 %v1930_v58, %v1922_v57  ;;  %v1938_v29 = vld [vmem:[#allocation19 + $0x698] sm:$0xff]  ;;  %v1748_v35 = vld [vmem:[#allocation19 + $0xa8] sm:$0xff] }
 0x624   : > { %2102 = vmatmul.mubr.f32.gmra.mrb[40].mxu1 %v10835_v1  ;;  %v1946_v30 = vld [vmem:[#allocation19 + $0x6d8] sm:$0xff]  ;;  %v1756_v22 = vld [vmem:[#allocation19 + $0xe8] sm:$0xff] }
 0x625   : > { %7342 = vmatpush1.bf16.msra.mxu1 %v7341_v42  ;;  %2107 = vmatprep.mubr.f32.mxu1 %v10845_v21  ;;  %v1889_v42 = vld [vmem:[#allocation19 + $0x510] sm:$0xff]  ;;  %v7383_v10 = vpack.c.bf16 %v1946_v30, %v1938_v29  ;;  %v1954_v50 = vld [vmem:[#allocation19 + $0x718] sm:$0xff]  ;;  %v7399_v37 = vpack.c.bf16 %v1756_v22, %v1748_v35 }
 0x626   : > { %7344 = vmatprep.subr.bf16.mxu1 %v7343_v31  ;;  %v1897_v31 = vld [vmem:[#allocation19 + $0x550] sm:$0xff]  ;;  %v1962_v12 = vld [vmem:[#allocation19 + $0x758] sm:$0xff] }
 0x627   : > { %v7373_v43 = vpack.c.bf16 %v1897_v31, %v1889_v42  ;;  %v7387_v52 = vpack.c.bf16 %v1962_v12, %v1954_v50  ;;  %v1970_v13 = vld [vmem:[#allocation19 + $0x798] sm:$0xff]  ;;  %v1764_v42 = vld [vmem:[#allocation19 + $0x128] sm:$0xff] }
 0x628   : > { %2108 = vmatmul.mubr.f32.gmra.mrb[42].mxu1 %v10837_v20  ;;  %v1978_v59 = vld [vmem:[#allocation19 + $0x7d8] sm:$0xff]  ;;  %v1772_v31 = vld [vmem:[#allocation19 + $0x168] sm:$0xff] }
 0x629   : > { %7346 = vmatpush1.bf16.msra.mxu1 %v7345_v45  ;;  %2113 = vmatprep.mubr.f32.mxu1 %v10847_v24  ;;  %v1905_v45 = vld [vmem:[#allocation19 + $0x590] sm:$0xff]  ;;  %v7391_v61 = vpack.c.bf16 %v1978_v59, %v1970_v13  ;;  %v7403_v41 = vpack.c.bf16 %v1772_v31, %v1764_v42 }
 0x62a   : > { %7348 = vmatprep.subr.bf16.mxu1 %v7347_v46  ;;  %v1913_v46 = vld [vmem:[#allocation19 + $0x5d0] sm:$0xff] }
 0x62b   : > { %v7377_v3 = vpack.c.bf16 %v1913_v46, %v1905_v45  ;;  %v1780_v45 = vld [vmem:[#allocation19 + $0x1a8] sm:$0xff] }
 0x62c   : > { %2114 = vmatmul.mubr.f32.gmra.mrb[44].mxu1 %v10849_v25  ;;  %v1788_v46 = vld [vmem:[#allocation19 + $0x1e8] sm:$0xff] }
 0x62d   : > { %7350 = vmatpush1.bf16.msra.mxu1 %v7349_v48  ;;  %2119 = vmatprep.mubr.f32.mxu1 %v10851_v26  ;;  %v1921_v48 = vld [vmem:[#allocation19 + $0x610] sm:$0xff]  ;;  %v7407_v58 = vpack.c.bf16 %v1788_v46, %v1780_v45 }
 0x62e   : > { %7352 = vmatprep.subr.bf16.mxu1 %v7351_v49  ;;  %v1929_v49 = vld [vmem:[#allocation19 + $0x650] sm:$0xff] }
 0x62f   : > { %v7381_v9 = vpack.c.bf16 %v1929_v49, %v1921_v48  ;;  %v1796_v48 = vld [vmem:[#allocation19 + $0x228] sm:$0xff] }
 0x630   : > { %2120 = vmatmul.mubr.f32.gmra.mrb[46].mxu1 %v10853_v27  ;;  %v1804_v49 = vld [vmem:[#allocation19 + $0x268] sm:$0xff] }
 0x631   : > { %7354 = vmatpush1.bf16.msra.mxu1 %v7353_v38  ;;  %2125 = vmatprep.mubr.f32.mxu1 %v10856_v54  ;;  %v1937_v38 = vld [vmem:[#allocation19 + $0x690] sm:$0xff]  ;;  %v7411_v30 = vpack.c.bf16 %v1804_v49, %v1796_v48 }
 0x632   : > { %7356 = vmatprep.subr.bf16.mxu1 %v7355_v11  ;;  %v1945_v11 = vld [vmem:[#allocation19 + $0x6d0] sm:$0xff] }
 0x633   : > { %v7385_v51 = vpack.c.bf16 %v1945_v11, %v1937_v38  ;;  %v1812_v38 = vld [vmem:[#allocation19 + $0x2a8] sm:$0xff] }
 0x634   : > { %2126 = vmatmul.mubr.f32.gmra.mrb[48].mxu1 %v10858_v0  ;;  %v1820_v11 = vld [vmem:[#allocation19 + $0x2e8] sm:$0xff] }
 0x635   : > { %7358 = vmatpush1.bf16.msra.mxu1 %v7357_v55  ;;  %2131 = vmatprep.mubr.f32.mxu1 %v10860_v33  ;;  %v1953_v55 = vld [vmem:[#allocation19 + $0x710] sm:$0xff]  ;;  %v7415_v12 = vpack.c.bf16 %v1820_v11, %v1812_v38 }
 0x636   : > { %7360 = vmatprep.subr.bf16.mxu1 %v7359_v56  ;;  %v1961_v56 = vld [vmem:[#allocation19 + $0x750] sm:$0xff] }
 0x637   : > { %v7389_v60 = vpack.c.bf16 %v1961_v56, %v1953_v55  ;;  %v1828_v55 = vld [vmem:[#allocation19 + $0x328] sm:$0xff] }
 0x638   : > { %2132 = vmatmul.mubr.f32.gmra.mrb[50].mxu1 %v10862_v34  ;;  %v1836_v56 = vld [vmem:[#allocation19 + $0x368] sm:$0xff] }
 0x639   : > { %7362 = vmatpush1.bf16.msra.mxu1 %v7361_v15  ;;  %2202 = vmatprep.mubr.f32.mxu1 %v10839_v2  ;;  %v1969_v15 = vld [vmem:[#allocation19 + $0x790] sm:$0xff]  ;;  %v7419_v59 = vpack.c.bf16 %v1836_v56, %v1828_v55 }
 0x63a   : > { %7364 = vmatprep.subr.bf16.mxu1 %v7363_v16  ;;  %v1977_v16 = vld [vmem:[#allocation19 + $0x7d0] sm:$0xff] }
 0x63b   : > { %v7393_v8 = vpack.c.bf16 %v1977_v16, %v1969_v15  ;;  %v1844_v15 = vld [vmem:[#allocation19 + $0x3a8] sm:$0xff] }
 0x63c   : > { %v1852_v16 = vld [vmem:[#allocation19 + $0x3e8] sm:$0xff] }
 0x63d   : > { %7366 = vmatpush1.bf16.msra.mxu1 %v7365_v28  ;;  %v1731_v28 = vld [vmem:[#allocation19 + $0x20] sm:$0xff]  ;;  %v7423_v19 = vpack.c.bf16 %v1852_v16, %v1844_v15 }
 0x63e   : > { %7368 = vmatprep.subr.bf16.mxu1 %v7367_v53  ;;  %v1739_v53 = vld [vmem:[#allocation19 + $0x60] sm:$0xff] }
 0x63f   : > { %v7397_v36 = vpack.c.bf16 %v1739_v53, %v1731_v28  ;;  %v1860_v28 = vld [vmem:[#allocation19 + $0x428] sm:$0xff] }
 0x640   : > { %v1868_v53 = vld [vmem:[#allocation19 + $0x468] sm:$0xff] }
 0x641   : > { %7370 = vmatpush1.bf16.msra.mxu1 %v7369_v6  ;;  %v1747_v6 = vld [vmem:[#allocation19 + $0xa0] sm:$0xff]  ;;  %v7427_v22 = vpack.c.bf16 %v1868_v53, %v1860_v28 }
 0x642   : > { %7372 = vmatprep.subr.bf16.mxu1 %v7371_v7  ;;  %v1755_v7 = vld [vmem:[#allocation19 + $0xe0] sm:$0xff] }
 0x643   : > { %v7401_v32 = vpack.c.bf16 %v1755_v7, %v1747_v6  ;;  %v1876_v6 = vld [vmem:[#allocation19 + $0x4a8] sm:$0xff] }
 0x644   : > { %v1884_v7 = vld [vmem:[#allocation19 + $0x4e8] sm:$0xff] }
 0x645   : > { %7374 = vmatpush1.bf16.msra.mxu1 %v7373_v43  ;;  %v1763_v43 = vld [vmem:[#allocation19 + $0x120] sm:$0xff]  ;;  %v7431_v31 = vpack.c.bf16 %v1884_v7, %v1876_v6 }
 0x646   : > { %7376 = vmatprep.subr.bf16.mxu1 %v7375_v44  ;;  %v1771_v44 = vld [vmem:[#allocation19 + $0x160] sm:$0xff] }
 0x647   : > { %v7405_v57 = vpack.c.bf16 %v1771_v44, %v1763_v43  ;;  %v1892_v43 = vld [vmem:[#allocation19 + $0x528] sm:$0xff] }
 0x648   : > { %v1900_v44 = vld [vmem:[#allocation19 + $0x568] sm:$0xff] }
 0x649   : > { %7378 = vmatpush1.bf16.msra.mxu1 %v7377_v3  ;;  %v1779_v3 = vld [vmem:[#allocation19 + $0x1a0] sm:$0xff]  ;;  %v7435_v46 = vpack.c.bf16 %v1900_v44, %v1892_v43 }
 0x64a   : > { %7380 = vmatprep.subr.bf16.mxu1 %v7379_v47  ;;  %v1787_v47 = vld [vmem:[#allocation19 + $0x1e0] sm:$0xff] }
 0x64b   : > { %v7409_v29 = vpack.c.bf16 %v1787_v47, %v1779_v3  ;;  %v1908_v3 = vld [vmem:[#allocation19 + $0x5a8] sm:$0xff] }
 0x64c   : > { %v1916_v47 = vld [vmem:[#allocation19 + $0x5e8] sm:$0xff] }
 0x64d   : > { %7382 = vmatpush1.bf16.msra.mxu1 %v7381_v9  ;;  %v1795_v9 = vld [vmem:[#allocation19 + $0x220] sm:$0xff]  ;;  %v7439_v49 = vpack.c.bf16 %v1916_v47, %v1908_v3 }
 0x64e   : > { %7384 = vmatprep.subr.bf16.mxu1 %v7383_v10  ;;  %v1803_v10 = vld [vmem:[#allocation19 + $0x260] sm:$0xff] }
 0x64f   : > { %v7413_v50 = vpack.c.bf16 %v1803_v10, %v1795_v9  ;;  %v1924_v9 = vld [vmem:[#allocation19 + $0x628] sm:$0xff] }
 0x650   : > { %v1932_v10 = vld [vmem:[#allocation19 + $0x668] sm:$0xff] }
 0x651   : > { %7386 = vmatpush1.bf16.msra.mxu1 %v7385_v51  ;;  %v1811_v51 = vld [vmem:[#allocation19 + $0x2a0] sm:$0xff]  ;;  %v7443_v11 = vpack.c.bf16 %v1932_v10, %v1924_v9 }
 0x652   : > { %7388 = vmatprep.subr.bf16.mxu1 %v7387_v52  ;;  %v1819_v52 = vld [vmem:[#allocation19 + $0x2e0] sm:$0xff] }
 0x653   : > { %v7417_v13 = vpack.c.bf16 %v1819_v52, %v1811_v51  ;;  %v1940_v51 = vld [vmem:[#allocation19 + $0x6a8] sm:$0xff] }
 0x654   : > { %v1948_v52 = vld [vmem:[#allocation19 + $0x6e8] sm:$0xff] }
 0x655   : > { %7390 = vmatpush1.bf16.msra.mxu1 %v7389_v60  ;;  %v1827_v60 = vld [vmem:[#allocation19 + $0x320] sm:$0xff]  ;;  %v7447_v56 = vpack.c.bf16 %v1948_v52, %v1940_v51 }
 0x656   : > { %7392 = vmatprep.subr.bf16.mxu1 %v7391_v61  ;;  %v1835_v61 = vld [vmem:[#allocation19 + $0x360] sm:$0xff] }
 0x657   : > { %v7421_v18 = vpack.c.bf16 %v1835_v61, %v1827_v60  ;;  %v1956_v60 = vld [vmem:[#allocation19 + $0x728] sm:$0xff] }
 0x658   : > { %v1964_v61 = vld [vmem:[#allocation19 + $0x768] sm:$0xff] }
 0x659   : > { %7394 = vmatpush1.bf16.msra.mxu1 %v7393_v8  ;;  %v1843_v8 = vld [vmem:[#allocation19 + $0x3a0] sm:$0xff]  ;;  %v7451_v16 = vpack.c.bf16 %v1964_v61, %v1956_v60 }
 0x65a   : > { %7396 = vmatprep.subr.bf16.mxu1 %v7395_v23  ;;  %v1851_v23 = vld [vmem:[#allocation19 + $0x3e0] sm:$0xff] }
 0x65b   : > { %v7425_v35 = vpack.c.bf16 %v1851_v23, %v1843_v8  ;;  %v1972_v8 = vld [vmem:[#allocation19 + $0x7a8] sm:$0xff] }
 0x65c   : > { %2203 = vmatmul.mubr.f32.vlgmr.msra.gmra.mrb[52].mxu1 %v10831_v62  ;;  %v1980_v23 = vld [vmem:[#allocation19 + $0x7e8] sm:$0xff] }
 0x65d   : > { %2208 = vmatprep.mubr.f32.mxu1 %v10841_v4  ;;  %7398 = vmatpush1.bf16.msra.mxu1 %v7397_v36  ;;  %v1859_v36 = vld [vmem:[#allocation19 + $0x420] sm:$0xff]  ;;  %v7455_v53 = vpack.c.bf16 %v1980_v23, %v1972_v8 }
 0x65e   : > { %7400 = vmatprep.subr.bf16.mxu1 %v7399_v37  ;;  %v1867_v37 = vld [vmem:[#allocation19 + $0x460] sm:$0xff] }
 0x65f   : > { %v7429_v42 = vpack.c.bf16 %v1867_v37, %v1859_v36  ;;  %v1734_v36 = vld [vmem:[#allocation19 + $0x38] sm:$0xff] }
 0x660   : > { %2209 = vmatmul.mubr.f32.gmra.mrb[54].mxu1 %v10833_v63  ;;  %v1742_v37 = vld [vmem:[#allocation19 + $0x78] sm:$0xff] }
 0x661   : > { %2214 = vmatprep.mubr.f32.mxu1 %v10843_v5  ;;  %7402 = vmatpush1.bf16.msra.mxu1 %v7401_v32  ;;  %v1875_v32 = vld [vmem:[#allocation19 + $0x4a0] sm:$0xff]  ;;  %v7459_v7 = vpack.c.bf16 %v1742_v37, %v1734_v36 }
 0x662   : > { %7404 = vmatprep.subr.bf16.mxu1 %v7403_v41  ;;  %v1883_v41 = vld [vmem:[#allocation19 + $0x4e0] sm:$0xff] }
 0x663   : > { %v7433_v45 = vpack.c.bf16 %v1883_v41, %v1875_v32  ;;  %v1750_v32 = vld [vmem:[#allocation19 + $0xb8] sm:$0xff] }
 0x664   : > { %2215 = vmatmul.mubr.f32.gmra.mrb[56].mxu1 %v10835_v1  ;;  %v1758_v41 = vld [vmem:[#allocation19 + $0xf8] sm:$0xff] }
 0x665   : > { %2220 = vmatprep.mubr.f32.mxu1 %v10845_v21  ;;  %7406 = vmatpush1.bf16.msra.mxu1 %v7405_v57  ;;  %v1891_v57 = vld [vmem:[#allocation19 + $0x520] sm:$0xff]  ;;  %v7463_v44 = vpack.c.bf16 %v1758_v41, %v1750_v32 }
 0x666   : > { %7408 = vmatprep.subr.bf16.mxu1 %v7407_v58  ;;  %v1899_v58 = vld [vmem:[#allocation19 + $0x560] sm:$0xff] }
 0x667   : > { %v7437_v48 = vpack.c.bf16 %v1899_v58, %v1891_v57  ;;  %v1766_v57 = vld [vmem:[#allocation19 + $0x138] sm:$0xff] }
 0x668   : > { %2221 = vmatmul.mubr.f32.gmra.mrb[58].mxu1 %v10837_v20  ;;  %v1774_v58 = vld [vmem:[#allocation19 + $0x178] sm:$0xff] }
 0x669   : > { %2226 = vmatprep.mubr.f32.mxu1 %v10847_v24  ;;  %7410 = vmatpush1.bf16.msra.mxu1 %v7409_v29  ;;  %v1907_v29 = vld [vmem:[#allocation19 + $0x5a0] sm:$0xff]  ;;  %v7467_v47 = vpack.c.bf16 %v1774_v58, %v1766_v57 }
 0x66a   : > { %7412 = vmatprep.subr.bf16.mxu1 %v7411_v30  ;;  %v1915_v30 = vld [vmem:[#allocation19 + $0x5e0] sm:$0xff] }
 0x66b   : > { %v7441_v38 = vpack.c.bf16 %v1915_v30, %v1907_v29  ;;  %v1782_v29 = vld [vmem:[#allocation19 + $0x1b8] sm:$0xff] }
 0x66c   : > { %2227 = vmatmul.mubr.f32.gmra.mrb[60].mxu1 %v10849_v25  ;;  %v1790_v30 = vld [vmem:[#allocation19 + $0x1f8] sm:$0xff] }
 0x66d   : > { %2232 = vmatprep.mubr.f32.mxu1 %v10851_v26  ;;  %7414 = vmatpush1.bf16.msra.mxu1 %v7413_v50  ;;  %v1923_v50 = vld [vmem:[#allocation19 + $0x620] sm:$0xff]  ;;  %v7471_v10 = vpack.c.bf16 %v1790_v30, %v1782_v29 }
 0x66e   : > { %7416 = vmatprep.subr.bf16.mxu1 %v7415_v12  ;;  %v1931_v12 = vld [vmem:[#allocation19 + $0x660] sm:$0xff] }
 0x66f   : > { %v7445_v55 = vpack.c.bf16 %v1931_v12, %v1923_v50  ;;  %v1798_v50 = vld [vmem:[#allocation19 + $0x238] sm:$0xff] }
 0x670   : > { %2233 = vmatmul.mubr.f32.gmra.mrb[62].mxu1 %v10853_v27  ;;  %v1806_v12 = vld [vmem:[#allocation19 + $0x278] sm:$0xff] }
 0x671   : > { %2238 = vmatprep.mubr.f32.mxu1 %v10856_v54  ;;  %7418 = vmatpush1.bf16.msra.mxu1 %v7417_v13  ;;  %v1939_v13 = vld [vmem:[#allocation19 + $0x6a0] sm:$0xff]  ;;  %v7475_v52 = vpack.c.bf16 %v1806_v12, %v1798_v50 }
 0x672   : > { %7420 = vmatprep.subr.bf16.mxu1 %v7419_v59  ;;  %v1947_v59 = vld [vmem:[#allocation19 + $0x6e0] sm:$0xff] }
 0x673   : > { %v7449_v15 = vpack.c.bf16 %v1947_v59, %v1939_v13  ;;  %v1814_v13 = vld [vmem:[#allocation19 + $0x2b8] sm:$0xff] }
 0x674   : > { %2239 = vmatmul.mubr.f32.gmra.mrb[64].mxu1 %v10858_v0  ;;  %v1822_v59 = vld [vmem:[#allocation19 + $0x2f8] sm:$0xff] }
 0x675   : > { %2244 = vmatprep.mubr.f32.mxu1 %v10860_v33  ;;  %7422 = vmatpush1.bf16.msra.mxu1 %v7421_v18  ;;  %v1955_v18 = vld [vmem:[#allocation19 + $0x720] sm:$0xff]  ;;  %v7479_v61 = vpack.c.bf16 %v1822_v59, %v1814_v13  ;;  %v1925_v59 = vld [vmem:[#allocation19 + $0x630] sm:$0xff] }
 0x676   : > { %7424 = vmatprep.subr.bf16.mxu1 %v7423_v19  ;;  %v1963_v19 = vld [vmem:[#allocation19 + $0x760] sm:$0xff] }
 0x677   : > { %v7453_v28 = vpack.c.bf16 %v1963_v19, %v1955_v18  ;;  %v1830_v18 = vld [vmem:[#allocation19 + $0x338] sm:$0xff] }
 0x678   : > { %2245 = vmatmul.mubr.f32.gmra.mrb[66].mxu1 %v10862_v34  ;;  %v1838_v19 = vld [vmem:[#allocation19 + $0x378] sm:$0xff] }
 0x679   : > { %7426 = vmatpush1.bf16.msra.mxu1 %v7425_v35  ;;  %2315 = vmatprep.mubr.f32.mxu1 %v10839_v2  ;;  %v1971_v35 = vld [vmem:[#allocation19 + $0x7a0] sm:$0xff]  ;;  %v7483_v23 = vpack.c.bf16 %v1838_v19, %v1830_v18  ;;  %v1941_v19 = vld [vmem:[#allocation19 + $0x6b0] sm:$0xff] }
 0x67a   : > { %7428 = vmatprep.subr.bf16.mxu1 %v7427_v22  ;;  %v1979_v22 = vld [vmem:[#allocation19 + $0x7e0] sm:$0xff] }
 0x67b   : > { %v7457_v6 = vpack.c.bf16 %v1979_v22, %v1971_v35  ;;  %v1846_v35 = vld [vmem:[#allocation19 + $0x3b8] sm:$0xff] }
 0x67c   : > { %v1854_v22 = vld [vmem:[#allocation19 + $0x3f8] sm:$0xff] }
 0x67d   : > { %7430 = vmatpush1.bf16.msra.mxu1 %v7429_v42  ;;  %v1733_v42 = vld [vmem:[#allocation19 + $0x30] sm:$0xff]  ;;  %v7487_v37 = vpack.c.bf16 %v1854_v22, %v1846_v35 }
 0x67e   : > { %7432 = vmatprep.subr.bf16.mxu1 %v7431_v31  ;;  %v1741_v31 = vld [vmem:[#allocation19 + $0x70] sm:$0xff] }
 0x67f   : > { %v7461_v43 = vpack.c.bf16 %v1741_v31, %v1733_v42  ;;  %v1862_v42 = vld [vmem:[#allocation19 + $0x438] sm:$0xff]  ;;  %v1957_v22 = vld [vmem:[#allocation19 + $0x730] sm:$0xff] }
 0x680   : > { %v1870_v31 = vld [vmem:[#allocation19 + $0x478] sm:$0xff] }
 0x681   : > { %7434 = vmatpush1.bf16.msra.mxu1 %v7433_v45  ;;  %v1749_v45 = vld [vmem:[#allocation19 + $0xb0] sm:$0xff]  ;;  %v7491_v41 = vpack.c.bf16 %v1870_v31, %v1862_v42 }
 0x682   : > { %7436 = vmatprep.subr.bf16.mxu1 %v7435_v46  ;;  %v1757_v46 = vld [vmem:[#allocation19 + $0xf0] sm:$0xff] }
 0x683   : > { %v7465_v3 = vpack.c.bf16 %v1757_v46, %v1749_v45  ;;  %v1878_v45 = vld [vmem:[#allocation19 + $0x4b8] sm:$0xff]  ;;  %v1973_v31 = vld [vmem:[#allocation19 + $0x7b0] sm:$0xff] }
 0x684   : > { %v1886_v46 = vld [vmem:[#allocation19 + $0x4f8] sm:$0xff] }
 0x685   : > { %7438 = vmatpush1.bf16.msra.mxu1 %v7437_v48  ;;  %v1765_v48 = vld [vmem:[#allocation19 + $0x130] sm:$0xff]  ;;  %v7495_v58 = vpack.c.bf16 %v1886_v46, %v1878_v45 }
 0x686   : > { %7440 = vmatprep.subr.bf16.mxu1 %v7439_v49  ;;  %v1773_v49 = vld [vmem:[#allocation19 + $0x170] sm:$0xff] }
 0x687   : > { %v7469_v9 = vpack.c.bf16 %v1773_v49, %v1765_v48  ;;  %v1894_v48 = vld [vmem:[#allocation19 + $0x538] sm:$0xff] }
 0x688   : > { %v1902_v49 = vld [vmem:[#allocation19 + $0x578] sm:$0xff] }
 0x689   : > { %7442 = vmatpush1.bf16.msra.mxu1 %v7441_v38  ;;  %v1781_v38 = vld [vmem:[#allocation19 + $0x1b0] sm:$0xff]  ;;  %v7499_v30 = vpack.c.bf16 %v1902_v49, %v1894_v48  ;;  %v2976_v48 = vld [vmem:[#allocation22 + $0x18] sm:$0xff] }
 0x68a   : > { %7444 = vmatprep.subr.bf16.mxu1 %v7443_v11  ;;  %v1789_v11 = vld [vmem:[#allocation19 + $0x1f0] sm:$0xff] }
 0x68b   : > { %v7473_v51 = vpack.c.bf16 %v1789_v11, %v1781_v38  ;;  %v1910_v38 = vld [vmem:[#allocation19 + $0x5b8] sm:$0xff] }
 0x68c   : > { %v1918_v11 = vld [vmem:[#allocation19 + $0x5f8] sm:$0xff] }
 0x68d   : > { %7446 = vmatpush1.bf16.msra.mxu1 %v7445_v55  ;;  %v1797_v55 = vld [vmem:[#allocation19 + $0x230] sm:$0xff]  ;;  %v7503_v12 = vpack.c.bf16 %v1918_v11, %v1910_v38 }
 0x68e   : > { %7448 = vmatprep.subr.bf16.mxu1 %v7447_v56  ;;  %v1805_v56 = vld [vmem:[#allocation19 + $0x270] sm:$0xff] }
 0x68f   : > { %v7477_v60 = vpack.c.bf16 %v1805_v56, %v1797_v55  ;;  %v1934_v55 = vld [vmem:[#allocation19 + $0x678] sm:$0xff] }
 0x691   : > { %7450 = vmatpush1.bf16.msra.mxu1 %v7449_v15  ;;  %v1813_v15 = vld [vmem:[#allocation19 + $0x2b0] sm:$0xff] }
 0x692   : > { %7452 = vmatprep.subr.bf16.mxu1 %v7451_v16  ;;  %v1821_v16 = vld [vmem:[#allocation19 + $0x2f0] sm:$0xff] }
 0x693   : > { %v7481_v8 = vpack.c.bf16 %v1821_v16, %v1813_v15  ;;  %v1950_v15 = vld [vmem:[#allocation19 + $0x6f8] sm:$0xff] }
 0x695   : > { %7454 = vmatpush1.bf16.msra.mxu1 %v7453_v28  ;;  %v1829_v28 = vld [vmem:[#allocation19 + $0x330] sm:$0xff] }
 0x696   : > { %7456 = vmatprep.subr.bf16.mxu1 %v7455_v53  ;;  %v1837_v53 = vld [vmem:[#allocation19 + $0x370] sm:$0xff] }
 0x697   : > { %v7485_v36 = vpack.c.bf16 %v1837_v53, %v1829_v28  ;;  %v1966_v28 = vld [vmem:[#allocation19 + $0x778] sm:$0xff] }
 0x699   : > { %7458 = vmatpush1.bf16.msra.mxu1 %v7457_v6  ;;  %v1845_v6 = vld [vmem:[#allocation19 + $0x3b0] sm:$0xff] }
 0x69a   : > { %7460 = vmatprep.subr.bf16.mxu1 %v7459_v7  ;;  %v1853_v7 = vld [vmem:[#allocation19 + $0x3f0] sm:$0xff] }
 0x69b   : > { %v7489_v32 = vpack.c.bf16 %v1853_v7, %v1845_v6  ;;  %v1982_v6 = vld [vmem:[#allocation19 + $0x7f8] sm:$0xff] }
 0x69c   : > { %2316 = vmatmul.mubr.f32.vlgmr.msra.gmra.mrb[68].mxu1 %v10831_v62 }
 0x69d   : > { %2321 = vmatprep.mubr.f32.mxu1 %v10841_v4  ;;  %7462 = vmatpush1.bf16.msra.mxu1 %v7461_v43  ;;  %v1861_v43 = vld [vmem:[#allocation19 + $0x430] sm:$0xff] }
 0x69e   : > { %7464 = vmatprep.subr.bf16.mxu1 %v7463_v44  ;;  %v1869_v44 = vld [vmem:[#allocation19 + $0x470] sm:$0xff] }
 0x69f   : > { %v7493_v57 = vpack.c.bf16 %v1869_v44, %v1861_v43 }
 0x6a0   : > { %2322 = vmatmul.mubr.f32.gmra.mrb[70].mxu1 %v10833_v63 }
 0x6a1   : > { %2327 = vmatprep.mubr.f32.mxu1 %v10843_v5  ;;  %7466 = vmatpush1.bf16.msra.mxu1 %v7465_v3  ;;  %v1877_v3 = vld [vmem:[#allocation19 + $0x4b0] sm:$0xff] }
 0x6a2   : > { %7468 = vmatprep.subr.bf16.mxu1 %v7467_v47  ;;  %v1885_v47 = vld [vmem:[#allocation19 + $0x4f0] sm:$0xff] }
 0x6a3   : > { %v7497_v29 = vpack.c.bf16 %v1885_v47, %v1877_v3  ;;  %v2974_v47 = vld [vmem:[#allocation22 + $0x8] sm:$0xff] }
 0x6a4   : > { %2328 = vmatmul.mubr.f32.gmra.mrb[72].mxu1 %v10835_v1 }
 0x6a5   : > { %2333 = vmatprep.mubr.f32.mxu1 %v10845_v21  ;;  %7470 = vmatpush1.bf16.msra.mxu1 %v7469_v9  ;;  %v1893_v9 = vld [vmem:[#allocation19 + $0x530] sm:$0xff] }
 0x6a6   : > { %7472 = vmatprep.subr.bf16.mxu1 %v7471_v10  ;;  %v1901_v10 = vld [vmem:[#allocation19 + $0x570] sm:$0xff] }
 0x6a7   : > { %v7501_v50 = vpack.c.bf16 %v1901_v10, %v1893_v9  ;;  %v2973_v9 = vld [vmem:[#allocation22] sm:$0xff]  ;;  %v2975_v10 = vld [vmem:[#allocation22 + $0x10] sm:$0xff] }
 0x6a8   : > { %2334 = vmatmul.mubr.f32.gmra.mrb[74].mxu1 %v10837_v20  ;;  %v7525_v11 = vpack.c.bf16 %v2975_v10, %v2973_v9  ;;  %v2998_v9 = vld [vmem:[#allocation22 + $0xc8] sm:$0xff]  ;;  %v3000_v10 = vld [vmem:[#allocation22 + $0xd8] sm:$0xff] }
 0x6a9   : > { %2339 = vmatprep.mubr.f32.mxu1 %v10847_v24  ;;  %7474 = vmatpush1.bf16.msra.mxu1 %v7473_v51  ;;  %v1917_v51 = vld [vmem:[#allocation19 + $0x5f0] sm:$0xff] }
 0x6aa   : > { %7476 = vmatprep.subr.bf16.mxu1 %v7475_v52  ;;  %v1926_v52 = vld [vmem:[#allocation19 + $0x638] sm:$0xff] }
 0x6ab   : > { %v7507_v13 = vpack.c.bf16 %v1934_v55, %v1926_v52 }
 0x6ac   : > { %2340 = vmatmul.mubr.f32.gmra.mrb[76].mxu1 %v10849_v25 }
 0x6ad   : > { %2345 = vmatprep.mubr.f32.mxu1 %v10851_v26  ;;  %7478 = vmatpush1.bf16.msra.mxu1 %v7477_v60  ;;  %v1933_v60 = vld [vmem:[#allocation19 + $0x670] sm:$0xff] }
 0x6ae   : > { %7480 = vmatprep.subr.bf16.mxu1 %v7479_v61  ;;  %v1942_v61 = vld [vmem:[#allocation19 + $0x6b8] sm:$0xff]  ;;  %v7509_v16 = vpack.c.bf16 %v1933_v60, %v1925_v59 }
 0x6af   : > { %v7511_v18 = vpack.c.bf16 %v1950_v15, %v1942_v61  ;;  %v2979_v59 = vld [vmem:[#allocation22 + $0x30] sm:$0xff] }
 0x6b0   : > { %2346 = vmatmul.mubr.f32.gmra.mrb[78].mxu1 %v10853_v27 }
 0x6b1   : > { %2351 = vmatprep.mubr.f32.mxu1 %v10856_v54  ;;  %7482 = vmatpush1.bf16.msra.mxu1 %v7481_v8  ;;  %v1949_v8 = vld [vmem:[#allocation19 + $0x6f0] sm:$0xff] }
 0x6b2   : > { %7484 = vmatprep.subr.bf16.mxu1 %v7483_v23  ;;  %v1958_v23 = vld [vmem:[#allocation19 + $0x738] sm:$0xff]  ;;  %v7513_v53 = vpack.c.bf16 %v1949_v8, %v1941_v19 }
 0x6b3   : > { %v7515_v35 = vpack.c.bf16 %v1966_v28, %v1958_v23  ;;  %v2981_v28 = vld [vmem:[#allocation22 + $0x40] sm:$0xff] }
 0x6b4   : > { %2352 = vmatmul.mubr.f32.gmra.mrb[80].mxu1 %v10858_v0 }
 0x6b5   : > { %2357 = vmatprep.mubr.f32.mxu1 %v10860_v33  ;;  %7486 = vmatpush1.bf16.msra.mxu1 %v7485_v36  ;;  %v1965_v36 = vld [vmem:[#allocation19 + $0x770] sm:$0xff] }
 0x6b6   : > { %7488 = vmatprep.subr.bf16.mxu1 %v7487_v37  ;;  %v1974_v37 = vld [vmem:[#allocation19 + $0x7b8] sm:$0xff]  ;;  %v7517_v7 = vpack.c.bf16 %v1965_v36, %v1957_v22 }
 0x6b7   : > { %v7519_v42 = vpack.c.bf16 %v1982_v6, %v1974_v37  ;;  %v2986_v37 = vld [vmem:[#allocation22 + $0x68] sm:$0xff]  ;;  %v2988_v6 = vld [vmem:[#allocation22 + $0x78] sm:$0xff] }
 0x6b8   : > { %2358 = vmatmul.mubr.f32.gmra.mrb[82].mxu1 %v10862_v34 }
 0x6b9   : > { %7490 = vmatpush1.bf16.msra.mxu1 %v7489_v32  ;;  %2428 = vmatprep.mubr.f32.mxu1 %v10839_v2  ;;  %v1909_v2 = vld [vmem:[#allocation19 + $0x5b0] sm:$0xff] }
 0x6ba   : > { %7492 = vmatprep.subr.bf16.mxu1 %v7491_v41  ;;  %v7505_v56 = vpack.c.bf16 %v1917_v51, %v1909_v2  ;;  %v1981_v32 = vld [vmem:[#allocation19 + $0x7f0] sm:$0xff]  ;;  %v2980_v51 = vld [vmem:[#allocation22 + $0x38] sm:$0xff] }
 0x6bb   : > { %v7521_v41 = vpack.c.bf16 %v1981_v32, %v1973_v31  ;;  %v2978_v2 = vld [vmem:[#allocation22 + $0x28] sm:$0xff]  ;;  %v2985_v31 = vld [vmem:[#allocation22 + $0x60] sm:$0xff]  ;;  %v2987_v32 = vld [vmem:[#allocation22 + $0x70] sm:$0xff] }
 0x6bd   : > { %7494 = vmatpush1.bf16.msra.mxu1 %v7493_v57 }
 0x6be   : > { %7496 = vmatprep.subr.bf16.mxu1 %v7495_v58 }
 0x6c1   : > { %7498 = vmatpush1.bf16.msra.mxu1 %v7497_v29 }
 0x6c2   : > { %7500 = vmatprep.subr.bf16.mxu1 %v7499_v30  ;;  %v7523_v30 = vpack.c.bf16 %v2976_v48, %v2974_v47 }
 0x6c4   : > { %7524 = vmatprep.subr.bf16.mxu0 %v7523_v30 }
 0x6c5   : > { %7502 = vmatpush1.bf16.msra.mxu1 %v7501_v50  ;;  %7526 = vmatpush1.bf16.msra.mxu0 %v7525_v11 }
 0x6c6   : > { %7504 = vmatprep.subr.bf16.mxu1 %v7503_v12 }
 0x6c9   : > { %7506 = vmatpush1.bf16.msra.mxu1 %v7505_v56  ;;  %v7527_v56 = vpack.c.bf16 %v2980_v51, %v2978_v2 }
 0x6ca   : > { %7508 = vmatprep.subr.bf16.mxu1 %v7507_v13  ;;  %v2977_v13 = vld [vmem:[#allocation22 + $0x20] sm:$0xff] }
 0x6cb   : > { %v7529_v60 = vpack.c.bf16 %v2979_v59, %v2977_v13  ;;  %7528 = vmatprep.subr.bf16.mxu0 %v7527_v56  ;;  %v2997_v56 = vld [vmem:[#allocation22 + $0xc0] sm:$0xff]  ;;  %v2999_v13 = vld [vmem:[#allocation22 + $0xd0] sm:$0xff] }
 0x6cd   : > { %7510 = vmatpush1.bf16.msra.mxu1 %v7509_v16  ;;  %7530 = vmatpush1.bf16.msra.mxu0 %v7529_v60  ;;  %v2982_v16 = vld [vmem:[#allocation22 + $0x48] sm:$0xff] }
 0x6ce   : > { %7512 = vmatprep.subr.bf16.mxu1 %v7511_v18  ;;  %v2984_v18 = vld [vmem:[#allocation22 + $0x58] sm:$0xff]  ;;  %v3002_v60 = vld [vmem:[#allocation22 + $0xe8] sm:$0xff] }
 0x6cf   : > { %v7531_v23 = vpack.c.bf16 %v2984_v18, %v2982_v16  ;;  %v1995_v18 = vsub.s32 2, %v10801_v17 }
 0x6d1   : > { %7514 = vmatpush1.bf16.msra.mxu1 %v7513_v53  ;;  %v2983_v53 = vld [vmem:[#allocation22 + $0x50] sm:$0xff]  ;;  %7532 = vmatprep.subr.bf16.mxu0 %v7531_v23 }
 0x6d2   : > { %7516 = vmatprep.subr.bf16.mxu1 %v7515_v35  ;;  %v7533_v35 = vpack.c.bf16 %v2983_v53, %v2981_v28 }
 0x6d4   : > { %7534 = vmatpush1.bf16.msra.mxu0 %v7533_v35 }
 0x6d5   : > { %7518 = vmatpush1.bf16.msra.mxu1 %v7517_v7 }
 0x6d6   : > { %7520 = vmatprep.subr.bf16.mxu1 %v7519_v42  ;;  %v7535_v42 = vpack.c.bf16 %v2988_v6, %v2986_v37 }
 0x6d8   : > { %7536 = vmatprep.subr.bf16.mxu0 %v7535_v42 }
 0x6d9   : > { %7522 = vmatpush1.bf16.msra.mxu1 %v7521_v41  ;;  %v7537_v41 = vpack.c.bf16 %v2987_v32, %v2985_v31  ;;  %v3003_v31 = vld [vmem:[#allocation22 + $0xf0] sm:$0xff] }
 0x6db   : > { %7538 = vmatpush1.bf16.msra.mxu0 %v7537_v41 }
 0x6dc   : > { %2429 = vmatmul.mubr.f32.vlgmr.msra.gmra.mrb[84].mxu1 %v10831_v62 }
 0x6dd   : > { %2434 = vmatprep.mubr.f32.mxu1 %v10841_v4 }
 0x6e0   : > { %2435 = vmatmul.mubr.f32.gmra.mrb[86].mxu1 %v10833_v63 }
 0x6e1   : > { %2440 = vmatprep.mubr.f32.mxu1 %v10843_v5 }
 0x6e4   : > { %2441 = vmatmul.mubr.f32.gmra.mrb[88].mxu1 %v10835_v1 }
 0x6e5   : > { %2446 = vmatprep.mubr.f32.mxu1 %v10845_v21 }
 0x6e8   : > { %2447 = vmatmul.mubr.f32.gmra.mrb[90].mxu1 %v10837_v20 }
 0x6e9   : > { %2452 = vmatprep.mubr.f32.mxu1 %v10847_v24 }
 0x6ec   : > { %2453 = vmatmul.mubr.f32.gmra.mrb[92].mxu1 %v10849_v25 }
 0x6ed   : > { %2458 = vmatprep.mubr.f32.mxu1 %v10851_v26 }
 0x6ef   : > { %v2091_v43 = vpop.f32.mrb[36].mxu1 }
 0x6f0   : > { %2459 = vmatmul.mubr.f32.gmra.mrb[94].mxu1 %v10853_v27  ;;  %v2093_v62 = vpop.f32.mrb[37].mxu1 }
 0x6f1   : > { %2464 = vmatprep.mubr.f32.mxu1 %v10856_v54  ;;  %v10934_v54 = vld [vmem:[#allocation20] sm:$0xff] }
 0x6f2   : > { %v10946_v44 = vrot.slane %v10934_v54, %v10807_v40  ;;  %v10974_v37 = vrot.slane %v10934_v54, %v1995_v18 }
 0x6f3   : > { %v2097_v63 = vpop.f32.mrb[38].mxu1 }
 0x6f4   : > { %2465 = vmatmul.mubr.f32.gmra.mrb[96].mxu1 %v10858_v0  ;;  %v2099_v1 = vpop.f32.mrb[39].mxu1  ;;  %v2094_v58 = vadd.f32 %v2093_v62, %v10946_v44  ;;  %v2990_v62 = vld [vmem:[#allocation22 + $0x88] sm:$0xff] }
 0x6f5   : > { %2470 = vmatprep.mubr.f32.mxu1 %v10860_v33  ;;  %v2100_v29 = vadd.f32 %v2099_v1, %v10946_v44  ;;  %v2989_v1 = vld [vmem:[#allocation22 + $0x80] sm:$0xff] }
 0x6f6   : > { %v6919_v38 = vmul.f32 -1.442695, %v2094_v58 }
 0x6f7   : > { %v2103_v4 = vpop.f32.mrb[40].mxu1  ;;  %v6921_v52 = vmul.f32 -1.442695, %v2100_v29  ;;  %v2995_v29 = vld [vmem:[#allocation22 + $0xb0] sm:$0xff] }
 0x6f8   : > { %2471 = vmatmul.mubr.f32.gmra.mrb[98].mxu1 %v10862_v34  ;;  %v2105_v20 = vpop.f32.mrb[41].mxu1  ;;  %v10942_v34 = vrot.slane %v10934_v54, %v10804_v39 }
 0x6f9   : > { %3431 = vmatprep.mubr.f32.mxu1 %v9683_v14  ;;  %v2106_v55 = vadd.f32 %v2105_v20, %v10946_v44 }
 0x6fa   : > { %v2092_v57 = vadd.f32 %v2091_v43, %v10942_v34  ;;  %v2098_v3 = vadd.f32 %v2097_v63, %v10942_v34  ;;  %v2104_v12 = vadd.f32 %v2103_v4, %v10942_v34  ;;  %v2992_v63 = vld [vmem:[#allocation22 + $0x98] sm:$0xff] }
 0x6fb   : > { %v2109_v5 = vpop.f32.mrb[42].mxu1  ;;  %v6923_v19 = vmul.f32 -1.442695, %v2106_v55  ;;  %v7547_v55 = vpack.c.bf16 %v3000_v10, %v2998_v9 }
 0x6fc   : > { %v2111_v21 = vpop.f32.mrb[43].mxu1  ;;  %v6918_v49 = vmul.f32 -1.442695, %v2092_v57  ;;  %v6920_v50 = vmul.f32 -1.442695, %v2098_v3  ;;  %v2110_v15 = vadd.f32 %v2109_v5, %v10942_v34  ;;  %v7539_v5 = vpack.c.bf16 %v2992_v63, %v2990_v62  ;;  %v2996_v57 = vld [vmem:[#allocation22 + $0xb8] sm:$0xff] }
 0x6fd   : > { %v6922_v61 = vmul.f32 -1.442695, %v2104_v12  ;;  %v2112_v8 = vadd.f32 %v2111_v21, %v10946_v44  ;;  %v2991_v21 = vld [vmem:[#allocation22 + $0x90] sm:$0xff] }
 0x6fe   : > { %8657 = vpow2.f32 %v6918_v49  ;;  %v6924_v22 = vmul.f32 -1.442695, %v2110_v15  ;;  %v7541_v47 = vpack.c.bf16 %v2991_v21, %v2989_v1  ;;  %v2993_v49 = vld [vmem:[#allocation22 + $0xa0] sm:$0xff]  ;;  %7540 = vmatprep.subr.bf16.mxu0 %v7539_v5 }
 0x6ff   : > { %v2115_v24 = vpop.f32.mrb[44].mxu1  ;;  %8659 = vpow2.f32 %v6919_v38  ;;  %v6925_v7 = vmul.f32 -1.442695, %v2112_v8  ;;  %v7545_v2 = vpack.c.bf16 %v2995_v29, %v2993_v49  ;;  %v7549_v8 = vpack.c.bf16 %v2999_v13, %v2997_v56  ;;  %v3009_v56 = vld [vmem:[#allocation22 + $0x120] sm:$0xff]  ;;  %v3011_v13 = vld [vmem:[#allocation22 + $0x130] sm:$0xff] }
 0x700   : > { %v10928_v25 = vpop.f32.mrb[45].mxu1  ;;  %8661 = vpow2.f32 %v6920_v50  ;;  %v2116_v36 = vadd.f32 %v2115_v24, %v10942_v34  ;;  %v2994_v24 = vld [vmem:[#allocation22 + $0xa8] sm:$0xff]  ;;  %7542 = vmatpush1.bf16.msra.mxu0 %v7541_v47  ;;  %v3005_v47 = vld [vmem:[#allocation22 + $0x100] sm:$0xff] }
 0x701   : > { %8663 = vpow2.f32 %v6921_v52  ;;  %v2118_v3 = vadd.f32 %v10928_v25, %v10946_v44  ;;  %v7543_v48 = vpack.c.bf16 %v2996_v57, %v2994_v24  ;;  %v3006_v24 = vld [vmem:[#allocation22 + $0x108] sm:$0xff]  ;;  %v3008_v57 = vld [vmem:[#allocation22 + $0x118] sm:$0xff] }
 0x702   : > { %8665 = vpow2.f32 %v6922_v61  ;;  %v6926_v20 = vmul.f32 -1.442695, %v2116_v36  ;;  %v3004_v61 = vld [vmem:[#allocation22 + $0xf8] sm:$0xff] }
 0x703   : > { %v10930_v26 = vpop.f32.mrb[46].mxu1  ;;  %8667 = vpow2.f32 %v6923_v19  ;;  %v6927_v52 = vmul.f32 -1.442695, %v2118_v3  ;;  %7544 = vmatprep.subr.bf16.mxu0 %v7543_v48  ;;  %v7551_v35 = vpack.c.bf16 %v3004_v61, %v3002_v60  ;;  %v7555_v3 = vpack.c.bf16 %v3008_v57, %v3006_v24  ;;  %v3007_v48 = vld [vmem:[#allocation22 + $0x110] sm:$0xff] }
 0x704   : > { %v10932_v27 = vpop.f32.mrb[47].mxu1  ;;  %8669 = vpow2.f32 %v6924_v22  ;;  %v2122_v50 = vadd.f32 %v10930_v26, %v10942_v34  ;;  %7546 = vmatpush1.bf16.msra.mxu0 %v7545_v2  ;;  %v3012_v2 = vld [vmem:[#allocation22 + $0x138] sm:$0xff] }
 0x705   : > { %8671 = vpow2.f32 %v6925_v7  ;;  %v2124_v25 = vadd.f32 %v10932_v27, %v10946_v44  ;;  %v1999_v27 = vsub.s32 3, %v10801_v17  ;;  %7548 = vmatprep.subr.bf16.mxu0 %v7547_v55 }
 0x706   : > { %8673 = vpow2.f32 %v6926_v20  ;;  %v6928_v26 = vmul.f32 -1.442695, %v2122_v50 }
 0x707   : > { %v10936_v0 = vpop.f32.mrb[48].mxu1  ;;  %v6929_v28 = vmul.f32 -1.442695, %v2124_v25  ;;  %v10977_v7 = vrot.slane %v10934_v54, %v1999_v27 }
 0x708   : > { %v10938_v33 = vpop.f32.mrb[49].mxu1  ;;  %v8658_v43 = vpop.eup %8657  ;;  %v2128_v16 = vadd.f32 %v10936_v0, %v10942_v34  ;;  %7550 = vmatpush1.bf16.msra.mxu0 %v7549_v8 }
 0x709   : > { %v8660_v4 = vpop.eup %8659  ;;  %v2525_v30 = vadd.f32 1.0, %v8658_v43  ;;  %v2130_v53 = vadd.f32 %v10938_v33, %v10946_v44  ;;  %7552 = vmatprep.subr.bf16.mxu0 %v7551_v35  ;;  %v3001_v33 = vld [vmem:[#allocation22 + $0xe0] sm:$0xff] }
 0x70a   : > { %v8662_v58 = vpop.eup %8661  ;;  %v2526_v11 = vadd.f32 1.0, %v8660_v4  ;;  %v6930_v0 = vmul.f32 -1.442695, %v2128_v16  ;;  %v7553_v63 = vpack.c.bf16 %v3003_v31, %v3001_v33 }
 0x70b   : > { %v10948_v45 = vpop.f32.mrb[50].mxu1  ;;  %v8664_v38 = vpop.eup %8663  ;;  %v2527_v12 = vadd.f32 1.0, %v8662_v58  ;;  %8675 = vrcp.f32 %v2525_v30  ;;  %v6931_v42 = vmul.f32 -1.442695, %v2130_v53 }
 0x70c   : > { %v10950_v46 = vpop.f32.mrb[51].mxu1  ;;  %v8666_v51 = vpop.eup %8665  ;;  %v2528_v59 = vadd.f32 1.0, %v8664_v38  ;;  %8677 = vrcp.f32 %v2526_v11  ;;  %v2134_v43 = vadd.f32 %v10948_v45, %v10942_v34  ;;  %7554 = vmatpush1.bf16.msra.mxu0 %v7553_v63 }
 0x70d   : > { %v8668_v15 = vpop.eup %8667  ;;  %8679 = vrcp.f32 %v2527_v12  ;;  %v2529_v19 = vadd.f32 1.0, %v8666_v51  ;;  %v2136_v5 = vadd.f32 %v10950_v46, %v10946_v44  ;;  %v7557_v44 = vpack.c.bf16 %v3007_v48, %v3005_v47  ;;  %7556 = vmatprep.subr.bf16.mxu0 %v7555_v3  ;;  %v3010_v12 = vld [vmem:[#allocation22 + $0x128] sm:$0xff]  ;;  %v3019_v3 = vld [vmem:[#allocation22 + $0x170] sm:$0xff] }
 0x70e   : > { %v8670_v23 = vpop.eup %8669  ;;  %8681 = vpow2.f32 %v6927_v52  ;;  %v2530_v22 = vadd.f32 1.0, %v8668_v15  ;;  %v6932_v29 = vmul.f32 -1.442695, %v2134_v43  ;;  %v7559_v55 = vpack.c.bf16 %v3012_v2, %v3010_v12  ;;  %v3022_v2 = vld [vmem:[#allocation22 + $0x188] sm:$0xff] }
 0x70f   : > { %8683 = vrcp.f32 %v2528_v59  ;;  %v8672_v36 = vpop.eup %8671  ;;  %v2531_v6 = vadd.f32 1.0, %v8670_v23  ;;  %v6933_v52 = vmul.f32 -1.442695, %v2136_v5  ;;  %v3014_v23 = vld [vmem:[#allocation22 + $0x148] sm:$0xff] }
 0x710   : > { %8685 = vpow2.f32 %v6928_v26  ;;  %v8674_v32 = vpop.eup %8673  ;;  %v2532_v41 = vadd.f32 1.0, %v8672_v36  ;;  %7558 = vmatpush1.bf16.msra.mxu0 %v7557_v44  ;;  %v7561_v26 = vpack.c.bf16 %v3011_v13, %v3009_v56  ;;  %v3018_v5 = vld [vmem:[#allocation22 + $0x168] sm:$0xff]  ;;  %v3021_v56 = vld [vmem:[#allocation22 + $0x180] sm:$0xff]  ;;  %v3023_v13 = vld [vmem:[#allocation22 + $0x190] sm:$0xff] }
 0x711   : > { %8687 = vrcp.f32 %v2529_v19  ;;  %v2533_v34 = vadd.f32 1.0, %v8674_v32  ;;  %7560 = vmatprep.subr.bf16.mxu0 %v7559_v55 }
 0x712   : > { %8689 = vpow2.f32 %v6929_v28  ;;  %v3016_v28 = vld [vmem:[#allocation22 + $0x158] sm:$0xff] }
 0x713   : > { %8691 = vrcp.f32 %v2530_v22  ;;  %v7563_v36 = vpack.c.bf16 %v3016_v28, %v3014_v23 }
 0x714   : > { %8693 = vpow2.f32 %v6930_v0  ;;  %7562 = vmatpush1.bf16.msra.mxu0 %v7561_v26  ;;  %v3013_v0 = vld [vmem:[#allocation22 + $0x140] sm:$0xff] }
 0x715   : > { %v10982_v20 = vpop.eup %8675  ;;  %8695 = vrcp.f32 %v2531_v6  ;;  %v3015_v6 = vld [vmem:[#allocation22 + $0x150] sm:$0xff]  ;;  %7564 = vmatprep.subr.bf16.mxu0 %v7563_v36  ;;  %v3028_v36 = vld [vmem:[#allocation22 + $0x1b8] sm:$0xff] }
 0x716   : > { %v10987_v58 = vpop.eup %8677  ;;  %8697 = vpow2.f32 %v6931_v42 }
 0x717   : > { %v10989_v49 = vpop.eup %8679  ;;  %8699 = vrcp.f32 %v2532_v41  ;;  %v7565_v41 = vpack.c.bf16 %v3015_v6, %v3013_v0 }
 0x718   : > { %v8682_v46 = vpop.eup %8681 }
 0x719   : > { %v10992_v11 = vpop.eup %8683  ;;  %v2534_v60 = vadd.f32 1.0, %v8682_v46  ;;  %7566 = vmatpush1.bf16.msra.mxu0 %v7565_v41 }
 0x71a   : > { %v8686_v51 = vpop.eup %8685 }
 0x71b   : > { %v10995_v59 = vpop.eup %8687  ;;  %v2535_v35 = vadd.f32 1.0, %v8686_v51  ;;  %v3024_v51 = vld [vmem:[#allocation22 + $0x198] sm:$0xff] }
 0x71c   : > { %v8690_v16 = vpop.eup %8689  ;;  %v7571_v55 = vpack.c.bf16 %v3024_v51, %v3022_v2 }
 0x71d   : > { %v10998_v27 = vpop.eup %8691  ;;  %v2536_v33 = vadd.f32 1.0, %v8690_v16  ;;  %v7573_v16 = vpack.c.bf16 %v3023_v13, %v3021_v56  ;;  %v8945_v13 = vld [vmem:[%s10370_s15] sm:$0xff] }
 0x71e   : > { %v11001_v53 = vpop.eup %8693 }
 0x71f   : > { %v11003_v42 = vpop.eup %8695 }
 0x720   : > { %v11005_v43 = vpop.eup %8697 }
 0x72f   : > { %v2204_v62 = vpop.f32.mrb[52].mxu1 }
 0x730   : > { %v2205_v1 = vadd.f32 %v2204_v62, %v10974_v37  ;;  %v2206_v4 = vpop.f32.mrb[53].mxu1 }
 0x731   : > { %v2207_v21 = vadd.f32 %v2206_v4, %v10977_v7 }
 0x732   : > { %v6934_v45 = vmul.f32 -1.442695, %v2205_v1  ;;  %v11008_v1 = vpop.eup %8699 }
 0x733   : > { %v6935_v30 = vmul.f32 -1.442695, %v2207_v21  ;;  %v2210_v9 = vpop.f32.mrb[54].mxu1  ;;  %v3020_v21 = vld [vmem:[#allocation22 + $0x178] sm:$0xff] }
 0x734   : > { %8701 = vpow2.f32 %v6934_v45  ;;  %v2211_v10 = vadd.f32 %v2210_v9, %v10974_v37  ;;  %v2212_v38 = vpop.f32.mrb[55].mxu1  ;;  %v3017_v45 = vld [vmem:[#allocation22 + $0x160] sm:$0xff] }
 0x735   : > { %8703 = vpow2.f32 %v6935_v30  ;;  %v2213_v50 = vadd.f32 %v2212_v38, %v10977_v7  ;;  %v7569_v9 = vpack.c.bf16 %v3019_v3, %v3017_v45 }
 0x736   : > { %8705 = vrcp.f32 %v2533_v34  ;;  %v6936_v25 = vmul.f32 -1.442695, %v2211_v10  ;;  %v7567_v34 = vpack.c.bf16 %v3020_v21, %v3018_v5 }
 0x737   : > { %8707 = vpow2.f32 %v6932_v29  ;;  %v6937_v61 = vmul.f32 -1.442695, %v2213_v50  ;;  %v2216_v15 = vpop.f32.mrb[56].mxu1 }
 0x738   : > { %8709 = vpow2.f32 %v6936_v25  ;;  %v2217_v18 = vadd.f32 %v2216_v15, %v10974_v37  ;;  %v2218_v19 = vpop.f32.mrb[57].mxu1  ;;  %7568 = vmatprep.subr.bf16.mxu0 %v7567_v34 }
 0x739   : > { %8711 = vpow2.f32 %v6937_v61  ;;  %v2219_v8 = vadd.f32 %v2218_v19, %v10977_v7  ;;  %7570 = vmatpush1.bf16.msra.mxu0 %v7569_v9 }
 0x73a   : > { %8713 = vpow2.f32 %v6933_v52  ;;  %v6938_v22 = vmul.f32 -1.442695, %v2217_v18  ;;  %7572 = vmatprep.subr.bf16.mxu0 %v7571_v55 }
 0x73b   : > { %8715 = vrcp.f32 %v2534_v60  ;;  %v6939_v31 = vmul.f32 -1.442695, %v2219_v8  ;;  %v2222_v32 = vpop.f32.mrb[58].mxu1 }
 0x73c   : > { %8717 = vpow2.f32 %v6938_v22  ;;  %v2223_v62 = vadd.f32 %v2222_v32, %v10974_v37  ;;  %v2224_v63 = vpop.f32.mrb[59].mxu1  ;;  %v3026_v22 = vld [vmem:[#allocation22 + $0x1a8] sm:$0xff]  ;;  %v3027_v32 = vld [vmem:[#allocation22 + $0x1b0] sm:$0xff] }
 0x73d   : > { %8719 = vpow2.f32 %v6939_v31  ;;  %v2225_v4 = vadd.f32 %v2224_v63, %v10977_v7  ;;  %7574 = vmatpush1.bf16.msra.mxu0 %v7573_v16  ;;  %v3025_v31 = vld [vmem:[#allocation22 + $0x1a0] sm:$0xff] }
 0x73e   : > { %v8702_v24 = vpop.eup %8701  ;;  %8721 = vrcp.f32 %v2535_v35  ;;  %v6940_v57 = vmul.f32 -1.442695, %v2223_v62  ;;  %v7577_v5 = vpack.c.bf16 %v3027_v32, %v3025_v31  ;;  %v3035_v31 = vld [vmem:[#allocation22 + $0x1f0] sm:$0xff] }
 0x73f   : > { %v8704_v47 = vpop.eup %8703  ;;  %8723 = vrcp.f32 %v2536_v33  ;;  %v2637_v48 = vadd.f32 1.0, %v8702_v24  ;;  %v6941_v29 = vmul.f32 -1.442695, %v2225_v4  ;;  %v2228_v30 = vpop.f32.mrb[60].mxu1  ;;  %v7575_v33 = vpack.c.bf16 %v3028_v36, %v3026_v22  ;;  %v8948_v22 = vld [vmem:[%s10378_s13 + $0x8] sm:$0xff] }
 0x740   : > { %v11011_v44 = vpop.eup %8705  ;;  %v2638_v46 = vadd.f32 1.0, %v8704_v47  ;;  %8725 = vpow2.f32 %v6940_v57  ;;  %v2229_v10 = vadd.f32 %v2228_v30, %v10974_v37  ;;  %v2230_v38 = vpop.f32.mrb[61].mxu1  ;;  %v3030_v47 = vld [vmem:[#allocation22 + $0x1c8] sm:$0xff] }
 0x741   : > { %v11014_v50 = vpop.eup %8707  ;;  %8727 = vrcp.f32 %v2637_v48  ;;  %v2231_v12 = vadd.f32 %v2230_v38, %v10977_v7  ;;  %7576 = vmatprep.subr.bf16.mxu0 %v7575_v33  ;;  %v3032_v48 = vld [vmem:[#allocation22 + $0x1d8] sm:$0xff]  ;;  %v3033_v33 = vld [vmem:[#allocation22 + $0x1e0] sm:$0xff] }
 0x742   : > { %v8710_v52 = vpop.eup %8709  ;;  %8729 = vrcp.f32 %v2638_v46  ;;  %v6942_v25 = vmul.f32 -1.442695, %v2229_v10  ;;  %7578 = vmatpush1.bf16.msra.mxu0 %v7577_v5  ;;  %v7579_v9 = vpack.c.bf16 %v3032_v48, %v3030_v47  ;;  %v3029_v46 = vld [vmem:[#allocation22 + $0x1c0] sm:$0xff]  ;;  %v3031_v10 = vld [vmem:[#allocation22 + $0x1d0] sm:$0xff]  ;;  %v8951_v47 = vld [vmem:[%s10370_s15 + $0x18] sm:$0xff] }
 0x743   : > { %v8712_v60 = vpop.eup %8711  ;;  %v2639_v61 = vadd.f32 1.0, %v8710_v52  ;;  %8731 = vpow2.f32 %v6941_v29  ;;  %v6943_v15 = vmul.f32 -1.442695, %v2231_v12  ;;  %v2234_v26 = vpop.f32.mrb[62].mxu1  ;;  %v7581_v52 = vpack.c.bf16 %v3031_v10, %v3029_v46  ;;  %v8949_v5 = vld [vmem:[%s10370_s15 + $0x10] sm:$0xff] }
 0x744   : > { %v11017_v18 = vpop.eup %8713  ;;  %v2640_v19 = vadd.f32 1.0, %v8712_v60  ;;  %8733 = vpow2.f32 %v6942_v25  ;;  %v2235_v8 = vadd.f32 %v2234_v26, %v10974_v37  ;;  %v2236_v23 = vpop.f32.mrb[63].mxu1  ;;  %7580 = vmatprep.subr.bf16.mxu0 %v7579_v9  ;;  %v2573_v60 = vmul.f32 %v8945_v13, %v10982_v20  ;;  %v8955_v13 = vld [vmem:[%s10370_s15 + $0x28] sm:$0xff] }
 0x745   : > { %v11020_v28 = vpop.eup %8715  ;;  %8735 = vrcp.f32 %v2639_v61  ;;  %v2237_v35 = vadd.f32 %v2236_v23, %v10977_v7  ;;  %v8946_v61 = vld [vmem:[%s10378_s13] sm:$0xff]  ;;  %v8947_v23 = vld [vmem:[%s10370_s15 + $0x8] sm:$0xff]  ;;  %v2576_v48 = vmul.f32 %v8951_v47, %v10992_v11  ;;  %v2537_v46 = vadd.f32 1.0, %v11001_v53 }
 0x746   : > { %v8718_v0 = vpop.eup %8717  ;;  %8737 = vrcp.f32 %v2640_v19  ;;  %v6944_v6 = vmul.f32 -1.442695, %v2235_v8  ;;  %7582 = vmatpush1.bf16.msra.mxu0 %v7581_v52  ;;  %v3034_v19 = vld [vmem:[#allocation22 + $0x1e8] sm:$0xff]  ;;  %v3036_v8 = vld [vmem:[#allocation22 + $0x1f8] sm:$0xff]  ;;  %v8953_v52 = vld [vmem:[%s10370_s15 + $0x20] sm:$0xff] }
 0x747   : > { %v8720_v41 = vpop.eup %8719  ;;  %v2641_v62 = vadd.f32 1.0, %v8718_v0  ;;  %8739 = vpow2.f32 %v6943_v15  ;;  %v6945_v63 = vmul.f32 -1.442695, %v2237_v35  ;;  %v2240_v4 = vpop.f32.mrb[64].mxu1  ;;  %v2574_v35 = vmul.f32 %v8947_v23, %v10987_v58 }
 0x748   : > { %v11023_v21 = vpop.eup %8721  ;;  %v2642_v24 = vadd.f32 1.0, %v8720_v41  ;;  %8741 = vpow2.f32 %v6944_v6  ;;  %v2241_v57 = vadd.f32 %v2240_v4, %v10974_v37  ;;  %v2242_v34 = vpop.f32.mrb[65].mxu1  ;;  %v7583_v6 = vpack.c.bf16 %v3036_v8, %v3034_v19 }
 0x749   : > { %v11026_v45 = vpop.eup %8723  ;;  %8743 = vrcp.f32 %v2641_v62  ;;  %v2243_v3 = vadd.f32 %v2242_v34, %v10977_v7  ;;  %v7585_v62 = vpack.c.bf16 %v3035_v31, %v3033_v33 }
 0x74a   : > { %v8726_v29 = vpop.eup %8725  ;;  %8745 = vrcp.f32 %v2642_v24  ;;  %v6946_v30 = vmul.f32 -1.442695, %v2241_v57  ;;  %7584 = vmatprep.subr.bf16.mxu0 %v7583_v6  ;;  %v2575_v24 = vmul.f32 %v8949_v5, %v10989_v49  ;;  %v8950_v57 = vld [vmem:[%s10378_s13 + $0x10] sm:$0xff]  ;;  %v2540_v6 = vadd.f32 1.0, %v11017_v18  ;;  %v8962_v5 = vld [vmem:[%s10378_s13 + $0x40] sm:$0xff] }
 0x74b   : > { %v8728_v38 = vpop.eup %8727  ;;  %v2643_v12 = vadd.f32 1.0, %v8726_v29  ;;  %8747 = vpow2.f32 %v6945_v63  ;;  %v6947_v2 = vmul.f32 -1.442695, %v2243_v3  ;;  %v2246_v51 = vpop.f32.mrb[66].mxu1  ;;  %7586 = vmatpush1.bf16.msra.mxu0 %v7585_v62  ;;  %v8952_v29 = vld [vmem:[%s10378_s13 + $0x18] sm:$0xff] }
 0x74c   : > { %v8730_v25 = vpop.eup %8729  ;;  %8749 = vpow2.f32 %v6946_v30  ;;  %v2247_v55 = vadd.f32 %v2246_v51, %v10974_v37  ;;  %v2248_v56 = vpop.f32.mrb[67].mxu1  ;;  %v2685_v15 = vmul.f32 %v8946_v61, %v8728_v38  ;;  %v8956_v61 = vld [vmem:[%s10378_s13 + $0x28] sm:$0xff] }
 0x74d   : > { %v8732_v26 = vpop.eup %8731  ;;  %8751 = vrcp.f32 %v2643_v12  ;;  %v2249_v16 = vadd.f32 %v2248_v56, %v10977_v7  ;;  %v2686_v36 = vmul.f32 %v8948_v22, %v8730_v25  ;;  %v2538_v12 = vadd.f32 1.0, %v11005_v43 }
 0x74e   : > { %v8734_v37 = vpop.eup %8733  ;;  %v2644_v0 = vadd.f32 1.0, %v8732_v26  ;;  %8753 = vpow2.f32 %v6947_v2  ;;  %v6948_v20 = vmul.f32 -1.442695, %v2247_v55  ;;  %v11039_v4 = vadd.f32 %v2685_v15, %v2573_v60  ;;  %v8954_v55 = vld [vmem:[%s10378_s13 + $0x20] sm:$0xff] }
 0x74f   : > { %v8736_v32 = vpop.eup %8735  ;;  %v2645_v7 = vadd.f32 1.0, %v8734_v37  ;;  %v6949_v41 = vmul.f32 -1.442695, %v2249_v16  ;;  %v11037_v63 = vadd.f32 %v2686_v36, %v2574_v35  ;;  %v2577_v25 = vmul.f32 %v8953_v52, %v10995_v59  ;;  %v8957_v35 = vld [vmem:[%s10370_s15 + $0x30] sm:$0xff] }
 0x750   : > { %v8738_v58 = vpop.eup %8737  ;;  %8755 = vrcp.f32 %v2644_v0  ;;  %v2687_v34 = vmul.f32 %v8950_v57, %v8736_v32  ;;  %v2578_v60 = vmul.f32 %v8955_v13, %v10998_v27  ;;  %v2579_v22 = vmul.f32 %v8957_v35, %v11003_v42  ;;  %v8958_v27 = vld [vmem:[%s10378_s13 + $0x30] sm:$0xff]  ;;  %v8959_v32 = vld [vmem:[%s10370_s15 + $0x38] sm:$0xff]  ;;  %v8972_v35 = vld [vmem:[%s10378_s13 + $0x68] sm:$0xff] }
 0x751   : > { %v8740_v3 = vpop.eup %8739  ;;  %8757 = vrcp.f32 %v2645_v7  ;;  %v2688_v30 = vmul.f32 %v8952_v29, %v8738_v58  ;;  %v2539_v37 = vadd.f32 1.0, %v11014_v50  ;;  %v2580_v7 = vmul.f32 %v8959_v32, %v11008_v1  ;;  %v8961_v58 = vld [vmem:[%s10370_s15 + $0x40] sm:$0xff]  ;;  %v8963_v29 = vld [vmem:[%s10370_s15 + $0x48] sm:$0xff]  ;;  %v8968_v13 = vld [vmem:[%s10378_s13 + $0x58] sm:$0xff] }
 0x752   : > { %v8742_v9 = vpop.eup %8741  ;;  %v2646_v10 = vadd.f32 1.0, %v8740_v3  ;;  %8759 = vpow2.f32 %v6948_v20  ;;  %v11048_v38 = vadd.f32 %v2687_v34, %v2575_v24  ;;  %v2581_v50 = vmul.f32 %v8961_v58, %v11011_v44  ;;  %v8973_v32 = vld [vmem:[%s10370_s15 + $0x70] sm:$0xff] }
 0x753   : > { %v8744_v49 = vpop.eup %8743  ;;  %v2647_v2 = vadd.f32 1.0, %v8742_v9  ;;  %8761 = vpow2.f32 %v6949_v41  ;;  %v11051_v51 = vadd.f32 %v2688_v30, %v2576_v48  ;;  %v8960_v41 = vld [vmem:[%s10378_s13 + $0x38] sm:$0xff]  ;;  %v2582_v44 = vmul.f32 %v8963_v29, %v11020_v28  ;;  %v8964_v30 = vld [vmem:[%s10378_s13 + $0x48] sm:$0xff] }
 0x754   : > { %v8746_v11 = vpop.eup %8745  ;;  %8763 = vrcp.f32 %v2646_v10  ;;  %v2689_v53 = vmul.f32 %v8954_v55, %v8744_v49  ;;  %v8965_v10 = vld [vmem:[%s10370_s15 + $0x50] sm:$0xff] }
 0x755   : > { %v8748_v56 = vpop.eup %8747  ;;  %8765 = vrcp.f32 %v2647_v2  ;;  %v2690_v43 = vmul.f32 %v8956_v61, %v8746_v11  ;;  %v2583_v49 = vmul.f32 %v8965_v10, %v11023_v21  ;;  %v8969_v61 = vld [vmem:[%s10370_s15 + $0x60] sm:$0xff] }
 0x756   : > { %v8750_v15 = vpop.eup %8749  ;;  %8767 = vrcp.f32 %v2537_v46  ;;  %v2648_v26 = vadd.f32 1.0, %v8748_v56  ;;  %v11059_v16 = vadd.f32 %v2689_v53, %v2577_v25  ;;  %v8967_v53 = vld [vmem:[%s10370_s15 + $0x58] sm:$0xff] }
 0x757   : > { %v8752_v19 = vpop.eup %8751  ;;  %8769 = vrcp.f32 %v2538_v12  ;;  %v2649_v8 = vadd.f32 1.0, %v8750_v15  ;;  %v11061_v59 = vadd.f32 %v2690_v43, %v2578_v60  ;;  %v8966_v12 = vld [vmem:[%s10378_s13 + $0x50] sm:$0xff]  ;;  %v2584_v56 = vmul.f32 %v8967_v53, %v11026_v45  ;;  %v8970_v15 = vld [vmem:[%s10378_s13 + $0x60] sm:$0xff] }
 0x758   : > { %v8754_v23 = vpop.eup %8753  ;;  %8771 = vrcp.f32 %v2648_v26  ;;  %v2691_v36 = vmul.f32 %v8958_v27, %v8752_v19 }
 0x759   : > { %8773 = vrcp.f32 %v2649_v8  ;;  %v2650_v0 = vadd.f32 1.0, %v8754_v23  ;;  %v8971_v8 = vld [vmem:[%s10370_s15 + $0x68] sm:$0xff] }
 0x75a   : > { %v8756_v20 = vpop.eup %8755  ;;  %v11068_v33 = vadd.f32 %v2691_v36, %v2579_v22 }
 0x75b   : > { %v8758_v31 = vpop.eup %8757  ;;  %8775 = vrcp.f32 %v2650_v0  ;;  %v2692_v42 = vmul.f32 %v8960_v41, %v8756_v20  ;;  %v8974_v41 = vld [vmem:[%s10378_s13 + $0x70] sm:$0xff] }
 0x75c   : > { %v8760_v62 = vpop.eup %8759  ;;  %v2693_v24 = vmul.f32 %v8962_v5, %v8758_v31  ;;  %8777 = vrcp.f32 %v2539_v37  ;;  %v2003_v37 = vsub.s32 4, %v10801_v17 }
 0x75d   : > { %v8762_v57 = vpop.eup %8761  ;;  %v2651_v18 = vadd.f32 1.0, %v8760_v62  ;;  %v11076_v34 = vadd.f32 %v2692_v42, %v2580_v7  ;;  %8779 = vrcp.f32 %v2540_v6  ;;  %v2007_v6 = vsub.s32 5, %v10801_v17  ;;  %v8975_v62 = vld [vmem:[%s10370_s15 + $0x78] sm:$0xff]  ;;  %s12077_s15 = scalar_lea.vmem [#allocation32], %s10366_s2  ;;  %s12326_s2 = sld [smem:[#allocation49_spill]] }
 0x75e   : > { %v8764_v3 = vpop.eup %8763  ;;  %v2652_v1 = vadd.f32 1.0, %v8762_v57  ;;  %v11078_v47 = vadd.f32 %v2693_v24, %v2581_v50  ;;  %v8976_v50 = vld [vmem:[%s10378_s13 + $0x78] sm:$0xff]  ;;  %v11110_v24 = vrot.slane %v10934_v54, %v2003_v37  ;;  %s7063_s13 = sshll.u32 %s9819_s29, 11  ;;  %s6562_s29 = scalar_lea.sflag [#allocation4], %s10363_s30 }
 0x75f   : > { %v8766_v48 = vpop.eup %8765  ;;  %8781 = vrcp.f32 %v2651_v18  ;;  %v2694_v9 = vmul.f32 %v8964_v30, %v8764_v3  ;;  %v11115_v18 = vrot.slane %v10934_v54, %v2007_v6  ;;  %s12136_s4 = scalar_lea.hbm %s12327_s1, %s7063_s13 }
 0x760   : > { %v8768_v46 = vpop.eup %8767  ;;  %8783 = vrcp.f32 %v2652_v1  ;;  %v2695_v2 = vmul.f32 %v8966_v12, %v8766_v48 }
 0x761   : > { %v8770_v11 = vpop.eup %8769  ;;  %v11086_v52 = vadd.f32 %v2694_v9, %v2582_v44  ;;  %v2585_v43 = vmul.f32 %v8969_v61, %v8768_v46 }
 0x762   : > { %v8772_v25 = vpop.eup %8771  ;;  %v11088_v55 = vadd.f32 %v2695_v2, %v2583_v49  ;;  %v2586_v23 = vmul.f32 %v8971_v8, %v8770_v11 }
 0x763   : > { %v8774_v28 = vpop.eup %8773  ;;  %v2696_v60 = vmul.f32 %v8968_v13, %v8772_v25  ;;  %p12328_p12 = scmp.ne.s32.totalorder %s12326_s2, 0 }
 0x764   : > { %v2697_v21 = vmul.f32 %v8970_v15, %v8774_v28 }
 0x765   : > { %v8776_v26 = vpop.eup %8775  ;;  %v11095_v19 = vadd.f32 %v2696_v60, %v2584_v56 }
 0x766   : > { %v2698_v22 = vmul.f32 %v8972_v35, %v8776_v26  ;;  %v11099_v27 = vadd.f32 %v2697_v21, %v2585_v43  ;;  %v8778_v45 = vpop.eup %8777 }
 0x767   : > { %v8780_v36 = vpop.eup %8779  ;;  %v2587_v7 = vmul.f32 %v8973_v32, %v8778_v45 }
 0x768   : > { %v11102_v0 = vadd.f32 %v2698_v22, %v2586_v23  ;;  %v2588_v58 = vmul.f32 %v8975_v62, %v8780_v36 }
 0x769   : > { %v8782_v20 = vpop.eup %8781 }
 0x76a   : > { %v8784_v31 = vpop.eup %8783  ;;  %v2699_v42 = vmul.f32 %v8974_v41, %v8782_v20 }
 0x76b   : > { %v2700_v5 = vmul.f32 %v8976_v50, %v8784_v31 }
 0x76c   : > { %v11112_v57 = vadd.f32 %v2699_v42, %v2587_v7 }
 0x76d   : > { %v11117_v3 = vadd.f32 %v2700_v5, %v2588_v58 }
 0x76f   : > { %v2317_v1 = vpop.f32.mrb[68].mxu1 }
 0x770   : > { %v2318_v48 = vadd.f32 %v2317_v1, %v11110_v24  ;;  %v2319_v29 = vpop.f32.mrb[69].mxu1 }
 0x771   : > { %v2320_v44 = vadd.f32 %v2319_v29, %v11115_v18 }
 0x772   : > { %v6950_v30 = vmul.f32 -1.442695, %v2318_v48 }
 0x773   : > { %v6951_v9 = vmul.f32 -1.442695, %v2320_v44  ;;  %v2323_v46 = vpop.f32.mrb[70].mxu1 }
 0x774   : > { %8785 = vpow2.f32 %v6950_v30  ;;  %v2324_v10 = vadd.f32 %v2323_v46, %v11110_v24  ;;  %v2325_v49 = vpop.f32.mrb[71].mxu1 }
 0x775   : > { %8787 = vpow2.f32 %v6951_v9  ;;  %v2326_v12 = vadd.f32 %v2325_v49, %v11115_v18 }
 0x776   : > { %v6952_v54 = vmul.f32 -1.442695, %v2324_v10 }
 0x777   : > { %v6953_v2 = vmul.f32 -1.442695, %v2326_v12  ;;  %v2329_v11 = vpop.f32.mrb[72].mxu1 }
 0x778   : > { %8789 = vpow2.f32 %v6952_v54  ;;  %v2330_v25 = vadd.f32 %v2329_v11, %v11110_v24  ;;  %v2331_v28 = vpop.f32.mrb[73].mxu1 }
 0x779   : > { %8791 = vpow2.f32 %v6953_v2  ;;  %v2332_v53 = vadd.f32 %v2331_v28, %v11115_v18 }
 0x77a   : > { %v6954_v56 = vmul.f32 -1.442695, %v2330_v25 }
 0x77b   : > { %v6955_v13 = vmul.f32 -1.442695, %v2332_v53  ;;  %v2335_v60 = vpop.f32.mrb[74].mxu1 }
 0x77c   : > { %8793 = vpow2.f32 %v6954_v56  ;;  %v2336_v61 = vadd.f32 %v2335_v60, %v11110_v24  ;;  %v2337_v43 = vpop.f32.mrb[75].mxu1 }
 0x77d   : > { %8795 = vpow2.f32 %v6955_v13  ;;  %v2338_v15 = vadd.f32 %v2337_v43, %v11115_v18 }
 0x77e   : > { %v8786_v21 = vpop.eup %8785  ;;  %v6956_v26 = vmul.f32 -1.442695, %v2336_v61  ;;  %v8977_v61 = vld [vmem:[%s10385_s17] sm:$0xff] }
 0x77f   : > { %v8788_v8 = vpop.eup %8787  ;;  %v2765_v23 = vadd.f32 1.0, %v8786_v21  ;;  %v6957_v35 = vmul.f32 -1.442695, %v2338_v15  ;;  %v2341_v22 = vpop.f32.mrb[76].mxu1 }
 0x780   : > { %v2766_v45 = vadd.f32 1.0, %v8788_v8  ;;  %8797 = vpow2.f32 %v6956_v26  ;;  %v2342_v36 = vadd.f32 %v2341_v22, %v11110_v24  ;;  %v2343_v37 = vpop.f32.mrb[77].mxu1  ;;  %v8978_v26 = vld [vmem:[%s10385_s17 + $0x8] sm:$0xff] }
 0x781   : > { %8799 = vrcp.f32 %v2765_v23  ;;  %v2344_v20 = vadd.f32 %v2343_v37, %v11115_v18 }
 0x782   : > { %v8790_v6 = vpop.eup %8789  ;;  %8801 = vrcp.f32 %v2766_v45  ;;  %v6958_v31 = vmul.f32 -1.442695, %v2342_v36 }
 0x783   : > { %v8792_v32 = vpop.eup %8791  ;;  %v2767_v7 = vadd.f32 1.0, %v8790_v6  ;;  %8803 = vpow2.f32 %v6957_v35  ;;  %v6959_v41 = vmul.f32 -1.442695, %v2344_v20  ;;  %v2347_v42 = vpop.f32.mrb[78].mxu1 }
 0x784   : > { %v2768_v62 = vadd.f32 1.0, %v8792_v32  ;;  %8805 = vpow2.f32 %v6958_v31  ;;  %v2348_v58 = vadd.f32 %v2347_v42, %v11110_v24  ;;  %v2349_v50 = vpop.f32.mrb[79].mxu1  ;;  %v8979_v31 = vld [vmem:[%s10385_s17 + $0x10] sm:$0xff] }
 0x785   : > { %8807 = vrcp.f32 %v2767_v7  ;;  %v2350_v5 = vadd.f32 %v2349_v50, %v11115_v18  ;;  %v8980_v7 = vld [vmem:[%s10385_s17 + $0x18] sm:$0xff] }
 0x786   : > { %v8794_v1 = vpop.eup %8793  ;;  %8809 = vrcp.f32 %v2768_v62  ;;  %v6960_v48 = vmul.f32 -1.442695, %v2348_v58 }
 0x787   : > { %v8796_v29 = vpop.eup %8795  ;;  %v2769_v44 = vadd.f32 1.0, %v8794_v1  ;;  %8811 = vpow2.f32 %v6959_v41  ;;  %v6961_v30 = vmul.f32 -1.442695, %v2350_v5  ;;  %v2353_v9 = vpop.f32.mrb[80].mxu1  ;;  %v8981_v1 = vld [vmem:[%s10385_s17 + $0x20] sm:$0xff] }
 0x788   : > { %v2770_v46 = vadd.f32 1.0, %v8796_v29  ;;  %8813 = vpow2.f32 %v6960_v48  ;;  %v2354_v10 = vadd.f32 %v2353_v9, %v11110_v24  ;;  %v2355_v49 = vpop.f32.mrb[81].mxu1 }
 0x789   : > { %8815 = vrcp.f32 %v2769_v44  ;;  %v2356_v12 = vadd.f32 %v2355_v49, %v11115_v18  ;;  %v8982_v44 = vld [vmem:[%s10385_s17 + $0x28] sm:$0xff] }
 0x78a   : > { %v8798_v54 = vpop.eup %8797  ;;  %8817 = vrcp.f32 %v2770_v46  ;;  %v6962_v2 = vmul.f32 -1.442695, %v2354_v10 }
 0x78b   : > { %v8800_v11 = vpop.eup %8799  ;;  %v2771_v25 = vadd.f32 1.0, %v8798_v54  ;;  %8819 = vpow2.f32 %v6961_v30  ;;  %v6963_v28 = vmul.f32 -1.442695, %v2356_v12  ;;  %v2359_v53 = vpop.f32.mrb[82].mxu1  ;;  %v8983_v54 = vld [vmem:[%s10385_s17 + $0x30] sm:$0xff] }
 0x78c   : > { %v8802_v56 = vpop.eup %8801  ;;  %8821 = vpow2.f32 %v6962_v2  ;;  %v2360_v13 = vadd.f32 %v2359_v53, %v11110_v24  ;;  %v2361_v60 = vpop.f32.mrb[83].mxu1  ;;  %v2813_v43 = vmul.f32 %v8977_v61, %v8800_v11 }
 0x78d   : > { %v8804_v15 = vpop.eup %8803  ;;  %8823 = vrcp.f32 %v2771_v25  ;;  %v2362_v21 = vadd.f32 %v2361_v60, %v11115_v18  ;;  %v2814_v8 = vmul.f32 %v8978_v26, %v8802_v56  ;;  %v8985_v60 = vld [vmem:[%s10385_s17 + $0x40] sm:$0xff] }
 0x78e   : > { %v8806_v23 = vpop.eup %8805  ;;  %v2772_v35 = vadd.f32 1.0, %v8804_v15  ;;  %8825 = vpow2.f32 %v6963_v28  ;;  %v6964_v22 = vmul.f32 -1.442695, %v2360_v13  ;;  %v11138_v45 = vadd.f32 %v2813_v43, %v11039_v4 }
 0x78f   : > { %v8808_v36 = vpop.eup %8807  ;;  %v2773_v24 = vadd.f32 1.0, %v8806_v23  ;;  %v6965_v37 = vmul.f32 -1.442695, %v2362_v21  ;;  %v11141_v20 = vadd.f32 %v2814_v8, %v11037_v63  ;;  %v8986_v23 = vld [vmem:[%s10385_s17 + $0x48] sm:$0xff] }
 0x790   : > { %v8810_v6 = vpop.eup %8809  ;;  %8827 = vrcp.f32 %v2772_v35  ;;  %v2815_v18 = vmul.f32 %v8979_v31, %v8808_v36  ;;  %v8988_v31 = vld [vmem:[%s10385_s17 + $0x58] sm:$0xff] }
 0x791   : > { %v8812_v32 = vpop.eup %8811  ;;  %8829 = vrcp.f32 %v2773_v24  ;;  %v2816_v41 = vmul.f32 %v8980_v7, %v8810_v6 }
 0x792   : > { %v8814_v42 = vpop.eup %8813  ;;  %v2774_v62 = vadd.f32 1.0, %v8812_v32  ;;  %8831 = vpow2.f32 %v6964_v22  ;;  %v11146_v4 = vadd.f32 %v2815_v18, %v11048_v38  ;;  %v8987_v22 = vld [vmem:[%s10385_s17 + $0x50] sm:$0xff]  ;;  %v8989_v18 = vld [vmem:[%s10385_s17 + $0x60] sm:$0xff] }
 0x793   : > { %v8816_v58 = vpop.eup %8815  ;;  %v2775_v50 = vadd.f32 1.0, %v8814_v42  ;;  %8833 = vpow2.f32 %v6965_v37  ;;  %v11149_v63 = vadd.f32 %v2816_v41, %v11051_v51  ;;  %v8990_v42 = vld [vmem:[%s10385_s17 + $0x68] sm:$0xff] }
 0x794   : > { %v8818_v5 = vpop.eup %8817  ;;  %8835 = vrcp.f32 %v2774_v62  ;;  %v2817_v48 = vmul.f32 %v8981_v1, %v8816_v58  ;;  %v2011_v58 = vsub.s32 6, %v10801_v17 }
 0x795   : > { %v8820_v29 = vpop.eup %8819  ;;  %8837 = vrcp.f32 %v2775_v50  ;;  %v2818_v30 = vmul.f32 %v8982_v44, %v8818_v5  ;;  %v2015_v5 = vsub.s32 7, %v10801_v17  ;;  %v8992_v44 = vld [vmem:[%s10385_s17 + $0x78] sm:$0xff] }
 0x796   : > { %v8822_v9 = vpop.eup %8821  ;;  %v2776_v46 = vadd.f32 1.0, %v8820_v29  ;;  %v11154_v38 = vadd.f32 %v2817_v48, %v11059_v16  ;;  %v8984_v16 = vld [vmem:[%s10385_s17 + $0x38] sm:$0xff]  ;;  %v8991_v48 = vld [vmem:[%s10385_s17 + $0x70] sm:$0xff]  ;;  %s6575_s17 = sshll.u32 %s12077_s15, 4  ;;  %s12138_s17 = int_to_ptr.vmem [resolvable:$true] %s6575_s17 }
 0x797   : > { %v8824_v10 = vpop.eup %8823  ;;  %v2777_v49 = vadd.f32 1.0, %v8822_v9  ;;  %v11157_v51 = vadd.f32 %v2818_v30, %v11061_v59  ;;  %s9550_s11 = scalar_lea.vmem %s12138_s17, 2048  ;;  %p9557_p10 = scmp.lt.s32.totalorder %s12138_s17, %s9555_s16 }
 0x798   : > { %v8826_v12 = vpop.eup %8825  ;;  %8839 = vrcp.f32 %v2776_v46  ;;  %v2819_v2 = vmul.f32 %v8983_v54, %v8824_v10  ;;  %p9551_p6 = scmp.ne.s32.totalorder %s12138_s17, %s9550_s11  ;;  %p9558_p11 = scmp.lt.s32.totalorder %s9556_s21, %s9550_s11 }
 0x799   : > { %8841 = vrcp.f32 %v2777_v49  ;;  %v2778_v11 = vadd.f32 1.0, %v8826_v12 }
 0x79a   : > { %v8828_v25 = vpop.eup %8827  ;;  %v11161_v28 = vadd.f32 %v2819_v2, %v11068_v33  ;;  %p9552_p4 = pnand %p9551_p6, %p12328_p12  ;;  %p9559_p2 = por %p9558_p11, %p9557_p10 }
 0x79b   : > { %v8830_v53 = vpop.eup %8829  ;;  %8843 = vrcp.f32 %v2778_v11  ;;  %v2820_v56 = vmul.f32 %v8984_v16, %v8828_v25 }
 0x79c   : > { %v8832_v13 = vpop.eup %8831  ;;  %v2821_v59 = vmul.f32 %v8985_v60, %v8830_v53  ;;  %p9553_p13 = pneg %p9552_p4 }
 0x79d   : > { %v8834_v61 = vpop.eup %8833  ;;  %v2779_v43 = vadd.f32 1.0, %v8832_v13  ;;  %v11166_v15 = vadd.f32 %v2820_v56, %v11076_v34 }
 0x79e   : > { %v8836_v21 = vpop.eup %8835  ;;  %v2780_v26 = vadd.f32 1.0, %v8834_v61  ;;  %v11169_v33 = vadd.f32 %v2821_v59, %v11078_v47  ;;  %p9560_p0 = pnand %p9559_p2, %p9553_p13 }
 0x79f   : > { %v8838_v8 = vpop.eup %8837  ;;  %8845 = vrcp.f32 %v2779_v43  ;;  %v2822_v35 = vmul.f32 %v8986_v23, %v8836_v21 }
 0x7a0   : > { %8847 = vrcp.f32 %v2780_v26  ;;  %v2823_v36 = vmul.f32 %v8987_v22, %v8838_v8 }
 0x7a1   : > { %v11174_v24 = vadd.f32 %v2822_v35, %v11086_v52 }
 0x7a2   : > { %v8840_v37 = vpop.eup %8839  ;;  %v11177_v34 = vadd.f32 %v2823_v36, %v11088_v55 }
 0x7a3   : > { %v8842_v6 = vpop.eup %8841  ;;  %v2824_v47 = vmul.f32 %v8988_v31, %v8840_v37 }
 0x7a4   : > { %v2825_v32 = vmul.f32 %v8989_v18, %v8842_v6 }
 0x7a5   : > { %v8844_v7 = vpop.eup %8843  ;;  %v11182_v41 = vadd.f32 %v2824_v47, %v11095_v19  ;;  %v8993_v19 = vld [vmem:[#allocation20] sm:$0xff] }
 0x7a6   : > { %v2826_v62 = vmul.f32 %v8990_v42, %v8844_v7  ;;  %v11186_v52 = vadd.f32 %v2825_v32, %v11099_v27  ;;  %v11195_v9 = vrot.slane %v8993_v19, %v2011_v58  ;;  %v11200_v27 = vrot.slane %v8993_v19, %v2015_v5 }
 0x7a8   : > { %v11190_v55 = vadd.f32 %v2826_v62, %v11102_v0 }
 0x7a9   : > { %v8846_v50 = vpop.eup %8845 }
 0x7aa   : > { %v8848_v1 = vpop.eup %8847  ;;  %v2827_v29 = vmul.f32 %v8991_v48, %v8846_v50 }
 0x7ab   : > { %v2828_v30 = vmul.f32 %v8992_v44, %v8848_v1 }
 0x7ac   : > { %v11198_v46 = vadd.f32 %v2827_v29, %v11112_v57 }
 0x7ad   : > { %v11203_v10 = vadd.f32 %v2828_v30, %v11117_v3 }
 0x7af   : > { %v2430_v0 = vpop.f32.mrb[84].mxu1 }
 0x7b0   : > { %v2431_v49 = vadd.f32 %v2430_v0, %v11195_v9  ;;  %v2432_v17 = vpop.f32.mrb[85].mxu1 }
 0x7b1   : > { %v2433_v12 = vadd.f32 %v2432_v17, %v11200_v27 }
 0x7b2   : > { %v6966_v54 = vmul.f32 -1.442695, %v2431_v49 }
 0x7b3   : > { %v6967_v2 = vmul.f32 -1.442695, %v2433_v12  ;;  %v2436_v11 = vpop.f32.mrb[86].mxu1 }
 0x7b4   : > { %8849 = vpow2.f32 %v6966_v54  ;;  %v2437_v25 = vadd.f32 %v2436_v11, %v11195_v9  ;;  %v2438_v53 = vpop.f32.mrb[87].mxu1 }
 0x7b5   : > { %8851 = vpow2.f32 %v6967_v2  ;;  %v2439_v57 = vadd.f32 %v2438_v53, %v11200_v27 }
 0x7b6   : > { %v6968_v16 = vmul.f32 -1.442695, %v2437_v25 }
 0x7b7   : > { %v6969_v56 = vmul.f32 -1.442695, %v2439_v57  ;;  %v2442_v3 = vpop.f32.mrb[88].mxu1 }
 0x7b8   : > { %8853 = vpow2.f32 %v6968_v16  ;;  %v2443_v13 = vadd.f32 %v2442_v3, %v11195_v9  ;;  %v2444_v60 = vpop.f32.mrb[89].mxu1 }
 0x7b9   : > { %8855 = vpow2.f32 %v6969_v56  ;;  %v2445_v59 = vadd.f32 %v2444_v60, %v11200_v27 }
 0x7ba   : > { %v6970_v61 = vmul.f32 -1.442695, %v2443_v13 }
 0x7bb   : > { %v6971_v43 = vmul.f32 -1.442695, %v2445_v59  ;;  %v2448_v21 = vpop.f32.mrb[90].mxu1 }
 0x7bc   : > { %8857 = vpow2.f32 %v6970_v61  ;;  %v2449_v26 = vadd.f32 %v2448_v21, %v11195_v9  ;;  %v2450_v8 = vpop.f32.mrb[91].mxu1  ;;  %v8994_v21 = vld [vmem:[%s10388_s9] sm:$0xff] }
 0x7bd   : > { %8859 = vpow2.f32 %v6971_v43  ;;  %v2451_v23 = vadd.f32 %v2450_v8, %v11200_v27 }
 0x7be   : > { %v8850_v35 = vpop.eup %8849  ;;  %v6972_v22 = vmul.f32 -1.442695, %v2449_v26 }
 0x7bf   : > { %v8852_v36 = vpop.eup %8851  ;;  %v2893_v37 = vadd.f32 1.0, %v8850_v35  ;;  %v6973_v6 = vmul.f32 -1.442695, %v2451_v23  ;;  %v2454_v31 = vpop.f32.mrb[92].mxu1  ;;  %v8995_v35 = vld [vmem:[%s10388_s9 + $0x8] sm:$0xff] }
 0x7c0   : > { %v2894_v47 = vadd.f32 1.0, %v8852_v36  ;;  %8861 = vpow2.f32 %v6972_v22  ;;  %v2455_v18 = vadd.f32 %v2454_v31, %v11195_v9  ;;  %v2456_v32 = vpop.f32.mrb[93].mxu1 }
 0x7c1   : > { %8863 = vrcp.f32 %v2893_v37  ;;  %v2457_v7 = vadd.f32 %v2456_v32, %v11200_v27 }
 0x7c2   : > { %v8854_v42 = vpop.eup %8853  ;;  %8865 = vrcp.f32 %v2894_v47  ;;  %v6974_v62 = vmul.f32 -1.442695, %v2455_v18 }
 0x7c3   : > { %v8856_v58 = vpop.eup %8855  ;;  %v2895_v50 = vadd.f32 1.0, %v8854_v42  ;;  %8867 = vpow2.f32 %v6973_v6  ;;  %v6975_v5 = vmul.f32 -1.442695, %v2457_v7  ;;  %v2460_v1 = vpop.f32.mrb[94].mxu1  ;;  %v8996_v42 = vld [vmem:[%s10388_s9 + $0x10] sm:$0xff] }
 0x7c4   : > { %v2896_v48 = vadd.f32 1.0, %v8856_v58  ;;  %8869 = vpow2.f32 %v6974_v62  ;;  %v2461_v29 = vadd.f32 %v2460_v1, %v11195_v9  ;;  %v2462_v44 = vpop.f32.mrb[95].mxu1 }
 0x7c5   : > { %8871 = vrcp.f32 %v2895_v50  ;;  %v2463_v30 = vadd.f32 %v2462_v44, %v11200_v27 }
 0x7c6   : > { %v8858_v19 = vpop.eup %8857  ;;  %8873 = vrcp.f32 %v2896_v48  ;;  %v6976_v0 = vmul.f32 -1.442695, %v2461_v29 }
 0x7c7   : > { %v8860_v49 = vpop.eup %8859  ;;  %v2897_v17 = vadd.f32 1.0, %v8858_v19  ;;  %8875 = vpow2.f32 %v6975_v5  ;;  %v6977_v12 = vmul.f32 -1.442695, %v2463_v30  ;;  %v2466_v54 = vpop.f32.mrb[96].mxu1  ;;  %v8998_v30 = vld [vmem:[%s10388_s9 + $0x20] sm:$0xff] }
 0x7c8   : > { %v2898_v2 = vadd.f32 1.0, %v8860_v49  ;;  %8877 = vpow2.f32 %v6976_v0  ;;  %v2467_v11 = vadd.f32 %v2466_v54, %v11195_v9  ;;  %v2468_v25 = vpop.f32.mrb[97].mxu1  ;;  %v8999_v49 = vld [vmem:[%s10388_s9 + $0x28] sm:$0xff] }
 0x7c9   : > { %8879 = vrcp.f32 %v2897_v17  ;;  %v2469_v53 = vadd.f32 %v2468_v25, %v11200_v27 }
 0x7ca   : > { %v8862_v57 = vpop.eup %8861  ;;  %8881 = vrcp.f32 %v2898_v2  ;;  %v6978_v16 = vmul.f32 -1.442695, %v2467_v11 }
 0x7cb   : > { %v8864_v56 = vpop.eup %8863  ;;  %v2899_v3 = vadd.f32 1.0, %v8862_v57  ;;  %8883 = vpow2.f32 %v6977_v12  ;;  %v6979_v13 = vmul.f32 -1.442695, %v2469_v53  ;;  %v2472_v60 = vpop.f32.mrb[98].mxu1  ;;  %v9000_v53 = vld [vmem:[%s10388_s9 + $0x30] sm:$0xff] }
 0x7cc   : > { %v8866_v59 = vpop.eup %8865  ;;  %8885 = vpow2.f32 %v6978_v16  ;;  %v2473_v61 = vadd.f32 %v2472_v60, %v11195_v9  ;;  %v2474_v43 = vpop.f32.mrb[99].mxu1  ;;  %v2941_v26 = vmul.f32 %v8994_v21, %v8864_v56 }
 0x7cd   : > { %v8868_v8 = vpop.eup %8867  ;;  %8887 = vrcp.f32 %v2899_v3  ;;  %v2475_v23 = vadd.f32 %v2474_v43, %v11200_v27  ;;  %v2942_v22 = vmul.f32 %v8995_v35, %v8866_v59  ;;  %v8997_v27 = vld [vmem:[%s10388_s9 + $0x18] sm:$0xff] }
 0x7ce   : > { %v8870_v36 = vpop.eup %8869  ;;  %v2900_v37 = vadd.f32 1.0, %v8868_v8  ;;  %8889 = vpow2.f32 %v6979_v13  ;;  %v6980_v6 = vmul.f32 -1.442695, %v2473_v61  ;;  %v2957_v31 = vadd.f32 %v2941_v26, %v11138_v45 }
 0x7cf   : > { %v8872_v47 = vpop.eup %8871  ;;  %v2901_v18 = vadd.f32 1.0, %v8870_v36  ;;  %v6981_v9 = vmul.f32 -1.442695, %v2475_v23  ;;  %v2958_v32 = vadd.f32 %v2942_v22, %v11141_v20 }
 0x7d0   : > { %v8874_v7 = vpop.eup %8873  ;;  %8891 = vrcp.f32 %v2900_v37  ;;  %v2943_v62 = vmul.f32 %v8996_v42, %v8872_v47  ;;  %v9004_v37 = vld [vmem:[%s10388_s9 + $0x50] sm:$0xff] }
 0x7d1   : > { %v8876_v58 = vpop.eup %8875  ;;  %8893 = vrcp.f32 %v2901_v18  ;;  %3101 = vmatprep.mubr.f32.mxu0 %v2958_v32  ;;  %v2944_v50 = vmul.f32 %v8997_v27, %v8874_v7  ;;  %v9006_v32 = vld [vmem:[%s10388_s9 + $0x60] sm:$0xff] }
 0x7d2   : > { %v8878_v5 = vpop.eup %8877  ;;  %v2902_v1 = vadd.f32 1.0, %v8876_v58  ;;  %8895 = vpow2.f32 %v6980_v6  ;;  %3102 = vmatmul.mubr.f32.vlgmr.msra.gmra.mrb[2].mxu0 %v2957_v31  ;;  %v2959_v45 = vadd.f32 %v2943_v62, %v11146_v4  ;;  %v9007_v58 = vld [vmem:[%s10388_s9 + $0x68] sm:$0xff] }
 0x7d3   : > { %v8880_v48 = vpop.eup %8879  ;;  %v2903_v29 = vadd.f32 1.0, %v8878_v5  ;;  %8897 = vpow2.f32 %v6981_v9  ;;  %v2960_v20 = vadd.f32 %v2944_v50, %v11149_v63  ;;  %v9005_v9 = vld [vmem:[%s10388_s9 + $0x58] sm:$0xff] }
 0x7d4   : > { %v8882_v44 = vpop.eup %8881  ;;  %8899 = vrcp.f32 %v2902_v1  ;;  %v2945_v19 = vmul.f32 %v8998_v30, %v8880_v48  ;;  %v9008_v1 = vld [vmem:[%s10388_s9 + $0x70] sm:$0xff]  ;;  %v9009_v48 = vld [vmem:[%s10388_s9 + $0x78] sm:$0xff] }
 0x7d5   : > { %v8884_v0 = vpop.eup %8883  ;;  %8901 = vrcp.f32 %v2903_v29  ;;  %3107 = vmatprep.mubr.f32.mxu0 %v2960_v20  ;;  %v2946_v17 = vmul.f32 %v8999_v49, %v8882_v44 }
 0x7d6   : > { %v8886_v12 = vpop.eup %8885  ;;  %v2904_v54 = vadd.f32 1.0, %v8884_v0  ;;  %3108 = vmatmul.mubr.f32.gmra.mrb[4].mxu0 %v2959_v45  ;;  %v2961_v4 = vadd.f32 %v2945_v19, %v11154_v38  ;;  %v9001_v38 = vld [vmem:[%s10388_s9 + $0x38] sm:$0xff] }
 0x7d7   : > { %v8888_v2 = vpop.eup %8887  ;;  %v2905_v11 = vadd.f32 1.0, %v8886_v12  ;;  %v2962_v63 = vadd.f32 %v2946_v17, %v11157_v51  ;;  %v9002_v51 = vld [vmem:[%s10388_s9 + $0x40] sm:$0xff] }
 0x7d8   : > { %v8890_v25 = vpop.eup %8889  ;;  %8903 = vrcp.f32 %v2904_v54  ;;  %v2947_v57 = vmul.f32 %v9000_v53, %v8888_v2 }
 0x7d9   : > { %8905 = vrcp.f32 %v2905_v11  ;;  %v2906_v16 = vadd.f32 1.0, %v8890_v25  ;;  %3113 = vmatprep.mubr.f32.mxu0 %v2962_v63 }
 0x7da   : > { %v8892_v56 = vpop.eup %8891  ;;  %3114 = vmatmul.mubr.f32.gmra.mrb[6].mxu0 %v2961_v4  ;;  %v2963_v3 = vadd.f32 %v2947_v57, %v11161_v28  ;;  %v9003_v28 = vld [vmem:[%s10388_s9 + $0x48] sm:$0xff] }
 0x7db   : > { %v8894_v13 = vpop.eup %8893  ;;  %8907 = vrcp.f32 %v2906_v16  ;;  %v2948_v60 = vmul.f32 %v9001_v38, %v8892_v56 }
 0x7dc   : > { %v8896_v59 = vpop.eup %8895  ;;  %v2949_v61 = vmul.f32 %v9002_v51, %v8894_v13 }
 0x7dd   : > { %v8898_v43 = vpop.eup %8897  ;;  %v2907_v21 = vadd.f32 1.0, %v8896_v59  ;;  %v2964_v26 = vadd.f32 %v2948_v60, %v11166_v15 }
 0x7de   : > { %v8900_v8 = vpop.eup %8899  ;;  %v2908_v23 = vadd.f32 1.0, %v8898_v43  ;;  %v2965_v35 = vadd.f32 %v2949_v61, %v11169_v33 }
 0x7df   : > { %v8902_v22 = vpop.eup %8901  ;;  %8909 = vrcp.f32 %v2907_v21  ;;  %3119 = vmatprep.mubr.f32.mxu0 %v2964_v26  ;;  %v2950_v36 = vmul.f32 %v9003_v28, %v8900_v8 }
 0x7e0   : > { %8911 = vrcp.f32 %v2908_v23  ;;  %3120 = vmatmul.mubr.f32.gmra.mrb[8].mxu0 %v2963_v3  ;;  %v2951_v6 = vmul.f32 %v9004_v37, %v8902_v22 }
 0x7e1   : > { %v2966_v31 = vadd.f32 %v2950_v36, %v11174_v24 }
 0x7e2   : > { %v8904_v47 = vpop.eup %8903  ;;  %v2967_v15 = vadd.f32 %v2951_v6, %v11177_v34 }
 0x7e3   : > { %v8906_v18 = vpop.eup %8905  ;;  %3125 = vmatprep.mubr.f32.mxu0 %v2966_v31  ;;  %v2952_v33 = vmul.f32 %v9005_v9, %v8904_v47 }
 0x7e4   : > { %3126 = vmatmul.mubr.f32.gmra.mrb[10].mxu0 %v2965_v35  ;;  %v2953_v7 = vmul.f32 %v9006_v32, %v8906_v18 }
 0x7e5   : > { %v8908_v42 = vpop.eup %8907  ;;  %v2968_v62 = vadd.f32 %v2952_v33, %v11182_v41 }
 0x7e6   : > { %v2954_v27 = vmul.f32 %v9007_v58, %v8908_v42  ;;  %v2969_v50 = vadd.f32 %v2953_v7, %v11186_v52 }
 0x7e7   : > { %3131 = vmatprep.mubr.f32.mxu0 %v2968_v62 }
 0x7e8   : > { %3132 = vmatmul.mubr.f32.gmra.mrb[12].mxu0 %v2967_v15  ;;  %v2970_v24 = vadd.f32 %v2954_v27, %v11190_v55 }
 0x7e9   : > { %v8910_v34 = vpop.eup %8909 }
 0x7ea   : > { %v8912_v5 = vpop.eup %8911  ;;  %3137 = vmatprep.mubr.f32.mxu0 %v2970_v24  ;;  %v2955_v45 = vmul.f32 %v9008_v1, %v8910_v34 }
 0x7eb   : > { %v2956_v29 = vmul.f32 %v9009_v48, %v8912_v5 }
 0x7ec   : > { %3138 = vmatmul.mubr.f32.gmra.mrb[14].mxu0 %v2969_v50  ;;  %v2971_v20 = vadd.f32 %v2955_v45, %v11198_v46 }
 0x7ed   : > { %v2972_v41 = vadd.f32 %v2956_v29, %v11203_v10 }
 0x7ef   : > { %3143 = vmatprep.mubr.f32.mxu0 %v2972_v41 }
 0x7f0   : > { %3144 = vmatmul.mubr.f32.gmra.mrb[16].mxu0 %v2971_v20 }
 0x8a5   : > { %v3103_v44 = vpop.f32.mrb[2].mxu0 }
 0x8a6   : > { %v3105_v52 = vpop.f32.mrb[3].mxu0 }
 0x8a7   : > { %v3152_v30 = vadd.f32 %v3105_v52, %v3103_v44 }
 0x8a9   : > { %3153 = vadd.xlane.f32.xlu0 %v3152_v30  ;;  %v3109_v19 = vpop.f32.mrb[4].mxu0 }
 0x8aa   : > { %v3111_v55 = vpop.f32.mrb[5].mxu0 }
 0x8ab   : > { %v3155_v0 = vadd.f32 %v3111_v55, %v3109_v19 }
 0x8ad   : > { %3156 = vadd.xlane.f32.xlu0 %v3155_v0  ;;  %v3115_v49 = vpop.f32.mrb[6].mxu0 }
 0x8ae   : > { %v3117_v17 = vpop.f32.mrb[7].mxu0 }
 0x8af   : > { %v3158_v12 = vadd.f32 %v3117_v17, %v3115_v49 }
 0x8b1   : > { %3159 = vadd.xlane.f32.xlu1 %v3158_v12 }
 0x8b3   : > { %v3121_v54 = vpop.f32.mrb[8].mxu0 }
 0x8b4   : > { %v3123_v4 = vpop.f32.mrb[9].mxu0 }
 0x8b5   : > { %v3161_v2 = vadd.f32 %v3123_v4, %v3121_v54 }
 0x8b7   : > { %3162 = vadd.xlane.f32.xlu1 %v3161_v2  ;;  %v3127_v46 = vpop.f32.mrb[10].mxu0 }
 0x8b8   : > { %v3129_v10 = vpop.f32.mrb[11].mxu0 }
 0x8b9   : > { %v3164_v11 = vadd.f32 %v3129_v10, %v3127_v46 }
 0x8bb   : > { %3165 = vadd.xlane.f32.xlu0 %v3164_v11  ;;  %v3133_v63 = vpop.f32.mrb[12].mxu0 }
 0x8bc   : > { %v3135_v25 = vpop.f32.mrb[13].mxu0 }
 0x8bd   : > { %v3167_v53 = vadd.f32 %v3135_v25, %v3133_v63 }
 0x8bf   : > { %3168 = vadd.xlane.f32.xlu1 %v3167_v53  ;;  %v3139_v57 = vpop.f32.mrb[14].mxu0 }
 0x8c0   : > { %v3141_v16 = vpop.f32.mrb[15].mxu0 }
 0x8c1   : > { %v3170_v56 = vadd.f32 %v3141_v16, %v3139_v57 }
 0x8c3   : > { %3171 = vadd.xlane.f32.xlu0 %v3170_v56  ;;  %v3145_v3 = vpop.f32.mrb[16].mxu0 }
 0x8c4   : > { %v3147_v13 = vpop.f32.mrb[17].mxu0 }
 0x8c5   : > { %v3173_v38 = vadd.f32 %v3147_v13, %v3145_v3 }
 0x8c7   : > { %3174 = vadd.xlane.f32.xlu1 %v3173_v38 }
 0x936   : > { %v3154_v60 = vpop.xlane.xlu0 %3153 }
 0x937   : > { %v3177_v59 = vmul.f32 0.00390625, %v3154_v60 }
 0x939   : > { %v11253_v51 = vsub.f32 %v3103_v44, %v3177_v59  ;;  %v11255_v61 = vsub.f32 %v3105_v52, %v3177_v59 }
 0x93a   : > { %v3157_v43 = vpop.xlane.xlu0 %3156 }
 0x93b   : > { %v3178_v21 = vmul.f32 0.00390625, %v3157_v43  ;;  %v3201_v26 = vmul.f32 %v11253_v51, %v11253_v51  ;;  %v3202_v8 = vmul.f32 %v11255_v61, %v11255_v61 }
 0x93d   : > { %v11261_v23 = vsub.f32 %v3109_v19, %v3178_v21  ;;  %v11263_v35 = vsub.f32 %v3111_v55, %v3178_v21  ;;  %v3217_v22 = vadd.f32 %v3202_v8, %v3201_v26  ;;  %v3150_v26 = vld [vmem:[#allocation23] sm:$0x3] }
 0x93e   : > { %v3160_v28 = vpop.xlane.xlu1 %3159 }
 0x93f   : > { %v3179_v36 = vmul.f32 0.00390625, %v3160_v28  ;;  %3218 = vadd.xlane.f32.xlu0 %v3217_v22  ;;  %v3203_v37 = vmul.f32 %v11261_v23, %v11261_v23  ;;  %v3204_v6 = vmul.f32 %v11263_v35, %v11263_v35 }
 0x941   : > { %v11269_v31 = vsub.f32 %v3115_v49, %v3179_v36  ;;  %v11271_v47 = vsub.f32 %v3117_v17, %v3179_v36  ;;  %v3220_v15 = vadd.f32 %v3204_v6, %v3203_v37  ;;  %v3151_v36 = vld [vmem:[#allocation25] sm:$0x3]  ;;  %v11318_v37 = vrot.slane %v3150_v26, %v10804_v39 }
 0x942   : > { %v11321_v6 = vrot.slane %v3150_v26, %v10807_v40 }
 0x943   : > { %3221 = vadd.xlane.f32.xlu1 %v3220_v15  ;;  %v3205_v18 = vmul.f32 %v11269_v31, %v11269_v31  ;;  %v3206_v9 = vmul.f32 %v11271_v47, %v11271_v47 }
 0x944   : > { %v3163_v33 = vpop.xlane.xlu1 %3162 }
 0x945   : > { %v3180_v32 = vmul.f32 0.00390625, %v3163_v33  ;;  %v3223_v7 = vadd.f32 %v3206_v9, %v3205_v18 }
 0x947   : > { %v11277_v42 = vsub.f32 %v3121_v54, %v3180_v32  ;;  %v11279_v62 = vsub.f32 %v3123_v4, %v3180_v32  ;;  %3224 = vadd.xlane.f32.xlu0 %v3223_v7  ;;  %v11326_v7 = vrot.slane %v3151_v36, %v10804_v39 }
 0x948   : > { %v3166_v58 = vpop.xlane.xlu0 %3165 }
 0x949   : > { %v3181_v27 = vmul.f32 0.00390625, %v3166_v58  ;;  %v3207_v50 = vmul.f32 %v11277_v42, %v11277_v42  ;;  %v3208_v24 = vmul.f32 %v11279_v62, %v11279_v62  ;;  %v11329_v58 = vrot.slane %v3151_v36, %v10807_v40 }
 0x94b   : > { %v11285_v34 = vsub.f32 %v3127_v46, %v3181_v27  ;;  %v11287_v5 = vsub.f32 %v3129_v10, %v3181_v27  ;;  %v3226_v1 = vadd.f32 %v3208_v24, %v3207_v50 }
 0x94c   : > { %v3169_v45 = vpop.xlane.xlu1 %3168 }
 0x94d   : > { %v3182_v48 = vmul.f32 0.00390625, %v3169_v45  ;;  %3227 = vadd.xlane.f32.xlu1 %v3226_v1  ;;  %v3209_v29 = vmul.f32 %v11285_v34, %v11285_v34  ;;  %v3210_v20 = vmul.f32 %v11287_v5, %v11287_v5 }
 0x94f   : > { %v11293_v41 = vsub.f32 %v3133_v63, %v3182_v48  ;;  %v11295_v44 = vsub.f32 %v3135_v25, %v3182_v48  ;;  %v3229_v52 = vadd.f32 %v3210_v20, %v3209_v29 }
 0x950   : > { %v3172_v30 = vpop.xlane.xlu0 %3171 }
 0x951   : > { %v3183_v19 = vmul.f32 0.00390625, %v3172_v30  ;;  %3230 = vadd.xlane.f32.xlu0 %v3229_v52  ;;  %v3211_v55 = vmul.f32 %v11293_v41, %v11293_v41  ;;  %v3212_v0 = vmul.f32 %v11295_v44, %v11295_v44 }
 0x953   : > { %v11301_v49 = vsub.f32 %v3139_v57, %v3183_v19  ;;  %v11303_v17 = vsub.f32 %v3141_v16, %v3183_v19  ;;  %v3232_v12 = vadd.f32 %v3212_v0, %v3211_v55 }
 0x954   : > { %v3175_v54 = vpop.xlane.xlu1 %3174 }
 0x955   : > { %v3184_v4 = vmul.f32 0.00390625, %v3175_v54  ;;  %3233 = vadd.xlane.f32.xlu1 %v3232_v12  ;;  %v3213_v2 = vmul.f32 %v11301_v49, %v11301_v49  ;;  %v3214_v46 = vmul.f32 %v11303_v17, %v11303_v17 }
 0x957   : > { %v11309_v10 = vsub.f32 %v3145_v3, %v3184_v4  ;;  %v11311_v11 = vsub.f32 %v3147_v13, %v3184_v4  ;;  %v3235_v63 = vadd.f32 %v3214_v46, %v3213_v2 }
 0x959   : > { %3236 = vadd.xlane.f32.xlu0 %v3235_v63  ;;  %v3215_v25 = vmul.f32 %v11309_v10, %v11309_v10  ;;  %v3216_v53 = vmul.f32 %v11311_v11, %v11311_v11 }
 0x95b   : > { %v3238_v57 = vadd.f32 %v3216_v53, %v3215_v25 }
 0x95d   : > { %3239 = vadd.xlane.f32.xlu1 %v3238_v57 }
 0x9cc   : > { %v3219_v16 = vpop.xlane.xlu0 %3218 }
 0x9cd   : > { %v3241_v56 = vmul.f32 0.00390625, %v3219_v16 }
 0x9cf   : > { %v3249_v38 = vadd.f32 1e-06, %v3241_v56 }
 0x9d0   : > { %v3222_v60 = vpop.xlane.xlu1 %3221 }
 0x9d1   : > { %8913 = vrsqrt.f32 %v3249_v38  ;;  %v3242_v59 = vmul.f32 0.00390625, %v3222_v60 }
 0x9d3   : > { %v3250_v3 = vadd.f32 1e-06, %v3242_v59 }
 0x9d4   : > { %v3225_v43 = vpop.xlane.xlu0 %3224 }
 0x9d5   : > { %8915 = vrsqrt.f32 %v3250_v3  ;;  %v3243_v13 = vmul.f32 0.00390625, %v3225_v43 }
 0x9d7   : > { %v3251_v21 = vadd.f32 1e-06, %v3243_v13 }
 0x9d9   : > { %8917 = vrsqrt.f32 %v3251_v21 }
 0x9da   : > { %v3228_v8 = vpop.xlane.xlu1 %3227 }
 0x9db   : > { %v8914_v22 = vpop.eup %8913  ;;  %v3244_v28 = vmul.f32 0.00390625, %v3228_v8 }
 0x9dc   : > { %v3265_v15 = vmul.f32 %v8914_v22, %v11253_v51  ;;  %v3266_v18 = vmul.f32 %v8914_v22, %v11255_v61 }
 0x9dd   : > { %v3252_v9 = vadd.f32 1e-06, %v3244_v28 }
 0x9de   : > { %v3231_v33 = vpop.xlane.xlu0 %3230  ;;  %v3292_v50 = vmul.f32 %v11318_v37, %v3265_v15  ;;  %v3293_v24 = vmul.f32 %v11321_v6, %v3266_v18 }
 0x9df   : > { %v8916_v32 = vpop.eup %8915  ;;  %8919 = vrsqrt.f32 %v3252_v9  ;;  %v3245_v27 = vmul.f32 0.00390625, %v3231_v33 }
 0x9e0   : > { %v3267_v1 = vmul.f32 %v8916_v32, %v11261_v23  ;;  %v3268_v51 = vmul.f32 %v8916_v32, %v11263_v35  ;;  %v3319_v30 = vadd.f32 %v11326_v7, %v3292_v50  ;;  %v3320_v19 = vadd.f32 %v11329_v58, %v3293_v24 }
 0x9e1   : > { %v3253_v61 = vadd.f32 1e-06, %v3245_v27 }
 0x9e2   : > { %v3294_v45 = vmul.f32 %v11318_v37, %v3267_v1  ;;  %v3295_v48 = vmul.f32 %v11321_v6, %v3268_v51  ;;  %v3234_v29 = vpop.xlane.xlu1 %3233 }
 0x9e3   : > { %v8918_v20 = vpop.eup %8917  ;;  %8921 = vrsqrt.f32 %v3253_v61  ;;  %v3246_v52 = vmul.f32 0.00390625, %v3234_v29 }
 0x9e4   : > { %v3321_v55 = vadd.f32 %v11326_v7, %v3294_v45  ;;  %v3322_v0 = vadd.f32 %v11329_v58, %v3295_v48  ;;  %v3269_v23 = vmul.f32 %v8918_v20, %v11269_v31  ;;  %v3270_v35 = vmul.f32 %v8918_v20, %v11271_v47 }
 0x9e5   : > { %v3254_v12 = vadd.f32 1e-06, %v3246_v52 }
 0x9e6   : > { %v11343_v54 = vpack.c.bf16 %v3322_v0, %v3320_v19  ;;  %v11345_v4 = vpack.c.bf16 %v3321_v55, %v3319_v30  ;;  %v3237_v2 = vpop.xlane.xlu0 %3236  ;;  %v3296_v25 = vmul.f32 %v11318_v37, %v3269_v23  ;;  %v3297_v53 = vmul.f32 %v11321_v6, %v3270_v35  ;;  %v3340_v23 = vld [vmem:[#allocation31 + $0x28] sm:$0xff]  ;;  %v3341_v35 = vld [vmem:[#allocation31 + $0x30] sm:$0xff] }
 0x9e7   : > { %8923 = vrsqrt.f32 %v3254_v12  ;;  %v3247_v46 = vmul.f32 0.00390625, %v3237_v2  ;;  %v3342_v12 = vld [vmem:[#allocation31 + $0x38] sm:$0xff]  ;;  %v3545_v2 = vld [vmem:[#allocation31 + $0x40] sm:$0xff] }
 0x9e8   : > { %7588 = vmatprep.subr.bf16.mxu1 %v11343_v54  ;;  %v3323_v3 = vadd.f32 %v11326_v7, %v3296_v25  ;;  %v3324_v43 = vadd.f32 %v11329_v58, %v3297_v53  ;;  %v3548_v25 = vld [vmem:[#allocation31 + $0x58] sm:$0xff]  ;;  %v3549_v53 = vld [vmem:[#allocation31 + $0x60] sm:$0xff] }
 0x9e9   : > { %v8920_v63 = vpop.eup %8919  ;;  %v3255_v57 = vadd.f32 1e-06, %v3247_v46  ;;  %7590 = vmatpush1.bf16.msra.mxu1 %v11345_v4  ;;  %v3546_v46 = vld [vmem:[#allocation31 + $0x48] sm:$0xff] }
 0x9ea   : > { %v3271_v31 = vmul.f32 %v8920_v63, %v11277_v42  ;;  %v3272_v47 = vmul.f32 %v8920_v63, %v11279_v62  ;;  %v3240_v16 = vpop.xlane.xlu1 %3239  ;;  %v3547_v63 = vld [vmem:[#allocation31 + $0x50] sm:$0xff] }
 0x9eb   : > { %8925 = vrsqrt.f32 %v3255_v57  ;;  %v3248_v56 = vmul.f32 0.00390625, %v3240_v16  ;;  %v3550_v57 = vld [vmem:[#allocation31 + $0x68] sm:$0xff] }
 0x9ec   : > { %v3298_v38 = vmul.f32 %v11318_v37, %v3271_v31  ;;  %v3299_v60 = vmul.f32 %v11321_v6, %v3272_v47  ;;  %v3692_v31 = vld [vmem:[#allocation26 + $0x208] sm:$0xff]  ;;  %v3694_v47 = vld [vmem:[#allocation26 + $0x218] sm:$0xff] }
 0x9ed   : > { %v8922_v59 = vpop.eup %8921  ;;  %v3256_v13 = vadd.f32 1e-06, %v3248_v56  ;;  %v7619_v16 = vpack.c.bf16 %v3694_v47, %v3692_v31  ;;  %v3691_v56 = vld [vmem:[#allocation26 + $0x200] sm:$0xff]  ;;  %v3721_v31 = vld [vmem:[#allocation26 + $0x2f0] sm:$0xff] }
 0x9ee   : > { %v3325_v21 = vadd.f32 %v11326_v7, %v3298_v38  ;;  %v3326_v26 = vadd.f32 %v11329_v58, %v3299_v60  ;;  %v3273_v42 = vmul.f32 %v8922_v59, %v11285_v34  ;;  %v3274_v62 = vmul.f32 %v8922_v59, %v11287_v5  ;;  %v3693_v38 = vld [vmem:[#allocation26 + $0x210] sm:$0xff] }
 0x9ef   : > { %8927 = vrsqrt.f32 %v3256_v13  ;;  %v3551_v60 = vld [vmem:[#allocation31 + $0x70] sm:$0xff]  ;;  %v7621_v59 = vpack.c.bf16 %v3693_v38, %v3691_v56  ;;  %7620 = vmatprep.subr.bf16.mxu0 %v7619_v16  ;;  %v3987_v47 = vld [vmem:[#allocation31 + $0xa8] sm:$0xff] }
 0x9f0   : > { %v11361_v8 = vpack.c.bf16 %v3326_v26, %v3324_v43  ;;  %v11363_v22 = vpack.c.bf16 %v3325_v21, %v3323_v3  ;;  %v3300_v36 = vmul.f32 %v11318_v37, %v3273_v42  ;;  %v3301_v15 = vmul.f32 %v11321_v6, %v3274_v62  ;;  %v3696_v3 = vld [vmem:[#allocation26 + $0x228] sm:$0xff]  ;;  %v3698_v43 = vld [vmem:[#allocation26 + $0x238] sm:$0xff]  ;;  %v3695_v21 = vld [vmem:[#allocation26 + $0x220] sm:$0xff] }
 0x9f1   : > { %v8924_v28 = vpop.eup %8923  ;;  %7622 = vmatpush1.bf16.msra.mxu0 %v7621_v59  ;;  %v7623_v13 = vpack.c.bf16 %v3698_v43, %v3696_v3  ;;  %v3697_v26 = vld [vmem:[#allocation26 + $0x230] sm:$0xff]  ;;  %v3552_v42 = vld [vmem:[#allocation31 + $0x78] sm:$0xff]  ;;  %v3724_v56 = vld [vmem:[#allocation26 + $0x308] sm:$0xff] }
 0x9f2   : > { %v3275_v18 = vmul.f32 %v8924_v28, %v11293_v41  ;;  %v3276_v9 = vmul.f32 %v8924_v28, %v11295_v44  ;;  %7592 = vmatprep.subr.bf16.mxu1 %v11361_v8  ;;  %v3327_v32 = vadd.f32 %v11326_v7, %v3300_v36  ;;  %v3328_v27 = vadd.f32 %v11329_v58, %v3301_v15  ;;  %v3700_v28 = vld [vmem:[#allocation26 + $0x248] sm:$0xff]  ;;  %v3702_v36 = vld [vmem:[#allocation26 + $0x258] sm:$0xff]  ;;  %v3723_v59 = vld [vmem:[#allocation26 + $0x300] sm:$0xff] }
 0x9f3   : > { %7594 = vmatpush1.bf16.msra.mxu1 %v11363_v22  ;;  %v7625_v62 = vpack.c.bf16 %v3697_v26, %v3695_v21  ;;  %7624 = vmatprep.subr.bf16.mxu0 %v7623_v13  ;;  %v7627_v15 = vpack.c.bf16 %v3702_v36, %v3700_v28  ;;  %v3726_v38 = vld [vmem:[#allocation26 + $0x318] sm:$0xff]  ;;  %v3725_v3 = vld [vmem:[#allocation26 + $0x310] sm:$0xff]  ;;  %v3728_v21 = vld [vmem:[#allocation26 + $0x328] sm:$0xff] }
 0x9f4   : > { %v3302_v34 = vmul.f32 %v11318_v37, %v3275_v18  ;;  %v3303_v5 = vmul.f32 %v11321_v6, %v3276_v9  ;;  %v3699_v18 = vld [vmem:[#allocation26 + $0x240] sm:$0xff]  ;;  %v3701_v9 = vld [vmem:[#allocation26 + $0x250] sm:$0xff]  ;;  %v7653_v13 = vpack.c.bf16 %v3725_v3, %v3723_v59  ;;  %v3730_v26 = vld [vmem:[#allocation26 + $0x338] sm:$0xff] }
 0x9f5   : > { %v8926_v33 = vpop.eup %8925  ;;  %7626 = vmatpush1.bf16.msra.mxu0 %v7625_v62  ;;  %v3988_v43 = vld [vmem:[#allocation31 + $0xb0] sm:$0xff]  ;;  %v3727_v62 = vld [vmem:[#allocation26 + $0x320] sm:$0xff]  ;;  %v3481_v59 = vld [vmem:[#allocation26 + $0x8] sm:$0xff] }
 0x9f6   : > { %v3329_v50 = vadd.f32 %v11326_v7, %v3302_v34  ;;  %v3330_v24 = vadd.f32 %v11329_v58, %v3303_v5  ;;  %v3277_v41 = vmul.f32 %v8926_v33, %v11301_v49  ;;  %v3278_v44 = vmul.f32 %v8926_v33, %v11303_v17  ;;  %v3982_v34 = vld [vmem:[#allocation31 + $0x80] sm:$0xff]  ;;  %7628 = vmatprep.subr.bf16.mxu0 %v7627_v15  ;;  %v3729_v28 = vld [vmem:[#allocation26 + $0x330] sm:$0xff]  ;;  %v3989_v36 = vld [vmem:[#allocation31 + $0xb8] sm:$0xff] }
 0x9f7   : > { %v7629_v5 = vpack.c.bf16 %v3701_v9, %v3699_v18  ;;  %v3704_v33 = vld [vmem:[#allocation26 + $0x268] sm:$0xff]  ;;  %v7657_v15 = vpack.c.bf16 %v3729_v28, %v3727_v62  ;;  %v3734_v9 = vld [vmem:[#allocation26 + $0x358] sm:$0xff] }
 0x9f8   : > { %v11379_v1 = vpack.c.bf16 %v3330_v24, %v3328_v27  ;;  %v11381_v51 = vpack.c.bf16 %v3329_v50, %v3327_v32  ;;  %v3304_v45 = vmul.f32 %v11318_v37, %v3277_v41  ;;  %v3305_v48 = vmul.f32 %v11321_v6, %v3278_v44  ;;  %v3706_v32 = vld [vmem:[#allocation26 + $0x278] sm:$0xff]  ;;  %v3703_v50 = vld [vmem:[#allocation26 + $0x260] sm:$0xff]  ;;  %v3705_v24 = vld [vmem:[#allocation26 + $0x270] sm:$0xff] }
 0x9f9   : > { %v8928_v61 = vpop.eup %8927  ;;  %7630 = vmatpush1.bf16.msra.mxu0 %v7629_v5  ;;  %v7631_v27 = vpack.c.bf16 %v3706_v32, %v3704_v33  ;;  %v3983_v41 = vld [vmem:[#allocation31 + $0x88] sm:$0xff]  ;;  %v7633_v44 = vpack.c.bf16 %v3705_v24, %v3703_v50  ;;  %v3731_v5 = vld [vmem:[#allocation26 + $0x340] sm:$0xff]  ;;  %v3738_v24 = vld [vmem:[#allocation26 + $0x378] sm:$0xff] }
 0x9fa   : > { %v3279_v29 = vmul.f32 %v8928_v61, %v11309_v10  ;;  %v3280_v20 = vmul.f32 %v8928_v61, %v11311_v11  ;;  %7596 = vmatprep.subr.bf16.mxu1 %v11379_v1  ;;  %v3331_v52 = vadd.f32 %v11326_v7, %v3304_v45  ;;  %v3332_v30 = vadd.f32 %v11329_v58, %v3305_v48  ;;  %v3335_v11 = vld [vmem:[#allocation31] sm:$0xff]  ;;  %v3710_v45 = vld [vmem:[#allocation26 + $0x298] sm:$0xff]  ;;  %v3733_v33 = vld [vmem:[#allocation26 + $0x350] sm:$0xff] }
 0x9fb   : > { %7598 = vmatpush1.bf16.msra.mxu1 %v11381_v51  ;;  %7632 = vmatprep.subr.bf16.mxu0 %v7631_v27  ;;  %v3708_v61 = vld [vmem:[#allocation26 + $0x288] sm:$0xff]  ;;  %v7661_v27 = vpack.c.bf16 %v3733_v33, %v3731_v5  ;;  %v3483_v3 = vld [vmem:[#allocation26 + $0x18] sm:$0xff] }
 0x9fc   : > { %v3306_v49 = vmul.f32 %v11318_v37, %v3279_v29  ;;  %v3307_v17 = vmul.f32 %v11321_v6, %v3280_v20  ;;  %v3336_v37 = vld [vmem:[#allocation31 + $0x8] sm:$0xff]  ;;  %v3337_v6 = vld [vmem:[#allocation31 + $0x10] sm:$0xff]  ;;  %v7635_v48 = vpack.c.bf16 %v3710_v45, %v3708_v61  ;;  %v3707_v29 = vld [vmem:[#allocation26 + $0x280] sm:$0xff] }
 0x9fd   : > { %7634 = vmatpush1.bf16.msra.mxu0 %v7633_v44  ;;  %v3709_v20 = vld [vmem:[#allocation26 + $0x290] sm:$0xff]  ;;  %v3732_v18 = vld [vmem:[#allocation26 + $0x348] sm:$0xff]  ;;  %v3735_v44 = vld [vmem:[#allocation26 + $0x360] sm:$0xff] }
 0x9fe   : > { %v3333_v19 = vadd.f32 %v11326_v7, %v3306_v49  ;;  %v3334_v55 = vadd.f32 %v11329_v58, %v3307_v17  ;;  %v3338_v7 = vld [vmem:[#allocation31 + $0x18] sm:$0xff]  ;;  %v3339_v58 = vld [vmem:[#allocation31 + $0x20] sm:$0xff]  ;;  %v3984_v49 = vld [vmem:[#allocation31 + $0x90] sm:$0xff]  ;;  %v7637_v17 = vpack.c.bf16 %v3709_v20, %v3707_v29  ;;  %7636 = vmatprep.subr.bf16.mxu0 %v7635_v48 }
 0x9ff   : > { %v4322_v32 = vld [vmem:[#allocation31 + $0xc0] sm:$0xff]  ;;  %v3737_v61 = vld [vmem:[#allocation26 + $0x370] sm:$0xff]  ;;  %v3742_v20 = vld [vmem:[#allocation26 + $0x398] sm:$0xff] }
 0xa00   : > { %v11395_v0 = vpack.c.bf16 %v3334_v55, %v3332_v30  ;;  %v11397_v10 = vpack.c.bf16 %v3333_v19, %v3331_v52  ;;  %v3712_v52 = vld [vmem:[#allocation26 + $0x2a8] sm:$0xff]  ;;  %v3714_v30 = vld [vmem:[#allocation26 + $0x2b8] sm:$0xff]  ;;  %v3711_v55 = vld [vmem:[#allocation26 + $0x2a0] sm:$0xff]  ;;  %v7665_v48 = vpack.c.bf16 %v3737_v61, %v3735_v44 }
 0xa01   : > { %7638 = vmatpush1.bf16.msra.mxu0 %v7637_v17  ;;  %v7639_v19 = vpack.c.bf16 %v3714_v30, %v3712_v52  ;;  %v3736_v50 = vld [vmem:[#allocation26 + $0x368] sm:$0xff]  ;;  %v3739_v17 = vld [vmem:[#allocation26 + $0x380] sm:$0xff]  ;;  %v3741_v52 = vld [vmem:[#allocation26 + $0x390] sm:$0xff] }
 0xa02   : > { %7600 = vmatprep.subr.bf16.mxu1 %v11395_v0  ;;  %v4323_v45 = vld [vmem:[#allocation31 + $0xc8] sm:$0xff]  ;;  %v4324_v30 = vld [vmem:[#allocation31 + $0xd0] sm:$0xff]  ;;  %v4665_v28 = vld [vmem:[#allocation31 + $0x118] sm:$0xff] }
 0xa03   : > { %7602 = vmatpush1.bf16.msra.mxu1 %v11397_v10  ;;  %7640 = vmatprep.subr.bf16.mxu0 %v7639_v19  ;;  %v3740_v29 = vld [vmem:[#allocation26 + $0x388] sm:$0xff]  ;;  %v7669_v19 = vpack.c.bf16 %v3741_v52, %v3739_v17  ;;  %v4664_v62 = vld [vmem:[#allocation31 + $0x110] sm:$0xff] }
 0xa04   : > { %7604 = vmatprep.subr.bf16.mxu1 %v11343_v54  ;;  %v5003_v5 = vld [vmem:[#allocation31 + $0x148] sm:$0xff]  ;;  %v5004_v33 = vld [vmem:[#allocation31 + $0x150] sm:$0xff]  ;;  %v5342_v44 = vld [vmem:[#allocation31 + $0x180] sm:$0xff] }
 0xa05   : > { %v5343_v61 = vld [vmem:[#allocation31 + $0x188] sm:$0xff]  ;;  %v5348_v52 = vld [vmem:[#allocation31 + $0x1b0] sm:$0xff] }
 0xa06   : > { %6982 = vmatmul.mubr.msk.f32.vlgmr.msra.gmra.mrb[100].mxu1 %vm1283_vm0, %v3335_v11  ;;  %v3713_v11 = vld [vmem:[#allocation26 + $0x2b0] sm:$0xff] }
 0xa07   : > { %7606 = vmatpush1.bf16.msra.mxu1 %v11345_v4  ;;  %3437 = vmatprep.mubr.f32.mxu1 %v9683_v14 }
 0xa08   : > { %7608 = vmatprep.subr.bf16.mxu1 %v11361_v8 }
 0xa0a   : > { %6983 = vmatmul.mubr.msk.f32.gmra.mrb[102].mxu1 %vm1283_vm0, %v3336_v37  ;;  %v3985_v37 = vld [vmem:[#allocation31 + $0x98] sm:$0xff] }
 0xa0b   : > { %7610 = vmatpush1.bf16.msra.mxu1 %v11363_v22  ;;  %3443 = vmatprep.mubr.f32.mxu1 %v9683_v14 }
 0xa0c   : > { %7612 = vmatprep.subr.bf16.mxu1 %v11379_v1 }
 0xa0e   : > { %6984 = vmatmul.mubr.msk.f32.gmra.mrb[104].mxu1 %vm1283_vm0, %v3337_v6  ;;  %v7641_v6 = vpack.c.bf16 %v3713_v11, %v3711_v55  ;;  %v3744_v55 = vld [vmem:[#allocation26 + $0x3a8] sm:$0xff]  ;;  %v3746_v11 = vld [vmem:[#allocation26 + $0x3b8] sm:$0xff] }
 0xa0f   : > { %7614 = vmatpush1.bf16.msra.mxu1 %v11381_v51  ;;  %3449 = vmatprep.mubr.f32.mxu1 %v9683_v14 }
 0xa10   : > { %7616 = vmatprep.subr.bf16.mxu1 %v11395_v0  ;;  %7642 = vmatpush1.bf16.msra.mxu0 %v7641_v6  ;;  %v3743_v6 = vld [vmem:[#allocation26 + $0x3a0] sm:$0xff] }
 0xa12   : > { %6985 = vmatmul.mubr.msk.f32.gmra.mrb[106].mxu1 %vm1283_vm0, %v3338_v7  ;;  %v3716_v7 = vld [vmem:[#allocation26 + $0x2c8] sm:$0xff] }
 0xa13   : > { %7618 = vmatpush1.bf16.msra.mxu1 %v11397_v10  ;;  %3455 = vmatprep.mubr.f32.mxu1 %v9683_v14 }
 0xa14   : > { %7748 = vmatprep.subr.bf16.mxu1 %v11343_v54 }
 0xa16   : > { %6986 = vmatmul.mubr.msk.f32.gmra.mrb[108].mxu1 %vm1283_vm0, %v3339_v58  ;;  %v3718_v58 = vld [vmem:[#allocation26 + $0x2d8] sm:$0xff] }
 0xa17   : > { %3461 = vmatprep.mubr.f32.mxu1 %v9683_v14 }
 0xa1a   : > { %6987 = vmatmul.mubr.msk.f32.gmra.mrb[110].mxu1 %vm1283_vm0, %v3340_v23  ;;  %v7643_v23 = vpack.c.bf16 %v3718_v58, %v3716_v7  ;;  %v3745_v7 = vld [vmem:[#allocation26 + $0x3b0] sm:$0xff]  ;;  %v4325_v58 = vld [vmem:[#allocation31 + $0xd8] sm:$0xff] }
 0xa1b   : > { %3467 = vmatprep.mubr.f32.mxu1 %v9683_v14 }
 0xa1c   : > { %7644 = vmatprep.subr.bf16.mxu0 %v7643_v23  ;;  %v7673_v23 = vpack.c.bf16 %v3745_v7, %v3743_v6 }
 0xa1e   : > { %6988 = vmatmul.mubr.msk.f32.gmra.mrb[112].mxu1 %vm1283_vm0, %v3341_v35  ;;  %v3715_v35 = vld [vmem:[#allocation26 + $0x2c0] sm:$0xff] }
 0xa1f   : > { %3473 = vmatprep.mubr.f32.mxu1 %v9683_v14 }
 0xa22   : > { %6989 = vmatmul.mubr.msk.f32.gmra.mrb[114].mxu1 %vm1283_vm0, %v3342_v12  ;;  %v3717_v12 = vld [vmem:[#allocation26 + $0x2d0] sm:$0xff] }
 0xa23   : > { %3641 = vmatprep.mubr.f32.mxu1 %v9683_v14 }
 0xa26   : > { %6990 = vmatmul.mubr.msk.f32.vlgmr.msra.gmra.mrb[116].mxu1 %vm1283_vm0, %v3545_v2  ;;  %v3986_v2 = vld [vmem:[#allocation31 + $0xa0] sm:$0xff] }
 0xa27   : > { %7750 = vmatpush1.bf16.msra.mxu1 %v11345_v4  ;;  %3647 = vmatprep.mubr.f32.mxu1 %v9683_v14 }
 0xa28   : > { %7752 = vmatprep.subr.bf16.mxu1 %v11361_v8 }
 0xa2a   : > { %6991 = vmatmul.mubr.msk.f32.gmra.mrb[118].mxu1 %vm1283_vm0, %v3546_v46  ;;  %v7645_v46 = vpack.c.bf16 %v3717_v12, %v3715_v35  ;;  %v3748_v35 = vld [vmem:[#allocation26 + $0x3c8] sm:$0xff]  ;;  %v3750_v12 = vld [vmem:[#allocation26 + $0x3d8] sm:$0xff] }
 0xa2b   : > { %7754 = vmatpush1.bf16.msra.mxu1 %v11363_v22  ;;  %3653 = vmatprep.mubr.f32.mxu1 %v9683_v14 }
 0xa2c   : > { %7756 = vmatprep.subr.bf16.mxu1 %v11379_v1  ;;  %7646 = vmatpush1.bf16.msra.mxu0 %v7645_v46  ;;  %v3747_v46 = vld [vmem:[#allocation26 + $0x3c0] sm:$0xff] }
 0xa2e   : > { %6992 = vmatmul.mubr.msk.f32.gmra.mrb[120].mxu1 %vm1283_vm0, %v3547_v63  ;;  %v3720_v63 = vld [vmem:[#allocation26 + $0x2e8] sm:$0xff] }
 0xa2f   : > { %7758 = vmatpush1.bf16.msra.mxu1 %v11381_v51  ;;  %3659 = vmatprep.mubr.f32.mxu1 %v9683_v14 }
 0xa30   : > { %7760 = vmatprep.subr.bf16.mxu1 %v11395_v0 }
 0xa32   : > { %6993 = vmatmul.mubr.msk.f32.gmra.mrb[122].mxu1 %vm1283_vm0, %v3548_v25  ;;  %v3722_v25 = vld [vmem:[#allocation26 + $0x2f8] sm:$0xff] }
 0xa33   : > { %7762 = vmatpush1.bf16.msra.mxu1 %v11397_v10  ;;  %3665 = vmatprep.mubr.f32.mxu1 %v9683_v14 }
 0xa34   : > { %7828 = vmatprep.subr.bf16.mxu1 %v11343_v54 }
 0xa36   : > { %6994 = vmatmul.mubr.msk.f32.gmra.mrb[124].mxu1 %vm1283_vm0, %v3549_v53  ;;  %v7647_v53 = vpack.c.bf16 %v3722_v25, %v3720_v63  ;;  %v3749_v63 = vld [vmem:[#allocation26 + $0x3d0] sm:$0xff]  ;;  %v4326_v25 = vld [vmem:[#allocation31 + $0xe0] sm:$0xff] }
 0xa37   : > { %3671 = vmatprep.mubr.f32.mxu1 %v9683_v14 }
 0xa38   : > { %7648 = vmatprep.subr.bf16.mxu0 %v7647_v53  ;;  %v7677_v53 = vpack.c.bf16 %v3749_v63, %v3747_v46  ;;  %v3485_v63 = vld [vmem:[#allocation26 + $0x28] sm:$0xff] }
 0xa3a   : > { %6995 = vmatmul.mubr.msk.f32.gmra.mrb[126].mxu1 %vm1283_vm0, %v3550_v57  ;;  %v3719_v57 = vld [vmem:[#allocation26 + $0x2e0] sm:$0xff] }
 0xa3b   : > { %3677 = vmatprep.mubr.f32.mxu1 %v9683_v14  ;;  %v7649_v16 = vpack.c.bf16 %v3721_v31, %v3719_v57  ;;  %v3752_v57 = vld [vmem:[#allocation26 + $0x3e8] sm:$0xff]  ;;  %v3754_v31 = vld [vmem:[#allocation26 + $0x3f8] sm:$0xff] }
 0xa3d   : > { %7650 = vmatpush1.bf16.msra.mxu0 %v7649_v16  ;;  %v3751_v16 = vld [vmem:[#allocation26 + $0x3e0] sm:$0xff] }
 0xa3e   : > { %6996 = vmatmul.mubr.msk.f32.gmra.mrb[128].mxu1 %vm1283_vm0, %v3551_v60  ;;  %v7651_v60 = vpack.c.bf16 %v3726_v38, %v3724_v56  ;;  %v3753_v56 = vld [vmem:[#allocation26 + $0x3f0] sm:$0xff] }
 0xa3f   : > { %3683 = vmatprep.mubr.f32.mxu1 %v9683_v14  ;;  %v4327_v38 = vld [vmem:[#allocation31 + $0xe8] sm:$0xff] }
 0xa40   : > { %7652 = vmatprep.subr.bf16.mxu0 %v7651_v60  ;;  %v7681_v60 = vpack.c.bf16 %v3753_v56, %v3751_v16  ;;  %v3489_v16 = vld [vmem:[#allocation26 + $0x48] sm:$0xff]  ;;  %v3491_v56 = vld [vmem:[#allocation26 + $0x58] sm:$0xff] }
 0xa41   : > { %7654 = vmatpush1.bf16.msra.mxu0 %v7653_v13  ;;  %v4328_v13 = vld [vmem:[#allocation31 + $0xf0] sm:$0xff] }
 0xa42   : > { %6997 = vmatmul.mubr.msk.f32.gmra.mrb[130].mxu1 %vm1283_vm0, %v3552_v42  ;;  %v7655_v42 = vpack.c.bf16 %v3730_v26, %v3728_v21  ;;  %v4329_v21 = vld [vmem:[#allocation31 + $0xf8] sm:$0xff]  ;;  %v4662_v26 = vld [vmem:[#allocation31 + $0x100] sm:$0xff] }
 0xa43   : > { %4078 = vmatprep.mubr.f32.mxu1 %v9683_v14 }
 0xa44   : > { %7656 = vmatprep.subr.bf16.mxu0 %v7655_v42  ;;  %v4663_v42 = vld [vmem:[#allocation31 + $0x108] sm:$0xff] }
 0xa45   : > { %7658 = vmatpush1.bf16.msra.mxu0 %v7657_v15  ;;  %v4667_v15 = vld [vmem:[#allocation31 + $0x128] sm:$0xff] }
 0xa46   : > { %6998 = vmatmul.mubr.msk.f32.vlgmr.msra.gmra.mrb[132].mxu1 %vm1283_vm0, %v3982_v34  ;;  %v7659_v34 = vpack.c.bf16 %v3734_v9, %v3732_v18  ;;  %v4668_v18 = vld [vmem:[#allocation31 + $0x130] sm:$0xff]  ;;  %v4669_v9 = vld [vmem:[#allocation31 + $0x138] sm:$0xff] }
 0xa47   : > { %7830 = vmatpush1.bf16.msra.mxu1 %v11345_v4  ;;  %4084 = vmatprep.mubr.f32.mxu1 %v9683_v14 }
 0xa48   : > { %7832 = vmatprep.subr.bf16.mxu1 %v11361_v8  ;;  %7660 = vmatprep.subr.bf16.mxu0 %v7659_v34  ;;  %v5002_v34 = vld [vmem:[#allocation31 + $0x140] sm:$0xff] }
 0xa49   : > { %7662 = vmatpush1.bf16.msra.mxu0 %v7661_v27  ;;  %v5006_v27 = vld [vmem:[#allocation31 + $0x160] sm:$0xff] }
 0xa4a   : > { %6999 = vmatmul.mubr.msk.f32.gmra.mrb[134].mxu1 %vm1283_vm0, %v3983_v41  ;;  %v7663_v41 = vpack.c.bf16 %v3738_v24, %v3736_v50  ;;  %v5007_v50 = vld [vmem:[#allocation31 + $0x168] sm:$0xff]  ;;  %v5008_v24 = vld [vmem:[#allocation31 + $0x170] sm:$0xff] }
 0xa4b   : > { %7834 = vmatpush1.bf16.msra.mxu1 %v11363_v22  ;;  %4090 = vmatprep.mubr.f32.mxu1 %v9683_v14 }
 0xa4c   : > { %7836 = vmatprep.subr.bf16.mxu1 %v11379_v1  ;;  %7664 = vmatprep.subr.bf16.mxu0 %v7663_v41  ;;  %v5009_v41 = vld [vmem:[#allocation31 + $0x178] sm:$0xff] }
 0xa4d   : > { %7666 = vmatpush1.bf16.msra.mxu0 %v7665_v48  ;;  %v5345_v48 = vld [vmem:[#allocation31 + $0x198] sm:$0xff] }
 0xa4e   : > { %7000 = vmatmul.mubr.msk.f32.gmra.mrb[136].mxu1 %vm1283_vm0, %v3984_v49  ;;  %v7667_v49 = vpack.c.bf16 %v3742_v20, %v3740_v29  ;;  %v5346_v29 = vld [vmem:[#allocation31 + $0x1a0] sm:$0xff]  ;;  %v5347_v20 = vld [vmem:[#allocation31 + $0x1a8] sm:$0xff] }
 0xa4f   : > { %7838 = vmatpush1.bf16.msra.mxu1 %v11381_v51  ;;  %4096 = vmatprep.mubr.f32.mxu1 %v9683_v14 }
 0xa50   : > { %7840 = vmatprep.subr.bf16.mxu1 %v11395_v0  ;;  %7668 = vmatprep.subr.bf16.mxu0 %v7667_v49 }
 0xa51   : > { %7670 = vmatpush1.bf16.msra.mxu0 %v7669_v19 }
 0xa52   : > { %7001 = vmatmul.mubr.msk.f32.gmra.mrb[138].mxu1 %vm1283_vm0, %v3985_v37  ;;  %v7671_v37 = vpack.c.bf16 %v3746_v11, %v3744_v55 }
 0xa53   : > { %7842 = vmatpush1.bf16.msra.mxu1 %v11397_v10  ;;  %4102 = vmatprep.mubr.f32.mxu1 %v9683_v14 }
 0xa54   : > { %7908 = vmatprep.subr.bf16.mxu1 %v11343_v54  ;;  %7672 = vmatprep.subr.bf16.mxu0 %v7671_v37  ;;  %v5682_v37 = vld [vmem:[#allocation31 + $0x1c0] sm:$0xff] }
 0xa55   : > { %7674 = vmatpush1.bf16.msra.mxu0 %v7673_v23 }
 0xa56   : > { %7002 = vmatmul.mubr.msk.f32.gmra.mrb[140].mxu1 %vm1283_vm0, %v3986_v2  ;;  %v7675_v2 = vpack.c.bf16 %v3750_v12, %v3748_v35 }
 0xa57   : > { %4108 = vmatprep.mubr.f32.mxu1 %v9683_v14 }
 0xa58   : > { %7676 = vmatprep.subr.bf16.mxu0 %v7675_v2 }
 0xa59   : > { %7678 = vmatpush1.bf16.msra.mxu0 %v7677_v53 }
 0xa5a   : > { %7003 = vmatmul.mubr.msk.f32.gmra.mrb[142].mxu1 %vm1283_vm0, %v3987_v47  ;;  %v7679_v47 = vpack.c.bf16 %v3754_v31, %v3752_v57 }
 0xa5b   : > { %4114 = vmatprep.mubr.f32.mxu1 %v9683_v14 }
 0xa5c   : > { %7680 = vmatprep.subr.bf16.mxu0 %v7679_v47  ;;  %v3484_v47 = vld [vmem:[#allocation26 + $0x20] sm:$0xff] }
 0xa5d   : > { %7682 = vmatpush1.bf16.msra.mxu0 %v7681_v60 }
 0xa5e   : > { %7004 = vmatmul.mubr.msk.f32.gmra.mrb[144].mxu1 %vm1283_vm0, %v3988_v43  ;;  %v7683_v43 = vpack.c.bf16 %v3483_v3, %v3481_v59  ;;  %v7691_v59 = vpack.c.bf16 %v3491_v56, %v3489_v16  ;;  %v3488_v3 = vld [vmem:[#allocation26 + $0x40] sm:$0xff] }
 0xa5f   : > { %4120 = vmatprep.mubr.f32.mxu1 %v9683_v14  ;;  %v3508_v56 = vld [vmem:[#allocation26 + $0xe0] sm:$0xff] }
 0xa60   : > { %7684 = vmatprep.subr.bf16.mxu0 %v7683_v43  ;;  %v3490_v43 = vld [vmem:[#allocation26 + $0x50] sm:$0xff] }
 0xa62   : > { %7005 = vmatmul.mubr.msk.f32.gmra.mrb[146].mxu1 %vm1283_vm0, %v3989_v36  ;;  %v4666_v36 = vld [vmem:[#allocation31 + $0x120] sm:$0xff] }
 0xa63   : > { %4418 = vmatprep.mubr.f32.mxu1 %v9683_v14 }
 0xa66   : > { %7006 = vmatmul.mubr.msk.f32.vlgmr.msra.gmra.mrb[148].mxu1 %vm1283_vm0, %v4322_v32  ;;  %v5005_v32 = vld [vmem:[#allocation31 + $0x158] sm:$0xff] }
 0xa67   : > { %7910 = vmatpush1.bf16.msra.mxu1 %v11345_v4  ;;  %4424 = vmatprep.mubr.f32.mxu1 %v9683_v14 }
 0xa68   : > { %7912 = vmatprep.subr.bf16.mxu1 %v11361_v8 }
 0xa6a   : > { %7007 = vmatmul.mubr.msk.f32.gmra.mrb[150].mxu1 %vm1283_vm0, %v4323_v45  ;;  %v5344_v45 = vld [vmem:[#allocation31 + $0x190] sm:$0xff] }
 0xa6b   : > { %7914 = vmatpush1.bf16.msra.mxu1 %v11363_v22  ;;  %4430 = vmatprep.mubr.f32.mxu1 %v9683_v14 }
 0xa6c   : > { %7916 = vmatprep.subr.bf16.mxu1 %v11379_v1 }
 0xa6e   : > { %7008 = vmatmul.mubr.msk.f32.gmra.mrb[152].mxu1 %vm1283_vm0, %v4324_v30 }
 0xa6f   : > { %7918 = vmatpush1.bf16.msra.mxu1 %v11381_v51  ;;  %4436 = vmatprep.mubr.f32.mxu1 %v9683_v14 }
 0xa70   : > { %7920 = vmatprep.subr.bf16.mxu1 %v11395_v0 }
 0xa72   : > { %7009 = vmatmul.mubr.msk.f32.gmra.mrb[154].mxu1 %vm1283_vm0, %v4325_v58 }
 0xa73   : > { %7922 = vmatpush1.bf16.msra.mxu1 %v11397_v10  ;;  %4442 = vmatprep.mubr.f32.mxu1 %v9683_v14 }
 0xa74   : > { %7988 = vmatprep.subr.bf16.mxu1 %v11343_v54 }
 0xa76   : > { %7010 = vmatmul.mubr.msk.f32.gmra.mrb[156].mxu1 %vm1283_vm0, %v4326_v25  ;;  %v3487_v25 = vld [vmem:[#allocation26 + $0x38] sm:$0xff] }
 0xa77   : > { %4448 = vmatprep.mubr.f32.mxu1 %v9683_v14 }
 0xa7a   : > { %7011 = vmatmul.mubr.msk.f32.gmra.mrb[158].mxu1 %vm1283_vm0, %v4327_v38 }
 0xa7b   : > { %4454 = vmatprep.mubr.f32.mxu1 %v9683_v14 }
 0xa7e   : > { %7012 = vmatmul.mubr.msk.f32.gmra.mrb[160].mxu1 %vm1283_vm0, %v4328_v13  ;;  %v3493_v13 = vld [vmem:[#allocation26 + $0x68] sm:$0xff] }
 0xa7f   : > { %4460 = vmatprep.mubr.f32.mxu1 %v9683_v14 }
 0xa82   : > { %7013 = vmatmul.mubr.msk.f32.gmra.mrb[162].mxu1 %vm1283_vm0, %v4329_v21  ;;  %v3495_v21 = vld [vmem:[#allocation26 + $0x78] sm:$0xff] }
 0xa83   : > { %4758 = vmatprep.mubr.f32.mxu1 %v9683_v14 }
 0xa86   : > { %7014 = vmatmul.mubr.msk.f32.vlgmr.msra.gmra.mrb[164].mxu1 %vm1283_vm0, %v4662_v26 }
 0xa87   : > { %7990 = vmatpush1.bf16.msra.mxu1 %v11345_v4  ;;  %4764 = vmatprep.mubr.f32.mxu1 %v9683_v14 }
 0xa88   : > { %7992 = vmatprep.subr.bf16.mxu1 %v11361_v8 }
 0xa8a   : > { %7015 = vmatmul.mubr.msk.f32.gmra.mrb[166].mxu1 %vm1283_vm0, %v4663_v42  ;;  %v7693_v42 = vpack.c.bf16 %v3490_v43, %v3488_v3 }
 0xa8b   : > { %7994 = vmatpush1.bf16.msra.mxu1 %v11363_v22  ;;  %4770 = vmatprep.mubr.f32.mxu1 %v9683_v14 }
 0xa8c   : > { %7996 = vmatprep.subr.bf16.mxu1 %v11379_v1 }
 0xa8e   : > { %7016 = vmatmul.mubr.msk.f32.gmra.mrb[168].mxu1 %vm1283_vm0, %v4664_v62 }
 0xa8f   : > { %7998 = vmatpush1.bf16.msra.mxu1 %v11381_v51  ;;  %4776 = vmatprep.mubr.f32.mxu1 %v9683_v14 }
 0xa90   : > { %8000 = vmatprep.subr.bf16.mxu1 %v11395_v0 }
 0xa92   : > { %7017 = vmatmul.mubr.msk.f32.gmra.mrb[170].mxu1 %vm1283_vm0, %v4665_v28  ;;  %v7695_v28 = vpack.c.bf16 %v3495_v21, %v3493_v13  ;;  %v3512_v21 = vld [vmem:[#allocation26 + $0x100] sm:$0xff] }
 0xa93   : > { %8002 = vmatpush1.bf16.msra.mxu1 %v11397_v10  ;;  %4782 = vmatprep.mubr.f32.mxu1 %v9683_v14 }
 0xa94   : > { %8068 = vmatprep.subr.bf16.mxu1 %v11343_v54 }
 0xa96   : > { %7018 = vmatmul.mubr.msk.f32.gmra.mrb[172].mxu1 %vm1283_vm0, %v4666_v36  ;;  %v3492_v36 = vld [vmem:[#allocation26 + $0x60] sm:$0xff] }
 0xa97   : > { %4788 = vmatprep.mubr.f32.mxu1 %v9683_v14 }
 0xa9a   : > { %7019 = vmatmul.mubr.msk.f32.gmra.mrb[174].mxu1 %vm1283_vm0, %v4667_v15  ;;  %v3494_v15 = vld [vmem:[#allocation26 + $0x70] sm:$0xff] }
 0xa9b   : > { %4794 = vmatprep.mubr.f32.mxu1 %v9683_v14 }
 0xa9e   : > { %7020 = vmatmul.mubr.msk.f32.gmra.mrb[176].mxu1 %vm1283_vm0, %v4668_v18  ;;  %v3497_v18 = vld [vmem:[#allocation26 + $0x88] sm:$0xff] }
 0xa9f   : > { %4800 = vmatprep.mubr.f32.mxu1 %v9683_v14 }
 0xaa2   : > { %7021 = vmatmul.mubr.msk.f32.gmra.mrb[178].mxu1 %vm1283_vm0, %v4669_v9  ;;  %v3499_v9 = vld [vmem:[#allocation26 + $0x98] sm:$0xff] }
 0xaa3   : > { %5098 = vmatprep.mubr.f32.mxu1 %v9683_v14 }
 0xaa6   : > { %7022 = vmatmul.mubr.msk.f32.vlgmr.msra.gmra.mrb[180].mxu1 %vm1283_vm0, %v5002_v34 }
 0xaa7   : > { %8070 = vmatpush1.bf16.msra.mxu1 %v11345_v4  ;;  %5104 = vmatprep.mubr.f32.mxu1 %v9683_v14 }
 0xaa8   : > { %8072 = vmatprep.subr.bf16.mxu1 %v11361_v8 }
 0xaaa   : > { %7023 = vmatmul.mubr.msk.f32.gmra.mrb[182].mxu1 %vm1283_vm0, %v5003_v5  ;;  %v7697_v5 = vpack.c.bf16 %v3494_v15, %v3492_v36 }
 0xaab   : > { %8074 = vmatpush1.bf16.msra.mxu1 %v11363_v22  ;;  %5110 = vmatprep.mubr.f32.mxu1 %v9683_v14 }
 0xaac   : > { %8076 = vmatprep.subr.bf16.mxu1 %v11379_v1 }
 0xaae   : > { %7024 = vmatmul.mubr.msk.f32.gmra.mrb[184].mxu1 %vm1283_vm0, %v5004_v33 }
 0xaaf   : > { %8078 = vmatpush1.bf16.msra.mxu1 %v11381_v51  ;;  %5116 = vmatprep.mubr.f32.mxu1 %v9683_v14 }
 0xab0   : > { %8080 = vmatprep.subr.bf16.mxu1 %v11395_v0 }
 0xab2   : > { %7025 = vmatmul.mubr.msk.f32.gmra.mrb[186].mxu1 %vm1283_vm0, %v5005_v32  ;;  %v7699_v32 = vpack.c.bf16 %v3499_v9, %v3497_v18  ;;  %v3516_v18 = vld [vmem:[#allocation26 + $0x120] sm:$0xff]  ;;  %v3518_v9 = vld [vmem:[#allocation26 + $0x130] sm:$0xff] }
 0xab3   : > { %8082 = vmatpush1.bf16.msra.mxu1 %v11397_v10  ;;  %5122 = vmatprep.mubr.f32.mxu1 %v9683_v14 }
 0xab4   : > { %8148 = vmatprep.subr.bf16.mxu1 %v11343_v54 }
 0xab6   : > { %7026 = vmatmul.mubr.msk.f32.gmra.mrb[188].mxu1 %vm1283_vm0, %v5006_v27  ;;  %v3496_v27 = vld [vmem:[#allocation26 + $0x80] sm:$0xff] }
 0xab7   : > { %5128 = vmatprep.mubr.f32.mxu1 %v9683_v14 }
 0xaba   : > { %7027 = vmatmul.mubr.msk.f32.gmra.mrb[190].mxu1 %vm1283_vm0, %v5007_v50  ;;  %v3498_v50 = vld [vmem:[#allocation26 + $0x90] sm:$0xff] }
 0xabb   : > { %5134 = vmatprep.mubr.f32.mxu1 %v9683_v14 }
 0xabe   : > { %7028 = vmatmul.mubr.msk.f32.gmra.mrb[192].mxu1 %vm1283_vm0, %v5008_v24  ;;  %v3501_v24 = vld [vmem:[#allocation26 + $0xa8] sm:$0xff] }
 0xabf   : > { %5140 = vmatprep.mubr.f32.mxu1 %v9683_v14 }
 0xac2   : > { %7029 = vmatmul.mubr.msk.f32.gmra.mrb[194].mxu1 %vm1283_vm0, %v5009_v41  ;;  %v3503_v41 = vld [vmem:[#allocation26 + $0xb8] sm:$0xff] }
 0xac3   : > { %5438 = vmatprep.mubr.f32.mxu1 %v9683_v14 }
 0xac6   : > { %7030 = vmatmul.mubr.msk.f32.vlgmr.msra.gmra.mrb[196].mxu1 %vm1283_vm0, %v5342_v44 }
 0xac7   : > { %8150 = vmatpush1.bf16.msra.mxu1 %v11345_v4  ;;  %5444 = vmatprep.mubr.f32.mxu1 %v9683_v14 }
 0xac8   : > { %8152 = vmatprep.subr.bf16.mxu1 %v11361_v8 }
 0xaca   : > { %7031 = vmatmul.mubr.msk.f32.gmra.mrb[198].mxu1 %vm1283_vm0, %v5343_v61  ;;  %v7701_v61 = vpack.c.bf16 %v3498_v50, %v3496_v27 }
 0xacb   : > { %8154 = vmatpush1.bf16.msra.mxu1 %v11363_v22  ;;  %5450 = vmatprep.mubr.f32.mxu1 %v9683_v14 }
 0xacc   : > { %8156 = vmatprep.subr.bf16.mxu1 %v11379_v1 }
 0xace   : > { %7032 = vmatmul.mubr.msk.f32.gmra.mrb[200].mxu1 %vm1283_vm0, %v5344_v45 }
 0xacf   : > { %8158 = vmatpush1.bf16.msra.mxu1 %v11381_v51  ;;  %5456 = vmatprep.mubr.f32.mxu1 %v9683_v14 }
 0xad0   : > { %8160 = vmatprep.subr.bf16.mxu1 %v11395_v0 }
 0xad2   : > { %7033 = vmatmul.mubr.msk.f32.gmra.mrb[202].mxu1 %vm1283_vm0, %v5345_v48  ;;  %v7703_v48 = vpack.c.bf16 %v3503_v41, %v3501_v24  ;;  %v3520_v24 = vld [vmem:[#allocation26 + $0x140] sm:$0xff]  ;;  %v3522_v41 = vld [vmem:[#allocation26 + $0x150] sm:$0xff] }
 0xad3   : > { %8162 = vmatpush1.bf16.msra.mxu1 %v11397_v10  ;;  %5462 = vmatprep.mubr.f32.mxu1 %v9683_v14 }
 0xad4   : > { %8228 = vmatprep.subr.bf16.mxu1 %v11343_v54  ;;  %v5349_v54 = vld [vmem:[#allocation31 + $0x1b8] sm:$0xff] }
 0xad6   : > { %7034 = vmatmul.mubr.msk.f32.gmra.mrb[204].mxu1 %vm1283_vm0, %v5346_v29  ;;  %v3500_v29 = vld [vmem:[#allocation26 + $0xa0] sm:$0xff] }
 0xad7   : > { %5468 = vmatprep.mubr.f32.mxu1 %v9683_v14 }
 0xad9   : > { %v11564_v49 = vpop.f32.mrb[100].mxu1 }
 0xada   : > { %7035 = vmatmul.mubr.msk.f32.gmra.mrb[206].mxu1 %vm1283_vm0, %v5347_v20  ;;  %v11567_v17 = vpop.f32.mrb[101].mxu1  ;;  %v3502_v20 = vld [vmem:[#allocation26 + $0xb0] sm:$0xff] }
 0xadb   : > { %5474 = vmatprep.mubr.f32.mxu1 %v9683_v14 }
 0xadd   : > { %v11570_v30 = vpop.f32.mrb[102].mxu1 }
 0xade   : > { %7036 = vmatmul.mubr.msk.f32.gmra.mrb[208].mxu1 %vm1283_vm0, %v5348_v52  ;;  %v11573_v19 = vpop.f32.mrb[103].mxu1  ;;  %v3505_v52 = vld [vmem:[#allocation26 + $0xc8] sm:$0xff] }
 0xadf   : > { %5480 = vmatprep.mubr.f32.mxu1 %v9683_v14 }
 0xae1   : > { %v11576_v55 = vpop.f32.mrb[104].mxu1 }
 0xae2   : > { %7037 = vmatmul.mubr.msk.f32.gmra.mrb[210].mxu1 %vm1283_vm0, %v5349_v54  ;;  %v11579_v11 = vpop.f32.mrb[105].mxu1  ;;  %v3507_v54 = vld [vmem:[#allocation26 + $0xd8] sm:$0xff] }
 0xae3   : > { %5778 = vmatprep.mubr.f32.mxu1 %v9683_v14 }
 0xae5   : > { %v11582_v6 = vpop.f32.mrb[106].mxu1 }
 0xae6   : > { %7038 = vmatmul.mubr.msk.f32.vlgmr.msra.gmra.mrb[212].mxu1 %vm1283_vm0, %v5682_v37  ;;  %v11585_v7 = vpop.f32.mrb[107].mxu1 }
 0xae7   : > { %8230 = vmatpush1.bf16.msra.mxu1 %v11345_v4  ;;  %5784 = vmatprep.mubr.f32.mxu1 %v9683_v14 }
 0xae8   : > { %8232 = vmatprep.subr.bf16.mxu1 %v11361_v8 }
 0xae9   : > { %v11590_v58 = vpop.f32.mrb[108].mxu1 }
 0xaea   : > { %v11592_v23 = vpop.f32.mrb[109].mxu1 }
 0xaeb   : > { %8234 = vmatpush1.bf16.msra.mxu1 %v11363_v22  ;;  %v3480_v22 = vld [vmem:[#allocation26] sm:$0xff] }
 0xaec   : > { %8236 = vmatprep.subr.bf16.mxu1 %v11379_v1  ;;  %v3482_v1 = vld [vmem:[#allocation26 + $0x10] sm:$0xff] }
 0xaed   : > { %v11596_v35 = vpop.f32.mrb[110].mxu1  ;;  %v7685_v57 = vpack.c.bf16 %v3482_v1, %v3480_v22  ;;  %v7705_v22 = vpack.c.bf16 %v3502_v20, %v3500_v29  ;;  %v3524_v20 = vld [vmem:[#allocation26 + $0x160] sm:$0xff] }
 0xaee   : > { %v11598_v12 = vpop.f32.mrb[111].mxu1 }
 0xaef   : > { %8238 = vmatpush1.bf16.msra.mxu1 %v11381_v51  ;;  %v7687_v51 = vpack.c.bf16 %v3487_v25, %v3485_v63  ;;  %v7707_v63 = vpack.c.bf16 %v3507_v54, %v3505_v52  ;;  %v3504_v25 = vld [vmem:[#allocation26 + $0xc0] sm:$0xff]  ;;  %v3526_v52 = vld [vmem:[#allocation26 + $0x170] sm:$0xff] }
 0xaf0   : > { %8240 = vmatprep.subr.bf16.mxu1 %v11395_v0  ;;  %v3486_v0 = vld [vmem:[#allocation26 + $0x30] sm:$0xff] }
 0xaf1   : > { %v11602_v4 = vpop.f32.mrb[112].mxu1  ;;  %v7689_v38 = vpack.c.bf16 %v3486_v0, %v3484_v47 }
 0xaf2   : > { %v11604_v2 = vpop.f32.mrb[113].mxu1 }
 0xaf3   : > { %8242 = vmatpush1.bf16.msra.mxu1 %v11397_v10 }
 0xaf5   : > { %v11607_v8 = vpop.f32.mrb[114].mxu1 }
 0xaf6   : > { %v11609_v46 = vpop.f32.mrb[115].mxu1 }
 0xaf9   : > { %v3643_v53 = vpop.f32.mrb[116].mxu1 }
 0xafa   : > { %v3645_v31 = vpop.f32.mrb[117].mxu1 }
 0xafb   : > { %3819 = vmatprep.mubr.f32.mxu0 %v3645_v31  ;;  %v3511_v31 = vld [vmem:[#allocation26 + $0xf8] sm:$0xff] }
 0xafc   : > { %3820 = vmatmul.mubr.f32.vlgmr.msra.gmra.mrb[18].mxu0 %v3643_v53  ;;  %v3506_v53 = vld [vmem:[#allocation26 + $0xd0] sm:$0xff] }
 0xafd   : > { %7686 = vmatpush1.bf16.msra.mxu0 %v7685_v57  ;;  %v3649_v10 = vpop.f32.mrb[118].mxu1  ;;  %v3509_v57 = vld [vmem:[#allocation26 + $0xe8] sm:$0xff]  ;;  %v7709_v47 = vpack.c.bf16 %v3506_v53, %v3504_v25  ;;  %v3528_v53 = vld [vmem:[#allocation26 + $0x180] sm:$0xff] }
 0xafe   : > { %v3651_v60 = vpop.f32.mrb[119].mxu1  ;;  %7688 = vmatprep.subr.bf16.mxu0 %v7687_v51  ;;  %v7711_v16 = vpack.c.bf16 %v3511_v31, %v3509_v57  ;;  %v3530_v57 = vld [vmem:[#allocation26 + $0x190] sm:$0xff] }
 0xaff   : > { %3825 = vmatprep.mubr.f32.mxu0 %v3651_v60  ;;  %v3515_v60 = vld [vmem:[#allocation26 + $0x118] sm:$0xff] }
 0xb00   : > { %3826 = vmatmul.mubr.f32.gmra.mrb[20].mxu0 %v3649_v10  ;;  %v3510_v10 = vld [vmem:[#allocation26 + $0xf0] sm:$0xff] }
 0xb01   : > { %7690 = vmatpush1.bf16.msra.mxu0 %v7689_v38  ;;  %v3655_v26 = vpop.f32.mrb[120].mxu1  ;;  %v3513_v38 = vld [vmem:[#allocation26 + $0x108] sm:$0xff]  ;;  %v7713_v3 = vpack.c.bf16 %v3510_v10, %v3508_v56  ;;  %v3532_v10 = vld [vmem:[#allocation26 + $0x1a0] sm:$0xff] }
 0xb02   : > { %v3657_v62 = vpop.f32.mrb[121].mxu1  ;;  %7692 = vmatprep.subr.bf16.mxu0 %v7691_v59  ;;  %v7715_v13 = vpack.c.bf16 %v3515_v60, %v3513_v38  ;;  %v3534_v38 = vld [vmem:[#allocation26 + $0x1b0] sm:$0xff] }
 0xb03   : > { %3831 = vmatprep.mubr.f32.mxu0 %v3657_v62  ;;  %v3519_v62 = vld [vmem:[#allocation26 + $0x138] sm:$0xff] }
 0xb04   : > { %3832 = vmatmul.mubr.f32.gmra.mrb[22].mxu0 %v3655_v26  ;;  %v3514_v26 = vld [vmem:[#allocation26 + $0x110] sm:$0xff] }
 0xb05   : > { %7694 = vmatpush1.bf16.msra.mxu0 %v7693_v42  ;;  %v3661_v34 = vpop.f32.mrb[122].mxu1  ;;  %v3517_v42 = vld [vmem:[#allocation26 + $0x128] sm:$0xff] }
 0xb06   : > { %v3663_v33 = vpop.f32.mrb[123].mxu1  ;;  %7696 = vmatprep.subr.bf16.mxu0 %v7695_v28  ;;  %v7717_v28 = vpack.c.bf16 %v3514_v26, %v3512_v21  ;;  %v7719_v15 = vpack.c.bf16 %v3519_v62, %v3517_v42  ;;  %v3536_v26 = vld [vmem:[#allocation26 + $0x1c0] sm:$0xff]  ;;  %v3538_v42 = vld [vmem:[#allocation26 + $0x1d0] sm:$0xff] }
 0xb07   : > { %3837 = vmatprep.mubr.f32.mxu0 %v3663_v33  ;;  %v3523_v33 = vld [vmem:[#allocation26 + $0x158] sm:$0xff] }
 0xb08   : > { %3838 = vmatmul.mubr.f32.gmra.mrb[24].mxu0 %v3661_v34 }
 0xb09   : > { %7698 = vmatpush1.bf16.msra.mxu0 %v7697_v5  ;;  %v3667_v44 = vpop.f32.mrb[124].mxu1  ;;  %v3521_v5 = vld [vmem:[#allocation26 + $0x148] sm:$0xff] }
 0xb0a   : > { %v3669_v45 = vpop.f32.mrb[125].mxu1  ;;  %7700 = vmatprep.subr.bf16.mxu0 %v7699_v32  ;;  %v7721_v32 = vpack.c.bf16 %v3518_v9, %v3516_v18  ;;  %v7723_v50 = vpack.c.bf16 %v3523_v33, %v3521_v5  ;;  %v7741_v18 = vpack.c.bf16 %v3538_v42, %v3536_v26  ;;  %v3540_v33 = vld [vmem:[#allocation26 + $0x1e0] sm:$0xff] }
 0xb0b   : > { %3843 = vmatprep.mubr.f32.mxu0 %v3669_v45  ;;  %v7725_v45 = vpack.c.bf16 %v3522_v41, %v3520_v24  ;;  %v4129_v24 = vld [vmem:[#allocation26 + $0x408] sm:$0xff]  ;;  %v4131_v41 = vld [vmem:[#allocation26 + $0x418] sm:$0xff] }
 0xb0c   : > { %3844 = vmatmul.mubr.f32.gmra.mrb[26].mxu0 %v3667_v44  ;;  %v3525_v44 = vld [vmem:[#allocation26 + $0x168] sm:$0xff] }
 0xb0d   : > { %7702 = vmatpush1.bf16.msra.mxu0 %v7701_v61  ;;  %v3673_v37 = vpop.f32.mrb[126].mxu1  ;;  %v3527_v61 = vld [vmem:[#allocation26 + $0x178] sm:$0xff] }
 0xb0e   : > { %v3675_v1 = vpop.f32.mrb[127].mxu1  ;;  %7704 = vmatprep.subr.bf16.mxu0 %v7703_v48  ;;  %v7727_v29 = vpack.c.bf16 %v3527_v61, %v3525_v44 }
 0xb0f   : > { %3849 = vmatprep.mubr.f32.mxu0 %v3675_v1  ;;  %v7729_v1 = vpack.c.bf16 %v3526_v52, %v3524_v20  ;;  %v4130_v20 = vld [vmem:[#allocation26 + $0x410] sm:$0xff] }
 0xb10   : > { %3850 = vmatmul.mubr.f32.gmra.mrb[28].mxu0 %v3673_v37  ;;  %v3529_v37 = vld [vmem:[#allocation26 + $0x188] sm:$0xff] }
 0xb11   : > { %7706 = vmatpush1.bf16.msra.mxu0 %v7705_v22  ;;  %v3679_v51 = vpop.f32.mrb[128].mxu1  ;;  %v3531_v22 = vld [vmem:[#allocation26 + $0x198] sm:$0xff] }
 0xb12   : > { %v3681_v0 = vpop.f32.mrb[129].mxu1  ;;  %7708 = vmatprep.subr.bf16.mxu0 %v7707_v63  ;;  %v7731_v25 = vpack.c.bf16 %v3531_v22, %v3529_v37  ;;  %v4133_v37 = vld [vmem:[#allocation26 + $0x428] sm:$0xff]  ;;  %v4135_v22 = vld [vmem:[#allocation26 + $0x438] sm:$0xff] }
 0xb13   : > { %3855 = vmatprep.mubr.f32.mxu0 %v3681_v0  ;;  %v7733_v0 = vpack.c.bf16 %v3530_v57, %v3528_v53  ;;  %v7767_v53 = vpack.c.bf16 %v4135_v22, %v4133_v37  ;;  %v4132_v57 = vld [vmem:[#allocation26 + $0x420] sm:$0xff]  ;;  %v4157_v22 = vld [vmem:[#allocation26 + $0x4e8] sm:$0xff] }
 0xb14   : > { %3856 = vmatmul.mubr.f32.gmra.mrb[30].mxu0 %v3679_v51  ;;  %v3533_v51 = vld [vmem:[#allocation26 + $0x1a8] sm:$0xff]  ;;  %v4152_v37 = vld [vmem:[#allocation26 + $0x4c0] sm:$0xff] }
 0xb15   : > { %7710 = vmatpush1.bf16.msra.mxu0 %v7709_v47  ;;  %v3685_v59 = vpop.f32.mrb[130].mxu1  ;;  %v3535_v47 = vld [vmem:[#allocation26 + $0x1b8] sm:$0xff] }
 0xb16   : > { %v3687_v43 = vpop.f32.mrb[131].mxu1  ;;  %7712 = vmatprep.subr.bf16.mxu0 %v7711_v16  ;;  %v7735_v56 = vpack.c.bf16 %v3535_v47, %v3533_v51  ;;  %v4134_v51 = vld [vmem:[#allocation26 + $0x430] sm:$0xff] }
 0xb17   : > { %3861 = vmatprep.mubr.f32.mxu0 %v3687_v43  ;;  %v7737_v43 = vpack.c.bf16 %v3534_v38, %v3532_v10  ;;  %v7769_v10 = vpack.c.bf16 %v4134_v51, %v4132_v57  ;;  %v4156_v57 = vld [vmem:[#allocation26 + $0x4e0] sm:$0xff]  ;;  %v4161_v51 = vld [vmem:[#allocation26 + $0x508] sm:$0xff] }
 0xb18   : > { %3862 = vmatmul.mubr.f32.gmra.mrb[32].mxu0 %v3685_v59  ;;  %v3537_v59 = vld [vmem:[#allocation26 + $0x1c8] sm:$0xff] }
 0xb19   : > { %7714 = vmatpush1.bf16.msra.mxu0 %v7713_v3  ;;  %3932 = vmatprep.mubr.f32.mxu0 %v11567_v17  ;;  %v11612_v36 = vpop.f32.mrb[132].mxu1  ;;  %v3539_v3 = vld [vmem:[#allocation26 + $0x1d8] sm:$0xff] }
 0xb1a   : > { %7716 = vmatprep.subr.bf16.mxu0 %v7715_v13  ;;  %v11614_v34 = vpop.f32.mrb[133].mxu1  ;;  %v7739_v21 = vpack.c.bf16 %v3539_v3, %v3537_v59  ;;  %v4136_v59 = vld [vmem:[#allocation26 + $0x440] sm:$0xff]  ;;  %v4138_v3 = vld [vmem:[#allocation26 + $0x450] sm:$0xff] }
 0xb1b   : > { %v7773_v26 = vpack.c.bf16 %v4138_v3, %v4136_v59 }
 0xb1d   : > { %7718 = vmatpush1.bf16.msra.mxu0 %v7717_v28  ;;  %v11616_v27 = vpop.f32.mrb[134].mxu1  ;;  %v3541_v28 = vld [vmem:[#allocation26 + $0x1e8] sm:$0xff] }
 0xb1e   : > { %7720 = vmatprep.subr.bf16.mxu0 %v7719_v15  ;;  %v11618_v17 = vpop.f32.mrb[135].mxu1  ;;  %v3543_v15 = vld [vmem:[#allocation26 + $0x1f8] sm:$0xff] }
 0xb1f   : > { %v7743_v5 = vpack.c.bf16 %v3543_v15, %v3541_v28  ;;  %v4140_v28 = vld [vmem:[#allocation26 + $0x460] sm:$0xff]  ;;  %v4145_v15 = vld [vmem:[#allocation26 + $0x488] sm:$0xff] }
 0xb21   : > { %7722 = vmatpush1.bf16.msra.mxu0 %v7721_v32  ;;  %v11620_v48 = vpop.f32.mrb[136].mxu1  ;;  %v3542_v32 = vld [vmem:[#allocation26 + $0x1f0] sm:$0xff] }
 0xb22   : > { %7724 = vmatprep.subr.bf16.mxu0 %v7723_v50  ;;  %v11622_v54 = vpop.f32.mrb[137].mxu1  ;;  %v7745_v44 = vpack.c.bf16 %v3542_v32, %v3540_v33  ;;  %v4144_v33 = vld [vmem:[#allocation26 + $0x480] sm:$0xff]  ;;  %v4149_v32 = vld [vmem:[#allocation26 + $0x4a8] sm:$0xff] }
 0xb25   : > { %7726 = vmatpush1.bf16.msra.mxu0 %v7725_v45  ;;  %v11624_v63 = vpop.f32.mrb[138].mxu1  ;;  %v7763_v45 = vpack.c.bf16 %v4131_v41, %v4129_v24 }
 0xb26   : > { %7728 = vmatprep.subr.bf16.mxu0 %v7727_v29  ;;  %v11626_v31 = vpop.f32.mrb[139].mxu1  ;;  %v4128_v29 = vld [vmem:[#allocation26 + $0x400] sm:$0xff] }
 0xb29   : > { %7730 = vmatpush1.bf16.msra.mxu0 %v7729_v1  ;;  %v11628_v16 = vpop.f32.mrb[140].mxu1  ;;  %v7765_v1 = vpack.c.bf16 %v4130_v20, %v4128_v29 }
 0xb2a   : > { %7732 = vmatprep.subr.bf16.mxu0 %v7731_v25  ;;  %v11630_v60 = vpop.f32.mrb[141].mxu1 }
 0xb2d   : > { %7734 = vmatpush1.bf16.msra.mxu0 %v7733_v0  ;;  %v11632_v13 = vpop.f32.mrb[142].mxu1  ;;  %v4137_v0 = vld [vmem:[#allocation26 + $0x448] sm:$0xff] }
 0xb2e   : > { %7736 = vmatprep.subr.bf16.mxu0 %v7735_v56  ;;  %v11634_v62 = vpop.f32.mrb[143].mxu1  ;;  %v4139_v56 = vld [vmem:[#allocation26 + $0x458] sm:$0xff] }
 0xb2f   : > { %v7771_v38 = vpack.c.bf16 %v4139_v56, %v4137_v0 }
 0xb31   : > { %7738 = vmatpush1.bf16.msra.mxu0 %v7737_v43  ;;  %v11636_v9 = vpop.f32.mrb[144].mxu1  ;;  %v4141_v43 = vld [vmem:[#allocation26 + $0x468] sm:$0xff] }
 0xb32   : > { %7740 = vmatprep.subr.bf16.mxu0 %v7739_v21  ;;  %v11638_v50 = vpop.f32.mrb[145].mxu1  ;;  %v4143_v21 = vld [vmem:[#allocation26 + $0x478] sm:$0xff] }
 0xb33   : > { %v7775_v42 = vpack.c.bf16 %v4143_v21, %v4141_v43  ;;  %v4164_v43 = vld [vmem:[#allocation26 + $0x520] sm:$0xff]  ;;  %v4169_v21 = vld [vmem:[#allocation26 + $0x548] sm:$0xff] }
 0xb35   : > { %7742 = vmatpush1.bf16.msra.mxu0 %v7741_v18  ;;  %v11640_v61 = vpop.f32.mrb[146].mxu1 }
 0xb36   : > { %7744 = vmatprep.subr.bf16.mxu0 %v7743_v5  ;;  %v11642_v52 = vpop.f32.mrb[147].mxu1 }
 0xb39   : > { %7746 = vmatpush1.bf16.msra.mxu0 %v7745_v44  ;;  %v11644_v25 = vpop.f32.mrb[148].mxu1  ;;  %v4148_v44 = vld [vmem:[#allocation26 + $0x4a0] sm:$0xff] }
 0xb3a   : > { %7764 = vmatprep.subr.bf16.mxu0 %v7763_v45  ;;  %v11646_v47 = vpop.f32.mrb[149].mxu1  ;;  %v4153_v45 = vld [vmem:[#allocation26 + $0x4c8] sm:$0xff] }
 0xb3c   : > { %3933 = vmatmul.mubr.f32.vlgmr.msra.gmra.mrb[18].mxu0 %v11564_v49  ;;  %v4142_v49 = vld [vmem:[#allocation26 + $0x470] sm:$0xff] }
 0xb3d   : > { %3938 = vmatprep.mubr.f32.mxu0 %v11573_v19  ;;  %7766 = vmatpush1.bf16.msra.mxu0 %v7765_v1  ;;  %v4147_v19 = vld [vmem:[#allocation26 + $0x498] sm:$0xff]  ;;  %v7777_v18 = vpack.c.bf16 %v4142_v49, %v4140_v28 }
 0xb3e   : > { %7768 = vmatprep.subr.bf16.mxu0 %v7767_v53  ;;  %v7779_v5 = vpack.c.bf16 %v4147_v19, %v4145_v15  ;;  %v4168_v15 = vld [vmem:[#allocation26 + $0x540] sm:$0xff]  ;;  %v4173_v19 = vld [vmem:[#allocation26 + $0x568] sm:$0xff] }
 0xb40   : > { %3939 = vmatmul.mubr.f32.gmra.mrb[20].mxu0 %v11570_v30  ;;  %v4146_v30 = vld [vmem:[#allocation26 + $0x490] sm:$0xff] }
 0xb41   : > { %3944 = vmatprep.mubr.f32.mxu0 %v11579_v11  ;;  %7770 = vmatpush1.bf16.msra.mxu0 %v7769_v10  ;;  %v4151_v11 = vld [vmem:[#allocation26 + $0x4b8] sm:$0xff]  ;;  %v7781_v24 = vpack.c.bf16 %v4146_v30, %v4144_v33  ;;  %v4160_v10 = vld [vmem:[#allocation26 + $0x500] sm:$0xff] }
 0xb42   : > { %7772 = vmatprep.subr.bf16.mxu0 %v7771_v38  ;;  %v7783_v41 = vpack.c.bf16 %v4151_v11, %v4149_v32  ;;  %v4165_v38 = vld [vmem:[#allocation26 + $0x528] sm:$0xff]  ;;  %v4172_v32 = vld [vmem:[#allocation26 + $0x560] sm:$0xff]  ;;  %v4174_v11 = vld [vmem:[#allocation26 + $0x570] sm:$0xff] }
 0xb44   : > { %3945 = vmatmul.mubr.f32.gmra.mrb[22].mxu0 %v11576_v55  ;;  %v4150_v55 = vld [vmem:[#allocation26 + $0x4b0] sm:$0xff] }
 0xb45   : > { %3950 = vmatprep.mubr.f32.mxu0 %v11585_v7  ;;  %7774 = vmatpush1.bf16.msra.mxu0 %v7773_v26  ;;  %v4155_v7 = vld [vmem:[#allocation26 + $0x4d8] sm:$0xff]  ;;  %v7785_v29 = vpack.c.bf16 %v4150_v55, %v4148_v44  ;;  %v11664_v26 = vpop.f32.mrb[150].mxu1  ;;  %v7809_v55 = vpack.c.bf16 %v4174_v11, %v4172_v32  ;;  %v4468_v32 = vld [vmem:[#allocation26 + $0x600] sm:$0xff]  ;;  %v4470_v11 = vld [vmem:[#allocation26 + $0x610] sm:$0xff] }
 0xb46   : > { %7776 = vmatprep.subr.bf16.mxu0 %v7775_v42  ;;  %v7787_v20 = vpack.c.bf16 %v4155_v7, %v4153_v45  ;;  %v11666_v28 = vpop.f32.mrb[151].mxu1 }
 0xb48   : > { %3951 = vmatmul.mubr.f32.gmra.mrb[24].mxu0 %v11582_v6  ;;  %v4154_v6 = vld [vmem:[#allocation26 + $0x4d0] sm:$0xff] }
 0xb49   : > { %3956 = vmatprep.mubr.f32.mxu0 %v11592_v23  ;;  %7778 = vmatpush1.bf16.msra.mxu0 %v7777_v18  ;;  %v4159_v23 = vld [vmem:[#allocation26 + $0x4f8] sm:$0xff]  ;;  %v7789_v1 = vpack.c.bf16 %v4154_v6, %v4152_v37  ;;  %v4181_v37 = vld [vmem:[#allocation26 + $0x5a8] sm:$0xff] }
 0xb4a   : > { %7780 = vmatprep.subr.bf16.mxu0 %v7779_v5  ;;  %v7791_v53 = vpack.c.bf16 %v4159_v23, %v4157_v22  ;;  %v4175_v18 = vld [vmem:[#allocation26 + $0x578] sm:$0xff]  ;;  %v11668_v5 = vpop.f32.mrb[152].mxu1 }
 0xb4b   : > { %v11670_v33 = vpop.f32.mrb[153].mxu1  ;;  %v7807_v30 = vpack.c.bf16 %v4175_v18, %v4173_v19  ;;  %v4183_v6 = vld [vmem:[#allocation26 + $0x5b8] sm:$0xff] }
 0xb4c   : > { %3957 = vmatmul.mubr.f32.gmra.mrb[26].mxu0 %v11590_v58  ;;  %v4158_v58 = vld [vmem:[#allocation26 + $0x4f0] sm:$0xff]  ;;  %v11672_v44 = vpop.f32.mrb[154].mxu1 }
 0xb4d   : > { %3962 = vmatprep.mubr.f32.mxu0 %v11598_v12  ;;  %7782 = vmatpush1.bf16.msra.mxu0 %v7781_v24  ;;  %v4163_v12 = vld [vmem:[#allocation26 + $0x518] sm:$0xff]  ;;  %v7793_v0 = vpack.c.bf16 %v4158_v58, %v4156_v57  ;;  %v4177_v24 = vld [vmem:[#allocation26 + $0x588] sm:$0xff]  ;;  %v11674_v45 = vpop.f32.mrb[155].mxu1  ;;  %v4180_v57 = vld [vmem:[#allocation26 + $0x5a0] sm:$0xff] }
 0xb4e   : > { %7784 = vmatprep.subr.bf16.mxu0 %v7783_v41  ;;  %v7795_v56 = vpack.c.bf16 %v4163_v12, %v4161_v51  ;;  %v4179_v41 = vld [vmem:[#allocation26 + $0x598] sm:$0xff]  ;;  %v11676_v22 = vpop.f32.mrb[156].mxu1  ;;  %v4182_v58 = vld [vmem:[#allocation26 + $0x5b0] sm:$0xff]  ;;  %v4185_v51 = vld [vmem:[#allocation26 + $0x5c8] sm:$0xff] }
 0xb4f   : > { %v7811_v7 = vpack.c.bf16 %v4179_v41, %v4177_v24  ;;  %v4187_v12 = vld [vmem:[#allocation26 + $0x5d8] sm:$0xff]  ;;  %v4473_v24 = vld [vmem:[#allocation26 + $0x628] sm:$0xff] }
 0xb50   : > { %3963 = vmatmul.mubr.f32.gmra.mrb[28].mxu0 %v11596_v35  ;;  %v4162_v35 = vld [vmem:[#allocation26 + $0x510] sm:$0xff]  ;;  %v4475_v41 = vld [vmem:[#allocation26 + $0x638] sm:$0xff] }
 0xb51   : > { %3968 = vmatprep.mubr.f32.mxu0 %v11604_v2  ;;  %7786 = vmatpush1.bf16.msra.mxu0 %v7785_v29  ;;  %v4167_v2 = vld [vmem:[#allocation26 + $0x538] sm:$0xff]  ;;  %v7797_v59 = vpack.c.bf16 %v4162_v35, %v4160_v10  ;;  %v4176_v29 = vld [vmem:[#allocation26 + $0x580] sm:$0xff]  ;;  %v7819_v35 = vpack.c.bf16 %v4187_v12, %v4185_v51  ;;  %v4478_v12 = vld [vmem:[#allocation26 + $0x650] sm:$0xff] }
 0xb52   : > { %7788 = vmatprep.subr.bf16.mxu0 %v7787_v20  ;;  %v7799_v3 = vpack.c.bf16 %v4167_v2, %v4165_v38  ;;  %v4178_v20 = vld [vmem:[#allocation26 + $0x590] sm:$0xff]  ;;  %v4184_v38 = vld [vmem:[#allocation26 + $0x5c0] sm:$0xff] }
 0xb53   : > { %v7813_v23 = vpack.c.bf16 %v4178_v20, %v4176_v29  ;;  %v4186_v2 = vld [vmem:[#allocation26 + $0x5d0] sm:$0xff]  ;;  %v7847_v29 = vpack.c.bf16 %v4475_v41, %v4473_v24  ;;  %v4472_v20 = vld [vmem:[#allocation26 + $0x620] sm:$0xff] }
 0xb54   : > { %3969 = vmatmul.mubr.f32.gmra.mrb[30].mxu0 %v11602_v4  ;;  %v4166_v4 = vld [vmem:[#allocation26 + $0x530] sm:$0xff]  ;;  %v4476_v51 = vld [vmem:[#allocation26 + $0x640] sm:$0xff] }
 0xb55   : > { %3974 = vmatprep.mubr.f32.mxu0 %v11609_v46  ;;  %7790 = vmatpush1.bf16.msra.mxu0 %v7789_v1  ;;  %v4171_v46 = vld [vmem:[#allocation26 + $0x558] sm:$0xff]  ;;  %v7801_v42 = vpack.c.bf16 %v4166_v4, %v4164_v43  ;;  %v11678_v1 = vpop.f32.mrb[157].mxu1  ;;  %v7821_v4 = vpack.c.bf16 %v4186_v2, %v4184_v38  ;;  %v7853_v38 = vpack.c.bf16 %v4478_v12, %v4476_v51  ;;  %v4494_v41 = vld [vmem:[#allocation26 + $0x6d0] sm:$0xff] }
 0xb56   : > { %7792 = vmatprep.subr.bf16.mxu0 %v7791_v53  ;;  %v7803_v49 = vpack.c.bf16 %v4171_v46, %v4169_v21  ;;  %v7815_v53 = vpack.c.bf16 %v4183_v6, %v4181_v37  ;;  %v4474_v37 = vld [vmem:[#allocation26 + $0x630] sm:$0xff] }
 0xb57   : > { %v4502_v12 = vld [vmem:[#allocation26 + $0x710] sm:$0xff] }
 0xb58   : > { %3975 = vmatmul.mubr.f32.gmra.mrb[32].mxu0 %v11607_v8  ;;  %v4170_v8 = vld [vmem:[#allocation26 + $0x550] sm:$0xff] }
 0xb59   : > { %7794 = vmatpush1.bf16.msra.mxu0 %v7793_v0  ;;  %4256 = vmatprep.mubr.f32.mxu0 %v11614_v34  ;;  %v7805_v34 = vpack.c.bf16 %v4170_v8, %v4168_v15  ;;  %v11680_v0 = vpop.f32.mrb[158].mxu1  ;;  %v4469_v15 = vld [vmem:[#allocation26 + $0x608] sm:$0xff]  ;;  %v4471_v8 = vld [vmem:[#allocation26 + $0x618] sm:$0xff] }
 0xb5a   : > { %7796 = vmatprep.subr.bf16.mxu0 %v7795_v56  ;;  %v7817_v56 = vpack.c.bf16 %v4182_v58, %v4180_v57  ;;  %v11682_v10 = vpop.f32.mrb[159].mxu1  ;;  %v7849_v57 = vpack.c.bf16 %v4474_v37, %v4472_v20  ;;  %v5685_v20 = vld [vmem:[#allocation31 + $0x1d8] sm:$0xff] }
 0xb5b   : > { %v11684_v43 = vpop.f32.mrb[160].mxu1 }
 0xb5c   : > { %v11686_v21 = vpop.f32.mrb[161].mxu1 }
 0xb5d   : > { %7798 = vmatpush1.bf16.msra.mxu0 %v7797_v59  ;;  %v4189_v59 = vld [vmem:[#allocation26 + $0x5e8] sm:$0xff]  ;;  %v11688_v19 = vpop.f32.mrb[162].mxu1 }
 0xb5e   : > { %7800 = vmatprep.subr.bf16.mxu0 %v7799_v3  ;;  %v4191_v3 = vld [vmem:[#allocation26 + $0x5f8] sm:$0xff] }
 0xb5f   : > { %v7823_v46 = vpack.c.bf16 %v4191_v3, %v4189_v59  ;;  %v4480_v59 = vld [vmem:[#allocation26 + $0x660] sm:$0xff]  ;;  %v4485_v3 = vld [vmem:[#allocation26 + $0x688] sm:$0xff] }
 0xb61   : > { %7802 = vmatpush1.bf16.msra.mxu0 %v7801_v42  ;;  %v4188_v42 = vld [vmem:[#allocation26 + $0x5e0] sm:$0xff] }
 0xb62   : > { %7804 = vmatprep.subr.bf16.mxu0 %v7803_v49  ;;  %v4190_v49 = vld [vmem:[#allocation26 + $0x5f0] sm:$0xff] }
 0xb63   : > { %v7825_v18 = vpack.c.bf16 %v4190_v49, %v4188_v42  ;;  %v4484_v42 = vld [vmem:[#allocation26 + $0x680] sm:$0xff]  ;;  %v4489_v49 = vld [vmem:[#allocation26 + $0x6a8] sm:$0xff] }
 0xb65   : > { %7806 = vmatpush1.bf16.msra.mxu0 %v7805_v34  ;;  %v11690_v34 = vpop.f32.mrb[163].mxu1 }
 0xb66   : > { %7808 = vmatprep.subr.bf16.mxu0 %v7807_v30  ;;  %v7843_v30 = vpack.c.bf16 %v4471_v8, %v4469_v15  ;;  %v4491_v15 = vld [vmem:[#allocation26 + $0x6b8] sm:$0xff]  ;;  %v5683_v8 = vld [vmem:[#allocation31 + $0x1c8] sm:$0xff] }
 0xb67   : > { %7039 = vmatmul.mubr.msk.f32.gmra.mrb[214].mxu1 %vm1283_vm0, %v5683_v8  ;;  %v5689_v8 = vld [vmem:[#allocation31 + $0x1f8] sm:$0xff] }
 0xb68   : > { %5790 = vmatprep.mubr.f32.mxu1 %v9683_v14 }
 0xb69   : > { %7810 = vmatpush1.bf16.msra.mxu0 %v7809_v55  ;;  %v7845_v55 = vpack.c.bf16 %v4470_v11, %v4468_v32  ;;  %v4495_v32 = vld [vmem:[#allocation26 + $0x6d8] sm:$0xff] }
 0xb6a   : > { %7812 = vmatprep.subr.bf16.mxu0 %v7811_v7  ;;  %v11692_v7 = vpop.f32.mrb[164].mxu1  ;;  %v5684_v11 = vld [vmem:[#allocation31 + $0x1d0] sm:$0xff] }
 0xb6b   : > { %v11694_v6 = vpop.f32.mrb[165].mxu1  ;;  %7040 = vmatmul.mubr.msk.f32.gmra.mrb[216].mxu1 %vm1283_vm0, %v5684_v11  ;;  %v4517_v11 = vld [vmem:[#allocation26 + $0x788] sm:$0xff] }
 0xb6c   : > { %5796 = vmatprep.mubr.f32.mxu1 %v9683_v14 }
 0xb6d   : > { %7814 = vmatpush1.bf16.msra.mxu0 %v7813_v23  ;;  %v4477_v23 = vld [vmem:[#allocation26 + $0x648] sm:$0xff] }
 0xb6e   : > { %7816 = vmatprep.subr.bf16.mxu0 %v7815_v53  ;;  %v4479_v53 = vld [vmem:[#allocation26 + $0x658] sm:$0xff] }
 0xb6f   : > { %v7851_v58 = vpack.c.bf16 %v4479_v53, %v4477_v23  ;;  %7041 = vmatmul.mubr.msk.f32.gmra.mrb[218].mxu1 %vm1283_vm0, %v5685_v20  ;;  %v4498_v23 = vld [vmem:[#allocation26 + $0x6f0] sm:$0xff]  ;;  %v4501_v53 = vld [vmem:[#allocation26 + $0x708] sm:$0xff]  ;;  %v4516_v20 = vld [vmem:[#allocation26 + $0x780] sm:$0xff] }
 0xb70   : > { %5802 = vmatprep.mubr.f32.mxu1 %v9683_v14 }
 0xb71   : > { %7818 = vmatpush1.bf16.msra.mxu0 %v7817_v56  ;;  %v4481_v56 = vld [vmem:[#allocation26 + $0x668] sm:$0xff] }
 0xb72   : > { %7820 = vmatprep.subr.bf16.mxu0 %v7819_v35  ;;  %v4483_v35 = vld [vmem:[#allocation26 + $0x678] sm:$0xff] }
 0xb73   : > { %v7855_v2 = vpack.c.bf16 %v4483_v35, %v4481_v56  ;;  %v4505_v56 = vld [vmem:[#allocation26 + $0x728] sm:$0xff]  ;;  %v4507_v35 = vld [vmem:[#allocation26 + $0x738] sm:$0xff] }
 0xb75   : > { %7822 = vmatpush1.bf16.msra.mxu0 %v7821_v4  ;;  %v4487_v4 = vld [vmem:[#allocation26 + $0x698] sm:$0xff] }
 0xb76   : > { %7824 = vmatprep.subr.bf16.mxu0 %v7823_v46  ;;  %v7859_v46 = vpack.c.bf16 %v4487_v4, %v4485_v3  ;;  %v4511_v3 = vld [vmem:[#allocation26 + $0x758] sm:$0xff] }
 0xb77   : > { %v5688_v4 = vld [vmem:[#allocation31 + $0x1f0] sm:$0xff] }
 0xb79   : > { %7826 = vmatpush1.bf16.msra.mxu0 %v7825_v18  ;;  %v4488_v18 = vld [vmem:[#allocation26 + $0x6a0] sm:$0xff] }
 0xb7a   : > { %7844 = vmatprep.subr.bf16.mxu0 %v7843_v30  ;;  %v4490_v30 = vld [vmem:[#allocation26 + $0x6b0] sm:$0xff] }
 0xb7c   : > { %4257 = vmatmul.mubr.f32.vlgmr.msra.gmra.mrb[18].mxu0 %v11612_v36  ;;  %v4482_v36 = vld [vmem:[#allocation26 + $0x670] sm:$0xff] }
 0xb7d   : > { %7846 = vmatpush1.bf16.msra.mxu0 %v7845_v55  ;;  %4262 = vmatprep.mubr.f32.mxu0 %v11618_v17  ;;  %v7857_v17 = vpack.c.bf16 %v4482_v36, %v4480_v59  ;;  %v4497_v55 = vld [vmem:[#allocation26 + $0x6e8] sm:$0xff]  ;;  %v4506_v59 = vld [vmem:[#allocation26 + $0x730] sm:$0xff] }
 0xb7e   : > { %7848 = vmatprep.subr.bf16.mxu0 %v7847_v29  ;;  %v4499_v29 = vld [vmem:[#allocation26 + $0x6f8] sm:$0xff]  ;;  %v4509_v36 = vld [vmem:[#allocation26 + $0x748] sm:$0xff] }
 0xb7f   : > { %v7871_v37 = vpack.c.bf16 %v4499_v29, %v4497_v55 }
 0xb80   : > { %4263 = vmatmul.mubr.f32.gmra.mrb[20].mxu0 %v11616_v27  ;;  %v4486_v27 = vld [vmem:[#allocation26 + $0x690] sm:$0xff] }
 0xb81   : > { %7850 = vmatpush1.bf16.msra.mxu0 %v7849_v57  ;;  %4268 = vmatprep.mubr.f32.mxu0 %v11622_v54  ;;  %v7861_v54 = vpack.c.bf16 %v4486_v27, %v4484_v42  ;;  %v4503_v57 = vld [vmem:[#allocation26 + $0x718] sm:$0xff]  ;;  %v4508_v42 = vld [vmem:[#allocation26 + $0x740] sm:$0xff]  ;;  %v4510_v27 = vld [vmem:[#allocation26 + $0x750] sm:$0xff] }
 0xb82   : > { %7852 = vmatprep.subr.bf16.mxu0 %v7851_v58  ;;  %v5686_v58 = vld [vmem:[#allocation31 + $0x1e0] sm:$0xff]  ;;  %v7875_v51 = vpack.c.bf16 %v4503_v57, %v4501_v53  ;;  %v6023_v53 = vld [vmem:[#allocation31 + $0x208] sm:$0xff] }
 0xb83   : > { %7042 = vmatmul.mubr.msk.f32.gmra.mrb[220].mxu1 %vm1283_vm0, %v5686_v58 }
 0xb84   : > { %4269 = vmatmul.mubr.f32.gmra.mrb[22].mxu0 %v11620_v48  ;;  %v7863_v48 = vpack.c.bf16 %v4491_v15, %v4489_v49  ;;  %5808 = vmatprep.mubr.f32.mxu1 %v9683_v14  ;;  %v4513_v49 = vld [vmem:[#allocation26 + $0x768] sm:$0xff]  ;;  %v4515_v15 = vld [vmem:[#allocation26 + $0x778] sm:$0xff] }
 0xb85   : > { %7854 = vmatpush1.bf16.msra.mxu0 %v7853_v38  ;;  %4274 = vmatprep.mubr.f32.mxu0 %v11626_v31  ;;  %v4493_v31 = vld [vmem:[#allocation26 + $0x6c8] sm:$0xff] }
 0xb86   : > { %7856 = vmatprep.subr.bf16.mxu0 %v7855_v2  ;;  %v7867_v24 = vpack.c.bf16 %v4495_v32, %v4493_v31  ;;  %v5687_v38 = vld [vmem:[#allocation31 + $0x1e8] sm:$0xff]  ;;  %v7879_v2 = vpack.c.bf16 %v4507_v35, %v4505_v56  ;;  %v4512_v31 = vld [vmem:[#allocation26 + $0x760] sm:$0xff]  ;;  %v4527_v56 = vld [vmem:[#allocation26 + $0x7d8] sm:$0xff] }
 0xb87   : > { %7043 = vmatmul.mubr.msk.f32.gmra.mrb[222].mxu1 %vm1283_vm0, %v5687_v38  ;;  %v4514_v32 = vld [vmem:[#allocation26 + $0x770] sm:$0xff] }
 0xb88   : > { %4275 = vmatmul.mubr.f32.gmra.mrb[24].mxu0 %v11624_v63  ;;  %v7865_v63 = vpack.c.bf16 %v4490_v30, %v4488_v18  ;;  %5814 = vmatprep.mubr.f32.mxu1 %v9683_v14  ;;  %v7887_v30 = vpack.c.bf16 %v4515_v15, %v4513_v49  ;;  %v6024_v38 = vld [vmem:[#allocation31 + $0x210] sm:$0xff]  ;;  %v4528_v15 = vld [vmem:[#allocation26 + $0x7e0] sm:$0xff] }
 0xb89   : > { %7858 = vmatpush1.bf16.msra.mxu0 %v7857_v17  ;;  %4280 = vmatprep.mubr.f32.mxu0 %v11630_v60  ;;  %v4492_v60 = vld [vmem:[#allocation26 + $0x6c0] sm:$0xff]  ;;  %v11722_v17 = vpop.f32.mrb[166].mxu1 }
 0xb8a   : > { %7860 = vmatprep.subr.bf16.mxu0 %v7859_v46  ;;  %v11725_v46 = vpop.f32.mrb[167].mxu1 }
 0xb8b   : > { %7044 = vmatmul.mubr.msk.f32.gmra.mrb[224].mxu1 %vm1283_vm0, %v5688_v4  ;;  %v4531_v4 = vld [vmem:[#allocation26 + $0x7f8] sm:$0xff] }
 0xb8c   : > { %4281 = vmatmul.mubr.f32.gmra.mrb[26].mxu0 %v11628_v16  ;;  %v7869_v16 = vpack.c.bf16 %v4494_v41, %v4492_v60  ;;  %5820 = vmatprep.mubr.f32.mxu1 %v9683_v14  ;;  %v6022_v60 = vld [vmem:[#allocation31 + $0x200] sm:$0xff]  ;;  %v7889_v41 = vpack.c.bf16 %v4514_v32, %v4512_v31 }
 0xb8d   : > { %7862 = vmatpush1.bf16.msra.mxu0 %v7861_v54  ;;  %4286 = vmatprep.mubr.f32.mxu0 %v11634_v62  ;;  %v4496_v62 = vld [vmem:[#allocation26 + $0x6e0] sm:$0xff]  ;;  %v11728_v54 = vpop.f32.mrb[168].mxu1 }
 0xb8e   : > { %7864 = vmatprep.subr.bf16.mxu0 %v7863_v48  ;;  %v7885_v48 = vpack.c.bf16 %v4510_v27, %v4508_v42  ;;  %v11731_v18 = vpop.f32.mrb[169].mxu1  ;;  %v6026_v32 = vld [vmem:[#allocation31 + $0x220] sm:$0xff] }
 0xb8f   : > { %7045 = vmatmul.mubr.msk.f32.gmra.mrb[226].mxu1 %vm1283_vm0, %v5689_v8  ;;  %v4530_v8 = vld [vmem:[#allocation26 + $0x7f0] sm:$0xff] }
 0xb90   : > { %4287 = vmatmul.mubr.f32.gmra.mrb[28].mxu0 %v11632_v13  ;;  %v7873_v13 = vpack.c.bf16 %v4498_v23, %v4496_v62  ;;  %6118 = vmatprep.mubr.f32.mxu1 %v9683_v14  ;;  %v4523_v62 = vld [vmem:[#allocation26 + $0x7b8] sm:$0xff] }
 0xb91   : > { %7866 = vmatpush1.bf16.msra.mxu0 %v7865_v63  ;;  %4292 = vmatprep.mubr.f32.mxu0 %v11638_v50  ;;  %v4500_v50 = vld [vmem:[#allocation26 + $0x700] sm:$0xff]  ;;  %v4519_v63 = vld [vmem:[#allocation26 + $0x798] sm:$0xff] }
 0xb92   : > { %7868 = vmatprep.subr.bf16.mxu0 %v7867_v24  ;;  %v11734_v24 = vpop.f32.mrb[170].mxu1  ;;  %v7891_v29 = vpack.c.bf16 %v4519_v63, %v4517_v11  ;;  %v7905_v11 = vpack.c.bf16 %v4530_v8, %v4528_v15  ;;  %v4825_v15 = vld [vmem:[#allocation26 + $0x888] sm:$0xff]  ;;  %v4827_v8 = vld [vmem:[#allocation26 + $0x898] sm:$0xff] }
 0xb93   : > { %7046 = vmatmul.mubr.msk.f32.vlgmr.msra.gmra.mrb[228].mxu1 %vm1283_vm0, %v6022_v60  ;;  %v11737_v55 = vpop.f32.mrb[171].mxu1 }
 0xb94   : > { %4293 = vmatmul.mubr.f32.gmra.mrb[30].mxu0 %v11636_v9  ;;  %v7877_v9 = vpack.c.bf16 %v4502_v12, %v4500_v50  ;;  %6124 = vmatprep.mubr.f32.mxu1 %v9683_v14  ;;  %v11740_v23 = vpop.f32.mrb[172].mxu1  ;;  %v4522_v50 = vld [vmem:[#allocation26 + $0x7b0] sm:$0xff]  ;;  %v4525_v12 = vld [vmem:[#allocation26 + $0x7c8] sm:$0xff] }
 0xb95   : > { %7870 = vmatpush1.bf16.msra.mxu0 %v7869_v16  ;;  %4298 = vmatprep.mubr.f32.mxu0 %v11642_v52  ;;  %v4504_v52 = vld [vmem:[#allocation26 + $0x720] sm:$0xff]  ;;  %v4518_v16 = vld [vmem:[#allocation26 + $0x790] sm:$0xff]  ;;  %v11743_v58 = vpop.f32.mrb[173].mxu1 }
 0xb96   : > { %7872 = vmatprep.subr.bf16.mxu0 %v7871_v37  ;;  %v4521_v37 = vld [vmem:[#allocation26 + $0x7a8] sm:$0xff]  ;;  %v7893_v57 = vpack.c.bf16 %v4518_v16, %v4516_v20  ;;  %v11746_v35 = vpop.f32.mrb[174].mxu1  ;;  %v4815_v16 = vld [vmem:[#allocation26 + $0x838] sm:$0xff] }
 0xb97   : > { %7047 = vmatmul.mubr.msk.f32.gmra.mrb[230].mxu1 %vm1283_vm0, %v6023_v53  ;;  %v4813_v20 = vld [vmem:[#allocation26 + $0x828] sm:$0xff] }
 0xb98   : > { %4299 = vmatmul.mubr.f32.gmra.mrb[32].mxu0 %v11640_v61  ;;  %v7881_v61 = vpack.c.bf16 %v4506_v59, %v4504_v52  ;;  %6130 = vmatprep.mubr.f32.mxu1 %v9683_v14  ;;  %v7899_v52 = vpack.c.bf16 %v4527_v56, %v4525_v12  ;;  %v4524_v59 = vld [vmem:[#allocation26 + $0x7c0] sm:$0xff]  ;;  %v4817_v12 = vld [vmem:[#allocation26 + $0x848] sm:$0xff]  ;;  %v4819_v56 = vld [vmem:[#allocation26 + $0x858] sm:$0xff] }
 0xb99   : > { %7874 = vmatpush1.bf16.msra.mxu0 %v7873_v13  ;;  %4596 = vmatprep.mubr.f32.mxu0 %v11646_v47  ;;  %v7883_v47 = vpack.c.bf16 %v4511_v3, %v4509_v36  ;;  %v7895_v13 = vpack.c.bf16 %v4523_v62, %v4521_v37  ;;  %v4526_v36 = vld [vmem:[#allocation26 + $0x7d0] sm:$0xff]  ;;  %v4529_v3 = vld [vmem:[#allocation26 + $0x7e8] sm:$0xff] }
 0xb9a   : > { %7876 = vmatprep.subr.bf16.mxu0 %v7875_v51  ;;  %v4520_v51 = vld [vmem:[#allocation26 + $0x7a0] sm:$0xff]  ;;  %v7901_v42 = vpack.c.bf16 %v4526_v36, %v4524_v59  ;;  %v7903_v49 = vpack.c.bf16 %v4531_v4, %v4529_v3  ;;  %v6027_v37 = vld [vmem:[#allocation31 + $0x228] sm:$0xff]  ;;  %v4823_v4 = vld [vmem:[#allocation26 + $0x878] sm:$0xff] }
 0xb9b   : > { %7048 = vmatmul.mubr.msk.f32.gmra.mrb[232].mxu1 %vm1283_vm0, %v6024_v38  ;;  %v6028_v38 = vld [vmem:[#allocation31 + $0x230] sm:$0xff]  ;;  %v4816_v59 = vld [vmem:[#allocation26 + $0x840] sm:$0xff]  ;;  %v4821_v3 = vld [vmem:[#allocation26 + $0x868] sm:$0xff] }
 0xb9c   : > { %6136 = vmatprep.mubr.f32.mxu1 %v9683_v14  ;;  %v4818_v36 = vld [vmem:[#allocation26 + $0x850] sm:$0xff] }
 0xb9d   : > { %7878 = vmatpush1.bf16.msra.mxu0 %v7877_v9  ;;  %v7897_v9 = vpack.c.bf16 %v4522_v50, %v4520_v51  ;;  %v4814_v51 = vld [vmem:[#allocation26 + $0x830] sm:$0xff] }
 0xb9e   : > { %7880 = vmatprep.subr.bf16.mxu0 %v7879_v2  ;;  %v11749_v2 = vpop.f32.mrb[175].mxu1 }
 0xba1   : > { %7882 = vmatpush1.bf16.msra.mxu0 %v7881_v61  ;;  %v11752_v61 = vpop.f32.mrb[176].mxu1 }
 0xba2   : > { %7884 = vmatprep.subr.bf16.mxu0 %v7883_v47  ;;  %v6025_v47 = vld [vmem:[#allocation31 + $0x218] sm:$0xff]  ;;  %v11755_v27 = vpop.f32.mrb[177].mxu1 }
 0xba3   : > { %7049 = vmatmul.mubr.msk.f32.gmra.mrb[234].mxu1 %vm1283_vm0, %v6025_v47  ;;  %v11758_v31 = vpop.f32.mrb[178].mxu1  ;;  %v6029_v47 = vld [vmem:[#allocation31 + $0x238] sm:$0xff] }
 0xba4   : > { %6142 = vmatprep.mubr.f32.mxu1 %v9683_v14  ;;  %v11761_v63 = vpop.f32.mrb[179].mxu1 }
 0xba5   : > { %7886 = vmatpush1.bf16.msra.mxu0 %v7885_v48  ;;  %v4809_v48 = vld [vmem:[#allocation26 + $0x808] sm:$0xff]  ;;  %v11764_v53 = vpop.f32.mrb[180].mxu1 }
 0xba6   : > { %7888 = vmatprep.subr.bf16.mxu0 %v7887_v30  ;;  %v4811_v30 = vld [vmem:[#allocation26 + $0x818] sm:$0xff]  ;;  %v11767_v50 = vpop.f32.mrb[181].mxu1 }
 0xba7   : > { %7050 = vmatmul.mubr.msk.f32.gmra.mrb[236].mxu1 %vm1283_vm0, %v6026_v32  ;;  %v7923_v60 = vpack.c.bf16 %v4811_v30, %v4809_v48  ;;  %v4826_v30 = vld [vmem:[#allocation26 + $0x890] sm:$0xff]  ;;  %v4829_v32 = vld [vmem:[#allocation26 + $0x8a8] sm:$0xff] }
 0xba8   : > { %6148 = vmatprep.mubr.f32.mxu1 %v9683_v14 }
 0xba9   : > { %7890 = vmatpush1.bf16.msra.mxu0 %v7889_v41  ;;  %v4808_v41 = vld [vmem:[#allocation26 + $0x800] sm:$0xff] }
 0xbaa   : > { %7892 = vmatprep.subr.bf16.mxu0 %v7891_v29  ;;  %v4810_v29 = vld [vmem:[#allocation26 + $0x810] sm:$0xff] }
 0xbab   : > { %v7925_v62 = vpack.c.bf16 %v4810_v29, %v4808_v41  ;;  %7051 = vmatmul.mubr.msk.f32.gmra.mrb[238].mxu1 %vm1283_vm0, %v6027_v37  ;;  %v4828_v41 = vld [vmem:[#allocation26 + $0x8a0] sm:$0xff]  ;;  %v4833_v29 = vld [vmem:[#allocation26 + $0x8c8] sm:$0xff] }
 0xbac   : > { %6154 = vmatprep.mubr.f32.mxu1 %v9683_v14  ;;  %v4832_v37 = vld [vmem:[#allocation26 + $0x8c0] sm:$0xff] }
 0xbad   : > { %7894 = vmatpush1.bf16.msra.mxu0 %v7893_v57  ;;  %v7927_v57 = vpack.c.bf16 %v4815_v16, %v4813_v20  ;;  %v4835_v20 = vld [vmem:[#allocation26 + $0x8d8] sm:$0xff] }
 0xbae   : > { %7896 = vmatprep.subr.bf16.mxu0 %v7895_v13  ;;  %v4812_v13 = vld [vmem:[#allocation26 + $0x820] sm:$0xff]  ;;  %v7947_v16 = vpack.c.bf16 %v4835_v20, %v4833_v29 }
 0xbaf   : > { %7052 = vmatmul.mubr.msk.f32.gmra.mrb[240].mxu1 %vm1283_vm0, %v6028_v38  ;;  %v4856_v20 = vld [vmem:[#allocation26 + $0x980] sm:$0xff] }
 0xbb0   : > { %6160 = vmatprep.mubr.f32.mxu1 %v9683_v14  ;;  %v7939_v14 = vpack.c.bf16 %v4827_v8, %v4825_v15  ;;  %v4853_v15 = vld [vmem:[#allocation26 + $0x968] sm:$0xff]  ;;  %v4855_v8 = vld [vmem:[#allocation26 + $0x978] sm:$0xff] }
 0xbb1   : > { %7898 = vmatpush1.bf16.msra.mxu0 %v7897_v9  ;;  %v7929_v9 = vpack.c.bf16 %v4814_v51, %v4812_v13  ;;  %v4836_v51 = vld [vmem:[#allocation26 + $0x8e0] sm:$0xff] }
 0xbb2   : > { %7900 = vmatprep.subr.bf16.mxu0 %v7899_v52  ;;  %v7931_v52 = vpack.c.bf16 %v4819_v56, %v4817_v12  ;;  %v4841_v12 = vld [vmem:[#allocation26 + $0x908] sm:$0xff]  ;;  %v4843_v56 = vld [vmem:[#allocation26 + $0x918] sm:$0xff] }
 0xbb3   : > { %7053 = vmatmul.mubr.msk.f32.gmra.mrb[242].mxu1 %vm1283_vm0, %v6029_v47  ;;  %v7955_v38 = vpack.c.bf16 %v4843_v56, %v4841_v12  ;;  %v4851_v47 = vld [vmem:[#allocation26 + $0x958] sm:$0xff] }
 0xbb4   : > { %v4867_v12 = vld [vmem:[#allocation26 + $0x9d8] sm:$0xff] }
 0xbb5   : > { %7902 = vmatpush1.bf16.msra.mxu0 %v7901_v42  ;;  %v7935_v42 = vpack.c.bf16 %v4823_v4, %v4821_v3  ;;  %v4844_v3 = vld [vmem:[#allocation26 + $0x920] sm:$0xff]  ;;  %v4849_v4 = vld [vmem:[#allocation26 + $0x948] sm:$0xff] }
 0xbb6   : > { %7904 = vmatprep.subr.bf16.mxu0 %v7903_v49  ;;  %v4822_v49 = vld [vmem:[#allocation26 + $0x870] sm:$0xff] }
 0xbb9   : > { %7906 = vmatpush1.bf16.msra.mxu0 %v7905_v11 }
 0xbba   : > { %7924 = vmatprep.subr.bf16.mxu0 %v7923_v60 }
 0xbbc   : > { %4597 = vmatmul.mubr.f32.vlgmr.msra.gmra.mrb[18].mxu0 %v11644_v25  ;;  %v7933_v25 = vpack.c.bf16 %v4818_v36, %v4816_v59  ;;  %v4847_v59 = vld [vmem:[#allocation26 + $0x938] sm:$0xff] }
 0xbbd   : > { %7926 = vmatpush1.bf16.msra.mxu0 %v7925_v62  ;;  %4602 = vmatprep.mubr.f32.mxu0 %v11666_v28  ;;  %v4820_v28 = vld [vmem:[#allocation26 + $0x860] sm:$0xff]  ;;  %v4837_v62 = vld [vmem:[#allocation26 + $0x8e8] sm:$0xff] }
 0xbbe   : > { %7928 = vmatprep.subr.bf16.mxu0 %v7927_v57  ;;  %v7937_v48 = vpack.c.bf16 %v4822_v49, %v4820_v28  ;;  %v4839_v57 = vld [vmem:[#allocation26 + $0x8f8] sm:$0xff]  ;;  %v7963_v28 = vpack.c.bf16 %v4851_v47, %v4849_v4  ;;  %v4848_v49 = vld [vmem:[#allocation26 + $0x940] sm:$0xff] }
 0xbbf   : > { %v7951_v13 = vpack.c.bf16 %v4839_v57, %v4837_v62  ;;  %v4868_v47 = vld [vmem:[#allocation26 + $0x9e0] sm:$0xff] }
 0xbc0   : > { %4603 = vmatmul.mubr.f32.gmra.mrb[20].mxu0 %v11664_v26  ;;  %v4824_v26 = vld [vmem:[#allocation26 + $0x880] sm:$0xff] }
 0xbc1   : > { %7930 = vmatpush1.bf16.msra.mxu0 %v7929_v9  ;;  %4608 = vmatprep.mubr.f32.mxu0 %v11670_v33  ;;  %v4831_v33 = vld [vmem:[#allocation26 + $0x8b8] sm:$0xff]  ;;  %v7941_v11 = vpack.c.bf16 %v4826_v30, %v4824_v26  ;;  %v4840_v9 = vld [vmem:[#allocation26 + $0x900] sm:$0xff]  ;;  %v7967_v26 = vpack.c.bf16 %v4855_v8, %v4853_v15 }
 0xbc2   : > { %7932 = vmatprep.subr.bf16.mxu0 %v7931_v52  ;;  %v7943_v60 = vpack.c.bf16 %v4831_v33, %v4829_v32  ;;  %v4845_v52 = vld [vmem:[#allocation26 + $0x928] sm:$0xff]  ;;  %v4852_v30 = vld [vmem:[#allocation26 + $0x960] sm:$0xff]  ;;  %v4854_v32 = vld [vmem:[#allocation26 + $0x970] sm:$0xff] }
 0xbc3   : > { %v7959_v36 = vpack.c.bf16 %v4847_v59, %v4845_v52  ;;  %v4857_v33 = vld [vmem:[#allocation26 + $0x988] sm:$0xff]  ;;  %v4866_v52 = vld [vmem:[#allocation26 + $0x9d0] sm:$0xff] }
 0xbc4   : > { %4609 = vmatmul.mubr.f32.gmra.mrb[22].mxu0 %v11668_v5  ;;  %v4830_v5 = vld [vmem:[#allocation26 + $0x8b0] sm:$0xff]  ;;  %v4869_v59 = vld [vmem:[#allocation26 + $0x9e8] sm:$0xff] }
 0xbc5   : > { %7934 = vmatpush1.bf16.msra.mxu0 %v7933_v25  ;;  %4614 = vmatprep.mubr.f32.mxu0 %v11674_v45  ;;  %v7945_v45 = vpack.c.bf16 %v4830_v5, %v4828_v41  ;;  %v11789_v25 = vpop.f32.mrb[182].mxu1  ;;  %v7969_v41 = vpack.c.bf16 %v4854_v32, %v4852_v30  ;;  %v5150_v30 = vld [vmem:[#allocation26 + $0xa10] sm:$0xff]  ;;  %v5153_v32 = vld [vmem:[#allocation26 + $0xa28] sm:$0xff] }
 0xbc6   : > { %7936 = vmatprep.subr.bf16.mxu0 %v7935_v42  ;;  %v11791_v42 = vpop.f32.mrb[183].mxu1 }
 0xbc8   : > { %4615 = vmatmul.mubr.f32.gmra.mrb[24].mxu0 %v11672_v44  ;;  %v4834_v44 = vld [vmem:[#allocation26 + $0x8d0] sm:$0xff] }
 0xbc9   : > { %7938 = vmatpush1.bf16.msra.mxu0 %v7937_v48  ;;  %4620 = vmatprep.mubr.f32.mxu0 %v11678_v1  ;;  %v7949_v1 = vpack.c.bf16 %v4834_v44, %v4832_v37  ;;  %v11793_v48 = vpop.f32.mrb[184].mxu1  ;;  %v4863_v37 = vld [vmem:[#allocation26 + $0x9b8] sm:$0xff] }
 0xbca   : > { %7940 = vmatprep.subr.bf16.mxu0 %v7939_v14  ;;  %v11795_v14 = vpop.f32.mrb[185].mxu1 }
 0xbcc   : > { %4621 = vmatmul.mubr.f32.gmra.mrb[26].mxu0 %v11676_v22  ;;  %v4838_v22 = vld [vmem:[#allocation26 + $0x8f0] sm:$0xff] }
 0xbcd   : > { %7942 = vmatpush1.bf16.msra.mxu0 %v7941_v11  ;;  %4626 = vmatprep.mubr.f32.mxu0 %v11682_v10  ;;  %v7953_v10 = vpack.c.bf16 %v4838_v22, %v4836_v51  ;;  %v4859_v11 = vld [vmem:[#allocation26 + $0x998] sm:$0xff]  ;;  %v4862_v51 = vld [vmem:[#allocation26 + $0x9b0] sm:$0xff]  ;;  %v4865_v22 = vld [vmem:[#allocation26 + $0x9c8] sm:$0xff] }
 0xbce   : > { %7944 = vmatprep.subr.bf16.mxu0 %v7943_v60  ;;  %v11797_v60 = vpop.f32.mrb[186].mxu1  ;;  %v7971_v29 = vpack.c.bf16 %v4859_v11, %v4857_v33  ;;  %v5155_v33 = vld [vmem:[#allocation26 + $0xa38] sm:$0xff] }
 0xbcf   : > { %v11799_v5 = vpop.f32.mrb[187].mxu1 }
 0xbd0   : > { %4627 = vmatmul.mubr.f32.gmra.mrb[28].mxu0 %v11680_v0  ;;  %v4842_v0 = vld [vmem:[#allocation26 + $0x910] sm:$0xff]  ;;  %v11801_v44 = vpop.f32.mrb[188].mxu1 }
 0xbd1   : > { %7946 = vmatpush1.bf16.msra.mxu0 %v7945_v45  ;;  %4632 = vmatprep.mubr.f32.mxu0 %v11686_v21  ;;  %v7957_v21 = vpack.c.bf16 %v4842_v0, %v4840_v9  ;;  %v4858_v45 = vld [vmem:[#allocation26 + $0x990] sm:$0xff]  ;;  %v11803_v57 = vpop.f32.mrb[189].mxu1  ;;  %v7979_v9 = vpack.c.bf16 %v4867_v12, %v4865_v22  ;;  %v4864_v0 = vld [vmem:[#allocation26 + $0x9c0] sm:$0xff]  ;;  %v5161_v12 = vld [vmem:[#allocation26 + $0xa68] sm:$0xff] }
 0xbd2   : > { %7948 = vmatprep.subr.bf16.mxu0 %v7947_v16  ;;  %v4861_v16 = vld [vmem:[#allocation26 + $0x9a8] sm:$0xff]  ;;  %v7973_v62 = vpack.c.bf16 %v4858_v45, %v4856_v20  ;;  %v11805_v56 = vpop.f32.mrb[190].mxu1  ;;  %v5152_v20 = vld [vmem:[#allocation26 + $0xa20] sm:$0xff]  ;;  %v5154_v45 = vld [vmem:[#allocation26 + $0xa30] sm:$0xff] }
 0xbd3   : > { %v5158_v22 = vld [vmem:[#allocation26 + $0xa50] sm:$0xff] }
 0xbd4   : > { %4633 = vmatmul.mubr.f32.gmra.mrb[30].mxu0 %v11684_v43  ;;  %v4846_v43 = vld [vmem:[#allocation26 + $0x930] sm:$0xff] }
 0xbd5   : > { %7950 = vmatpush1.bf16.msra.mxu0 %v7949_v1  ;;  %4638 = vmatprep.mubr.f32.mxu0 %v11690_v34  ;;  %v7961_v34 = vpack.c.bf16 %v4846_v43, %v4844_v3  ;;  %v7975_v1 = vpack.c.bf16 %v4863_v37, %v4861_v16  ;;  %v7981_v3 = vpack.c.bf16 %v4866_v52, %v4864_v0  ;;  %v5157_v37 = vld [vmem:[#allocation26 + $0xa48] sm:$0xff]  ;;  %v5160_v52 = vld [vmem:[#allocation26 + $0xa60] sm:$0xff] }
 0xbd6   : > { %7952 = vmatprep.subr.bf16.mxu0 %v7951_v13  ;;  %v4860_v13 = vld [vmem:[#allocation26 + $0x9a0] sm:$0xff] }
 0xbd8   : > { %4639 = vmatmul.mubr.f32.gmra.mrb[32].mxu0 %v11688_v19  ;;  %v4850_v19 = vld [vmem:[#allocation26 + $0x950] sm:$0xff] }
 0xbd9   : > { %7954 = vmatpush1.bf16.msra.mxu0 %v7953_v10  ;;  %4936 = vmatprep.mubr.f32.mxu0 %v11694_v6  ;;  %v7965_v6 = vpack.c.bf16 %v4850_v19, %v4848_v49  ;;  %v7977_v10 = vpack.c.bf16 %v4862_v51, %v4860_v13  ;;  %v5151_v49 = vld [vmem:[#allocation26 + $0xa18] sm:$0xff]  ;;  %v5156_v51 = vld [vmem:[#allocation26 + $0xa40] sm:$0xff] }
 0xbda   : > { %7956 = vmatprep.subr.bf16.mxu0 %v7955_v38  ;;  %v11807_v38 = vpop.f32.mrb[191].mxu1 }
 0xbdd   : > { %7958 = vmatpush1.bf16.msra.mxu0 %v7957_v21  ;;  %v4871_v21 = vld [vmem:[#allocation26 + $0x9f8] sm:$0xff] }
 0xbde   : > { %7960 = vmatprep.subr.bf16.mxu0 %v7959_v36  ;;  %v11809_v36 = vpop.f32.mrb[192].mxu1  ;;  %v7983_v4 = vpack.c.bf16 %v4871_v21, %v4869_v59  ;;  %v5165_v59 = vld [vmem:[#allocation26 + $0xa88] sm:$0xff]  ;;  %v5167_v21 = vld [vmem:[#allocation26 + $0xa98] sm:$0xff] }
 0xbdf   : > { %v11811_v43 = vpop.f32.mrb[193].mxu1 }
 0xbe0   : > { %v11813_v19 = vpop.f32.mrb[194].mxu1 }
 0xbe1   : > { %7962 = vmatpush1.bf16.msra.mxu0 %v7961_v34  ;;  %v4870_v34 = vld [vmem:[#allocation26 + $0x9f0] sm:$0xff]  ;;  %v11815_v8 = vpop.f32.mrb[195].mxu1 }
 0xbe2   : > { %7964 = vmatprep.subr.bf16.mxu0 %v7963_v28  ;;  %v5149_v28 = vld [vmem:[#allocation26 + $0xa08] sm:$0xff]  ;;  %v7985_v15 = vpack.c.bf16 %v4870_v34, %v4868_v47  ;;  %v5171_v34 = vld [vmem:[#allocation26 + $0xab8] sm:$0xff] }
 0xbe3   : > { %v5169_v47 = vld [vmem:[#allocation26 + $0xaa8] sm:$0xff] }
 0xbe5   : > { %7966 = vmatpush1.bf16.msra.mxu0 %v7965_v6  ;;  %v8003_v6 = vpack.c.bf16 %v5151_v49, %v5149_v28  ;;  %v8023_v28 = vpack.c.bf16 %v5171_v34, %v5169_v47  ;;  %v5168_v49 = vld [vmem:[#allocation26 + $0xaa0] sm:$0xff]  ;;  %v5194_v47 = vld [vmem:[#allocation26 + $0xb70] sm:$0xff]  ;;  %v5197_v34 = vld [vmem:[#allocation26 + $0xb88] sm:$0xff] }
 0xbe6   : > { %7968 = vmatprep.subr.bf16.mxu0 %v7967_v26  ;;  %v5148_v26 = vld [vmem:[#allocation26 + $0xa00] sm:$0xff] }
 0xbe7   : > { %v8005_v11 = vpack.c.bf16 %v5150_v30, %v5148_v26  ;;  %v5172_v30 = vld [vmem:[#allocation26 + $0xac0] sm:$0xff] }
 0xbe9   : > { %7970 = vmatpush1.bf16.msra.mxu0 %v7969_v41  ;;  %v11817_v41 = vpop.f32.mrb[196].mxu1 }
 0xbea   : > { %7972 = vmatprep.subr.bf16.mxu0 %v7971_v29  ;;  %v8007_v29 = vpack.c.bf16 %v5155_v33, %v5153_v32  ;;  %v11819_v16 = vpop.f32.mrb[197].mxu1  ;;  %v5177_v32 = vld [vmem:[#allocation26 + $0xae8] sm:$0xff]  ;;  %v5179_v33 = vld [vmem:[#allocation26 + $0xaf8] sm:$0xff] }
 0xbed   : > { %7974 = vmatpush1.bf16.msra.mxu0 %v7973_v62  ;;  %v5159_v62 = vld [vmem:[#allocation26 + $0xa58] sm:$0xff] }
 0xbee   : > { %7976 = vmatprep.subr.bf16.mxu0 %v7975_v1  ;;  %v8009_v1 = vpack.c.bf16 %v5154_v45, %v5152_v20  ;;  %v8011_v13 = vpack.c.bf16 %v5159_v62, %v5157_v37  ;;  %v5181_v20 = vld [vmem:[#allocation26 + $0xb08] sm:$0xff]  ;;  %v5183_v45 = vld [vmem:[#allocation26 + $0xb18] sm:$0xff]  ;;  %v5180_v62 = vld [vmem:[#allocation26 + $0xb00] sm:$0xff] }
 0xbef   : > { %v8035_v37 = vpack.c.bf16 %v5183_v45, %v5181_v20  ;;  %v5207_v20 = vld [vmem:[#allocation26 + $0xbd8] sm:$0xff] }
 0xbf1   : > { %7978 = vmatpush1.bf16.msra.mxu0 %v7977_v10  ;;  %v5163_v10 = vld [vmem:[#allocation26 + $0xa78] sm:$0xff] }
 0xbf2   : > { %7980 = vmatprep.subr.bf16.mxu0 %v7979_v9  ;;  %v8013_v9 = vpack.c.bf16 %v5158_v22, %v5156_v51  ;;  %v8015_v0 = vpack.c.bf16 %v5163_v10, %v5161_v12  ;;  %v5184_v22 = vld [vmem:[#allocation26 + $0xb20] sm:$0xff]  ;;  %v5189_v12 = vld [vmem:[#allocation26 + $0xb48] sm:$0xff]  ;;  %v5191_v10 = vld [vmem:[#allocation26 + $0xb58] sm:$0xff] }
 0xbf5   : > { %7982 = vmatpush1.bf16.msra.mxu0 %v7981_v3  ;;  %v8019_v3 = vpack.c.bf16 %v5167_v21, %v5165_v59  ;;  %v5193_v59 = vld [vmem:[#allocation26 + $0xb68] sm:$0xff]  ;;  %v5195_v21 = vld [vmem:[#allocation26 + $0xb78] sm:$0xff] }
 0xbf6   : > { %7984 = vmatprep.subr.bf16.mxu0 %v7983_v4  ;;  %v5164_v4 = vld [vmem:[#allocation26 + $0xa80] sm:$0xff] }
 0xbf9   : > { %7986 = vmatpush1.bf16.msra.mxu0 %v7985_v15  ;;  %v5173_v15 = vld [vmem:[#allocation26 + $0xac8] sm:$0xff] }
 0xbfa   : > { %8004 = vmatprep.subr.bf16.mxu0 %v8003_v6  ;;  %v5175_v6 = vld [vmem:[#allocation26 + $0xad8] sm:$0xff] }
 0xbfb   : > { %v8027_v26 = vpack.c.bf16 %v5175_v6, %v5173_v15  ;;  %v5196_v6 = vld [vmem:[#allocation26 + $0xb80] sm:$0xff] }
 0xbfc   : > { %4937 = vmatmul.mubr.f32.vlgmr.msra.gmra.mrb[18].mxu0 %v11692_v7  ;;  %v5162_v7 = vld [vmem:[#allocation26 + $0xa70] sm:$0xff] }
 0xbfd   : > { %8006 = vmatpush1.bf16.msra.mxu0 %v8005_v11  ;;  %4942 = vmatprep.mubr.f32.mxu0 %v11725_v46  ;;  %v8017_v46 = vpack.c.bf16 %v5162_v7, %v5160_v52  ;;  %v8031_v11 = vpack.c.bf16 %v5179_v33, %v5177_v32  ;;  %v8043_v52 = vpack.c.bf16 %v5191_v10, %v5189_v12  ;;  %v5188_v7 = vld [vmem:[#allocation26 + $0xb40] sm:$0xff] }
 0xbfe   : > { %8008 = vmatprep.subr.bf16.mxu0 %v8007_v29  ;;  %v5176_v29 = vld [vmem:[#allocation26 + $0xae0] sm:$0xff] }
 0xbff   : > { %v5208_v10 = vld [vmem:[#allocation26 + $0xbe0] sm:$0xff] }
 0xc00   : > { %4943 = vmatmul.mubr.f32.gmra.mrb[20].mxu0 %v11722_v17  ;;  %v5166_v17 = vld [vmem:[#allocation26 + $0xa90] sm:$0xff] }
 0xc01   : > { %8010 = vmatpush1.bf16.msra.mxu0 %v8009_v1  ;;  %4948 = vmatprep.mubr.f32.mxu0 %v11731_v18  ;;  %v8021_v18 = vpack.c.bf16 %v5166_v17, %v5164_v4  ;;  %v5185_v1 = vld [vmem:[#allocation26 + $0xb28] sm:$0xff]  ;;  %v8047_v4 = vpack.c.bf16 %v5195_v21, %v5193_v59  ;;  %v5192_v17 = vld [vmem:[#allocation26 + $0xb60] sm:$0xff] }
 0xc02   : > { %8012 = vmatprep.subr.bf16.mxu0 %v8011_v13  ;;  %v5187_v13 = vld [vmem:[#allocation26 + $0xb38] sm:$0xff] }
 0xc03   : > { %v8039_v51 = vpack.c.bf16 %v5187_v13, %v5185_v1  ;;  %v5206_v1 = vld [vmem:[#allocation26 + $0xbd0] sm:$0xff]  ;;  %v5209_v13 = vld [vmem:[#allocation26 + $0xbe8] sm:$0xff] }
 0xc04   : > { %4949 = vmatmul.mubr.f32.gmra.mrb[22].mxu0 %v11728_v54  ;;  %v5170_v54 = vld [vmem:[#allocation26 + $0xab0] sm:$0xff] }
 0xc05   : > { %8014 = vmatpush1.bf16.msra.mxu0 %v8013_v9  ;;  %4954 = vmatprep.mubr.f32.mxu0 %v11737_v55  ;;  %v8025_v55 = vpack.c.bf16 %v5170_v54, %v5168_v49  ;;  %v11837_v9 = vpop.f32.mrb[198].mxu1  ;;  %v8049_v49 = vpack.c.bf16 %v5194_v47, %v5192_v17  ;;  %v5490_v17 = vld [vmem:[#allocation26 + $0xc10] sm:$0xff]  ;;  %v5493_v47 = vld [vmem:[#allocation26 + $0xc28] sm:$0xff] }
 0xc06   : > { %8016 = vmatprep.subr.bf16.mxu0 %v8015_v0  ;;  %v11839_v0 = vpop.f32.mrb[199].mxu1 }
 0xc08   : > { %4955 = vmatmul.mubr.f32.gmra.mrb[24].mxu0 %v11734_v24  ;;  %v5174_v24 = vld [vmem:[#allocation26 + $0xad0] sm:$0xff] }
 0xc09   : > { %8018 = vmatpush1.bf16.msra.mxu0 %v8017_v46  ;;  %4960 = vmatprep.mubr.f32.mxu0 %v11743_v58  ;;  %v8029_v58 = vpack.c.bf16 %v5174_v24, %v5172_v30  ;;  %v11841_v46 = vpop.f32.mrb[200].mxu1  ;;  %v5203_v30 = vld [vmem:[#allocation26 + $0xbb8] sm:$0xff] }
 0xc0a   : > { %8020 = vmatprep.subr.bf16.mxu0 %v8019_v3  ;;  %v11843_v3 = vpop.f32.mrb[201].mxu1 }
 0xc0c   : > { %4961 = vmatmul.mubr.f32.gmra.mrb[26].mxu0 %v11740_v23  ;;  %v5178_v23 = vld [vmem:[#allocation26 + $0xaf0] sm:$0xff] }
 0xc0d   : > { %8022 = vmatpush1.bf16.msra.mxu0 %v8021_v18  ;;  %4966 = vmatprep.mubr.f32.mxu0 %v11749_v2  ;;  %v8033_v2 = vpack.c.bf16 %v5178_v23, %v5176_v29  ;;  %v5199_v18 = vld [vmem:[#allocation26 + $0xb98] sm:$0xff]  ;;  %v5202_v29 = vld [vmem:[#allocation26 + $0xbb0] sm:$0xff]  ;;  %v5205_v23 = vld [vmem:[#allocation26 + $0xbc8] sm:$0xff] }
 0xc0e   : > { %8024 = vmatprep.subr.bf16.mxu0 %v8023_v28  ;;  %v11845_v28 = vpop.f32.mrb[202].mxu1  ;;  %v8051_v15 = vpack.c.bf16 %v5199_v18, %v5197_v34  ;;  %v5495_v34 = vld [vmem:[#allocation26 + $0xc38] sm:$0xff] }
 0xc0f   : > { %v11847_v54 = vpop.f32.mrb[203].mxu1 }
 0xc10   : > { %4967 = vmatmul.mubr.f32.gmra.mrb[28].mxu0 %v11746_v35  ;;  %v5182_v35 = vld [vmem:[#allocation26 + $0xb10] sm:$0xff]  ;;  %v11849_v24 = vpop.f32.mrb[204].mxu1 }
 0xc11   : > { %8026 = vmatpush1.bf16.msra.mxu0 %v8025_v55  ;;  %4972 = vmatprep.mubr.f32.mxu0 %v11755_v27  ;;  %v8037_v27 = vpack.c.bf16 %v5182_v35, %v5180_v62  ;;  %v5198_v55 = vld [vmem:[#allocation26 + $0xb90] sm:$0xff]  ;;  %v11851_v33 = vpop.f32.mrb[205].mxu1  ;;  %v8059_v62 = vpack.c.bf16 %v5207_v20, %v5205_v23  ;;  %v5204_v35 = vld [vmem:[#allocation26 + $0xbc0] sm:$0xff]  ;;  %v5501_v20 = vld [vmem:[#allocation26 + $0xc68] sm:$0xff] }
 0xc12   : > { %8028 = vmatprep.subr.bf16.mxu0 %v8027_v26  ;;  %v5201_v26 = vld [vmem:[#allocation26 + $0xba8] sm:$0xff]  ;;  %v8053_v32 = vpack.c.bf16 %v5198_v55, %v5196_v6  ;;  %v11853_v45 = vpop.f32.mrb[206].mxu1  ;;  %v5492_v6 = vld [vmem:[#allocation26 + $0xc20] sm:$0xff]  ;;  %v5494_v55 = vld [vmem:[#allocation26 + $0xc30] sm:$0xff] }
 0xc13   : > { %v5498_v23 = vld [vmem:[#allocation26 + $0xc50] sm:$0xff] }
 0xc14   : > { %4973 = vmatmul.mubr.f32.gmra.mrb[30].mxu0 %v11752_v61  ;;  %v5186_v61 = vld [vmem:[#allocation26 + $0xb30] sm:$0xff] }
 0xc15   : > { %8030 = vmatpush1.bf16.msra.mxu0 %v8029_v58  ;;  %4978 = vmatprep.mubr.f32.mxu0 %v11761_v63  ;;  %v8041_v63 = vpack.c.bf16 %v5186_v61, %v5184_v22  ;;  %v8055_v58 = vpack.c.bf16 %v5203_v30, %v5201_v26  ;;  %v8061_v22 = vpack.c.bf16 %v5206_v1, %v5204_v35  ;;  %v5497_v30 = vld [vmem:[#allocation26 + $0xc48] sm:$0xff]  ;;  %v5500_v1 = vld [vmem:[#allocation26 + $0xc60] sm:$0xff] }
 0xc16   : > { %8032 = vmatprep.subr.bf16.mxu0 %v8031_v11  ;;  %v5200_v11 = vld [vmem:[#allocation26 + $0xba0] sm:$0xff] }
 0xc18   : > { %4979 = vmatmul.mubr.f32.gmra.mrb[32].mxu0 %v11758_v31  ;;  %v5190_v31 = vld [vmem:[#allocation26 + $0xb50] sm:$0xff] }
 0xc19   : > { %8034 = vmatpush1.bf16.msra.mxu0 %v8033_v2  ;;  %5276 = vmatprep.mubr.f32.mxu0 %v11767_v50  ;;  %v8045_v50 = vpack.c.bf16 %v5190_v31, %v5188_v7  ;;  %v8057_v2 = vpack.c.bf16 %v5202_v29, %v5200_v11  ;;  %v5491_v7 = vld [vmem:[#allocation26 + $0xc18] sm:$0xff]  ;;  %v5496_v29 = vld [vmem:[#allocation26 + $0xc40] sm:$0xff] }
 0xc1a   : > { %8036 = vmatprep.subr.bf16.mxu0 %v8035_v37  ;;  %v11855_v37 = vpop.f32.mrb[207].mxu1 }
 0xc1d   : > { %8038 = vmatpush1.bf16.msra.mxu0 %v8037_v27  ;;  %v5211_v27 = vld [vmem:[#allocation26 + $0xbf8] sm:$0xff] }
 0xc1e   : > { %8040 = vmatprep.subr.bf16.mxu0 %v8039_v51  ;;  %v11857_v51 = vpop.f32.mrb[208].mxu1  ;;  %v8063_v12 = vpack.c.bf16 %v5211_v27, %v5209_v13  ;;  %v5505_v13 = vld [vmem:[#allocation26 + $0xc88] sm:$0xff]  ;;  %v5507_v27 = vld [vmem:[#allocation26 + $0xc98] sm:$0xff] }
 0xc1f   : > { %v11859_v61 = vpop.f32.mrb[209].mxu1 }
 0xc20   : > { %v11861_v31 = vpop.f32.mrb[210].mxu1 }
 0xc21   : > { %8042 = vmatpush1.bf16.msra.mxu0 %v8041_v63  ;;  %v5210_v63 = vld [vmem:[#allocation26 + $0xbf0] sm:$0xff]  ;;  %v11863_v21 = vpop.f32.mrb[211].mxu1 }
 0xc22   : > { %8044 = vmatprep.subr.bf16.mxu0 %v8043_v52  ;;  %v5489_v52 = vld [vmem:[#allocation26 + $0xc08] sm:$0xff]  ;;  %v8065_v59 = vpack.c.bf16 %v5210_v63, %v5208_v10  ;;  %v5511_v63 = vld [vmem:[#allocation26 + $0xcb8] sm:$0xff] }
 0xc23   : > { %v5509_v10 = vld [vmem:[#allocation26 + $0xca8] sm:$0xff] }
 0xc25   : > { %8046 = vmatpush1.bf16.msra.mxu0 %v8045_v50  ;;  %v8083_v50 = vpack.c.bf16 %v5491_v7, %v5489_v52  ;;  %v8103_v52 = vpack.c.bf16 %v5511_v63, %v5509_v10  ;;  %v5508_v7 = vld [vmem:[#allocation26 + $0xca0] sm:$0xff]  ;;  %v5534_v10 = vld [vmem:[#allocation26 + $0xd70] sm:$0xff]  ;;  %v5537_v63 = vld [vmem:[#allocation26 + $0xd88] sm:$0xff] }
 0xc26   : > { %8048 = vmatprep.subr.bf16.mxu0 %v8047_v4  ;;  %v5488_v4 = vld [vmem:[#allocation26 + $0xc00] sm:$0xff] }
 0xc27   : > { %v8085_v18 = vpack.c.bf16 %v5490_v17, %v5488_v4  ;;  %v5512_v17 = vld [vmem:[#allocation26 + $0xcc0] sm:$0xff] }
 0xc29   : > { %8050 = vmatpush1.bf16.msra.mxu0 %v8049_v49  ;;  %v11865_v49 = vpop.f32.mrb[212].mxu1 }
 0xc2a   : > { %8052 = vmatprep.subr.bf16.mxu0 %v8051_v15  ;;  %v8087_v15 = vpack.c.bf16 %v5495_v34, %v5493_v47  ;;  %v11867_v26 = vpop.f32.mrb[213].mxu1  ;;  %v5517_v47 = vld [vmem:[#allocation26 + $0xce8] sm:$0xff]  ;;  %v5519_v34 = vld [vmem:[#allocation26 + $0xcf8] sm:$0xff] }
 0xc2d   : > { %8054 = vmatpush1.bf16.msra.mxu0 %v8053_v32  ;;  %v5499_v32 = vld [vmem:[#allocation26 + $0xc58] sm:$0xff] }
 0xc2e   : > { %8056 = vmatprep.subr.bf16.mxu0 %v8055_v58  ;;  %v8089_v58 = vpack.c.bf16 %v5494_v55, %v5492_v6  ;;  %v8091_v11 = vpack.c.bf16 %v5499_v32, %v5497_v30  ;;  %v5521_v6 = vld [vmem:[#allocation26 + $0xd08] sm:$0xff]  ;;  %v5523_v55 = vld [vmem:[#allocation26 + $0xd18] sm:$0xff]  ;;  %v5520_v32 = vld [vmem:[#allocation26 + $0xd00] sm:$0xff] }
 0xc2f   : > { %v8115_v30 = vpack.c.bf16 %v5523_v55, %v5521_v6  ;;  %v5547_v6 = vld [vmem:[#allocation26 + $0xdd8] sm:$0xff] }
 0xc31   : > { %8058 = vmatpush1.bf16.msra.mxu0 %v8057_v2  ;;  %v5503_v2 = vld [vmem:[#allocation26 + $0xc78] sm:$0xff] }
 0xc32   : > { %8060 = vmatprep.subr.bf16.mxu0 %v8059_v62  ;;  %v8093_v62 = vpack.c.bf16 %v5498_v23, %v5496_v29  ;;  %v8095_v35 = vpack.c.bf16 %v5503_v2, %v5501_v20  ;;  %v5524_v23 = vld [vmem:[#allocation26 + $0xd20] sm:$0xff]  ;;  %v5529_v20 = vld [vmem:[#allocation26 + $0xd48] sm:$0xff]  ;;  %v5531_v2 = vld [vmem:[#allocation26 + $0xd58] sm:$0xff] }
 0xc35   : > { %8062 = vmatpush1.bf16.msra.mxu0 %v8061_v22  ;;  %v8099_v22 = vpack.c.bf16 %v5507_v27, %v5505_v13  ;;  %v5533_v13 = vld [vmem:[#allocation26 + $0xd68] sm:$0xff]  ;;  %v5535_v27 = vld [vmem:[#allocation26 + $0xd78] sm:$0xff] }
 0xc36   : > { %8064 = vmatprep.subr.bf16.mxu0 %v8063_v12  ;;  %v5504_v12 = vld [vmem:[#allocation26 + $0xc80] sm:$0xff] }
 0xc39   : > { %8066 = vmatpush1.bf16.msra.mxu0 %v8065_v59  ;;  %v5513_v59 = vld [vmem:[#allocation26 + $0xcc8] sm:$0xff] }
 0xc3a   : > { %8084 = vmatprep.subr.bf16.mxu0 %v8083_v50  ;;  %v5515_v50 = vld [vmem:[#allocation26 + $0xcd8] sm:$0xff] }
 0xc3b   : > { %v8107_v4 = vpack.c.bf16 %v5515_v50, %v5513_v59  ;;  %v5536_v50 = vld [vmem:[#allocation26 + $0xd80] sm:$0xff] }
 0xc3c   : > { %5277 = vmatmul.mubr.f32.vlgmr.msra.gmra.mrb[18].mxu0 %v11764_v53  ;;  %v5502_v53 = vld [vmem:[#allocation26 + $0xc70] sm:$0xff] }
 0xc3d   : > { %8086 = vmatpush1.bf16.msra.mxu0 %v8085_v18  ;;  %5282 = vmatprep.mubr.f32.mxu0 %v11791_v42  ;;  %v8097_v42 = vpack.c.bf16 %v5502_v53, %v5500_v1  ;;  %v8111_v18 = vpack.c.bf16 %v5519_v34, %v5517_v47  ;;  %v8123_v1 = vpack.c.bf16 %v5531_v2, %v5529_v20  ;;  %v5528_v53 = vld [vmem:[#allocation26 + $0xd40] sm:$0xff] }
 0xc3e   : > { %8088 = vmatprep.subr.bf16.mxu0 %v8087_v15  ;;  %v5516_v15 = vld [vmem:[#allocation26 + $0xce0] sm:$0xff] }
 0xc3f   : > { %v5548_v2 = vld [vmem:[#allocation26 + $0xde0] sm:$0xff] }
 0xc40   : > { %5283 = vmatmul.mubr.f32.gmra.mrb[20].mxu0 %v11789_v25  ;;  %v5506_v25 = vld [vmem:[#allocation26 + $0xc90] sm:$0xff] }
 0xc41   : > { %8090 = vmatpush1.bf16.msra.mxu0 %v8089_v58  ;;  %5288 = vmatprep.mubr.f32.mxu0 %v11795_v14  ;;  %v8101_v14 = vpack.c.bf16 %v5506_v25, %v5504_v12  ;;  %v5525_v58 = vld [vmem:[#allocation26 + $0xd28] sm:$0xff]  ;;  %v8127_v12 = vpack.c.bf16 %v5535_v27, %v5533_v13  ;;  %v5532_v25 = vld [vmem:[#allocation26 + $0xd60] sm:$0xff] }
 0xc42   : > { %8092 = vmatprep.subr.bf16.mxu0 %v8091_v11  ;;  %v5527_v11 = vld [vmem:[#allocation26 + $0xd38] sm:$0xff] }
 0xc43   : > { %v8119_v29 = vpack.c.bf16 %v5527_v11, %v5525_v58  ;;  %v5546_v58 = vld [vmem:[#allocation26 + $0xdd0] sm:$0xff]  ;;  %v5549_v11 = vld [vmem:[#allocation26 + $0xde8] sm:$0xff] }
 0xc44   : > { %5289 = vmatmul.mubr.f32.gmra.mrb[22].mxu0 %v11793_v48  ;;  %v5510_v48 = vld [vmem:[#allocation26 + $0xcb0] sm:$0xff] }
 0xc45   : > { %8094 = vmatpush1.bf16.msra.mxu0 %v8093_v62  ;;  %5294 = vmatprep.mubr.f32.mxu0 %v11799_v5  ;;  %v8105_v5 = vpack.c.bf16 %v5510_v48, %v5508_v7  ;;  %v11885_v62 = vpop.f32.mrb[214].mxu1  ;;  %v8129_v48 = vpack.c.bf16 %v5534_v10, %v5532_v25  ;;  %v5830_v25 = vld [vmem:[#allocation26 + $0xe10] sm:$0xff]  ;;  %v5833_v10 = vld [vmem:[#allocation26 + $0xe28] sm:$0xff] }
 0xc46   : > { %8096 = vmatprep.subr.bf16.mxu0 %v8095_v35 }
 0xc48   : > { %5295 = vmatmul.mubr.f32.gmra.mrb[24].mxu0 %v11797_v60  ;;  %v5514_v60 = vld [vmem:[#allocation26 + $0xcd0] sm:$0xff] }
 0xc49   : > { %8098 = vmatpush1.bf16.msra.mxu0 %v8097_v42  ;;  %5300 = vmatprep.mubr.f32.mxu0 %v11803_v57  ;;  %v8109_v57 = vpack.c.bf16 %v5514_v60, %v5512_v17  ;;  %v5543_v17 = vld [vmem:[#allocation26 + $0xdb8] sm:$0xff] }
 0xc4a   : > { %8100 = vmatprep.subr.bf16.mxu0 %v8099_v22 }
 0xc4c   : > { %5301 = vmatmul.mubr.f32.gmra.mrb[26].mxu0 %v11801_v44  ;;  %v5518_v44 = vld [vmem:[#allocation26 + $0xcf0] sm:$0xff] }
 0xc4d   : > { %8102 = vmatpush1.bf16.msra.mxu0 %v8101_v14  ;;  %5306 = vmatprep.mubr.f32.mxu0 %v11807_v38  ;;  %v8113_v38 = vpack.c.bf16 %v5518_v44, %v5516_v15  ;;  %v5539_v14 = vld [vmem:[#allocation26 + $0xd98] sm:$0xff]  ;;  %v5542_v15 = vld [vmem:[#allocation26 + $0xdb0] sm:$0xff]  ;;  %v5545_v44 = vld [vmem:[#allocation26 + $0xdc8] sm:$0xff] }
 0xc4e   : > { %8104 = vmatprep.subr.bf16.mxu0 %v8103_v52  ;;  %v8131_v59 = vpack.c.bf16 %v5539_v14, %v5537_v63  ;;  %v5835_v63 = vld [vmem:[#allocation26 + $0xe38] sm:$0xff] }
 0xc50   : > { %5307 = vmatmul.mubr.f32.gmra.mrb[28].mxu0 %v11805_v56  ;;  %v5522_v56 = vld [vmem:[#allocation26 + $0xd10] sm:$0xff] }
 0xc51   : > { %8106 = vmatpush1.bf16.msra.mxu0 %v8105_v5  ;;  %5312 = vmatprep.mubr.f32.mxu0 %v11811_v43  ;;  %v8117_v43 = vpack.c.bf16 %v5522_v56, %v5520_v32  ;;  %v5538_v5 = vld [vmem:[#allocation26 + $0xd90] sm:$0xff]  ;;  %v8139_v32 = vpack.c.bf16 %v5547_v6, %v5545_v44  ;;  %v5544_v56 = vld [vmem:[#allocation26 + $0xdc0] sm:$0xff] }
 0xc52   : > { %8108 = vmatprep.subr.bf16.mxu0 %v8107_v4  ;;  %v5541_v4 = vld [vmem:[#allocation26 + $0xda8] sm:$0xff]  ;;  %v8133_v34 = vpack.c.bf16 %v5538_v5, %v5536_v50  ;;  %v8167_v50 = vpack.c.bf16 %v5835_v63, %v5833_v10  ;;  %v5832_v5 = vld [vmem:[#allocation26 + $0xe20] sm:$0xff] }
 0xc53   : > { %v5836_v6 = vld [vmem:[#allocation26 + $0xe40] sm:$0xff] }
 0xc54   : > { %5313 = vmatmul.mubr.f32.gmra.mrb[30].mxu0 %v11809_v36  ;;  %v5526_v36 = vld [vmem:[#allocation26 + $0xd30] sm:$0xff]  ;;  %v5848_v63 = vld [vmem:[#allocation26 + $0xea0] sm:$0xff] }
 0xc55   : > { %8110 = vmatpush1.bf16.msra.mxu0 %v8109_v57  ;;  %5318 = vmatprep.mubr.f32.mxu0 %v11815_v8  ;;  %v11887_v8 = vpop.f32.mrb[215].mxu1  ;;  %v8121_v35 = vpack.c.bf16 %v5526_v36, %v5524_v23  ;;  %v8135_v57 = vpack.c.bf16 %v5543_v17, %v5541_v4  ;;  %v8141_v36 = vpack.c.bf16 %v5546_v58, %v5544_v56  ;;  %v5834_v4 = vld [vmem:[#allocation26 + $0xe30] sm:$0xff]  ;;  %v5837_v17 = vld [vmem:[#allocation26 + $0xe48] sm:$0xff]  ;;  %v5843_v56 = vld [vmem:[#allocation26 + $0xe78] sm:$0xff] }
 0xc56   : > { %8112 = vmatprep.subr.bf16.mxu0 %v8111_v18  ;;  %v11889_v42 = vpop.f32.mrb[216].mxu1  ;;  %v5540_v18 = vld [vmem:[#allocation26 + $0xda0] sm:$0xff] }
 0xc58   : > { %5319 = vmatmul.mubr.f32.gmra.mrb[32].mxu0 %v11813_v19  ;;  %v5530_v19 = vld [vmem:[#allocation26 + $0xd50] sm:$0xff] }
 0xc59   : > { %8114 = vmatpush1.bf16.msra.mxu0 %v8113_v38  ;;  %5616 = vmatprep.mubr.f32.mxu0 %v11819_v16  ;;  %v11891_v16 = vpop.f32.mrb[217].mxu1  ;;  %v8125_v22 = vpack.c.bf16 %v5530_v19, %v5528_v53  ;;  %v5831_v53 = vld [vmem:[#allocation26 + $0xe18] sm:$0xff] }
 0xc5a   : > { %8116 = vmatprep.subr.bf16.mxu0 %v8115_v30  ;;  %v11893_v52 = vpop.f32.mrb[218].mxu1  ;;  %v8137_v30 = vpack.c.bf16 %v5542_v15, %v5540_v18  ;;  %v8169_v18 = vpack.c.bf16 %v5834_v4, %v5832_v5  ;;  %v5855_v5 = vld [vmem:[#allocation26 + $0xed8] sm:$0xff] }
 0xc5b   : > { %v11895_v7 = vpop.f32.mrb[219].mxu1 }
 0xc5c   : > { %v11897_v60 = vpop.f32.mrb[220].mxu1 }
 0xc5d   : > { %8118 = vmatpush1.bf16.msra.mxu0 %v8117_v43  ;;  %v11899_v47 = vpop.f32.mrb[221].mxu1  ;;  %v5551_v43 = vld [vmem:[#allocation26 + $0xdf8] sm:$0xff] }
 0xc5e   : > { %8120 = vmatprep.subr.bf16.mxu0 %v8119_v29  ;;  %v11901_v55 = vpop.f32.mrb[222].mxu1  ;;  %v8143_v20 = vpack.c.bf16 %v5551_v43, %v5549_v11  ;;  %v5840_v43 = vld [vmem:[#allocation26 + $0xe60] sm:$0xff] }
 0xc5f   : > { %v11903_v38 = vpop.f32.mrb[223].mxu1 }
 0xc60   : > { %v11905_v29 = vpop.f32.mrb[224].mxu1 }
 0xc61   : > { %8122 = vmatpush1.bf16.msra.mxu0 %v8121_v35  ;;  %v11907_v23 = vpop.f32.mrb[225].mxu1  ;;  %v5550_v35 = vld [vmem:[#allocation26 + $0xdf0] sm:$0xff] }
 0xc62   : > { %8124 = vmatprep.subr.bf16.mxu0 %v8123_v1  ;;  %v5829_v1 = vld [vmem:[#allocation26 + $0xe08] sm:$0xff]  ;;  %v11909_v19 = vpop.f32.mrb[226].mxu1  ;;  %v8145_v27 = vpack.c.bf16 %v5550_v35, %v5548_v2  ;;  %v5847_v2 = vld [vmem:[#allocation26 + $0xe98] sm:$0xff] }
 0xc63   : > { %v11911_v13 = vpop.f32.mrb[227].mxu1 }
 0xc65   : > { %8126 = vmatpush1.bf16.msra.mxu0 %v8125_v22  ;;  %v8163_v22 = vpack.c.bf16 %v5831_v53, %v5829_v1  ;;  %v5844_v53 = vld [vmem:[#allocation26 + $0xe80] sm:$0xff] }
 0xc66   : > { %8128 = vmatprep.subr.bf16.mxu0 %v8127_v12  ;;  %v5828_v12 = vld [vmem:[#allocation26 + $0xe00] sm:$0xff]  ;;  %v11913_v14 = vpop.f32.mrb[228].mxu1 }
 0xc69   : > { %8130 = vmatpush1.bf16.msra.mxu0 %v8129_v48  ;;  %v8165_v48 = vpack.c.bf16 %v5830_v25, %v5828_v12  ;;  %v5851_v12 = vld [vmem:[#allocation26 + $0xeb8] sm:$0xff] }
 0xc6a   : > { %8132 = vmatprep.subr.bf16.mxu0 %v8131_v59  ;;  %v11915_v59 = vpop.f32.mrb[229].mxu1 }
 0xc6d   : > { %8134 = vmatpush1.bf16.msra.mxu0 %v8133_v34  ;;  %v5839_v34 = vld [vmem:[#allocation26 + $0xe58] sm:$0xff] }
 0xc6e   : > { %8136 = vmatprep.subr.bf16.mxu0 %v8135_v57  ;;  %v11918_v57 = vpop.f32.mrb[230].mxu1  ;;  %v8171_v44 = vpack.c.bf16 %v5839_v34, %v5837_v17  ;;  %v5852_v34 = vld [vmem:[#allocation26 + $0xec0] sm:$0xff] }
 0xc6f   : > { %v11921_v15 = vpop.f32.mrb[231].mxu1 }
 0xc70   : > { %v11924_v58 = vpop.f32.mrb[232].mxu1 }
 0xc71   : > { %8138 = vmatpush1.bf16.msra.mxu0 %v8137_v30  ;;  %v5838_v30 = vld [vmem:[#allocation26 + $0xe50] sm:$0xff]  ;;  %v11927_v11 = vpop.f32.mrb[233].mxu1 }
 0xc72   : > { %8140 = vmatprep.subr.bf16.mxu0 %v8139_v32  ;;  %v5841_v32 = vld [vmem:[#allocation26 + $0xe68] sm:$0xff] }
 0xc75   : > { %8142 = vmatpush1.bf16.msra.mxu0 %v8141_v36  ;;  %v5842_v36 = vld [vmem:[#allocation26 + $0xe70] sm:$0xff] }
 0xc76   : > { %8144 = vmatprep.subr.bf16.mxu0 %v8143_v20  ;;  %v5845_v20 = vld [vmem:[#allocation26 + $0xe88] sm:$0xff]  ;;  %v11930_v35 = vpop.f32.mrb[234].mxu1 }
 0xc77   : > { %v11933_v1 = vpop.f32.mrb[235].mxu1 }
 0xc79   : > { %8146 = vmatpush1.bf16.msra.mxu0 %v8145_v27  ;;  %v5846_v27 = vld [vmem:[#allocation26 + $0xe90] sm:$0xff] }
 0xc7a   : > { %8164 = vmatprep.subr.bf16.mxu0 %v8163_v22  ;;  %v5849_v22 = vld [vmem:[#allocation26 + $0xea8] sm:$0xff]  ;;  %v11936_v25 = vpop.f32.mrb[236].mxu1 }
 0xc7b   : > { %v11939_v10 = vpop.f32.mrb[237].mxu1 }
 0xc7c   : > { %5617 = vmatmul.mubr.f32.vlgmr.msra.gmra.mrb[18].mxu0 %v11817_v41  ;;  %v8173_v41 = vpack.c.bf16 %v5838_v30, %v5836_v6  ;;  %v5859_v6 = vld [vmem:[#allocation26 + $0xef8] sm:$0xff] }
 0xc7d   : > { %8166 = vmatpush1.bf16.msra.mxu0 %v8165_v48  ;;  %5622 = vmatprep.mubr.f32.mxu0 %v11839_v0  ;;  %v8175_v0 = vpack.c.bf16 %v5843_v56, %v5841_v32  ;;  %v5850_v48 = vld [vmem:[#allocation26 + $0xeb0] sm:$0xff]  ;;  %v5856_v56 = vld [vmem:[#allocation26 + $0xee0] sm:$0xff] }
 0xc7e   : > { %8168 = vmatprep.subr.bf16.mxu0 %v8167_v50  ;;  %v5853_v50 = vld [vmem:[#allocation26 + $0xec8] sm:$0xff]  ;;  %v11942_v4 = vpop.f32.mrb[238].mxu1 }
 0xc7f   : > { %v11945_v17 = vpop.f32.mrb[239].mxu1 }
 0xc80   : > { %5623 = vmatmul.mubr.f32.gmra.mrb[20].mxu0 %v11837_v9  ;;  %v8177_v9 = vpack.c.bf16 %v5842_v36, %v5840_v43  ;;  %v5863_v43 = vld [vmem:[#allocation26 + $0xf18] sm:$0xff] }
 0xc81   : > { %8170 = vmatpush1.bf16.msra.mxu0 %v8169_v18  ;;  %5628 = vmatprep.mubr.f32.mxu0 %v11843_v3  ;;  %v8179_v3 = vpack.c.bf16 %v5847_v2, %v5845_v20  ;;  %v5854_v18 = vld [vmem:[#allocation26 + $0xed0] sm:$0xff]  ;;  %v5860_v20 = vld [vmem:[#allocation26 + $0xf00] sm:$0xff] }
 0xc82   : > { %8172 = vmatprep.subr.bf16.mxu0 %v8171_v44  ;;  %v5857_v44 = vld [vmem:[#allocation26 + $0xee8] sm:$0xff]  ;;  %v8189_v30 = vpack.c.bf16 %v5854_v18, %v5852_v34  ;;  %v5862_v2 = vld [vmem:[#allocation26 + $0xf10] sm:$0xff]  ;;  %v5872_v34 = vld [vmem:[#allocation26 + $0xf60] sm:$0xff] }
 0xc83   : > { %v8191_v32 = vpack.c.bf16 %v5859_v6, %v5857_v44  ;;  %v5877_v18 = vld [vmem:[#allocation26 + $0xf88] sm:$0xff]  ;;  %v5879_v44 = vld [vmem:[#allocation26 + $0xf98] sm:$0xff] }
 0xc84   : > { %5629 = vmatmul.mubr.f32.gmra.mrb[22].mxu0 %v11841_v46  ;;  %v8181_v46 = vpack.c.bf16 %v5846_v27, %v5844_v53  ;;  %v5867_v53 = vld [vmem:[#allocation26 + $0xf38] sm:$0xff]  ;;  %v8197_v27 = vpack.c.bf16 %v5862_v2, %v5860_v20  ;;  %v5882_v20 = vld [vmem:[#allocation26 + $0xfb0] sm:$0xff]  ;;  %v5885_v2 = vld [vmem:[#allocation26 + $0xfc8] sm:$0xff] }
 0xc85   : > { %8174 = vmatpush1.bf16.msra.mxu0 %v8173_v41  ;;  %5634 = vmatprep.mubr.f32.mxu0 %v11847_v54  ;;  %v8183_v54 = vpack.c.bf16 %v5851_v12, %v5849_v22  ;;  %v5864_v22 = vld [vmem:[#allocation26 + $0xf20] sm:$0xff]  ;;  %v5869_v12 = vld [vmem:[#allocation26 + $0xf48] sm:$0xff] }
 0xc86   : > { %8176 = vmatprep.subr.bf16.mxu0 %v8175_v0  ;;  %v5861_v0 = vld [vmem:[#allocation26 + $0xf08] sm:$0xff] }
 0xc88   : > { %5635 = vmatmul.mubr.f32.gmra.mrb[24].mxu0 %v11845_v28  ;;  %v8185_v28 = vpack.c.bf16 %v5850_v48, %v5848_v63  ;;  %v5868_v48 = vld [vmem:[#allocation26 + $0xf40] sm:$0xff] }
 0xc89   : > { %8178 = vmatpush1.bf16.msra.mxu0 %v8177_v9  ;;  %5640 = vmatprep.mubr.f32.mxu0 %v11851_v33  ;;  %v8187_v33 = vpack.c.bf16 %v5855_v5, %v5853_v50  ;;  %v5870_v50 = vld [vmem:[#allocation26 + $0xf50] sm:$0xff]  ;;  %v5873_v5 = vld [vmem:[#allocation26 + $0xf68] sm:$0xff] }
 0xc8a   : > { %8180 = vmatprep.subr.bf16.mxu0 %v8179_v3  ;;  %v5865_v3 = vld [vmem:[#allocation26 + $0xf28] sm:$0xff] }
 0xc8c   : > { %5641 = vmatmul.mubr.f32.gmra.mrb[26].mxu0 %v11849_v24  ;;  %v11949_v24 = vpop.f32.mrb[240].mxu1 }
 0xc8d   : > { %8182 = vmatpush1.bf16.msra.mxu0 %v8181_v46  ;;  %5646 = vmatprep.mubr.f32.mxu0 %v11855_v37  ;;  %v5858_v37 = vld [vmem:[#allocation26 + $0xef0] sm:$0xff]  ;;  %v11951_v41 = vpop.f32.mrb[241].mxu1  ;;  %v5871_v46 = vld [vmem:[#allocation26 + $0xf58] sm:$0xff] }
 0xc8e   : > { %8184 = vmatprep.subr.bf16.mxu0 %v8183_v54  ;;  %v8193_v36 = vpack.c.bf16 %v5858_v37, %v5856_v56  ;;  %v8203_v63 = vpack.c.bf16 %v5871_v46, %v5869_v12  ;;  %v5878_v56 = vld [vmem:[#allocation26 + $0xf90] sm:$0xff]  ;;  %v5881_v37 = vld [vmem:[#allocation26 + $0xfa8] sm:$0xff]  ;;  %v5891_v12 = vld [vmem:[#allocation26 + $0xff8] sm:$0xff] }
 0xc90   : > { %5647 = vmatmul.mubr.f32.gmra.mrb[28].mxu0 %v11853_v45  ;;  %v11955_v45 = vpop.f32.mrb[242].mxu1 }
 0xc91   : > { %8186 = vmatpush1.bf16.msra.mxu0 %v8185_v28  ;;  %5652 = vmatprep.mubr.f32.mxu0 %v11859_v61  ;;  %v8195_v61 = vpack.c.bf16 %v5863_v43, %v5861_v0  ;;  %v11957_v9 = vpop.f32.mrb[243].mxu1  ;;  %v5875_v28 = vld [vmem:[#allocation26 + $0xf78] sm:$0xff] }
 0xc92   : > { %8188 = vmatprep.subr.bf16.mxu0 %v8187_v33  ;;  %v8207_v33 = vpack.c.bf16 %v5875_v28, %v5873_v5  ;;  %v5883_v0 = vld [vmem:[#allocation26 + $0xfb8] sm:$0xff] }
 0xc93   : > { %v6171_v5 = vld [vmem:[#allocation26 + $0x1018] sm:$0xff] }
 0xc94   : > { %5653 = vmatmul.mubr.f32.gmra.mrb[30].mxu0 %v11857_v51  ;;  %v8199_v51 = vpack.c.bf16 %v5867_v53, %v5865_v3  ;;  %v5887_v3 = vld [vmem:[#allocation26 + $0xfd8] sm:$0xff] }
 0xc95   : > { %8190 = vmatpush1.bf16.msra.mxu0 %v8189_v30  ;;  %5658 = vmatprep.mubr.f32.mxu0 %v11863_v21  ;;  %v5866_v21 = vld [vmem:[#allocation26 + $0xf30] sm:$0xff]  ;;  %v8211_v30 = vpack.c.bf16 %v5879_v44, %v5877_v18  ;;  %v6175_v18 = vld [vmem:[#allocation26 + $0x1038] sm:$0xff] }
 0xc96   : > { %8192 = vmatprep.subr.bf16.mxu0 %v8191_v32  ;;  %v8201_v54 = vpack.c.bf16 %v5866_v21, %v5864_v22  ;;  %v5876_v32 = vld [vmem:[#allocation26 + $0xf80] sm:$0xff]  ;;  %v5886_v22 = vld [vmem:[#allocation26 + $0xfd0] sm:$0xff]  ;;  %v5889_v21 = vld [vmem:[#allocation26 + $0xfe8] sm:$0xff] }
 0xc97   : > { %v8213_v43 = vpack.c.bf16 %v5878_v56, %v5876_v32  ;;  %v6174_v32 = vld [vmem:[#allocation26 + $0x1030] sm:$0xff]  ;;  %v6177_v56 = vld [vmem:[#allocation26 + $0x1048] sm:$0xff] }
 0xc98   : > { %5659 = vmatmul.mubr.f32.gmra.mrb[32].mxu0 %v11861_v31  ;;  %v8205_v31 = vpack.c.bf16 %v5870_v50, %v5868_v48  ;;  %v5890_v48 = vld [vmem:[#allocation26 + $0xff0] sm:$0xff]  ;;  %v6169_v50 = vld [vmem:[#allocation26 + $0x1008] sm:$0xff] }
 0xc99   : > { %8194 = vmatpush1.bf16.msra.mxu0 %v8193_v36  ;;  %5956 = vmatprep.mubr.f32.mxu0 %v11867_v26  ;;  %v5874_v26 = vld [vmem:[#allocation26 + $0xf70] sm:$0xff]  ;;  %v8215_v36 = vpack.c.bf16 %v5883_v0, %v5881_v37  ;;  %v6179_v37 = vld [vmem:[#allocation26 + $0x1058] sm:$0xff] }
 0xc9a   : > { %8196 = vmatprep.subr.bf16.mxu0 %v8195_v61  ;;  %v8209_v6 = vpack.c.bf16 %v5874_v26, %v5872_v34  ;;  %v5880_v61 = vld [vmem:[#allocation26 + $0xfa0] sm:$0xff]  ;;  %v6170_v34 = vld [vmem:[#allocation26 + $0x1010] sm:$0xff]  ;;  %v6173_v26 = vld [vmem:[#allocation26 + $0x1028] sm:$0xff] }
 0xc9b   : > { %v8217_v53 = vpack.c.bf16 %v5882_v20, %v5880_v61  ;;  %v6178_v61 = vld [vmem:[#allocation26 + $0x1050] sm:$0xff]  ;;  %v6181_v20 = vld [vmem:[#allocation26 + $0x1068] sm:$0xff] }
 0xc9d   : > { %8198 = vmatpush1.bf16.msra.mxu0 %v8197_v27  ;;  %v8219_v27 = vpack.c.bf16 %v5887_v3, %v5885_v2  ;;  %v6183_v2 = vld [vmem:[#allocation26 + $0x1078] sm:$0xff] }
 0xc9e   : > { %8200 = vmatprep.subr.bf16.mxu0 %v8199_v51  ;;  %v5884_v51 = vld [vmem:[#allocation26 + $0xfc0] sm:$0xff] }
 0xc9f   : > { %v8221_v46 = vpack.c.bf16 %v5886_v22, %v5884_v51  ;;  %v6185_v51 = vld [vmem:[#allocation26 + $0x1088] sm:$0xff]  ;;  %v6187_v22 = vld [vmem:[#allocation26 + $0x1098] sm:$0xff] }
 0xca1   : > { %8202 = vmatpush1.bf16.msra.mxu0 %v8201_v54  ;;  %v8223_v54 = vpack.c.bf16 %v5891_v12, %v5889_v21  ;;  %v8259_v21 = vpack.c.bf16 %v6187_v22, %v6185_v51  ;;  %v6184_v12 = vld [vmem:[#allocation26 + $0x1080] sm:$0xff]  ;;  %v6217_v22 = vld [vmem:[#allocation26 + $0x1188] sm:$0xff] }
 0xca2   : > { %8204 = vmatprep.subr.bf16.mxu0 %v8203_v63  ;;  %v5888_v63 = vld [vmem:[#allocation26 + $0xfe0] sm:$0xff] }
 0xca3   : > { %v8225_v28 = vpack.c.bf16 %v5890_v48, %v5888_v63  ;;  %v6188_v48 = vld [vmem:[#allocation26 + $0x10a0] sm:$0xff] }
 0xca4   : > { %v6212_v51 = vld [vmem:[#allocation26 + $0x1160] sm:$0xff] }
 0xca5   : > { %8206 = vmatpush1.bf16.msra.mxu0 %v8205_v31  ;;  %v8243_v31 = vpack.c.bf16 %v6171_v5, %v6169_v50  ;;  %v6193_v50 = vld [vmem:[#allocation26 + $0x10c8] sm:$0xff]  ;;  %v6195_v5 = vld [vmem:[#allocation26 + $0x10d8] sm:$0xff] }
 0xca6   : > { %8208 = vmatprep.subr.bf16.mxu0 %v8207_v33  ;;  %v6168_v33 = vld [vmem:[#allocation26 + $0x1000] sm:$0xff] }
 0xca7   : > { %v8245_v44 = vpack.c.bf16 %v6170_v34, %v6168_v33  ;;  %v6197_v33 = vld [vmem:[#allocation26 + $0x10e8] sm:$0xff]  ;;  %v6199_v34 = vld [vmem:[#allocation26 + $0x10f8] sm:$0xff] }
 0xca9   : > { %8210 = vmatpush1.bf16.msra.mxu0 %v8209_v6  ;;  %v8247_v6 = vpack.c.bf16 %v6175_v18, %v6173_v26  ;;  %v8271_v26 = vpack.c.bf16 %v6199_v34, %v6197_v33  ;;  %v6196_v18 = vld [vmem:[#allocation26 + $0x10e0] sm:$0xff]  ;;  %v6226_v33 = vld [vmem:[#allocation26 + $0x11d0] sm:$0xff]  ;;  %v6229_v34 = vld [vmem:[#allocation26 + $0x11e8] sm:$0xff] }
 0xcaa   : > { %8212 = vmatprep.subr.bf16.mxu0 %v8211_v30  ;;  %v6172_v30 = vld [vmem:[#allocation26 + $0x1020] sm:$0xff] }
 0xcab   : > { %v8249_v0 = vpack.c.bf16 %v6174_v32, %v6172_v30  ;;  %v6200_v32 = vld [vmem:[#allocation26 + $0x1100] sm:$0xff] }
 0xcad   : > { %8214 = vmatpush1.bf16.msra.mxu0 %v8213_v43  ;;  %v8251_v43 = vpack.c.bf16 %v6179_v37, %v6177_v56  ;;  %v6205_v56 = vld [vmem:[#allocation26 + $0x1128] sm:$0xff]  ;;  %v6207_v37 = vld [vmem:[#allocation26 + $0x1138] sm:$0xff] }
 0xcae   : > { %8216 = vmatprep.subr.bf16.mxu0 %v8215_v36  ;;  %v6176_v36 = vld [vmem:[#allocation26 + $0x1040] sm:$0xff] }
 0xcaf   : > { %v8253_v3 = vpack.c.bf16 %v6178_v61, %v6176_v36  ;;  %v6209_v36 = vld [vmem:[#allocation26 + $0x1148] sm:$0xff]  ;;  %v6211_v61 = vld [vmem:[#allocation26 + $0x1158] sm:$0xff] }
 0xcb1   : > { %8218 = vmatpush1.bf16.msra.mxu0 %v8217_v53  ;;  %v8255_v53 = vpack.c.bf16 %v6183_v2, %v6181_v20  ;;  %v8283_v20 = vpack.c.bf16 %v6211_v61, %v6209_v36  ;;  %v6208_v2 = vld [vmem:[#allocation26 + $0x1140] sm:$0xff] }
 0xcb2   : > { %8220 = vmatprep.subr.bf16.mxu0 %v8219_v27  ;;  %v6180_v27 = vld [vmem:[#allocation26 + $0x1060] sm:$0xff] }
 0xcb5   : > { %8222 = vmatpush1.bf16.msra.mxu0 %v8221_v46  ;;  %v6189_v46 = vld [vmem:[#allocation26 + $0x10a8] sm:$0xff] }
 0xcb6   : > { %8224 = vmatprep.subr.bf16.mxu0 %v8223_v54  ;;  %v6191_v54 = vld [vmem:[#allocation26 + $0x10b8] sm:$0xff] }
 0xcb7   : > { %v8263_v63 = vpack.c.bf16 %v6191_v54, %v6189_v46  ;;  %v6218_v46 = vld [vmem:[#allocation26 + $0x1190] sm:$0xff]  ;;  %v6221_v54 = vld [vmem:[#allocation26 + $0x11a8] sm:$0xff] }
 0xcb9   : > { %8226 = vmatpush1.bf16.msra.mxu0 %v8225_v28  ;;  %v8267_v28 = vpack.c.bf16 %v6195_v5, %v6193_v50  ;;  %v6222_v50 = vld [vmem:[#allocation26 + $0x11b0] sm:$0xff]  ;;  %v6225_v5 = vld [vmem:[#allocation26 + $0x11c8] sm:$0xff] }
 0xcba   : > { %8244 = vmatprep.subr.bf16.mxu0 %v8243_v31  ;;  %v6192_v31 = vld [vmem:[#allocation26 + $0x10c0] sm:$0xff] }
 0xcbc   : > { %5957 = vmatmul.mubr.f32.vlgmr.msra.gmra.mrb[18].mxu0 %v11865_v49  ;;  %v6182_v49 = vld [vmem:[#allocation26 + $0x1070] sm:$0xff] }
 0xcbd   : > { %8246 = vmatpush1.bf16.msra.mxu0 %v8245_v44  ;;  %5962 = vmatprep.mubr.f32.mxu0 %v11887_v8  ;;  %v8257_v8 = vpack.c.bf16 %v6182_v49, %v6180_v27  ;;  %v6201_v44 = vld [vmem:[#allocation26 + $0x1108] sm:$0xff]  ;;  %v6215_v27 = vld [vmem:[#allocation26 + $0x1178] sm:$0xff] }
 0xcbe   : > { %8248 = vmatprep.subr.bf16.mxu0 %v8247_v6  ;;  %v6203_v6 = vld [vmem:[#allocation26 + $0x1118] sm:$0xff] }
 0xcbf   : > { %v8275_v30 = vpack.c.bf16 %v6203_v6, %v6201_v44  ;;  %v6230_v44 = vld [vmem:[#allocation26 + $0x11f0] sm:$0xff] }
 0xcc0   : > { %5963 = vmatmul.mubr.f32.gmra.mrb[20].mxu0 %v11885_v62  ;;  %v6186_v62 = vld [vmem:[#allocation26 + $0x1090] sm:$0xff] }
 0xcc1   : > { %8250 = vmatpush1.bf16.msra.mxu0 %v8249_v0  ;;  %5968 = vmatprep.mubr.f32.mxu0 %v11891_v16  ;;  %v8261_v16 = vpack.c.bf16 %v6186_v62, %v6184_v12  ;;  %v8279_v0 = vpack.c.bf16 %v6207_v37, %v6205_v56  ;;  %v6216_v62 = vld [vmem:[#allocation26 + $0x1180] sm:$0xff] }
 0xcc2   : > { %8252 = vmatprep.subr.bf16.mxu0 %v8251_v43  ;;  %v6204_v43 = vld [vmem:[#allocation26 + $0x1120] sm:$0xff] }
 0xcc4   : > { %5969 = vmatmul.mubr.f32.gmra.mrb[22].mxu0 %v11889_v42  ;;  %v6190_v42 = vld [vmem:[#allocation26 + $0x10b0] sm:$0xff] }
 0xcc5   : > { %8254 = vmatpush1.bf16.msra.mxu0 %v8253_v3  ;;  %5974 = vmatprep.mubr.f32.mxu0 %v11895_v7  ;;  %v8265_v7 = vpack.c.bf16 %v6190_v42, %v6188_v48  ;;  %v6210_v3 = vld [vmem:[#allocation26 + $0x1150] sm:$0xff]  ;;  %v6220_v42 = vld [vmem:[#allocation26 + $0x11a0] sm:$0xff] }
 0xcc6   : > { %8256 = vmatprep.subr.bf16.mxu0 %v8255_v53  ;;  %v6213_v53 = vld [vmem:[#allocation26 + $0x1168] sm:$0xff] }
 0xcc7   : > { %v8287_v49 = vpack.c.bf16 %v6215_v27, %v6213_v53 }
 0xcc8   : > { %5975 = vmatmul.mubr.f32.gmra.mrb[24].mxu0 %v11893_v52  ;;  %v6194_v52 = vld [vmem:[#allocation26 + $0x10d0] sm:$0xff] }
 0xcc9   : > { %8258 = vmatpush1.bf16.msra.mxu0 %v8257_v8  ;;  %5980 = vmatprep.mubr.f32.mxu0 %v11899_v47  ;;  %v8269_v47 = vpack.c.bf16 %v6194_v52, %v6192_v31  ;;  %v6219_v8 = vld [vmem:[#allocation26 + $0x1198] sm:$0xff]  ;;  %v6224_v52 = vld [vmem:[#allocation26 + $0x11c0] sm:$0xff] }
 0xcca   : > { %8260 = vmatprep.subr.bf16.mxu0 %v8259_v21  ;;  %v8291_v12 = vpack.c.bf16 %v6219_v8, %v6217_v22 }
 0xccc   : > { %5981 = vmatmul.mubr.f32.gmra.mrb[26].mxu0 %v11897_v60  ;;  %v6198_v60 = vld [vmem:[#allocation26 + $0x10f0] sm:$0xff] }
 0xccd   : > { %8262 = vmatpush1.bf16.msra.mxu0 %v8261_v16  ;;  %5986 = vmatprep.mubr.f32.mxu0 %v11903_v38  ;;  %v8273_v38 = vpack.c.bf16 %v6198_v60, %v6196_v18  ;;  %v6223_v16 = vld [vmem:[#allocation26 + $0x11b8] sm:$0xff]  ;;  %v6228_v60 = vld [vmem:[#allocation26 + $0x11e0] sm:$0xff] }
 0xcce   : > { %8264 = vmatprep.subr.bf16.mxu0 %v8263_v63  ;;  %v8293_v63 = vpack.c.bf16 %v6218_v46, %v6216_v62  ;;  %v8295_v48 = vpack.c.bf16 %v6223_v16, %v6221_v54  ;;  %v8305_v6 = vpack.c.bf16 %v6230_v44, %v6228_v60 }
 0xcd0   : > { %5987 = vmatmul.mubr.f32.gmra.mrb[28].mxu0 %v11901_v55  ;;  %v6202_v55 = vld [vmem:[#allocation26 + $0x1110] sm:$0xff] }
 0xcd1   : > { %8266 = vmatpush1.bf16.msra.mxu0 %v8265_v7  ;;  %5992 = vmatprep.mubr.f32.mxu0 %v11907_v23  ;;  %v8277_v23 = vpack.c.bf16 %v6202_v55, %v6200_v32  ;;  %v6227_v7 = vld [vmem:[#allocation26 + $0x11d8] sm:$0xff] }
 0xcd2   : > { %8268 = vmatprep.subr.bf16.mxu0 %v8267_v28  ;;  %v8297_v28 = vpack.c.bf16 %v6222_v50, %v6220_v42  ;;  %v8299_v31 = vpack.c.bf16 %v6227_v7, %v6225_v5 }
 0xcd4   : > { %5993 = vmatmul.mubr.f32.gmra.mrb[30].mxu0 %v11905_v29  ;;  %v6206_v29 = vld [vmem:[#allocation26 + $0x1130] sm:$0xff] }
 0xcd5   : > { %8270 = vmatpush1.bf16.msra.mxu0 %v8269_v47  ;;  %5998 = vmatprep.mubr.f32.mxu0 %v11911_v13  ;;  %v8281_v13 = vpack.c.bf16 %v6206_v29, %v6204_v43  ;;  %v6231_v47 = vld [vmem:[#allocation26 + $0x11f8] sm:$0xff] }
 0xcd6   : > { %8272 = vmatprep.subr.bf16.mxu0 %v8271_v26  ;;  %v8301_v26 = vpack.c.bf16 %v6226_v33, %v6224_v52  ;;  %v8303_v18 = vpack.c.bf16 %v6231_v47, %v6229_v34 }
 0xcd8   : > { %5999 = vmatmul.mubr.f32.gmra.mrb[32].mxu0 %v11909_v19  ;;  %v8285_v19 = vpack.c.bf16 %v6210_v3, %v6208_v2 }
 0xcd9   : > { %8274 = vmatpush1.bf16.msra.mxu0 %v8273_v38  ;;  %6296 = vmatprep.mubr.f32.mxu0 %v11915_v59  ;;  %v6214_v59 = vld [vmem:[#allocation26 + $0x1170] sm:$0xff] }
 0xcda   : > { %8276 = vmatprep.subr.bf16.mxu0 %v8275_v30  ;;  %v8289_v21 = vpack.c.bf16 %v6214_v59, %v6212_v51 }
 0xcdd   : > { %8278 = vmatpush1.bf16.msra.mxu0 %v8277_v23 }
 0xcde   : > { %8280 = vmatprep.subr.bf16.mxu0 %v8279_v0 }
 0xce1   : > { %8282 = vmatpush1.bf16.msra.mxu0 %v8281_v13 }
 0xce2   : > { %8284 = vmatprep.subr.bf16.mxu0 %v8283_v20 }
 0xce5   : > { %8286 = vmatpush1.bf16.msra.mxu0 %v8285_v19 }
 0xce6   : > { %8288 = vmatprep.subr.bf16.mxu0 %v8287_v49 }
 0xce9   : > { %8290 = vmatpush1.bf16.msra.mxu0 %v8289_v21 }
 0xcea   : > { %8292 = vmatprep.subr.bf16.mxu0 %v8291_v12 }
 0xced   : > { %8294 = vmatpush1.bf16.msra.mxu0 %v8293_v63 }
 0xcee   : > { %8296 = vmatprep.subr.bf16.mxu0 %v8295_v48 }
 0xcf1   : > { %8298 = vmatpush1.bf16.msra.mxu0 %v8297_v28 }
 0xcf2   : > { %8300 = vmatprep.subr.bf16.mxu0 %v8299_v31 }
 0xcf5   : > { %8302 = vmatpush1.bf16.msra.mxu0 %v8301_v26 }
 0xcf6   : > { %8304 = vmatprep.subr.bf16.mxu0 %v8303_v18 }
 0xcf9   : > { %8306 = vmatpush1.bf16.msra.mxu0 %v8305_v6 }
 0xcfc   : > { %6297 = vmatmul.mubr.f32.vlgmr.msra.gmra.mrb[18].mxu0 %v11913_v14 }
 0xcfd   : > { %6302 = vmatprep.mubr.f32.mxu0 %v11921_v15 }
 0xd00   : > { %6303 = vmatmul.mubr.f32.gmra.mrb[20].mxu0 %v11918_v57 }
 0xd01   : > { %6308 = vmatprep.mubr.f32.mxu0 %v11927_v11 }
 0xd04   : > { %6309 = vmatmul.mubr.f32.gmra.mrb[22].mxu0 %v11924_v58 }
 0xd05   : > { %6314 = vmatprep.mubr.f32.mxu0 %v11933_v1 }
 0xd08   : > { %6315 = vmatmul.mubr.f32.gmra.mrb[24].mxu0 %v11930_v35 }
 0xd09   : > { %6320 = vmatprep.mubr.f32.mxu0 %v11939_v10 }
 0xd0c   : > { %6321 = vmatmul.mubr.f32.gmra.mrb[26].mxu0 %v11936_v25 }
 0xd0d   : > { %6326 = vmatprep.mubr.f32.mxu0 %v11945_v17 }
 0xd10   : > { %6327 = vmatmul.mubr.f32.gmra.mrb[28].mxu0 %v11942_v4 }
 0xd11   : > { %6332 = vmatprep.mubr.f32.mxu0 %v11951_v41 }
 0xd14   : > { %6333 = vmatmul.mubr.f32.gmra.mrb[30].mxu0 %v11949_v24 }
 0xd15   : > { %6338 = vmatprep.mubr.f32.mxu0 %v11957_v9 }
 0xd18   : > { %6339 = vmatmul.mubr.f32.gmra.mrb[32].mxu0 %v11955_v45 }
 0xdcf   : > { %v6298_v14 = vpop.f32.mrb[18].mxu0 }
 0xdd0   : > { %v6300_v57 = vpop.f32.mrb[19].mxu0 }
 0xdd1   : > { %v6363_v15 = vadd.f32 %v6300_v57, %v6298_v14 }
 0xdd3   : > { %6364 = vadd.xlane.f32.xlu0 %v6363_v15  ;;  %v6304_v58 = vpop.f32.mrb[20].mxu0 }
 0xdd4   : > { %v6306_v11 = vpop.f32.mrb[21].mxu0 }
 0xdd5   : > { %v6366_v35 = vadd.f32 %v6306_v11, %v6304_v58 }
 0xdd7   : > { %6367 = vadd.xlane.f32.xlu1 %v6366_v35  ;;  %v6310_v1 = vpop.f32.mrb[22].mxu0 }
 0xdd8   : > { %v6312_v25 = vpop.f32.mrb[23].mxu0 }
 0xdd9   : > { %v6369_v10 = vadd.f32 %v6312_v25, %v6310_v1 }
 0xddb   : > { %6370 = vadd.xlane.f32.xlu0 %v6369_v10  ;;  %v6316_v4 = vpop.f32.mrb[24].mxu0 }
 0xddc   : > { %v6318_v17 = vpop.f32.mrb[25].mxu0 }
 0xddd   : > { %v6372_v41 = vadd.f32 %v6318_v17, %v6316_v4 }
 0xddf   : > { %6373 = vadd.xlane.f32.xlu1 %v6372_v41  ;;  %v6322_v24 = vpop.f32.mrb[26].mxu0 }
 0xde0   : > { %v6324_v9 = vpop.f32.mrb[27].mxu0 }
 0xde1   : > { %v6375_v38 = vadd.f32 %v6324_v9, %v6322_v24 }
 0xde3   : > { %6376 = vadd.xlane.f32.xlu0 %v6375_v38  ;;  %v6328_v45 = vpop.f32.mrb[28].mxu0 }
 0xde4   : > { %v6330_v30 = vpop.f32.mrb[29].mxu0 }
 0xde5   : > { %v6378_v32 = vadd.f32 %v6330_v30, %v6328_v45 }
 0xde7   : > { %6379 = vadd.xlane.f32.xlu1 %v6378_v32  ;;  %v6334_v55 = vpop.f32.mrb[30].mxu0 }
 0xde8   : > { %v6336_v56 = vpop.f32.mrb[31].mxu0 }
 0xde9   : > { %v6381_v37 = vadd.f32 %v6336_v56, %v6334_v55 }
 0xdeb   : > { %6382 = vadd.xlane.f32.xlu0 %v6381_v37  ;;  %v6340_v23 = vpop.f32.mrb[32].mxu0 }
 0xdec   : > { %v6342_v0 = vpop.f32.mrb[33].mxu0 }
 0xded   : > { %v6384_v43 = vadd.f32 %v6342_v0, %v6340_v23 }
 0xdef   : > { %6385 = vadd.xlane.f32.xlu1 %v6384_v43 }
 0xe60   : > { %v6365_v29 = vpop.xlane.xlu0 %6364 }
 0xe61   : > { %v6387_v36 = vmul.f32 0.00390625, %v6365_v29 }
 0xe63   : > { %v11992_v61 = vsub.f32 %v6298_v14, %v6387_v36  ;;  %v11994_v13 = vsub.f32 %v6300_v57, %v6387_v36 }
 0xe64   : > { %v6368_v20 = vpop.xlane.xlu1 %6367 }
 0xe65   : > { %v6388_v2 = vmul.f32 0.00390625, %v6368_v20  ;;  %v6411_v3 = vmul.f32 %v11992_v61, %v11992_v61  ;;  %v6412_v53 = vmul.f32 %v11994_v13, %v11994_v13  ;;  %v6361_v20 = vld [vmem:[#allocation28] sm:$0x3] }
 0xe67   : > { %v12000_v27 = vsub.f32 %v6304_v58, %v6388_v2  ;;  %v12002_v19 = vsub.f32 %v6306_v11, %v6388_v2  ;;  %v6427_v49 = vadd.f32 %v6412_v53, %v6411_v3  ;;  %v6362_v53 = vld [vmem:[#allocation29] sm:$0x3] }
 0xe68   : > { %v6371_v51 = vpop.xlane.xlu0 %6370 }
 0xe69   : > { %v6389_v59 = vmul.f32 0.00390625, %v6371_v51  ;;  %6428 = vadd.xlane.f32.xlu0 %v6427_v49  ;;  %v6413_v22 = vmul.f32 %v12000_v27, %v12000_v27  ;;  %v6414_v8 = vmul.f32 %v12002_v19, %v12002_v19  ;;  %v12057_v51 = vrot.slane %v6361_v20, %v10804_v39 }
 0xe6b   : > { %v12008_v21 = vsub.f32 %v6310_v1, %v6389_v59  ;;  %v12010_v12 = vsub.f32 %v6312_v25, %v6389_v59  ;;  %v6430_v62 = vadd.f32 %v6414_v8, %v6413_v22  ;;  %v12060_v59 = vrot.slane %v6361_v20, %v10807_v40 }
 0xe6c   : > { %v6374_v46 = vpop.xlane.xlu1 %6373 }
 0xe6d   : > { %v6390_v54 = vmul.f32 0.00390625, %v6374_v46  ;;  %6431 = vadd.xlane.f32.xlu1 %v6430_v62  ;;  %v6415_v16 = vmul.f32 %v12008_v21, %v12008_v21  ;;  %v6416_v63 = vmul.f32 %v12010_v12, %v12010_v12  ;;  %v12063_v62 = vrot.slane %v6362_v53, %v10804_v39 }
 0xe6e   : > { %v12066_v46 = vrot.slane %v6362_v53, %v10807_v40 }
 0xe6f   : > { %v12016_v48 = vsub.f32 %v6316_v4, %v6390_v54  ;;  %v12018_v42 = vsub.f32 %v6318_v17, %v6390_v54  ;;  %v6433_v50 = vadd.f32 %v6416_v63, %v6415_v16 }
 0xe70   : > { %v6377_v5 = vpop.xlane.xlu0 %6376 }
 0xe71   : > { %v6391_v7 = vmul.f32 0.00390625, %v6377_v5  ;;  %6434 = vadd.xlane.f32.xlu0 %v6433_v50  ;;  %v6417_v28 = vmul.f32 %v12016_v48, %v12016_v48  ;;  %v6418_v31 = vmul.f32 %v12018_v42, %v12018_v42 }
 0xe73   : > { %v12024_v52 = vsub.f32 %v6322_v24, %v6391_v7  ;;  %v12026_v33 = vsub.f32 %v6324_v9, %v6391_v7  ;;  %v6436_v34 = vadd.f32 %v6418_v31, %v6417_v28 }
 0xe74   : > { %v6380_v47 = vpop.xlane.xlu1 %6379 }
 0xe75   : > { %v6392_v26 = vmul.f32 0.00390625, %v6380_v47  ;;  %6437 = vadd.xlane.f32.xlu1 %v6436_v34  ;;  %v6419_v18 = vmul.f32 %v12024_v52, %v12024_v52  ;;  %v6420_v60 = vmul.f32 %v12026_v33, %v12026_v33 }
 0xe77   : > { %v12032_v44 = vsub.f32 %v6328_v45, %v6392_v26  ;;  %v12034_v6 = vsub.f32 %v6330_v30, %v6392_v26  ;;  %v6439_v14 = vadd.f32 %v6420_v60, %v6419_v18 }
 0xe78   : > { %v6383_v57 = vpop.xlane.xlu0 %6382 }
 0xe79   : > { %v6393_v15 = vmul.f32 0.00390625, %v6383_v57  ;;  %6440 = vadd.xlane.f32.xlu0 %v6439_v14  ;;  %v6421_v58 = vmul.f32 %v12032_v44, %v12032_v44  ;;  %v6422_v11 = vmul.f32 %v12034_v6, %v12034_v6 }
 0xe7b   : > { %v12040_v35 = vsub.f32 %v6334_v55, %v6393_v15  ;;  %v12042_v1 = vsub.f32 %v6336_v56, %v6393_v15  ;;  %v6442_v25 = vadd.f32 %v6422_v11, %v6421_v58 }
 0xe7c   : > { %v6386_v10 = vpop.xlane.xlu1 %6385 }
 0xe7d   : > { %v6394_v4 = vmul.f32 0.00390625, %v6386_v10  ;;  %6443 = vadd.xlane.f32.xlu1 %v6442_v25  ;;  %v6423_v17 = vmul.f32 %v12040_v35, %v12040_v35  ;;  %v6424_v41 = vmul.f32 %v12042_v1, %v12042_v1 }
 0xe7f   : > { %v12048_v24 = vsub.f32 %v6340_v23, %v6394_v4  ;;  %v12050_v9 = vsub.f32 %v6342_v0, %v6394_v4  ;;  %v6445_v38 = vadd.f32 %v6424_v41, %v6423_v17 }
 0xe81   : > { %6446 = vadd.xlane.f32.xlu0 %v6445_v38  ;;  %v6425_v45 = vmul.f32 %v12048_v24, %v12048_v24  ;;  %v6426_v30 = vmul.f32 %v12050_v9, %v12050_v9 }
 0xe83   : > { %v6448_v32 = vadd.f32 %v6426_v30, %v6425_v45 }
 0xe85   : > { %6449 = vadd.xlane.f32.xlu1 %v6448_v32 }
 0xef6   : > { %v6429_v55 = vpop.xlane.xlu0 %6428 }
 0xef7   : > { %v6451_v56 = vmul.f32 0.00390625, %v6429_v55 }
 0xef9   : > { %v6459_v37 = vadd.f32 1e-06, %v6451_v56 }
 0xefa   : > { %v6432_v43 = vpop.xlane.xlu1 %6431 }
 0xefb   : > { %8929 = vrsqrt.f32 %v6459_v37  ;;  %v6452_v29 = vmul.f32 0.00390625, %v6432_v43 }
 0xefd   : > { %v6460_v23 = vadd.f32 1e-06, %v6452_v29 }
 0xefe   : > { %v6435_v36 = vpop.xlane.xlu0 %6434 }
 0xeff   : > { %8931 = vrsqrt.f32 %v6460_v23  ;;  %v6453_v0 = vmul.f32 0.00390625, %v6435_v36 }
 0xf01   : > { %v6461_v2 = vadd.f32 1e-06, %v6453_v0 }
 0xf02   : > { %v6438_v3 = vpop.xlane.xlu1 %6437 }
 0xf03   : > { %8933 = vrsqrt.f32 %v6461_v2  ;;  %v6454_v49 = vmul.f32 0.00390625, %v6438_v3 }
 0xf05   : > { %v8930_v22 = vpop.eup %8929  ;;  %v6462_v8 = vadd.f32 1e-06, %v6454_v49 }
 0xf06   : > { %v6475_v54 = vmul.f32 %v8930_v22, %v11992_v61  ;;  %v6476_v16 = vmul.f32 %v8930_v22, %v11994_v13  ;;  %v6441_v63 = vpop.xlane.xlu0 %6440 }
 0xf07   : > { %8935 = vrsqrt.f32 %v6462_v8  ;;  %v6455_v50 = vmul.f32 0.00390625, %v6441_v63 }
 0xf08   : > { %v6502_v5 = vmul.f32 %v12057_v51, %v6475_v54  ;;  %v6503_v7 = vmul.f32 %v12060_v59, %v6476_v16 }
 0xf09   : > { %v8932_v28 = vpop.eup %8931  ;;  %v6463_v31 = vadd.f32 1e-06, %v6455_v50 }
 0xf0a   : > { %v6529_v39 = vadd.f32 %v12063_v62, %v6502_v5  ;;  %v6530_v34 = vadd.f32 %v12066_v46, %v6503_v7  ;;  %v6477_v40 = vmul.f32 %v8932_v28, %v12000_v27  ;;  %v6478_v61 = vmul.f32 %v8932_v28, %v12002_v19  ;;  %v6444_v47 = vpop.xlane.xlu1 %6443 }
 0xf0b   : > { %8937 = vrsqrt.f32 %v6463_v31  ;;  %v6456_v13 = vmul.f32 0.00390625, %v6444_v47 }
 0xf0c   : > { %6545 = vst [vmem:[%s12077_s15] sm:$0xff] %v6529_v39  ;;  %6546 = vst [vmem:[%s12077_s15 + $0x8] sm:$0xff] %v6530_v34  ;;  %v6504_v26 = vmul.f32 %v12057_v51, %v6477_v40  ;;  %v6505_v18 = vmul.f32 %v12060_v59, %v6478_v61 }
 0xf0d   : > { %v8934_v60 = vpop.eup %8933  ;;  %v6464_v14 = vadd.f32 1e-06, %v6456_v13 }
 0xf0e   : > { %v6531_v27 = vadd.f32 %v12063_v62, %v6504_v26  ;;  %v6532_v19 = vadd.f32 %v12066_v46, %v6505_v18  ;;  %v6479_v57 = vmul.f32 %v8934_v60, %v12008_v21  ;;  %v6480_v15 = vmul.f32 %v8934_v60, %v12010_v12  ;;  %v6447_v58 = vpop.xlane.xlu0 %6446 }
 0xf0f   : > { %8939 = vrsqrt.f32 %v6464_v14  ;;  %v6457_v11 = vmul.f32 0.00390625, %v6447_v58 }
 0xf10   : > { %6547 = vst [vmem:[%s12077_s15 + $0x10] sm:$0xff] %v6531_v27  ;;  %6548 = vst [vmem:[%s12077_s15 + $0x18] sm:$0xff] %v6532_v19  ;;  %v6506_v25 = vmul.f32 %v12057_v51, %v6479_v57  ;;  %v6507_v10 = vmul.f32 %v12060_v59, %v6480_v15 }
 0xf11   : > { %v8936_v4 = vpop.eup %8935  ;;  %v6465_v17 = vadd.f32 1e-06, %v6457_v11 }
 0xf12   : > { %v6533_v41 = vadd.f32 %v12063_v62, %v6506_v25  ;;  %v6534_v38 = vadd.f32 %v12066_v46, %v6507_v10  ;;  %v6481_v21 = vmul.f32 %v8936_v4, %v12016_v48  ;;  %v6482_v12 = vmul.f32 %v8936_v4, %v12018_v42  ;;  %v6450_v45 = vpop.xlane.xlu1 %6449 }
 0xf13   : > { %8941 = vrsqrt.f32 %v6465_v17  ;;  %v6458_v30 = vmul.f32 0.00390625, %v6450_v45 }
 0xf14   : > { %6549 = vst [vmem:[%s12077_s15 + $0x20] sm:$0xff] %v6533_v41  ;;  %6550 = vst [vmem:[%s12077_s15 + $0x28] sm:$0xff] %v6534_v38  ;;  %v6508_v32 = vmul.f32 %v12057_v51, %v6481_v21  ;;  %v6509_v55 = vmul.f32 %v12060_v59, %v6482_v12 }
 0xf15   : > { %v8938_v56 = vpop.eup %8937  ;;  %v6466_v37 = vadd.f32 1e-06, %v6458_v30 }
 0xf16   : > { %v6535_v43 = vadd.f32 %v12063_v62, %v6508_v32  ;;  %v6536_v48 = vadd.f32 %v12066_v46, %v6509_v55  ;;  %v6483_v42 = vmul.f32 %v8938_v56, %v12024_v52  ;;  %v6484_v29 = vmul.f32 %v8938_v56, %v12026_v33 }
 0xf17   : > { %8943 = vrsqrt.f32 %v6466_v37 }
 0xf18   : > { %6551 = vst [vmem:[%s12077_s15 + $0x30] sm:$0xff] %v6535_v43  ;;  %6552 = vst [vmem:[%s12077_s15 + $0x38] sm:$0xff] %v6536_v48  ;;  %v6510_v23 = vmul.f32 %v12057_v51, %v6483_v42  ;;  %v6511_v36 = vmul.f32 %v12060_v59, %v6484_v29 }
 0xf19   : > { %v8940_v0 = vpop.eup %8939 }
 0xf1a   : > { %v6537_v20 = vadd.f32 %v12063_v62, %v6510_v23  ;;  %v6538_v2 = vadd.f32 %v12066_v46, %v6511_v36  ;;  %v6485_v3 = vmul.f32 %v8940_v0, %v12032_v44  ;;  %v6486_v52 = vmul.f32 %v8940_v0, %v12034_v6 }
 0xf1c   : > { %6553 = vst [vmem:[%s12077_s15 + $0x40] sm:$0xff] %v6537_v20  ;;  %6554 = vst [vmem:[%s12077_s15 + $0x48] sm:$0xff] %v6538_v2  ;;  %v6512_v33 = vmul.f32 %v12057_v51, %v6485_v3  ;;  %v6513_v53 = vmul.f32 %v12060_v59, %v6486_v52 }
 0xf1d   : > { %v8942_v49 = vpop.eup %8941 }
 0xf1e   : > { %v6539_v22 = vadd.f32 %v12063_v62, %v6512_v33  ;;  %v6540_v8 = vadd.f32 %v12066_v46, %v6513_v53  ;;  %v6487_v54 = vmul.f32 %v8942_v49, %v12040_v35  ;;  %v6488_v44 = vmul.f32 %v8942_v49, %v12042_v1 }
 0xf20   : > { %6555 = vst [vmem:[%s12077_s15 + $0x50] sm:$0xff] %v6539_v22  ;;  %6556 = vst [vmem:[%s12077_s15 + $0x58] sm:$0xff] %v6540_v8  ;;  %v6514_v6 = vmul.f32 %v12057_v51, %v6487_v54  ;;  %v6515_v16 = vmul.f32 %v12060_v59, %v6488_v44 }
 0xf21   : > { %v8944_v63 = vpop.eup %8943 }
 0xf22   : > { %v6541_v50 = vadd.f32 %v12063_v62, %v6514_v6  ;;  %v6542_v5 = vadd.f32 %v12066_v46, %v6515_v16  ;;  %v6489_v7 = vmul.f32 %v8944_v63, %v12048_v24  ;;  %v6490_v35 = vmul.f32 %v8944_v63, %v12050_v9 }
 0xf24   : > { %6557 = vst [vmem:[%s12077_s15 + $0x60] sm:$0xff] %v6541_v50  ;;  %6558 = vst [vmem:[%s12077_s15 + $0x68] sm:$0xff] %v6542_v5  ;;  %v6516_v1 = vmul.f32 %v12057_v51, %v6489_v7  ;;  %v6517_v28 = vmul.f32 %v12060_v59, %v6490_v35 }
 0xf26   : > { %v6543_v24 = vadd.f32 %v12063_v62, %v6516_v1  ;;  %v6544_v9 = vadd.f32 %v12066_v46, %v6517_v28 }
 0xf28   : > { %6559 = vst [vmem:[%s12077_s15 + $0x70] sm:$0xff] %v6543_v24  ;;  %6560 = vst [vmem:[%s12077_s15 + $0x78] sm:$0xff] %v6544_v9 }
 0xf29   : > { %9563 = shalt.err (!%p9560_p0)
}
 0xf2a   : > { %s9564_s8 = scalar_lea.hbm %s12136_s4, 2048  ;;  %s9568_s23 = scalar_lea.hbm %s12327_s1, 4096 }
 0xf2b   : > { %p9565_p5 = scmp.ne.s32.totalorder %s12136_s4, %s9564_s8  ;;  %p9569_p3 = scmp.lt.u32.totalorder %s12136_s4, %s12327_s1 }
 0xf2c   : > { %p9570_p7 = scmp.lt.u32.totalorder %s9568_s23, %s9564_s8  ;;  %p9572_p6 = scmp.lt.u32.totalorder %s9564_s8, %s12136_s4 }
 0xf2d   : > { %p9566_p9 = pnand %p9565_p5, %p12328_p12 }
 0xf2e   : > { %p9571_p8 = por %p9570_p7, %p9569_p3 }
 0xf2f   : > { %p9567_p1 = pneg %p9566_p9 }
 0xf30   : > { %p9573_p4 = por %p9572_p6, %p9571_p8 }
 0xf32   : > { %p9574_p13 = pnand %p9573_p4, %p9567_p1 }
 0xf34   : > { %9577 = shalt.err (!%p9574_p13)
}
 0xf35   : > { %s9686_s9 = smov 256   ;;  %s9687_s20 = smov 16  }
 0xf36   : > { %8503 = dma.vmem_to_hbm [thread:$0]  (%p12328_p12), %s12138_s17, 2048, %s12136_s4, %s6562_s29, %s9686_s9, %s9686_s9, %s9687_s20  }
 0xf37 PF: > { %s12329_s11 = sld [smem:[#allocation45_spill]]  ;;  %s12330_s19 = sld [smem:[#allocation50_spill]] }
 0xf38   : > { %p12332_p11 = scmp.ge.s32.totalorder %s9656_s27, 2 }
 0xf3d   : > { %s6590_s16 = sand.u32 1, %s12329_s11   ;;  %p12331_p10 = scmp.ne.s32.totalorder %s12330_s19, 0 }
 0xf3e   : > { %s6591_s21 = scalar_lea.sflag [#allocation4], %s6590_s16 }
 0xf3f   : > { %p8565_p2 = pnand %p12332_p11, %p12331_p10 }
 0xf41   : > { %9639 = dma.done.wait (!%p8565_p2), %s6591_s21, 2048  }
 0xf42   : > { %9641 = vsyncadd (!%p8565_p2), %s6591_s21, 4294965248  ;;  %s12333_s27 = sld [smem:[#allocation47_spill]]  ;;  %s12334_s8 = sld [smem:[#allocation48_spill]] }
 0xf43   : > { %s12335_s2 = smov %s9648_s25  ;;  %s12336_s25 = smov %s9652_s26 }
 0xf48   : > { %p47_p0 = scmp.ge.s32.totalorder %s12333_s27, 4   ;;  %s12337_s26 = smov %s12334_s8 }
 0xf4a   :  { %49 = sbr.rel (!%p47_p0) target bundleno = 36 (0x24), region = 262 }
 0xf51   :  { %6596 = vsyncpa [#allocation3], 1 }
 0xf52   :  { %6598 = vsyncpa [#allocation3 + $0x1], 1 }
 0xf53   :  { %6599 = vsyncpa [#allocation6], 1 }
 0xf54   :  { %6601 = vsyncpa [#allocation6 + $0x1], 1 }
 0xf55   :  { %6602 = vsyncpa [#allocation9], 1 }
 0xf56   :  { %6604 = vsyncpa [#allocation9 + $0x1], 1 }
 0xf57   :  { %6605 = vsyncpa [#allocation12], 1 }
 0xf58   :  { %6606 = vsyncpa [#allocation15], 1 }
 0xf59   :  { %6607 = vsyncpa [#allocation18], 1 }
 0xf5a   :  { %6608 = vsyncpa [#allocation21], 1 }
 0xf5b   :  { %6609 = vsyncpa [#allocation24], 1 }
 0xf5c   :  { %6610 = vsyncpa [#allocation27], 1 }
 0xf5d   :  { %6611 = vsyncpa [#allocation30], 1 }
 0xf5e   :  { %6612 = vsyncpa [#allocation4], 1 }
 0xf5f   :  { %6614 = vsyncpa [#allocation4 + $0x1], 1 }

</bundles_post_ra>
